<compile_context>
chip_gen: v5e
topology: v5e:2x2
jax: 0.10.0
libtpu: 0.0.40
codegen_flags: <defaults>
</compile_context>

<pallas_src>
import numpy as np
import jax
import jax.numpy as jnp
from jax import lax
from jax.experimental import pallas as pl
from jax.experimental.pallas import tpu as pltpu

# ----- hyperparameters (small, consistent with the module) -----
HIDDEN_DIM = 32          # HIDDEN_DIM
N_LAYERS   = 1           # N_LAYERS (single-layer BiLSTM)
CLASS_NUM  = 2           # CLASS_NUM
EMB_DIM    = 300         # conv kernel width hardcoded to 300 in the module
EMB_PAD    = 384         # lane-aligned (3*128) zero-padded embedding width
SEQ_LEN    = 16
SEQ_PAD    = 24          # 3 front pad + 16 data rows + 5 back pad (8-aligned)
BATCH      = 2
MAX_K      = 7
PAD        = 3           # (MAX_K - 1)//2 -> 'same' padding along sequence
C_PAD      = 128         # per-batch conv feature lanes (3H = 96 padded to 128)

NCHAIN = 2 * BATCH               # fwd/bwd x batch LSTM chains stacked on lanes
GW     = NCHAIN * HIDDEN_DIM     # 128 lanes per gate block (i/f/g/o)
TW     = 4 * GW                  # 512 lanes of gate pre-activations


# ----------------------------------------------------------------------------
# Pallas kernel: whole batch in a single invocation (grid=(1,)).
# ----------------------------------------------------------------------------
def model_kernel(x_ref, wc_ref, bc_ref, wih_ref, bg_ref, whh_ref,
                 wigm_ref, big_ref, wlin_ref, blin_ref, out_ref):
    f32 = jnp.float32
    bf16 = jnp.bfloat16
    L, H, B = SEQ_LEN, HIDDEN_DIM, BATCH

    # ---- TextCNN: 7 accumulating per-tap matmuls per batch (no im2col) ----
    conv_parts = []
    for b in range(B):
        acc = bc_ref[...] + jnp.dot(x_ref[b, 0:L, :].astype(bf16), wc_ref[0],
                                    preferred_element_type=f32)
        for dk in range(1, MAX_K):
            acc = acc + jnp.dot(x_ref[b, dk:dk + L, :].astype(bf16), wc_ref[dk],
                                preferred_element_type=f32)
        conv_parts.append(jnp.maximum(acc, 0.0))                 # ReLU, (L, C_PAD)
    cnn01 = jnp.concatenate(conv_parts, axis=-1).astype(bf16)    # (L, B*C_PAD), 128-aligned

    # ---- input->gate pre-activations for all 4 chains, natural time order ----
    # lane layout: [i(128) | f(128) | g(128) | o(128)], each gate block ordered
    # [fwd_b0(32) | fwd_b1(32) | bwd_b0(32) | bwd_b1(32)] -> matches h/c layout.
    gx = jnp.dot(cnn01, wih_ref[...], preferred_element_type=f32) + bg_ref[...]  # (L, TW)

    # static lane mask: True on forward-chain lanes of every gate block
    lane = lax.broadcasted_iota(jnp.int32, (1, TW), 1)
    fwd_mask = (lane % GW) < (B * H)

    # ---- BiLSTM recurrence: both directions x batch stacked on 128 lanes ----
    whh = whh_ref[...]                       # (GW, TW) bf16, loaded ONCE (hoisted)
    h = jnp.zeros((1, GW), f32)
    c = jnp.zeros((1, GW), f32)
    hs_list = []
    for i in range(L):                       # fully unrolled (static)
        j = L - 1 - i
        # fwd chains consume time i, bwd chains time L-1-i (no reversal matmul)
        gxi = jnp.where(fwd_mask, gx[i:i + 1, :], gx[j:j + 1, :])
        g = gxi + jnp.dot(h.astype(bf16), whh, preferred_element_type=f32)  # (1, TW)
        i_g = jax.nn.sigmoid(g[:, 0 * GW:1 * GW])
        f_g = jax.nn.sigmoid(g[:, 1 * GW:2 * GW])
        g_g = jnp.tanh(g[:, 2 * GW:3 * GW])
        o_g = jax.nn.sigmoid(g[:, 3 * GW:4 * GW])
        c = f_g * c + i_g * g_g
        h = o_g * jnp.tanh(c)
        hs_list.append(h)                    # row i: fwd@t=i, bwd@t=L-1-i

    # ---- info-gain weighting directly on the lane-stacked representation ----
    # stack natural + reversed step order at COMPILE time (no runtime reversal)
    hs2 = jnp.concatenate(hs_list + hs_list[::-1], axis=0)        # (2L, GW)
    s2 = jnp.dot(hs2, wigm_ref[...], preferred_element_type=f32)  # per-chain scores,
    hs = hs2[0:L, :]                                              # broadcast over 32 lanes
    s_nat = s2[0:L, :]
    s_rev = s2[L:2 * L, :]
    # fwd lanes need the bwd score of the SAME time (held in the reversed rows)
    v = s_nat + pltpu.roll(s_rev, shift=B * H, axis=1)            # swap fwd/bwd halves
    ig_w = jax.nn.sigmoid(v + big_ref[...])                       # (L, GW) gate weights
    ig_vec = jnp.sum(hs * ig_w, axis=0, keepdims=True)            # (1, GW) temporal sum

    # ---- classifier (dropout == identity at inference) ----
    lin = jnp.dot(ig_vec, wlin_ref[...], preferred_element_type=f32)  # (1, B*CLASS_NUM)
    out = jnp.concatenate([lin[:, b * CLASS_NUM:(b + 1) * CLASS_NUM]
                           for b in range(B)], axis=0)            # (B, CLASS_NUM)
    out_ref[...] = out + blin_ref[...]


# ----------------------------------------------------------------------------
# Host-side weight packing (layout plumbing; zeros where a branch / chain does
# not contribute).  MXU operands are cast to bf16, biases stay f32.
# ----------------------------------------------------------------------------
def _pack_params(params):
    H = HIDDEN_DIM
    f32 = jnp.float32
    bf16 = jnp.bfloat16

    # per-tap conv weights: (MAX_K, EMB_PAD, C_PAD), columns [k3 | k5 | k7 | pad]
    wc = jnp.zeros((MAX_K, EMB_PAD, C_PAD), f32)
    wc = wc.at[2:5, :EMB_DIM, 0:H].set(params["w1"])          # k=3 taps at 2..4
    wc = wc.at[1:6, :EMB_DIM, H:2 * H].set(params["w2"])      # k=5 taps at 1..5
    wc = wc.at[0:7, :EMB_DIM, 2 * H:3 * H].set(params["w3"])  # k=7 taps at 0..6
    bc = jnp.zeros((1, C_PAD), f32)
    bc = bc.at[:, 0:H].set(params["b1"])
    bc = bc.at[:, H:2 * H].set(params["b2"])
    bc = bc.at[:, 2 * H:3 * H].set(params["b3"])

    # BiLSTM packing: chains q = (fwd,b0), (fwd,b1), (bwd,b0), (bwd,b1).
    # Gate G in [i,f,g,o] owns lanes [G*GW, (G+1)*GW); chain q owns the 32-lane
    # sub-block [q*H, (q+1)*H) inside every gate block.
    wih = [params["wih_f"], params["wih_f"], params["wih_b"], params["wih_b"]]
    whh = [params["whh_f"], params["whh_f"], params["whh_b"], params["whh_b"]]
    bgs = [params["bg_f"], params["bg_f"], params["bg_b"], params["bg_b"]]
    WIH = jnp.zeros((BATCH * C_PAD, TW), f32)     # rows: [cnn_b0(128) | cnn_b1(128)]
    WHH = jnp.zeros((GW, TW), f32)
    BG = jnp.zeros((1, TW), f32)
    for q in range(NCHAIN):
        bq = q % BATCH                             # input batch feeding chain q
        for G in range(4):
            col = G * GW + q * H
            WIH = WIH.at[bq * C_PAD:bq * C_PAD + 3 * H, col:col + H].set(
                wih[q][:, G * H:(G + 1) * H])
            WHH = WHH.at[q * H:(q + 1) * H, col:col + H].set(
                whh[q][:, G * H:(G + 1) * H])
            BG = BG.at[:, col:col + H].set(bgs[q][:, G * H:(G + 1) * H])

    # info-gain: block-diagonal broadcast matrix (GW, GW); every column of the
    # q-th 32x32 block equals the w_ig piece for that chain's direction.
    w_f = params["w_ig"][0:H, 0]
    w_b = params["w_ig"][H:2 * H, 0]
    WIGM = jnp.zeros((GW, GW), f32)
    for q in range(NCHAIN):
        piece = w_f if q < BATCH else w_b
        blk = jnp.tile(piece[:, None], (1, H))
        WIGM = WIGM.at[q * H:(q + 1) * H, q * H:(q + 1) * H].set(blk)
    big = jnp.broadcast_to(params["b_ig"].reshape(1, 1), (1, GW))

    # classifier repacked for the lane-stacked ig vector [f_b0|f_b1|b_b0|b_b1]
    WLIN = jnp.zeros((GW, BATCH * CLASS_NUM), f32)
    for b in range(BATCH):
        cols = slice(b * CLASS_NUM, (b + 1) * CLASS_NUM)
        WLIN = WLIN.at[b * H:(b + 1) * H, cols].set(params["w_lin"][0:H, :])
        WLIN = WLIN.at[(BATCH + b) * H:(BATCH + b + 1) * H, cols].set(
            params["w_lin"][H:2 * H, :])

    return (wc.astype(bf16), bc, WIH.astype(bf16), BG, WHH.astype(bf16),
            WIGM, big, WLIN, params["b_lin"])


# ----------------------------------------------------------------------------
# Wrapper (glue: padding, specs)
# ----------------------------------------------------------------------------
def bert_textcnn_bilstm_ig_forward(bert_out, params):
    B, L, E = bert_out.shape
    assert B == BATCH and L == SEQ_LEN and E == EMB_DIM
    x_pad = jnp.pad(bert_out.astype(jnp.float32),
                    ((0, 0), (PAD, SEQ_PAD - L - PAD), (0, EMB_PAD - EMB_DIM)))

    args = (x_pad,) + _pack_params(params)

    def full_spec(shape):
        nd = len(shape)
        return pl.BlockSpec(shape, lambda i, _nd=nd: (0,) * _nd)

    out = pl.pallas_call(
        model_kernel,
        out_shape=jax.ShapeDtypeStruct((B, CLASS_NUM), jnp.float32),
        grid_spec=pltpu.PrefetchScalarGridSpec(
            num_scalar_prefetch=0,
            grid=(1,),                                   # whole batch, one step
            in_specs=[full_spec(a.shape) for a in args],
            out_specs=full_spec((B, CLASS_NUM)),
        ),
        compiler_params=pltpu.CompilerParams(
            dimension_semantics=("arbitrary",)),
    )(*args)
    return out


# ----------------------------------------------------------------------------
# Pure-JAX reference (same math) for correctness check
# ----------------------------------------------------------------------------
def reference_forward(bert_out, p):
    B, L, E = bert_out.shape
    H = HIDDEN_DIM
    x_pad = jnp.pad(bert_out, ((0, 0), (PAD, PAD), (0, 0)))

    def conv(w, b, k):
        off = PAD - (k - 1) // 2
        out = jnp.zeros((B, L, H), jnp.float32)
        for dk in range(k):
            out = out + jnp.einsum('ble,eh->blh',
                                   x_pad[:, off + dk:off + dk + L, :], w[dk])
        return jax.nn.relu(out + b)

    cnn = jnp.concatenate([conv(p['w1'], p['b1'], 3),
                           conv(p['w2'], p['b2'], 5),
                           conv(p['w3'], p['b3'], 7)], axis=-1)  # (B, L, 3H)

    def lstm_dir(x, wih, whh, bg, reverse):
        gx = jnp.einsum('bli,ig->blg', x, wih) + bg      # (B, L, 4H)
        gx_t = jnp.swapaxes(gx, 0, 1)                    # (L, B, 4H)
        if reverse:
            gx_t = gx_t[::-1]

        def step(carry, g_t):
            h, c = carry
            g = g_t + h @ whh
            i = jax.nn.sigmoid(g[:, 0:H])
            f = jax.nn.sigmoid(g[:, H:2 * H])
            gg = jnp.tanh(g[:, 2 * H:3 * H])
            o = jax.nn.sigmoid(g[:, 3 * H:4 * H])
            c = f * c + i * gg
            h = o * jnp.tanh(c)
            return (h, c), h

        init = (jnp.zeros((B, H), jnp.float32), jnp.zeros((B, H), jnp.float32))
        _, hs = lax.scan(step, init, gx_t)
        if reverse:
            hs = hs[::-1]
        return jnp.swapaxes(hs, 0, 1)                    # (B, L, H)

    hf = lstm_dir(cnn, p['wih_f'], p['whh_f'], p['bg_f'], False)
    hb = lstm_dir(cnn, p['wih_b'], p['whh_b'], p['bg_b'], True)
    lstm_out = jnp.concatenate([hf, hb], axis=-1)        # (B, L, 2H)

    ig = jax.nn.sigmoid(lstm_out @ p['w_ig'] + p['b_ig'])
    ig_out = jnp.sum(lstm_out * ig, axis=1)              # (B, 2H)
    return ig_out @ p['w_lin'] + p['b_lin']


# ----------------------------------------------------------------------------
# Deterministic parameter init
# ----------------------------------------------------------------------------
def init_params(key):
    H, C, E = HIDDEN_DIM, CLASS_NUM, EMB_DIM
    keys = jax.random.split(key, 16)

    def nrm(k, shape, scale):
        return jax.random.normal(k, shape, jnp.float32) * scale

    return {
        "w1":    nrm(keys[0],  (3, E, H), 0.05),
        "b1":    nrm(keys[1],  (1, H), 0.05),
        "w2":    nrm(keys[2],  (5, E, H), 0.05),
        "b2":    nrm(keys[3],  (1, H), 0.05),
        "w3":    nrm(keys[4],  (7, E, H), 0.05),
        "b3":    nrm(keys[5],  (1, H), 0.05),
        "wih_f": nrm(keys[6],  (3 * H, 4 * H), 0.1),
        "whh_f": nrm(keys[7],  (H, 4 * H), 0.1),
        "bg_f":  nrm(keys[8],  (1, 4 * H), 0.1),   # b_ih + b_hh combined
        "wih_b": nrm(keys[9],  (3 * H, 4 * H), 0.1),
        "whh_b": nrm(keys[10], (H, 4 * H), 0.1),
        "bg_b":  nrm(keys[11], (1, 4 * H), 0.1),
        "w_ig":  nrm(keys[12], (2 * H, 1), 0.1),
        "b_ig":  nrm(keys[13], (1, 1), 0.1),
        "w_lin": nrm(keys[14], (2 * H, C), 0.1),
        "b_lin": nrm(keys[15], (1, C), 0.1),
    }


if __name__ == "__main__":
    root = jax.random.PRNGKey(0)
    k_x, k_p = jax.random.split(root)

    # synthetic frozen-BERT output (stands in for self.bert(input, mask)[0])
    bert_out = jax.random.normal(k_x, (BATCH, SEQ_LEN, EMB_DIM), jnp.float32) * 0.5
    params = init_params(k_p)
    # hidden = init_hidden(batch) == zeros, folded into the kernel's zero LSTM state.

    out = bert_textcnn_bilstm_ig_forward(bert_out, params)
    out = jax.block_until_ready(out)

    ref = jax.block_until_ready(reference_forward(bert_out, params))
    # slightly looser tolerance than before: MXU operands are now bf16
    np.testing.assert_allclose(np.asarray(out), np.asarray(ref),
                               rtol=5e-2, atol=5e-2)
    print("KERNEL_OK")
</pallas_src>

<mosaic_0001>
module attributes {stable_mosaic.version = 11 : i64} {
  func.func @model_kernel(%arg0: i32, %arg1: memref<2x24x384xf32, #tpu.memory_space<vmem>>, %arg2: memref<7x384x128xbf16, #tpu.memory_space<vmem>>, %arg3: memref<1x128xf32, #tpu.memory_space<vmem>>, %arg4: memref<256x512xbf16, #tpu.memory_space<vmem>>, %arg5: memref<1x512xf32, #tpu.memory_space<vmem>>, %arg6: memref<128x512xbf16, #tpu.memory_space<vmem>>, %arg7: memref<128x128xf32, #tpu.memory_space<vmem>>, %arg8: memref<1x128xf32, #tpu.memory_space<vmem>>, %arg9: memref<128x4xf32, #tpu.memory_space<vmem>>, %arg10: memref<1x2xf32, #tpu.memory_space<vmem>>, %arg11: memref<2x2xf32, #tpu.memory_space<vmem>>) attributes {dimension_semantics = [#tpu.dimension_semantics<arbitrary>], iteration_bounds = array<i64: 1>, scalar_prefetch = 0 : i64, scratch_operands = 0 : i64, tpu.core_type = #tpu.core_type<tc>, window_params = [{pipeline_mode = #tpu.pipeline_mode<synchronous>, transform_indices = @transform_0, window_bounds = array<i64: 2, 24, 384>}, {pipeline_mode = #tpu.pipeline_mode<synchronous>, transform_indices = @transform_1, window_bounds = array<i64: 7, 384, 128>}, {pipeline_mode = #tpu.pipeline_mode<synchronous>, transform_indices = @transform_2, window_bounds = array<i64: 1, 128>}, {pipeline_mode = #tpu.pipeline_mode<synchronous>, transform_indices = @transform_3, window_bounds = array<i64: 256, 512>}, {pipeline_mode = #tpu.pipeline_mode<synchronous>, transform_indices = @transform_4, window_bounds = array<i64: 1, 512>}, {pipeline_mode = #tpu.pipeline_mode<synchronous>, transform_indices = @transform_5, window_bounds = array<i64: 128, 512>}, {pipeline_mode = #tpu.pipeline_mode<synchronous>, transform_indices = @transform_6, window_bounds = array<i64: 128, 128>}, {pipeline_mode = #tpu.pipeline_mode<synchronous>, transform_indices = @transform_7, window_bounds = array<i64: 1, 128>}, {pipeline_mode = #tpu.pipeline_mode<synchronous>, transform_indices = @transform_8, window_bounds = array<i64: 128, 4>}, {pipeline_mode = #tpu.pipeline_mode<synchronous>, transform_indices = @transform_9, window_bounds = array<i64: 1, 2>}, {pipeline_mode = #tpu.pipeline_mode<synchronous>, transform_indices = @transform_10, window_bounds = array<i64: 2, 2>}]} {
    %c0 = arith.constant 0 : index
    %c0_0 = arith.constant 0 : index
    %0 = vector.load %arg3[%c0, %c0_0] : memref<1x128xf32, #tpu.memory_space<vmem>>, vector<1x128xf32>
    %c0_1 = arith.constant 0 : index
    %c0_2 = arith.constant 0 : index
    %c0_3 = arith.constant 0 : index
    %1 = vector.load %arg1[%c0_1, %c0_2, %c0_3] : memref<2x24x384xf32, #tpu.memory_space<vmem>>, vector<1x16x384xf32>
    %2 = vector.shape_cast %1 : vector<1x16x384xf32> to vector<16x384xf32>
    %3 = arith.truncf %2 : vector<16x384xf32> to vector<16x384xbf16>
    %c0_4 = arith.constant 0 : index
    %c0_5 = arith.constant 0 : index
    %c0_6 = arith.constant 0 : index
    %4 = vector.load %arg2[%c0_4, %c0_5, %c0_6] : memref<7x384x128xbf16, #tpu.memory_space<vmem>>, vector<1x384x128xbf16>
    %5 = vector.shape_cast %4 : vector<1x384x128xbf16> to vector<384x128xbf16>
    %cst = arith.constant dense<0.000000e+00> : vector<16x128xf32>
    %6 = tpu.matmul %3, %5, %cst {dimension_numbers = #tpu.dot_dimension_numbers<[1], [0], [0], [1], [0, 0, 1, 1], [], []>} : vector<16x384xbf16>, vector<384x128xbf16>, vector<16x128xf32> -> vector<16x128xf32>
    %7 = vector.broadcast %0 : vector<1x128xf32> to vector<16x128xf32>
    %8 = arith.addf %7, %6 : vector<16x128xf32>
    %c0_7 = arith.constant 0 : index
    %c1 = arith.constant 1 : index
    %c0_8 = arith.constant 0 : index
    %9 = vector.load %arg1[%c0_7, %c1, %c0_8] : memref<2x24x384xf32, #tpu.memory_space<vmem>>, vector<1x16x384xf32>
    %10 = vector.shape_cast %9 : vector<1x16x384xf32> to vector<16x384xf32>
    %11 = arith.truncf %10 : vector<16x384xf32> to vector<16x384xbf16>
    %c1_9 = arith.constant 1 : index
    %c0_10 = arith.constant 0 : index
    %c0_11 = arith.constant 0 : index
    %12 = vector.load %arg2[%c1_9, %c0_10, %c0_11] : memref<7x384x128xbf16, #tpu.memory_space<vmem>>, vector<1x384x128xbf16>
    %13 = vector.shape_cast %12 : vector<1x384x128xbf16> to vector<384x128xbf16>
    %cst_12 = arith.constant dense<0.000000e+00> : vector<16x128xf32>
    %14 = tpu.matmul %11, %13, %cst_12 {dimension_numbers = #tpu.dot_dimension_numbers<[1], [0], [0], [1], [0, 0, 1, 1], [], []>} : vector<16x384xbf16>, vector<384x128xbf16>, vector<16x128xf32> -> vector<16x128xf32>
    %15 = arith.addf %8, %14 : vector<16x128xf32>
    %c0_13 = arith.constant 0 : index
    %c2 = arith.constant 2 : index
    %c0_14 = arith.constant 0 : index
    %16 = vector.load %arg1[%c0_13, %c2, %c0_14] : memref<2x24x384xf32, #tpu.memory_space<vmem>>, vector<1x16x384xf32>
    %17 = vector.shape_cast %16 : vector<1x16x384xf32> to vector<16x384xf32>
    %18 = arith.truncf %17 : vector<16x384xf32> to vector<16x384xbf16>
    %c2_15 = arith.constant 2 : index
    %c0_16 = arith.constant 0 : index
    %c0_17 = arith.constant 0 : index
    %19 = vector.load %arg2[%c2_15, %c0_16, %c0_17] : memref<7x384x128xbf16, #tpu.memory_space<vmem>>, vector<1x384x128xbf16>
    %20 = vector.shape_cast %19 : vector<1x384x128xbf16> to vector<384x128xbf16>
    %cst_18 = arith.constant dense<0.000000e+00> : vector<16x128xf32>
    %21 = tpu.matmul %18, %20, %cst_18 {dimension_numbers = #tpu.dot_dimension_numbers<[1], [0], [0], [1], [0, 0, 1, 1], [], []>} : vector<16x384xbf16>, vector<384x128xbf16>, vector<16x128xf32> -> vector<16x128xf32>
    %22 = arith.addf %15, %21 : vector<16x128xf32>
    %c0_19 = arith.constant 0 : index
    %c3 = arith.constant 3 : index
    %c0_20 = arith.constant 0 : index
    %23 = vector.load %arg1[%c0_19, %c3, %c0_20] : memref<2x24x384xf32, #tpu.memory_space<vmem>>, vector<1x16x384xf32>
    %24 = vector.shape_cast %23 : vector<1x16x384xf32> to vector<16x384xf32>
    %25 = arith.truncf %24 : vector<16x384xf32> to vector<16x384xbf16>
    %c3_21 = arith.constant 3 : index
    %c0_22 = arith.constant 0 : index
    %c0_23 = arith.constant 0 : index
    %26 = vector.load %arg2[%c3_21, %c0_22, %c0_23] : memref<7x384x128xbf16, #tpu.memory_space<vmem>>, vector<1x384x128xbf16>
    %27 = vector.shape_cast %26 : vector<1x384x128xbf16> to vector<384x128xbf16>
    %cst_24 = arith.constant dense<0.000000e+00> : vector<16x128xf32>
    %28 = tpu.matmul %25, %27, %cst_24 {dimension_numbers = #tpu.dot_dimension_numbers<[1], [0], [0], [1], [0, 0, 1, 1], [], []>} : vector<16x384xbf16>, vector<384x128xbf16>, vector<16x128xf32> -> vector<16x128xf32>
    %29 = arith.addf %22, %28 : vector<16x128xf32>
    %c0_25 = arith.constant 0 : index
    %c4 = arith.constant 4 : index
    %c0_26 = arith.constant 0 : index
    %30 = vector.load %arg1[%c0_25, %c4, %c0_26] : memref<2x24x384xf32, #tpu.memory_space<vmem>>, vector<1x16x384xf32>
    %31 = vector.shape_cast %30 : vector<1x16x384xf32> to vector<16x384xf32>
    %32 = arith.truncf %31 : vector<16x384xf32> to vector<16x384xbf16>
    %c4_27 = arith.constant 4 : index
    %c0_28 = arith.constant 0 : index
    %c0_29 = arith.constant 0 : index
    %33 = vector.load %arg2[%c4_27, %c0_28, %c0_29] : memref<7x384x128xbf16, #tpu.memory_space<vmem>>, vector<1x384x128xbf16>
    %34 = vector.shape_cast %33 : vector<1x384x128xbf16> to vector<384x128xbf16>
    %cst_30 = arith.constant dense<0.000000e+00> : vector<16x128xf32>
    %35 = tpu.matmul %32, %34, %cst_30 {dimension_numbers = #tpu.dot_dimension_numbers<[1], [0], [0], [1], [0, 0, 1, 1], [], []>} : vector<16x384xbf16>, vector<384x128xbf16>, vector<16x128xf32> -> vector<16x128xf32>
    %36 = arith.addf %29, %35 : vector<16x128xf32>
    %c0_31 = arith.constant 0 : index
    %c5 = arith.constant 5 : index
    %c0_32 = arith.constant 0 : index
    %37 = vector.load %arg1[%c0_31, %c5, %c0_32] : memref<2x24x384xf32, #tpu.memory_space<vmem>>, vector<1x16x384xf32>
    %38 = vector.shape_cast %37 : vector<1x16x384xf32> to vector<16x384xf32>
    %39 = arith.truncf %38 : vector<16x384xf32> to vector<16x384xbf16>
    %c5_33 = arith.constant 5 : index
    %c0_34 = arith.constant 0 : index
    %c0_35 = arith.constant 0 : index
    %40 = vector.load %arg2[%c5_33, %c0_34, %c0_35] : memref<7x384x128xbf16, #tpu.memory_space<vmem>>, vector<1x384x128xbf16>
    %41 = vector.shape_cast %40 : vector<1x384x128xbf16> to vector<384x128xbf16>
    %cst_36 = arith.constant dense<0.000000e+00> : vector<16x128xf32>
    %42 = tpu.matmul %39, %41, %cst_36 {dimension_numbers = #tpu.dot_dimension_numbers<[1], [0], [0], [1], [0, 0, 1, 1], [], []>} : vector<16x384xbf16>, vector<384x128xbf16>, vector<16x128xf32> -> vector<16x128xf32>
    %43 = arith.addf %36, %42 : vector<16x128xf32>
    %c0_37 = arith.constant 0 : index
    %c6 = arith.constant 6 : index
    %c0_38 = arith.constant 0 : index
    %44 = vector.load %arg1[%c0_37, %c6, %c0_38] : memref<2x24x384xf32, #tpu.memory_space<vmem>>, vector<1x16x384xf32>
    %45 = vector.shape_cast %44 : vector<1x16x384xf32> to vector<16x384xf32>
    %46 = arith.truncf %45 : vector<16x384xf32> to vector<16x384xbf16>
    %c6_39 = arith.constant 6 : index
    %c0_40 = arith.constant 0 : index
    %c0_41 = arith.constant 0 : index
    %47 = vector.load %arg2[%c6_39, %c0_40, %c0_41] : memref<7x384x128xbf16, #tpu.memory_space<vmem>>, vector<1x384x128xbf16>
    %48 = vector.shape_cast %47 : vector<1x384x128xbf16> to vector<384x128xbf16>
    %cst_42 = arith.constant dense<0.000000e+00> : vector<16x128xf32>
    %49 = tpu.matmul %46, %48, %cst_42 {dimension_numbers = #tpu.dot_dimension_numbers<[1], [0], [0], [1], [0, 0, 1, 1], [], []>} : vector<16x384xbf16>, vector<384x128xbf16>, vector<16x128xf32> -> vector<16x128xf32>
    %50 = arith.addf %43, %49 : vector<16x128xf32>
    %cst_43 = arith.constant 0.000000e+00 : f32
    %51 = vector.broadcast %cst_43 : f32 to vector<16x128xf32>
    %52 = arith.maximumf %50, %51 : vector<16x128xf32>
    %c0_44 = arith.constant 0 : index
    %c0_45 = arith.constant 0 : index
    %53 = vector.load %arg3[%c0_44, %c0_45] : memref<1x128xf32, #tpu.memory_space<vmem>>, vector<1x128xf32>
    %c1_46 = arith.constant 1 : index
    %c0_47 = arith.constant 0 : index
    %c0_48 = arith.constant 0 : index
    %54 = vector.load %arg1[%c1_46, %c0_47, %c0_48] : memref<2x24x384xf32, #tpu.memory_space<vmem>>, vector<1x16x384xf32>
    %55 = vector.shape_cast %54 : vector<1x16x384xf32> to vector<16x384xf32>
    %56 = arith.truncf %55 : vector<16x384xf32> to vector<16x384xbf16>
    %c0_49 = arith.constant 0 : index
    %c0_50 = arith.constant 0 : index
    %c0_51 = arith.constant 0 : index
    %57 = vector.load %arg2[%c0_49, %c0_50, %c0_51] : memref<7x384x128xbf16, #tpu.memory_space<vmem>>, vector<1x384x128xbf16>
    %58 = vector.shape_cast %57 : vector<1x384x128xbf16> to vector<384x128xbf16>
    %cst_52 = arith.constant dense<0.000000e+00> : vector<16x128xf32>
    %59 = tpu.matmul %56, %58, %cst_52 {dimension_numbers = #tpu.dot_dimension_numbers<[1], [0], [0], [1], [0, 0, 1, 1], [], []>} : vector<16x384xbf16>, vector<384x128xbf16>, vector<16x128xf32> -> vector<16x128xf32>
    %60 = vector.broadcast %53 : vector<1x128xf32> to vector<16x128xf32>
    %61 = arith.addf %60, %59 : vector<16x128xf32>
    %c1_53 = arith.constant 1 : index
    %c1_54 = arith.constant 1 : index
    %c0_55 = arith.constant 0 : index
    %62 = vector.load %arg1[%c1_53, %c1_54, %c0_55] : memref<2x24x384xf32, #tpu.memory_space<vmem>>, vector<1x16x384xf32>
    %63 = vector.shape_cast %62 : vector<1x16x384xf32> to vector<16x384xf32>
    %64 = arith.truncf %63 : vector<16x384xf32> to vector<16x384xbf16>
    %c1_56 = arith.constant 1 : index
    %c0_57 = arith.constant 0 : index
    %c0_58 = arith.constant 0 : index
    %65 = vector.load %arg2[%c1_56, %c0_57, %c0_58] : memref<7x384x128xbf16, #tpu.memory_space<vmem>>, vector<1x384x128xbf16>
    %66 = vector.shape_cast %65 : vector<1x384x128xbf16> to vector<384x128xbf16>
    %cst_59 = arith.constant dense<0.000000e+00> : vector<16x128xf32>
    %67 = tpu.matmul %64, %66, %cst_59 {dimension_numbers = #tpu.dot_dimension_numbers<[1], [0], [0], [1], [0, 0, 1, 1], [], []>} : vector<16x384xbf16>, vector<384x128xbf16>, vector<16x128xf32> -> vector<16x128xf32>
    %68 = arith.addf %61, %67 : vector<16x128xf32>
    %c1_60 = arith.constant 1 : index
    %c2_61 = arith.constant 2 : index
    %c0_62 = arith.constant 0 : index
    %69 = vector.load %arg1[%c1_60, %c2_61, %c0_62] : memref<2x24x384xf32, #tpu.memory_space<vmem>>, vector<1x16x384xf32>
    %70 = vector.shape_cast %69 : vector<1x16x384xf32> to vector<16x384xf32>
    %71 = arith.truncf %70 : vector<16x384xf32> to vector<16x384xbf16>
    %c2_63 = arith.constant 2 : index
    %c0_64 = arith.constant 0 : index
    %c0_65 = arith.constant 0 : index
    %72 = vector.load %arg2[%c2_63, %c0_64, %c0_65] : memref<7x384x128xbf16, #tpu.memory_space<vmem>>, vector<1x384x128xbf16>
    %73 = vector.shape_cast %72 : vector<1x384x128xbf16> to vector<384x128xbf16>
    %cst_66 = arith.constant dense<0.000000e+00> : vector<16x128xf32>
    %74 = tpu.matmul %71, %73, %cst_66 {dimension_numbers = #tpu.dot_dimension_numbers<[1], [0], [0], [1], [0, 0, 1, 1], [], []>} : vector<16x384xbf16>, vector<384x128xbf16>, vector<16x128xf32> -> vector<16x128xf32>
    %75 = arith.addf %68, %74 : vector<16x128xf32>
    %c1_67 = arith.constant 1 : index
    %c3_68 = arith.constant 3 : index
    %c0_69 = arith.constant 0 : index
    %76 = vector.load %arg1[%c1_67, %c3_68, %c0_69] : memref<2x24x384xf32, #tpu.memory_space<vmem>>, vector<1x16x384xf32>
    %77 = vector.shape_cast %76 : vector<1x16x384xf32> to vector<16x384xf32>
    %78 = arith.truncf %77 : vector<16x384xf32> to vector<16x384xbf16>
    %c3_70 = arith.constant 3 : index
    %c0_71 = arith.constant 0 : index
    %c0_72 = arith.constant 0 : index
    %79 = vector.load %arg2[%c3_70, %c0_71, %c0_72] : memref<7x384x128xbf16, #tpu.memory_space<vmem>>, vector<1x384x128xbf16>
    %80 = vector.shape_cast %79 : vector<1x384x128xbf16> to vector<384x128xbf16>
    %cst_73 = arith.constant dense<0.000000e+00> : vector<16x128xf32>
    %81 = tpu.matmul %78, %80, %cst_73 {dimension_numbers = #tpu.dot_dimension_numbers<[1], [0], [0], [1], [0, 0, 1, 1], [], []>} : vector<16x384xbf16>, vector<384x128xbf16>, vector<16x128xf32> -> vector<16x128xf32>
    %82 = arith.addf %75, %81 : vector<16x128xf32>
    %c1_74 = arith.constant 1 : index
    %c4_75 = arith.constant 4 : index
    %c0_76 = arith.constant 0 : index
    %83 = vector.load %arg1[%c1_74, %c4_75, %c0_76] : memref<2x24x384xf32, #tpu.memory_space<vmem>>, vector<1x16x384xf32>
    %84 = vector.shape_cast %83 : vector<1x16x384xf32> to vector<16x384xf32>
    %85 = arith.truncf %84 : vector<16x384xf32> to vector<16x384xbf16>
    %c4_77 = arith.constant 4 : index
    %c0_78 = arith.constant 0 : index
    %c0_79 = arith.constant 0 : index
    %86 = vector.load %arg2[%c4_77, %c0_78, %c0_79] : memref<7x384x128xbf16, #tpu.memory_space<vmem>>, vector<1x384x128xbf16>
    %87 = vector.shape_cast %86 : vector<1x384x128xbf16> to vector<384x128xbf16>
    %cst_80 = arith.constant dense<0.000000e+00> : vector<16x128xf32>
    %88 = tpu.matmul %85, %87, %cst_80 {dimension_numbers = #tpu.dot_dimension_numbers<[1], [0], [0], [1], [0, 0, 1, 1], [], []>} : vector<16x384xbf16>, vector<384x128xbf16>, vector<16x128xf32> -> vector<16x128xf32>
    %89 = arith.addf %82, %88 : vector<16x128xf32>
    %c1_81 = arith.constant 1 : index
    %c5_82 = arith.constant 5 : index
    %c0_83 = arith.constant 0 : index
    %90 = vector.load %arg1[%c1_81, %c5_82, %c0_83] : memref<2x24x384xf32, #tpu.memory_space<vmem>>, vector<1x16x384xf32>
    %91 = vector.shape_cast %90 : vector<1x16x384xf32> to vector<16x384xf32>
    %92 = arith.truncf %91 : vector<16x384xf32> to vector<16x384xbf16>
    %c5_84 = arith.constant 5 : index
    %c0_85 = arith.constant 0 : index
    %c0_86 = arith.constant 0 : index
    %93 = vector.load %arg2[%c5_84, %c0_85, %c0_86] : memref<7x384x128xbf16, #tpu.memory_space<vmem>>, vector<1x384x128xbf16>
    %94 = vector.shape_cast %93 : vector<1x384x128xbf16> to vector<384x128xbf16>
    %cst_87 = arith.constant dense<0.000000e+00> : vector<16x128xf32>
    %95 = tpu.matmul %92, %94, %cst_87 {dimension_numbers = #tpu.dot_dimension_numbers<[1], [0], [0], [1], [0, 0, 1, 1], [], []>} : vector<16x384xbf16>, vector<384x128xbf16>, vector<16x128xf32> -> vector<16x128xf32>
    %96 = arith.addf %89, %95 : vector<16x128xf32>
    %c1_88 = arith.constant 1 : index
    %c6_89 = arith.constant 6 : index
    %c0_90 = arith.constant 0 : index
    %97 = vector.load %arg1[%c1_88, %c6_89, %c0_90] : memref<2x24x384xf32, #tpu.memory_space<vmem>>, vector<1x16x384xf32>
    %98 = vector.shape_cast %97 : vector<1x16x384xf32> to vector<16x384xf32>
    %99 = arith.truncf %98 : vector<16x384xf32> to vector<16x384xbf16>
    %c6_91 = arith.constant 6 : index
    %c0_92 = arith.constant 0 : index
    %c0_93 = arith.constant 0 : index
    %100 = vector.load %arg2[%c6_91, %c0_92, %c0_93] : memref<7x384x128xbf16, #tpu.memory_space<vmem>>, vector<1x384x128xbf16>
    %101 = vector.shape_cast %100 : vector<1x384x128xbf16> to vector<384x128xbf16>
    %cst_94 = arith.constant dense<0.000000e+00> : vector<16x128xf32>
    %102 = tpu.matmul %99, %101, %cst_94 {dimension_numbers = #tpu.dot_dimension_numbers<[1], [0], [0], [1], [0, 0, 1, 1], [], []>} : vector<16x384xbf16>, vector<384x128xbf16>, vector<16x128xf32> -> vector<16x128xf32>
    %103 = arith.addf %96, %102 : vector<16x128xf32>
    %cst_95 = arith.constant 0.000000e+00 : f32
    %104 = vector.broadcast %cst_95 : f32 to vector<16x128xf32>
    %105 = arith.maximumf %103, %104 : vector<16x128xf32>
    %106 = tpu.concatenate %52, %105 in 1 : vector<16x128xf32>, vector<16x128xf32> -> vector<16x256xf32>
    %107 = arith.truncf %106 : vector<16x256xf32> to vector<16x256xbf16>
    %c0_96 = arith.constant 0 : index
    %c0_97 = arith.constant 0 : index
    %108 = vector.load %arg4[%c0_96, %c0_97] : memref<256x512xbf16, #tpu.memory_space<vmem>>, vector<256x512xbf16>
    %cst_98 = arith.constant dense<0.000000e+00> : vector<16x512xf32>
    %109 = tpu.matmul %107, %108, %cst_98 {dimension_numbers = #tpu.dot_dimension_numbers<[1], [0], [0], [1], [0, 0, 1, 1], [], []>} : vector<16x256xbf16>, vector<256x512xbf16>, vector<16x512xf32> -> vector<16x512xf32>
    %c0_99 = arith.constant 0 : index
    %c0_100 = arith.constant 0 : index
    %110 = vector.load %arg5[%c0_99, %c0_100] : memref<1x512xf32, #tpu.memory_space<vmem>>, vector<1x512xf32>
    %111 = vector.broadcast %110 : vector<1x512xf32> to vector<16x512xf32>
    %112 = arith.addf %109, %111 : vector<16x512xf32>
    %113 = tpu.iota {dimensions = array<i32: 1>} : vector<1x512xi32>
    %c128_i32 = arith.constant 128 : i32
    %c0_i32 = arith.constant 0 : i32
    %114 = arith.cmpi eq, %c128_i32, %c0_i32 : i32
    %c1_i32 = arith.constant 1 : i32
    %115 = arith.select %114, %c1_i32, %c128_i32 : i32
    %116 = vector.broadcast %115 : i32 to vector<1x512xi32>
    %117 = arith.remsi %113, %116 : vector<1x512xi32>
    %c0_i32_101 = arith.constant 0 : i32
    %118 = vector.broadcast %c0_i32_101 : i32 to vector<1x512xi32>
    %119 = arith.cmpi ne, %117, %118 : vector<1x512xi32>
    %c0_i32_102 = arith.constant 0 : i32
    %120 = vector.broadcast %c0_i32_102 : i32 to vector<1x512xi32>
    %121 = arith.cmpi slt, %117, %120 : vector<1x512xi32>
    %c0_i32_103 = arith.constant 0 : i32
    %122 = arith.cmpi slt, %115, %c0_i32_103 : i32
    %123 = vector.broadcast %122 : i1 to vector<1x512xi1>
    %124 = vector.broadcast %123 : vector<1x512xi1> to vector<1x512xi1>
    %125 = arith.xori %121, %124 : vector<1x512xi1>
    %126 = arith.andi %125, %119 : vector<1x512xi1>
    %127 = vector.broadcast %115 : i32 to vector<1x512xi32>
    %128 = arith.addi %117, %127 : vector<1x512xi32>
    %129 = arith.select %126, %128, %117 : vector<1x512xi1>, vector<1x512xi32>
    %c64_i32 = arith.constant 64 : i32
    %130 = vector.broadcast %c64_i32 : i32 to vector<1x512xi32>
    %131 = arith.cmpi slt, %129, %130 : vector<1x512xi32>
    %c0_104 = arith.constant 0 : index
    %c0_105 = arith.constant 0 : index
    %132 = vector.load %arg6[%c0_104, %c0_105] : memref<128x512xbf16, #tpu.memory_space<vmem>>, vector<128x512xbf16>
    %cst_106 = arith.constant 0.000000e+00 : f32
    %133 = vector.broadcast %cst_106 : f32 to vector<1x128xf32>
    %cst_107 = arith.constant 0.000000e+00 : f32
    %134 = vector.broadcast %cst_107 : f32 to vector<1x128xf32>
    %135 = vector.extract_strided_slice %112 {offsets = [0, 0], sizes = [1, 512], strides = [1, 1]} : vector<16x512xf32> to vector<1x512xf32>
    %136 = vector.extract_strided_slice %112 {offsets = [15, 0], sizes = [1, 512], strides = [1, 1]} : vector<16x512xf32> to vector<1x512xf32>
    %137 = arith.select %131, %135, %136 : vector<1x512xi1>, vector<1x512xf32>
    %138 = arith.truncf %133 : vector<1x128xf32> to vector<1x128xbf16>
    %cst_108 = arith.constant dense<0.000000e+00> : vector<1x512xf32>
    %139 = tpu.matmul %138, %132, %cst_108 {dimension_numbers = #tpu.dot_dimension_numbers<[1], [0], [0], [1], [0, 0, 1, 1], [], []>} : vector<1x128xbf16>, vector<128x512xbf16>, vector<1x512xf32> -> vector<1x512xf32>
    %140 = arith.addf %137, %139 : vector<1x512xf32>
    %141 = vector.extract_strided_slice %140 {offsets = [0, 0], sizes = [1, 128], strides = [1, 1]} : vector<1x512xf32> to vector<1x128xf32>
    %142 = arith.negf %141 : vector<1x128xf32>
    %143 = math.exp %142 : vector<1x128xf32>
    %cst_109 = arith.constant 1.000000e+00 : f32
    %144 = vector.broadcast %cst_109 : f32 to vector<1x128xf32>
    %145 = arith.addf %144, %143 : vector<1x128xf32>
    %146 = arith.divf %144, %145 : vector<1x128xf32>
    %147 = vector.extract_strided_slice %140 {offsets = [0, 128], sizes = [1, 128], strides = [1, 1]} : vector<1x512xf32> to vector<1x128xf32>
    %148 = arith.negf %147 : vector<1x128xf32>
    %149 = math.exp %148 : vector<1x128xf32>
    %cst_110 = arith.constant 1.000000e+00 : f32
    %150 = vector.broadcast %cst_110 : f32 to vector<1x128xf32>
    %151 = arith.addf %150, %149 : vector<1x128xf32>
    %152 = arith.divf %150, %151 : vector<1x128xf32>
    %153 = vector.extract_strided_slice %140 {offsets = [0, 256], sizes = [1, 128], strides = [1, 1]} : vector<1x512xf32> to vector<1x128xf32>
    %154 = math.tanh %153 : vector<1x128xf32>
    %155 = vector.extract_strided_slice %140 {offsets = [0, 384], sizes = [1, 128], strides = [1, 1]} : vector<1x512xf32> to vector<1x128xf32>
    %156 = arith.negf %155 : vector<1x128xf32>
    %157 = math.exp %156 : vector<1x128xf32>
    %cst_111 = arith.constant 1.000000e+00 : f32
    %158 = vector.broadcast %cst_111 : f32 to vector<1x128xf32>
    %159 = arith.addf %158, %157 : vector<1x128xf32>
    %160 = arith.divf %158, %159 : vector<1x128xf32>
    %161 = arith.mulf %152, %134 : vector<1x128xf32>
    %162 = arith.mulf %146, %154 : vector<1x128xf32>
    %163 = arith.addf %161, %162 : vector<1x128xf32>
    %164 = math.tanh %163 : vector<1x128xf32>
    %165 = arith.mulf %160, %164 : vector<1x128xf32>
    %166 = vector.extract_strided_slice %112 {offsets = [1, 0], sizes = [1, 512], strides = [1, 1]} : vector<16x512xf32> to vector<1x512xf32>
    %167 = vector.extract_strided_slice %112 {offsets = [14, 0], sizes = [1, 512], strides = [1, 1]} : vector<16x512xf32> to vector<1x512xf32>
    %168 = arith.select %131, %166, %167 : vector<1x512xi1>, vector<1x512xf32>
    %169 = arith.truncf %165 : vector<1x128xf32> to vector<1x128xbf16>
    %cst_112 = arith.constant dense<0.000000e+00> : vector<1x512xf32>
    %170 = tpu.matmul %169, %132, %cst_112 {dimension_numbers = #tpu.dot_dimension_numbers<[1], [0], [0], [1], [0, 0, 1, 1], [], []>} : vector<1x128xbf16>, vector<128x512xbf16>, vector<1x512xf32> -> vector<1x512xf32>
    %171 = arith.addf %168, %170 : vector<1x512xf32>
    %172 = vector.extract_strided_slice %171 {offsets = [0, 0], sizes = [1, 128], strides = [1, 1]} : vector<1x512xf32> to vector<1x128xf32>
    %173 = arith.negf %172 : vector<1x128xf32>
    %174 = math.exp %173 : vector<1x128xf32>
    %cst_113 = arith.constant 1.000000e+00 : f32
    %175 = vector.broadcast %cst_113 : f32 to vector<1x128xf32>
    %176 = arith.addf %175, %174 : vector<1x128xf32>
    %177 = arith.divf %175, %176 : vector<1x128xf32>
    %178 = vector.extract_strided_slice %171 {offsets = [0, 128], sizes = [1, 128], strides = [1, 1]} : vector<1x512xf32> to vector<1x128xf32>
    %179 = arith.negf %178 : vector<1x128xf32>
    %180 = math.exp %179 : vector<1x128xf32>
    %cst_114 = arith.constant 1.000000e+00 : f32
    %181 = vector.broadcast %cst_114 : f32 to vector<1x128xf32>
    %182 = arith.addf %181, %180 : vector<1x128xf32>
    %183 = arith.divf %181, %182 : vector<1x128xf32>
    %184 = vector.extract_strided_slice %171 {offsets = [0, 256], sizes = [1, 128], strides = [1, 1]} : vector<1x512xf32> to vector<1x128xf32>
    %185 = math.tanh %184 : vector<1x128xf32>
    %186 = vector.extract_strided_slice %171 {offsets = [0, 384], sizes = [1, 128], strides = [1, 1]} : vector<1x512xf32> to vector<1x128xf32>
    %187 = arith.negf %186 : vector<1x128xf32>
    %188 = math.exp %187 : vector<1x128xf32>
    %cst_115 = arith.constant 1.000000e+00 : f32
    %189 = vector.broadcast %cst_115 : f32 to vector<1x128xf32>
    %190 = arith.addf %189, %188 : vector<1x128xf32>
    %191 = arith.divf %189, %190 : vector<1x128xf32>
    %192 = arith.mulf %183, %163 : vector<1x128xf32>
    %193 = arith.mulf %177, %185 : vector<1x128xf32>
    %194 = arith.addf %192, %193 : vector<1x128xf32>
    %195 = math.tanh %194 : vector<1x128xf32>
    %196 = arith.mulf %191, %195 : vector<1x128xf32>
    %197 = vector.extract_strided_slice %112 {offsets = [2, 0], sizes = [1, 512], strides = [1, 1]} : vector<16x512xf32> to vector<1x512xf32>
    %198 = vector.extract_strided_slice %112 {offsets = [13, 0], sizes = [1, 512], strides = [1, 1]} : vector<16x512xf32> to vector<1x512xf32>
    %199 = arith.select %131, %197, %198 : vector<1x512xi1>, vector<1x512xf32>
    %200 = arith.truncf %196 : vector<1x128xf32> to vector<1x128xbf16>
    %cst_116 = arith.constant dense<0.000000e+00> : vector<1x512xf32>
    %201 = tpu.matmul %200, %132, %cst_116 {dimension_numbers = #tpu.dot_dimension_numbers<[1], [0], [0], [1], [0, 0, 1, 1], [], []>} : vector<1x128xbf16>, vector<128x512xbf16>, vector<1x512xf32> -> vector<1x512xf32>
    %202 = arith.addf %199, %201 : vector<1x512xf32>
    %203 = vector.extract_strided_slice %202 {offsets = [0, 0], sizes = [1, 128], strides = [1, 1]} : vector<1x512xf32> to vector<1x128xf32>
    %204 = arith.negf %203 : vector<1x128xf32>
    %205 = math.exp %204 : vector<1x128xf32>
    %cst_117 = arith.constant 1.000000e+00 : f32
    %206 = vector.broadcast %cst_117 : f32 to vector<1x128xf32>
    %207 = arith.addf %206, %205 : vector<1x128xf32>
    %208 = arith.divf %206, %207 : vector<1x128xf32>
    %209 = vector.extract_strided_slice %202 {offsets = [0, 128], sizes = [1, 128], strides = [1, 1]} : vector<1x512xf32> to vector<1x128xf32>
    %210 = arith.negf %209 : vector<1x128xf32>
    %211 = math.exp %210 : vector<1x128xf32>
    %cst_118 = arith.constant 1.000000e+00 : f32
    %212 = vector.broadcast %cst_118 : f32 to vector<1x128xf32>
    %213 = arith.addf %212, %211 : vector<1x128xf32>
    %214 = arith.divf %212, %213 : vector<1x128xf32>
    %215 = vector.extract_strided_slice %202 {offsets = [0, 256], sizes = [1, 128], strides = [1, 1]} : vector<1x512xf32> to vector<1x128xf32>
    %216 = math.tanh %215 : vector<1x128xf32>
    %217 = vector.extract_strided_slice %202 {offsets = [0, 384], sizes = [1, 128], strides = [1, 1]} : vector<1x512xf32> to vector<1x128xf32>
    %218 = arith.negf %217 : vector<1x128xf32>
    %219 = math.exp %218 : vector<1x128xf32>
    %cst_119 = arith.constant 1.000000e+00 : f32
    %220 = vector.broadcast %cst_119 : f32 to vector<1x128xf32>
    %221 = arith.addf %220, %219 : vector<1x128xf32>
    %222 = arith.divf %220, %221 : vector<1x128xf32>
    %223 = arith.mulf %214, %194 : vector<1x128xf32>
    %224 = arith.mulf %208, %216 : vector<1x128xf32>
    %225 = arith.addf %223, %224 : vector<1x128xf32>
    %226 = math.tanh %225 : vector<1x128xf32>
    %227 = arith.mulf %222, %226 : vector<1x128xf32>
    %228 = vector.extract_strided_slice %112 {offsets = [3, 0], sizes = [1, 512], strides = [1, 1]} : vector<16x512xf32> to vector<1x512xf32>
    %229 = vector.extract_strided_slice %112 {offsets = [12, 0], sizes = [1, 512], strides = [1, 1]} : vector<16x512xf32> to vector<1x512xf32>
    %230 = arith.select %131, %228, %229 : vector<1x512xi1>, vector<1x512xf32>
    %231 = arith.truncf %227 : vector<1x128xf32> to vector<1x128xbf16>
    %cst_120 = arith.constant dense<0.000000e+00> : vector<1x512xf32>
    %232 = tpu.matmul %231, %132, %cst_120 {dimension_numbers = #tpu.dot_dimension_numbers<[1], [0], [0], [1], [0, 0, 1, 1], [], []>} : vector<1x128xbf16>, vector<128x512xbf16>, vector<1x512xf32> -> vector<1x512xf32>
    %233 = arith.addf %230, %232 : vector<1x512xf32>
    %234 = vector.extract_strided_slice %233 {offsets = [0, 0], sizes = [1, 128], strides = [1, 1]} : vector<1x512xf32> to vector<1x128xf32>
    %235 = arith.negf %234 : vector<1x128xf32>
    %236 = math.exp %235 : vector<1x128xf32>
    %cst_121 = arith.constant 1.000000e+00 : f32
    %237 = vector.broadcast %cst_121 : f32 to vector<1x128xf32>
    %238 = arith.addf %237, %236 : vector<1x128xf32>
    %239 = arith.divf %237, %238 : vector<1x128xf32>
    %240 = vector.extract_strided_slice %233 {offsets = [0, 128], sizes = [1, 128], strides = [1, 1]} : vector<1x512xf32> to vector<1x128xf32>
    %241 = arith.negf %240 : vector<1x128xf32>
    %242 = math.exp %241 : vector<1x128xf32>
    %cst_122 = arith.constant 1.000000e+00 : f32
    %243 = vector.broadcast %cst_122 : f32 to vector<1x128xf32>
    %244 = arith.addf %243, %242 : vector<1x128xf32>
    %245 = arith.divf %243, %244 : vector<1x128xf32>
    %246 = vector.extract_strided_slice %233 {offsets = [0, 256], sizes = [1, 128], strides = [1, 1]} : vector<1x512xf32> to vector<1x128xf32>
    %247 = math.tanh %246 : vector<1x128xf32>
    %248 = vector.extract_strided_slice %233 {offsets = [0, 384], sizes = [1, 128], strides = [1, 1]} : vector<1x512xf32> to vector<1x128xf32>
    %249 = arith.negf %248 : vector<1x128xf32>
    %250 = math.exp %249 : vector<1x128xf32>
    %cst_123 = arith.constant 1.000000e+00 : f32
    %251 = vector.broadcast %cst_123 : f32 to vector<1x128xf32>
    %252 = arith.addf %251, %250 : vector<1x128xf32>
    %253 = arith.divf %251, %252 : vector<1x128xf32>
    %254 = arith.mulf %245, %225 : vector<1x128xf32>
    %255 = arith.mulf %239, %247 : vector<1x128xf32>
    %256 = arith.addf %254, %255 : vector<1x128xf32>
    %257 = math.tanh %256 : vector<1x128xf32>
    %258 = arith.mulf %253, %257 : vector<1x128xf32>
    %259 = vector.extract_strided_slice %112 {offsets = [4, 0], sizes = [1, 512], strides = [1, 1]} : vector<16x512xf32> to vector<1x512xf32>
    %260 = vector.extract_strided_slice %112 {offsets = [11, 0], sizes = [1, 512], strides = [1, 1]} : vector<16x512xf32> to vector<1x512xf32>
    %261 = arith.select %131, %259, %260 : vector<1x512xi1>, vector<1x512xf32>
    %262 = arith.truncf %258 : vector<1x128xf32> to vector<1x128xbf16>
    %cst_124 = arith.constant dense<0.000000e+00> : vector<1x512xf32>
    %263 = tpu.matmul %262, %132, %cst_124 {dimension_numbers = #tpu.dot_dimension_numbers<[1], [0], [0], [1], [0, 0, 1, 1], [], []>} : vector<1x128xbf16>, vector<128x512xbf16>, vector<1x512xf32> -> vector<1x512xf32>
    %264 = arith.addf %261, %263 : vector<1x512xf32>
    %265 = vector.extract_strided_slice %264 {offsets = [0, 0], sizes = [1, 128], strides = [1, 1]} : vector<1x512xf32> to vector<1x128xf32>
    %266 = arith.negf %265 : vector<1x128xf32>
    %267 = math.exp %266 : vector<1x128xf32>
    %cst_125 = arith.constant 1.000000e+00 : f32
    %268 = vector.broadcast %cst_125 : f32 to vector<1x128xf32>
    %269 = arith.addf %268, %267 : vector<1x128xf32>
    %270 = arith.divf %268, %269 : vector<1x128xf32>
    %271 = vector.extract_strided_slice %264 {offsets = [0, 128], sizes = [1, 128], strides = [1, 1]} : vector<1x512xf32> to vector<1x128xf32>
    %272 = arith.negf %271 : vector<1x128xf32>
    %273 = math.exp %272 : vector<1x128xf32>
    %cst_126 = arith.constant 1.000000e+00 : f32
    %274 = vector.broadcast %cst_126 : f32 to vector<1x128xf32>
    %275 = arith.addf %274, %273 : vector<1x128xf32>
    %276 = arith.divf %274, %275 : vector<1x128xf32>
    %277 = vector.extract_strided_slice %264 {offsets = [0, 256], sizes = [1, 128], strides = [1, 1]} : vector<1x512xf32> to vector<1x128xf32>
    %278 = math.tanh %277 : vector<1x128xf32>
    %279 = vector.extract_strided_slice %264 {offsets = [0, 384], sizes = [1, 128], strides = [1, 1]} : vector<1x512xf32> to vector<1x128xf32>
    %280 = arith.negf %279 : vector<1x128xf32>
    %281 = math.exp %280 : vector<1x128xf32>
    %cst_127 = arith.constant 1.000000e+00 : f32
    %282 = vector.broadcast %cst_127 : f32 to vector<1x128xf32>
    %283 = arith.addf %282, %281 : vector<1x128xf32>
    %284 = arith.divf %282, %283 : vector<1x128xf32>
    %285 = arith.mulf %276, %256 : vector<1x128xf32>
    %286 = arith.mulf %270, %278 : vector<1x128xf32>
    %287 = arith.addf %285, %286 : vector<1x128xf32>
    %288 = math.tanh %287 : vector<1x128xf32>
    %289 = arith.mulf %284, %288 : vector<1x128xf32>
    %290 = vector.extract_strided_slice %112 {offsets = [5, 0], sizes = [1, 512], strides = [1, 1]} : vector<16x512xf32> to vector<1x512xf32>
    %291 = vector.extract_strided_slice %112 {offsets = [10, 0], sizes = [1, 512], strides = [1, 1]} : vector<16x512xf32> to vector<1x512xf32>
    %292 = arith.select %131, %290, %291 : vector<1x512xi1>, vector<1x512xf32>
    %293 = arith.truncf %289 : vector<1x128xf32> to vector<1x128xbf16>
    %cst_128 = arith.constant dense<0.000000e+00> : vector<1x512xf32>
    %294 = tpu.matmul %293, %132, %cst_128 {dimension_numbers = #tpu.dot_dimension_numbers<[1], [0], [0], [1], [0, 0, 1, 1], [], []>} : vector<1x128xbf16>, vector<128x512xbf16>, vector<1x512xf32> -> vector<1x512xf32>
    %295 = arith.addf %292, %294 : vector<1x512xf32>
    %296 = vector.extract_strided_slice %295 {offsets = [0, 0], sizes = [1, 128], strides = [1, 1]} : vector<1x512xf32> to vector<1x128xf32>
    %297 = arith.negf %296 : vector<1x128xf32>
    %298 = math.exp %297 : vector<1x128xf32>
    %cst_129 = arith.constant 1.000000e+00 : f32
    %299 = vector.broadcast %cst_129 : f32 to vector<1x128xf32>
    %300 = arith.addf %299, %298 : vector<1x128xf32>
    %301 = arith.divf %299, %300 : vector<1x128xf32>
    %302 = vector.extract_strided_slice %295 {offsets = [0, 128], sizes = [1, 128], strides = [1, 1]} : vector<1x512xf32> to vector<1x128xf32>
    %303 = arith.negf %302 : vector<1x128xf32>
    %304 = math.exp %303 : vector<1x128xf32>
    %cst_130 = arith.constant 1.000000e+00 : f32
    %305 = vector.broadcast %cst_130 : f32 to vector<1x128xf32>
    %306 = arith.addf %305, %304 : vector<1x128xf32>
    %307 = arith.divf %305, %306 : vector<1x128xf32>
    %308 = vector.extract_strided_slice %295 {offsets = [0, 256], sizes = [1, 128], strides = [1, 1]} : vector<1x512xf32> to vector<1x128xf32>
    %309 = math.tanh %308 : vector<1x128xf32>
    %310 = vector.extract_strided_slice %295 {offsets = [0, 384], sizes = [1, 128], strides = [1, 1]} : vector<1x512xf32> to vector<1x128xf32>
    %311 = arith.negf %310 : vector<1x128xf32>
    %312 = math.exp %311 : vector<1x128xf32>
    %cst_131 = arith.constant 1.000000e+00 : f32
    %313 = vector.broadcast %cst_131 : f32 to vector<1x128xf32>
    %314 = arith.addf %313, %312 : vector<1x128xf32>
    %315 = arith.divf %313, %314 : vector<1x128xf32>
    %316 = arith.mulf %307, %287 : vector<1x128xf32>
    %317 = arith.mulf %301, %309 : vector<1x128xf32>
    %318 = arith.addf %316, %317 : vector<1x128xf32>
    %319 = math.tanh %318 : vector<1x128xf32>
    %320 = arith.mulf %315, %319 : vector<1x128xf32>
    %321 = vector.extract_strided_slice %112 {offsets = [6, 0], sizes = [1, 512], strides = [1, 1]} : vector<16x512xf32> to vector<1x512xf32>
    %322 = vector.extract_strided_slice %112 {offsets = [9, 0], sizes = [1, 512], strides = [1, 1]} : vector<16x512xf32> to vector<1x512xf32>
    %323 = arith.select %131, %321, %322 : vector<1x512xi1>, vector<1x512xf32>
    %324 = arith.truncf %320 : vector<1x128xf32> to vector<1x128xbf16>
    %cst_132 = arith.constant dense<0.000000e+00> : vector<1x512xf32>
    %325 = tpu.matmul %324, %132, %cst_132 {dimension_numbers = #tpu.dot_dimension_numbers<[1], [0], [0], [1], [0, 0, 1, 1], [], []>} : vector<1x128xbf16>, vector<128x512xbf16>, vector<1x512xf32> -> vector<1x512xf32>
    %326 = arith.addf %323, %325 : vector<1x512xf32>
    %327 = vector.extract_strided_slice %326 {offsets = [0, 0], sizes = [1, 128], strides = [1, 1]} : vector<1x512xf32> to vector<1x128xf32>
    %328 = arith.negf %327 : vector<1x128xf32>
    %329 = math.exp %328 : vector<1x128xf32>
    %cst_133 = arith.constant 1.000000e+00 : f32
    %330 = vector.broadcast %cst_133 : f32 to vector<1x128xf32>
    %331 = arith.addf %330, %329 : vector<1x128xf32>
    %332 = arith.divf %330, %331 : vector<1x128xf32>
    %333 = vector.extract_strided_slice %326 {offsets = [0, 128], sizes = [1, 128], strides = [1, 1]} : vector<1x512xf32> to vector<1x128xf32>
    %334 = arith.negf %333 : vector<1x128xf32>
    %335 = math.exp %334 : vector<1x128xf32>
    %cst_134 = arith.constant 1.000000e+00 : f32
    %336 = vector.broadcast %cst_134 : f32 to vector<1x128xf32>
    %337 = arith.addf %336, %335 : vector<1x128xf32>
    %338 = arith.divf %336, %337 : vector<1x128xf32>
    %339 = vector.extract_strided_slice %326 {offsets = [0, 256], sizes = [1, 128], strides = [1, 1]} : vector<1x512xf32> to vector<1x128xf32>
    %340 = math.tanh %339 : vector<1x128xf32>
    %341 = vector.extract_strided_slice %326 {offsets = [0, 384], sizes = [1, 128], strides = [1, 1]} : vector<1x512xf32> to vector<1x128xf32>
    %342 = arith.negf %341 : vector<1x128xf32>
    %343 = math.exp %342 : vector<1x128xf32>
    %cst_135 = arith.constant 1.000000e+00 : f32
    %344 = vector.broadcast %cst_135 : f32 to vector<1x128xf32>
    %345 = arith.addf %344, %343 : vector<1x128xf32>
    %346 = arith.divf %344, %345 : vector<1x128xf32>
    %347 = arith.mulf %338, %318 : vector<1x128xf32>
    %348 = arith.mulf %332, %340 : vector<1x128xf32>
    %349 = arith.addf %347, %348 : vector<1x128xf32>
    %350 = math.tanh %349 : vector<1x128xf32>
    %351 = arith.mulf %346, %350 : vector<1x128xf32>
    %352 = vector.extract_strided_slice %112 {offsets = [7, 0], sizes = [1, 512], strides = [1, 1]} : vector<16x512xf32> to vector<1x512xf32>
    %353 = vector.extract_strided_slice %112 {offsets = [8, 0], sizes = [1, 512], strides = [1, 1]} : vector<16x512xf32> to vector<1x512xf32>
    %354 = arith.select %131, %352, %353 : vector<1x512xi1>, vector<1x512xf32>
    %355 = arith.truncf %351 : vector<1x128xf32> to vector<1x128xbf16>
    %cst_136 = arith.constant dense<0.000000e+00> : vector<1x512xf32>
    %356 = tpu.matmul %355, %132, %cst_136 {dimension_numbers = #tpu.dot_dimension_numbers<[1], [0], [0], [1], [0, 0, 1, 1], [], []>} : vector<1x128xbf16>, vector<128x512xbf16>, vector<1x512xf32> -> vector<1x512xf32>
    %357 = arith.addf %354, %356 : vector<1x512xf32>
    %358 = vector.extract_strided_slice %357 {offsets = [0, 0], sizes = [1, 128], strides = [1, 1]} : vector<1x512xf32> to vector<1x128xf32>
    %359 = arith.negf %358 : vector<1x128xf32>
    %360 = math.exp %359 : vector<1x128xf32>
    %cst_137 = arith.constant 1.000000e+00 : f32
    %361 = vector.broadcast %cst_137 : f32 to vector<1x128xf32>
    %362 = arith.addf %361, %360 : vector<1x128xf32>
    %363 = arith.divf %361, %362 : vector<1x128xf32>
    %364 = vector.extract_strided_slice %357 {offsets = [0, 128], sizes = [1, 128], strides = [1, 1]} : vector<1x512xf32> to vector<1x128xf32>
    %365 = arith.negf %364 : vector<1x128xf32>
    %366 = math.exp %365 : vector<1x128xf32>
    %cst_138 = arith.constant 1.000000e+00 : f32
    %367 = vector.broadcast %cst_138 : f32 to vector<1x128xf32>
    %368 = arith.addf %367, %366 : vector<1x128xf32>
    %369 = arith.divf %367, %368 : vector<1x128xf32>
    %370 = vector.extract_strided_slice %357 {offsets = [0, 256], sizes = [1, 128], strides = [1, 1]} : vector<1x512xf32> to vector<1x128xf32>
    %371 = math.tanh %370 : vector<1x128xf32>
    %372 = vector.extract_strided_slice %357 {offsets = [0, 384], sizes = [1, 128], strides = [1, 1]} : vector<1x512xf32> to vector<1x128xf32>
    %373 = arith.negf %372 : vector<1x128xf32>
    %374 = math.exp %373 : vector<1x128xf32>
    %cst_139 = arith.constant 1.000000e+00 : f32
    %375 = vector.broadcast %cst_139 : f32 to vector<1x128xf32>
    %376 = arith.addf %375, %374 : vector<1x128xf32>
    %377 = arith.divf %375, %376 : vector<1x128xf32>
    %378 = arith.mulf %369, %349 : vector<1x128xf32>
    %379 = arith.mulf %363, %371 : vector<1x128xf32>
    %380 = arith.addf %378, %379 : vector<1x128xf32>
    %381 = math.tanh %380 : vector<1x128xf32>
    %382 = arith.mulf %377, %381 : vector<1x128xf32>
    %383 = vector.extract_strided_slice %112 {offsets = [8, 0], sizes = [1, 512], strides = [1, 1]} : vector<16x512xf32> to vector<1x512xf32>
    %384 = vector.extract_strided_slice %112 {offsets = [7, 0], sizes = [1, 512], strides = [1, 1]} : vector<16x512xf32> to vector<1x512xf32>
    %385 = arith.select %131, %383, %384 : vector<1x512xi1>, vector<1x512xf32>
    %386 = arith.truncf %382 : vector<1x128xf32> to vector<1x128xbf16>
    %cst_140 = arith.constant dense<0.000000e+00> : vector<1x512xf32>
    %387 = tpu.matmul %386, %132, %cst_140 {dimension_numbers = #tpu.dot_dimension_numbers<[1], [0], [0], [1], [0, 0, 1, 1], [], []>} : vector<1x128xbf16>, vector<128x512xbf16>, vector<1x512xf32> -> vector<1x512xf32>
    %388 = arith.addf %385, %387 : vector<1x512xf32>
    %389 = vector.extract_strided_slice %388 {offsets = [0, 0], sizes = [1, 128], strides = [1, 1]} : vector<1x512xf32> to vector<1x128xf32>
    %390 = arith.negf %389 : vector<1x128xf32>
    %391 = math.exp %390 : vector<1x128xf32>
    %cst_141 = arith.constant 1.000000e+00 : f32
    %392 = vector.broadcast %cst_141 : f32 to vector<1x128xf32>
    %393 = arith.addf %392, %391 : vector<1x128xf32>
    %394 = arith.divf %392, %393 : vector<1x128xf32>
    %395 = vector.extract_strided_slice %388 {offsets = [0, 128], sizes = [1, 128], strides = [1, 1]} : vector<1x512xf32> to vector<1x128xf32>
    %396 = arith.negf %395 : vector<1x128xf32>
    %397 = math.exp %396 : vector<1x128xf32>
    %cst_142 = arith.constant 1.000000e+00 : f32
    %398 = vector.broadcast %cst_142 : f32 to vector<1x128xf32>
    %399 = arith.addf %398, %397 : vector<1x128xf32>
    %400 = arith.divf %398, %399 : vector<1x128xf32>
    %401 = vector.extract_strided_slice %388 {offsets = [0, 256], sizes = [1, 128], strides = [1, 1]} : vector<1x512xf32> to vector<1x128xf32>
    %402 = math.tanh %401 : vector<1x128xf32>
    %403 = vector.extract_strided_slice %388 {offsets = [0, 384], sizes = [1, 128], strides = [1, 1]} : vector<1x512xf32> to vector<1x128xf32>
    %404 = arith.negf %403 : vector<1x128xf32>
    %405 = math.exp %404 : vector<1x128xf32>
    %cst_143 = arith.constant 1.000000e+00 : f32
    %406 = vector.broadcast %cst_143 : f32 to vector<1x128xf32>
    %407 = arith.addf %406, %405 : vector<1x128xf32>
    %408 = arith.divf %406, %407 : vector<1x128xf32>
    %409 = arith.mulf %400, %380 : vector<1x128xf32>
    %410 = arith.mulf %394, %402 : vector<1x128xf32>
    %411 = arith.addf %409, %410 : vector<1x128xf32>
    %412 = math.tanh %411 : vector<1x128xf32>
    %413 = arith.mulf %408, %412 : vector<1x128xf32>
    %414 = vector.extract_strided_slice %112 {offsets = [9, 0], sizes = [1, 512], strides = [1, 1]} : vector<16x512xf32> to vector<1x512xf32>
    %415 = vector.extract_strided_slice %112 {offsets = [6, 0], sizes = [1, 512], strides = [1, 1]} : vector<16x512xf32> to vector<1x512xf32>
    %416 = arith.select %131, %414, %415 : vector<1x512xi1>, vector<1x512xf32>
    %417 = arith.truncf %413 : vector<1x128xf32> to vector<1x128xbf16>
    %cst_144 = arith.constant dense<0.000000e+00> : vector<1x512xf32>
    %418 = tpu.matmul %417, %132, %cst_144 {dimension_numbers = #tpu.dot_dimension_numbers<[1], [0], [0], [1], [0, 0, 1, 1], [], []>} : vector<1x128xbf16>, vector<128x512xbf16>, vector<1x512xf32> -> vector<1x512xf32>
    %419 = arith.addf %416, %418 : vector<1x512xf32>
    %420 = vector.extract_strided_slice %419 {offsets = [0, 0], sizes = [1, 128], strides = [1, 1]} : vector<1x512xf32> to vector<1x128xf32>
    %421 = arith.negf %420 : vector<1x128xf32>
    %422 = math.exp %421 : vector<1x128xf32>
    %cst_145 = arith.constant 1.000000e+00 : f32
    %423 = vector.broadcast %cst_145 : f32 to vector<1x128xf32>
    %424 = arith.addf %423, %422 : vector<1x128xf32>
    %425 = arith.divf %423, %424 : vector<1x128xf32>
    %426 = vector.extract_strided_slice %419 {offsets = [0, 128], sizes = [1, 128], strides = [1, 1]} : vector<1x512xf32> to vector<1x128xf32>
    %427 = arith.negf %426 : vector<1x128xf32>
    %428 = math.exp %427 : vector<1x128xf32>
    %cst_146 = arith.constant 1.000000e+00 : f32
    %429 = vector.broadcast %cst_146 : f32 to vector<1x128xf32>
    %430 = arith.addf %429, %428 : vector<1x128xf32>
    %431 = arith.divf %429, %430 : vector<1x128xf32>
    %432 = vector.extract_strided_slice %419 {offsets = [0, 256], sizes = [1, 128], strides = [1, 1]} : vector<1x512xf32> to vector<1x128xf32>
    %433 = math.tanh %432 : vector<1x128xf32>
    %434 = vector.extract_strided_slice %419 {offsets = [0, 384], sizes = [1, 128], strides = [1, 1]} : vector<1x512xf32> to vector<1x128xf32>
    %435 = arith.negf %434 : vector<1x128xf32>
    %436 = math.exp %435 : vector<1x128xf32>
    %cst_147 = arith.constant 1.000000e+00 : f32
    %437 = vector.broadcast %cst_147 : f32 to vector<1x128xf32>
    %438 = arith.addf %437, %436 : vector<1x128xf32>
    %439 = arith.divf %437, %438 : vector<1x128xf32>
    %440 = arith.mulf %431, %411 : vector<1x128xf32>
    %441 = arith.mulf %425, %433 : vector<1x128xf32>
    %442 = arith.addf %440, %441 : vector<1x128xf32>
    %443 = math.tanh %442 : vector<1x128xf32>
    %444 = arith.mulf %439, %443 : vector<1x128xf32>
    %445 = vector.extract_strided_slice %112 {offsets = [10, 0], sizes = [1, 512], strides = [1, 1]} : vector<16x512xf32> to vector<1x512xf32>
    %446 = vector.extract_strided_slice %112 {offsets = [5, 0], sizes = [1, 512], strides = [1, 1]} : vector<16x512xf32> to vector<1x512xf32>
    %447 = arith.select %131, %445, %446 : vector<1x512xi1>, vector<1x512xf32>
    %448 = arith.truncf %444 : vector<1x128xf32> to vector<1x128xbf16>
    %cst_148 = arith.constant dense<0.000000e+00> : vector<1x512xf32>
    %449 = tpu.matmul %448, %132, %cst_148 {dimension_numbers = #tpu.dot_dimension_numbers<[1], [0], [0], [1], [0, 0, 1, 1], [], []>} : vector<1x128xbf16>, vector<128x512xbf16>, vector<1x512xf32> -> vector<1x512xf32>
    %450 = arith.addf %447, %449 : vector<1x512xf32>
    %451 = vector.extract_strided_slice %450 {offsets = [0, 0], sizes = [1, 128], strides = [1, 1]} : vector<1x512xf32> to vector<1x128xf32>
    %452 = arith.negf %451 : vector<1x128xf32>
    %453 = math.exp %452 : vector<1x128xf32>
    %cst_149 = arith.constant 1.000000e+00 : f32
    %454 = vector.broadcast %cst_149 : f32 to vector<1x128xf32>
    %455 = arith.addf %454, %453 : vector<1x128xf32>
    %456 = arith.divf %454, %455 : vector<1x128xf32>
    %457 = vector.extract_strided_slice %450 {offsets = [0, 128], sizes = [1, 128], strides = [1, 1]} : vector<1x512xf32> to vector<1x128xf32>
    %458 = arith.negf %457 : vector<1x128xf32>
    %459 = math.exp %458 : vector<1x128xf32>
    %cst_150 = arith.constant 1.000000e+00 : f32
    %460 = vector.broadcast %cst_150 : f32 to vector<1x128xf32>
    %461 = arith.addf %460, %459 : vector<1x128xf32>
    %462 = arith.divf %460, %461 : vector<1x128xf32>
    %463 = vector.extract_strided_slice %450 {offsets = [0, 256], sizes = [1, 128], strides = [1, 1]} : vector<1x512xf32> to vector<1x128xf32>
    %464 = math.tanh %463 : vector<1x128xf32>
    %465 = vector.extract_strided_slice %450 {offsets = [0, 384], sizes = [1, 128], strides = [1, 1]} : vector<1x512xf32> to vector<1x128xf32>
    %466 = arith.negf %465 : vector<1x128xf32>
    %467 = math.exp %466 : vector<1x128xf32>
    %cst_151 = arith.constant 1.000000e+00 : f32
    %468 = vector.broadcast %cst_151 : f32 to vector<1x128xf32>
    %469 = arith.addf %468, %467 : vector<1x128xf32>
    %470 = arith.divf %468, %469 : vector<1x128xf32>
    %471 = arith.mulf %462, %442 : vector<1x128xf32>
    %472 = arith.mulf %456, %464 : vector<1x128xf32>
    %473 = arith.addf %471, %472 : vector<1x128xf32>
    %474 = math.tanh %473 : vector<1x128xf32>
    %475 = arith.mulf %470, %474 : vector<1x128xf32>
    %476 = vector.extract_strided_slice %112 {offsets = [11, 0], sizes = [1, 512], strides = [1, 1]} : vector<16x512xf32> to vector<1x512xf32>
    %477 = vector.extract_strided_slice %112 {offsets = [4, 0], sizes = [1, 512], strides = [1, 1]} : vector<16x512xf32> to vector<1x512xf32>
    %478 = arith.select %131, %476, %477 : vector<1x512xi1>, vector<1x512xf32>
    %479 = arith.truncf %475 : vector<1x128xf32> to vector<1x128xbf16>
    %cst_152 = arith.constant dense<0.000000e+00> : vector<1x512xf32>
    %480 = tpu.matmul %479, %132, %cst_152 {dimension_numbers = #tpu.dot_dimension_numbers<[1], [0], [0], [1], [0, 0, 1, 1], [], []>} : vector<1x128xbf16>, vector<128x512xbf16>, vector<1x512xf32> -> vector<1x512xf32>
    %481 = arith.addf %478, %480 : vector<1x512xf32>
    %482 = vector.extract_strided_slice %481 {offsets = [0, 0], sizes = [1, 128], strides = [1, 1]} : vector<1x512xf32> to vector<1x128xf32>
    %483 = arith.negf %482 : vector<1x128xf32>
    %484 = math.exp %483 : vector<1x128xf32>
    %cst_153 = arith.constant 1.000000e+00 : f32
    %485 = vector.broadcast %cst_153 : f32 to vector<1x128xf32>
    %486 = arith.addf %485, %484 : vector<1x128xf32>
    %487 = arith.divf %485, %486 : vector<1x128xf32>
    %488 = vector.extract_strided_slice %481 {offsets = [0, 128], sizes = [1, 128], strides = [1, 1]} : vector<1x512xf32> to vector<1x128xf32>
    %489 = arith.negf %488 : vector<1x128xf32>
    %490 = math.exp %489 : vector<1x128xf32>
    %cst_154 = arith.constant 1.000000e+00 : f32
    %491 = vector.broadcast %cst_154 : f32 to vector<1x128xf32>
    %492 = arith.addf %491, %490 : vector<1x128xf32>
    %493 = arith.divf %491, %492 : vector<1x128xf32>
    %494 = vector.extract_strided_slice %481 {offsets = [0, 256], sizes = [1, 128], strides = [1, 1]} : vector<1x512xf32> to vector<1x128xf32>
    %495 = math.tanh %494 : vector<1x128xf32>
    %496 = vector.extract_strided_slice %481 {offsets = [0, 384], sizes = [1, 128], strides = [1, 1]} : vector<1x512xf32> to vector<1x128xf32>
    %497 = arith.negf %496 : vector<1x128xf32>
    %498 = math.exp %497 : vector<1x128xf32>
    %cst_155 = arith.constant 1.000000e+00 : f32
    %499 = vector.broadcast %cst_155 : f32 to vector<1x128xf32>
    %500 = arith.addf %499, %498 : vector<1x128xf32>
    %501 = arith.divf %499, %500 : vector<1x128xf32>
    %502 = arith.mulf %493, %473 : vector<1x128xf32>
    %503 = arith.mulf %487, %495 : vector<1x128xf32>
    %504 = arith.addf %502, %503 : vector<1x128xf32>
    %505 = math.tanh %504 : vector<1x128xf32>
    %506 = arith.mulf %501, %505 : vector<1x128xf32>
    %507 = vector.extract_strided_slice %112 {offsets = [12, 0], sizes = [1, 512], strides = [1, 1]} : vector<16x512xf32> to vector<1x512xf32>
    %508 = vector.extract_strided_slice %112 {offsets = [3, 0], sizes = [1, 512], strides = [1, 1]} : vector<16x512xf32> to vector<1x512xf32>
    %509 = arith.select %131, %507, %508 : vector<1x512xi1>, vector<1x512xf32>
    %510 = arith.truncf %506 : vector<1x128xf32> to vector<1x128xbf16>
    %cst_156 = arith.constant dense<0.000000e+00> : vector<1x512xf32>
    %511 = tpu.matmul %510, %132, %cst_156 {dimension_numbers = #tpu.dot_dimension_numbers<[1], [0], [0], [1], [0, 0, 1, 1], [], []>} : vector<1x128xbf16>, vector<128x512xbf16>, vector<1x512xf32> -> vector<1x512xf32>
    %512 = arith.addf %509, %511 : vector<1x512xf32>
    %513 = vector.extract_strided_slice %512 {offsets = [0, 0], sizes = [1, 128], strides = [1, 1]} : vector<1x512xf32> to vector<1x128xf32>
    %514 = arith.negf %513 : vector<1x128xf32>
    %515 = math.exp %514 : vector<1x128xf32>
    %cst_157 = arith.constant 1.000000e+00 : f32
    %516 = vector.broadcast %cst_157 : f32 to vector<1x128xf32>
    %517 = arith.addf %516, %515 : vector<1x128xf32>
    %518 = arith.divf %516, %517 : vector<1x128xf32>
    %519 = vector.extract_strided_slice %512 {offsets = [0, 128], sizes = [1, 128], strides = [1, 1]} : vector<1x512xf32> to vector<1x128xf32>
    %520 = arith.negf %519 : vector<1x128xf32>
    %521 = math.exp %520 : vector<1x128xf32>
    %cst_158 = arith.constant 1.000000e+00 : f32
    %522 = vector.broadcast %cst_158 : f32 to vector<1x128xf32>
    %523 = arith.addf %522, %521 : vector<1x128xf32>
    %524 = arith.divf %522, %523 : vector<1x128xf32>
    %525 = vector.extract_strided_slice %512 {offsets = [0, 256], sizes = [1, 128], strides = [1, 1]} : vector<1x512xf32> to vector<1x128xf32>
    %526 = math.tanh %525 : vector<1x128xf32>
    %527 = vector.extract_strided_slice %512 {offsets = [0, 384], sizes = [1, 128], strides = [1, 1]} : vector<1x512xf32> to vector<1x128xf32>
    %528 = arith.negf %527 : vector<1x128xf32>
    %529 = math.exp %528 : vector<1x128xf32>
    %cst_159 = arith.constant 1.000000e+00 : f32
    %530 = vector.broadcast %cst_159 : f32 to vector<1x128xf32>
    %531 = arith.addf %530, %529 : vector<1x128xf32>
    %532 = arith.divf %530, %531 : vector<1x128xf32>
    %533 = arith.mulf %524, %504 : vector<1x128xf32>
    %534 = arith.mulf %518, %526 : vector<1x128xf32>
    %535 = arith.addf %533, %534 : vector<1x128xf32>
    %536 = math.tanh %535 : vector<1x128xf32>
    %537 = arith.mulf %532, %536 : vector<1x128xf32>
    %538 = vector.extract_strided_slice %112 {offsets = [13, 0], sizes = [1, 512], strides = [1, 1]} : vector<16x512xf32> to vector<1x512xf32>
    %539 = vector.extract_strided_slice %112 {offsets = [2, 0], sizes = [1, 512], strides = [1, 1]} : vector<16x512xf32> to vector<1x512xf32>
    %540 = arith.select %131, %538, %539 : vector<1x512xi1>, vector<1x512xf32>
    %541 = arith.truncf %537 : vector<1x128xf32> to vector<1x128xbf16>
    %cst_160 = arith.constant dense<0.000000e+00> : vector<1x512xf32>
    %542 = tpu.matmul %541, %132, %cst_160 {dimension_numbers = #tpu.dot_dimension_numbers<[1], [0], [0], [1], [0, 0, 1, 1], [], []>} : vector<1x128xbf16>, vector<128x512xbf16>, vector<1x512xf32> -> vector<1x512xf32>
    %543 = arith.addf %540, %542 : vector<1x512xf32>
    %544 = vector.extract_strided_slice %543 {offsets = [0, 0], sizes = [1, 128], strides = [1, 1]} : vector<1x512xf32> to vector<1x128xf32>
    %545 = arith.negf %544 : vector<1x128xf32>
    %546 = math.exp %545 : vector<1x128xf32>
    %cst_161 = arith.constant 1.000000e+00 : f32
    %547 = vector.broadcast %cst_161 : f32 to vector<1x128xf32>
    %548 = arith.addf %547, %546 : vector<1x128xf32>
    %549 = arith.divf %547, %548 : vector<1x128xf32>
    %550 = vector.extract_strided_slice %543 {offsets = [0, 128], sizes = [1, 128], strides = [1, 1]} : vector<1x512xf32> to vector<1x128xf32>
    %551 = arith.negf %550 : vector<1x128xf32>
    %552 = math.exp %551 : vector<1x128xf32>
    %cst_162 = arith.constant 1.000000e+00 : f32
    %553 = vector.broadcast %cst_162 : f32 to vector<1x128xf32>
    %554 = arith.addf %553, %552 : vector<1x128xf32>
    %555 = arith.divf %553, %554 : vector<1x128xf32>
    %556 = vector.extract_strided_slice %543 {offsets = [0, 256], sizes = [1, 128], strides = [1, 1]} : vector<1x512xf32> to vector<1x128xf32>
    %557 = math.tanh %556 : vector<1x128xf32>
    %558 = vector.extract_strided_slice %543 {offsets = [0, 384], sizes = [1, 128], strides = [1, 1]} : vector<1x512xf32> to vector<1x128xf32>
    %559 = arith.negf %558 : vector<1x128xf32>
    %560 = math.exp %559 : vector<1x128xf32>
    %cst_163 = arith.constant 1.000000e+00 : f32
    %561 = vector.broadcast %cst_163 : f32 to vector<1x128xf32>
    %562 = arith.addf %561, %560 : vector<1x128xf32>
    %563 = arith.divf %561, %562 : vector<1x128xf32>
    %564 = arith.mulf %555, %535 : vector<1x128xf32>
    %565 = arith.mulf %549, %557 : vector<1x128xf32>
    %566 = arith.addf %564, %565 : vector<1x128xf32>
    %567 = math.tanh %566 : vector<1x128xf32>
    %568 = arith.mulf %563, %567 : vector<1x128xf32>
    %569 = vector.extract_strided_slice %112 {offsets = [14, 0], sizes = [1, 512], strides = [1, 1]} : vector<16x512xf32> to vector<1x512xf32>
    %570 = vector.extract_strided_slice %112 {offsets = [1, 0], sizes = [1, 512], strides = [1, 1]} : vector<16x512xf32> to vector<1x512xf32>
    %571 = arith.select %131, %569, %570 : vector<1x512xi1>, vector<1x512xf32>
    %572 = arith.truncf %568 : vector<1x128xf32> to vector<1x128xbf16>
    %cst_164 = arith.constant dense<0.000000e+00> : vector<1x512xf32>
    %573 = tpu.matmul %572, %132, %cst_164 {dimension_numbers = #tpu.dot_dimension_numbers<[1], [0], [0], [1], [0, 0, 1, 1], [], []>} : vector<1x128xbf16>, vector<128x512xbf16>, vector<1x512xf32> -> vector<1x512xf32>
    %574 = arith.addf %571, %573 : vector<1x512xf32>
    %575 = vector.extract_strided_slice %574 {offsets = [0, 0], sizes = [1, 128], strides = [1, 1]} : vector<1x512xf32> to vector<1x128xf32>
    %576 = arith.negf %575 : vector<1x128xf32>
    %577 = math.exp %576 : vector<1x128xf32>
    %cst_165 = arith.constant 1.000000e+00 : f32
    %578 = vector.broadcast %cst_165 : f32 to vector<1x128xf32>
    %579 = arith.addf %578, %577 : vector<1x128xf32>
    %580 = arith.divf %578, %579 : vector<1x128xf32>
    %581 = vector.extract_strided_slice %574 {offsets = [0, 128], sizes = [1, 128], strides = [1, 1]} : vector<1x512xf32> to vector<1x128xf32>
    %582 = arith.negf %581 : vector<1x128xf32>
    %583 = math.exp %582 : vector<1x128xf32>
    %cst_166 = arith.constant 1.000000e+00 : f32
    %584 = vector.broadcast %cst_166 : f32 to vector<1x128xf32>
    %585 = arith.addf %584, %583 : vector<1x128xf32>
    %586 = arith.divf %584, %585 : vector<1x128xf32>
    %587 = vector.extract_strided_slice %574 {offsets = [0, 256], sizes = [1, 128], strides = [1, 1]} : vector<1x512xf32> to vector<1x128xf32>
    %588 = math.tanh %587 : vector<1x128xf32>
    %589 = vector.extract_strided_slice %574 {offsets = [0, 384], sizes = [1, 128], strides = [1, 1]} : vector<1x512xf32> to vector<1x128xf32>
    %590 = arith.negf %589 : vector<1x128xf32>
    %591 = math.exp %590 : vector<1x128xf32>
    %cst_167 = arith.constant 1.000000e+00 : f32
    %592 = vector.broadcast %cst_167 : f32 to vector<1x128xf32>
    %593 = arith.addf %592, %591 : vector<1x128xf32>
    %594 = arith.divf %592, %593 : vector<1x128xf32>
    %595 = arith.mulf %586, %566 : vector<1x128xf32>
    %596 = arith.mulf %580, %588 : vector<1x128xf32>
    %597 = arith.addf %595, %596 : vector<1x128xf32>
    %598 = math.tanh %597 : vector<1x128xf32>
    %599 = arith.mulf %594, %598 : vector<1x128xf32>
    %600 = vector.extract_strided_slice %112 {offsets = [15, 0], sizes = [1, 512], strides = [1, 1]} : vector<16x512xf32> to vector<1x512xf32>
    %601 = vector.extract_strided_slice %112 {offsets = [0, 0], sizes = [1, 512], strides = [1, 1]} : vector<16x512xf32> to vector<1x512xf32>
    %602 = arith.select %131, %600, %601 : vector<1x512xi1>, vector<1x512xf32>
    %603 = arith.truncf %599 : vector<1x128xf32> to vector<1x128xbf16>
    %cst_168 = arith.constant dense<0.000000e+00> : vector<1x512xf32>
    %604 = tpu.matmul %603, %132, %cst_168 {dimension_numbers = #tpu.dot_dimension_numbers<[1], [0], [0], [1], [0, 0, 1, 1], [], []>} : vector<1x128xbf16>, vector<128x512xbf16>, vector<1x512xf32> -> vector<1x512xf32>
    %605 = arith.addf %602, %604 : vector<1x512xf32>
    %606 = vector.extract_strided_slice %605 {offsets = [0, 0], sizes = [1, 128], strides = [1, 1]} : vector<1x512xf32> to vector<1x128xf32>
    %607 = arith.negf %606 : vector<1x128xf32>
    %608 = math.exp %607 : vector<1x128xf32>
    %cst_169 = arith.constant 1.000000e+00 : f32
    %609 = vector.broadcast %cst_169 : f32 to vector<1x128xf32>
    %610 = arith.addf %609, %608 : vector<1x128xf32>
    %611 = arith.divf %609, %610 : vector<1x128xf32>
    %612 = vector.extract_strided_slice %605 {offsets = [0, 128], sizes = [1, 128], strides = [1, 1]} : vector<1x512xf32> to vector<1x128xf32>
    %613 = arith.negf %612 : vector<1x128xf32>
    %614 = math.exp %613 : vector<1x128xf32>
    %cst_170 = arith.constant 1.000000e+00 : f32
    %615 = vector.broadcast %cst_170 : f32 to vector<1x128xf32>
    %616 = arith.addf %615, %614 : vector<1x128xf32>
    %617 = arith.divf %615, %616 : vector<1x128xf32>
    %618 = vector.extract_strided_slice %605 {offsets = [0, 256], sizes = [1, 128], strides = [1, 1]} : vector<1x512xf32> to vector<1x128xf32>
    %619 = math.tanh %618 : vector<1x128xf32>
    %620 = vector.extract_strided_slice %605 {offsets = [0, 384], sizes = [1, 128], strides = [1, 1]} : vector<1x512xf32> to vector<1x128xf32>
    %621 = arith.negf %620 : vector<1x128xf32>
    %622 = math.exp %621 : vector<1x128xf32>
    %cst_171 = arith.constant 1.000000e+00 : f32
    %623 = vector.broadcast %cst_171 : f32 to vector<1x128xf32>
    %624 = arith.addf %623, %622 : vector<1x128xf32>
    %625 = arith.divf %623, %624 : vector<1x128xf32>
    %626 = arith.mulf %617, %597 : vector<1x128xf32>
    %627 = arith.mulf %611, %619 : vector<1x128xf32>
    %628 = arith.addf %626, %627 : vector<1x128xf32>
    %629 = math.tanh %628 : vector<1x128xf32>
    %630 = arith.mulf %625, %629 : vector<1x128xf32>
    %631 = tpu.concatenate %165, %196, %227, %258, %289, %320, %351, %382, %413, %444, %475, %506, %537, %568, %599, %630 in 0 : vector<1x128xf32>, vector<1x128xf32>, vector<1x128xf32>, vector<1x128xf32>, vector<1x128xf32>, vector<1x128xf32>, vector<1x128xf32>, vector<1x128xf32>, vector<1x128xf32>, vector<1x128xf32>, vector<1x128xf32>, vector<1x128xf32>, vector<1x128xf32>, vector<1x128xf32>, vector<1x128xf32>, vector<1x128xf32> -> vector<16x128xf32>
    %632 = tpu.concatenate %630, %599, %568, %537, %506, %475, %444, %413, %382, %351, %320, %289, %258, %227, %196, %165 in 0 : vector<1x128xf32>, vector<1x128xf32>, vector<1x128xf32>, vector<1x128xf32>, vector<1x128xf32>, vector<1x128xf32>, vector<1x128xf32>, vector<1x128xf32>, vector<1x128xf32>, vector<1x128xf32>, vector<1x128xf32>, vector<1x128xf32>, vector<1x128xf32>, vector<1x128xf32>, vector<1x128xf32>, vector<1x128xf32> -> vector<16x128xf32>
    %633 = tpu.concatenate %631, %632 in 0 : vector<16x128xf32>, vector<16x128xf32> -> vector<32x128xf32>
    %c0_172 = arith.constant 0 : index
    %c0_173 = arith.constant 0 : index
    %634 = vector.load %arg7[%c0_172, %c0_173] : memref<128x128xf32, #tpu.memory_space<vmem>>, vector<128x128xf32>
    %cst_174 = arith.constant dense<0.000000e+00> : vector<32x128xf32>
    %635 = tpu.matmul %633, %634, %cst_174 {dimension_numbers = #tpu.dot_dimension_numbers<[1], [0], [0], [1], [0, 0, 1, 1], [], []>} : vector<32x128xf32>, vector<128x128xf32>, vector<32x128xf32> -> vector<32x128xf32>
    %636 = vector.extract_strided_slice %633 {offsets = [0, 0], sizes = [16, 128], strides = [1, 1]} : vector<32x128xf32> to vector<16x128xf32>
    %637 = vector.extract_strided_slice %635 {offsets = [0, 0], sizes = [16, 128], strides = [1, 1]} : vector<32x128xf32> to vector<16x128xf32>
    %638 = vector.extract_strided_slice %635 {offsets = [16, 0], sizes = [16, 128], strides = [1, 1]} : vector<32x128xf32> to vector<16x128xf32>
    %c64_i32_175 = arith.constant 64 : i32
    %639 = tpu.dynamic_rotate %638 by %c64_i32_175 dim 1 : vector<16x128xf32>, i32 -> vector<16x128xf32>
    %640 = arith.addf %637, %639 : vector<16x128xf32>
    %c0_176 = arith.constant 0 : index
    %c0_177 = arith.constant 0 : index
    %641 = vector.load %arg8[%c0_176, %c0_177] : memref<1x128xf32, #tpu.memory_space<vmem>>, vector<1x128xf32>
    %642 = vector.broadcast %641 : vector<1x128xf32> to vector<16x128xf32>
    %643 = arith.addf %640, %642 : vector<16x128xf32>
    %644 = arith.negf %643 : vector<16x128xf32>
    %645 = math.exp %644 : vector<16x128xf32>
    %cst_178 = arith.constant 1.000000e+00 : f32
    %646 = vector.broadcast %cst_178 : f32 to vector<16x128xf32>
    %647 = arith.addf %646, %645 : vector<16x128xf32>
    %648 = arith.divf %646, %647 : vector<16x128xf32>
    %649 = arith.mulf %636, %648 : vector<16x128xf32>
    %cst_179 = arith.constant dense<0.000000e+00> : vector<128xf32>
    %650 = vector.multi_reduction <add>, %649, %cst_179 [0] : vector<16x128xf32> to vector<128xf32>
    %651 = vector.shape_cast %650 : vector<128xf32> to vector<1x128xf32>
    %c0_180 = arith.constant 0 : index
    %c0_181 = arith.constant 0 : index
    %652 = vector.load %arg9[%c0_180, %c0_181] : memref<128x4xf32, #tpu.memory_space<vmem>>, vector<128x4xf32>
    %cst_182 = arith.constant dense<0.000000e+00> : vector<1x4xf32>
    %653 = tpu.matmul %651, %652, %cst_182 {dimension_numbers = #tpu.dot_dimension_numbers<[1], [0], [0], [1], [0, 0, 1, 1], [], []>} : vector<1x128xf32>, vector<128x4xf32>, vector<1x4xf32> -> vector<1x4xf32>
    %654 = vector.extract_strided_slice %653 {offsets = [0, 0], sizes = [1, 2], strides = [1, 1]} : vector<1x4xf32> to vector<1x2xf32>
    %655 = vector.extract_strided_slice %653 {offsets = [0, 2], sizes = [1, 2], strides = [1, 1]} : vector<1x4xf32> to vector<1x2xf32>
    %656 = tpu.concatenate %654, %655 in 0 : vector<1x2xf32>, vector<1x2xf32> -> vector<2x2xf32>
    %c0_183 = arith.constant 0 : index
    %c0_184 = arith.constant 0 : index
    %657 = vector.load %arg10[%c0_183, %c0_184] : memref<1x2xf32, #tpu.memory_space<vmem>>, vector<1x2xf32>
    %658 = vector.broadcast %657 : vector<1x2xf32> to vector<2x2xf32>
    %659 = arith.addf %656, %658 : vector<2x2xf32>
    %c0_185 = arith.constant 0 : index
    %c0_186 = arith.constant 0 : index
    %660 = vector.load %arg11[%c0_185, %c0_186] : memref<2x2xf32, #tpu.memory_space<vmem>>, vector<2x2xf32>
    tpu.vector_store %arg11[%c0_185, %c0_186], %659 {strides = array<i32>} : memref<2x2xf32, #tpu.memory_space<vmem>>, vector<2x2xf32>,
    return
  }
  func.func @transform_0(%arg0: i32) -> (i32, i32, i32) {
    %c0_i32 = arith.constant 0 : i32
    %c0_i32_0 = arith.constant 0 : i32
    %c0_i32_1 = arith.constant 0 : i32
    %c0_i32_2 = arith.constant 0 : i32
    return %c0_i32, %c0_i32_0, %c0_i32_1 : i32, i32, i32
  }
  func.func @transform_1(%arg0: i32) -> (i32, i32, i32) {
    %c0_i32 = arith.constant 0 : i32
    %c0_i32_0 = arith.constant 0 : i32
    %c0_i32_1 = arith.constant 0 : i32
    %c0_i32_2 = arith.constant 0 : i32
    return %c0_i32, %c0_i32_0, %c0_i32_1 : i32, i32, i32
  }
  func.func @transform_2(%arg0: i32) -> (i32, i32) {
    %c0_i32 = arith.constant 0 : i32
    %c0_i32_0 = arith.constant 0 : i32
    %c0_i32_1 = arith.constant 0 : i32
    return %c0_i32, %c0_i32_0 : i32, i32
  }
  func.func @transform_3(%arg0: i32) -> (i32, i32) {
    %c0_i32 = arith.constant 0 : i32
    %c0_i32_0 = arith.constant 0 : i32
    %c0_i32_1 = arith.constant 0 : i32
    return %c0_i32, %c0_i32_0 : i32, i32
  }
  func.func @transform_4(%arg0: i32) -> (i32, i32) {
    %c0_i32 = arith.constant 0 : i32
    %c0_i32_0 = arith.constant 0 : i32
    %c0_i32_1 = arith.constant 0 : i32
    return %c0_i32, %c0_i32_0 : i32, i32
  }
  func.func @transform_5(%arg0: i32) -> (i32, i32) {
    %c0_i32 = arith.constant 0 : i32
    %c0_i32_0 = arith.constant 0 : i32
    %c0_i32_1 = arith.constant 0 : i32
    return %c0_i32, %c0_i32_0 : i32, i32
  }
  func.func @transform_6(%arg0: i32) -> (i32, i32) {
    %c0_i32 = arith.constant 0 : i32
    %c0_i32_0 = arith.constant 0 : i32
    %c0_i32_1 = arith.constant 0 : i32
    return %c0_i32, %c0_i32_0 : i32, i32
  }
  func.func @transform_7(%arg0: i32) -> (i32, i32) {
    %c0_i32 = arith.constant 0 : i32
    %c0_i32_0 = arith.constant 0 : i32
    %c0_i32_1 = arith.constant 0 : i32
    return %c0_i32, %c0_i32_0 : i32, i32
  }
  func.func @transform_8(%arg0: i32) -> (i32, i32) {
    %c0_i32 = arith.constant 0 : i32
    %c0_i32_0 = arith.constant 0 : i32
    %c0_i32_1 = arith.constant 0 : i32
    return %c0_i32, %c0_i32_0 : i32, i32
  }
  func.func @transform_9(%arg0: i32) -> (i32, i32) {
    %c0_i32 = arith.constant 0 : i32
    %c0_i32_0 = arith.constant 0 : i32
    %c0_i32_1 = arith.constant 0 : i32
    return %c0_i32, %c0_i32_0 : i32, i32
  }
  func.func @transform_10(%arg0: i32) -> (i32, i32) {
    %c0_i32 = arith.constant 0 : i32
    %c0_i32_0 = arith.constant 0 : i32
    %c0_i32_1 = arith.constant 0 : i32
    return %c0_i32, %c0_i32_0 : i32, i32
  }
}

</mosaic_0001>

<bundles_post_ra>
// kernel: tpu_custom_call.1
= control target key start
LH: loop header
LB: loop body
LE: loop exit
PB: predicated region body
PF: predicated region fallthrough
CT: control target
= control target key end

     0   :  { %15 = vsyncpa [#allocation3], 0  ;;  %s9747_s0 = inlined_call_operand.hbm [shape: f32[2,24,384], index: 0, kind: input, shape index: {}]   ;;  %s9748_s1 = inlined_call_operand.hbm [shape: bf16[7,384,128], index: 1, kind: input, shape index: {}]   ;;  %s9749_s2 = inlined_call_operand.vmem [shape: f32[1,128], index: 2, kind: input, shape index: {}]   ;;  %s9750_s3 = inlined_call_operand.hbm [shape: bf16[256,512], index: 3, kind: input, shape index: {}]   ;;  %s9751_s4 = inlined_call_operand.vmem [shape: f32[1,512], index: 4, kind: input, shape index: {}]   ;;  %s9752_s5 = inlined_call_operand.hbm [shape: bf16[128,512], index: 5, kind: input, shape index: {}]   ;;  %s9753_s6 = inlined_call_operand.vmem [shape: f32[128,128], index: 6, kind: input, shape index: {}]   ;;  %s9754_s7 = inlined_call_operand.vmem [shape: f32[1,128], index: 7, kind: input, shape index: {}]   ;;  %s9755_s8 = inlined_call_operand.vmem [shape: f32[128,4], index: 8, kind: input, shape index: {}]   ;;  %s9756_s9 = inlined_call_operand.vmem [shape: f32[1,2], index: 9, kind: input, shape index: {}]   ;;  %s9757_s10 = inlined_call_operand.hbm [shape: f32[2,2], index: 10, kind: output, shape index: {}]  }
   0x1   :  { %16 = vsyncpa [#allocation6], 0 }
   0x2   :  { %17 = vsyncpa [#allocation9], 0  ;;  %s36_s15 = sshll.u32 %s9748_s1, 4  ;;  %s37_s15 = int_to_ptr.hbm [resolvable:$true] %s36_s15 }
   0x3   :  { %18 = vsyncpa [#allocation4], 0  ;;  %s7795_s16 = smov [#allocation5]   ;;  %s23_s20 = sshll.u32 %s9747_s0, 4  ;;  %s24_s20 = int_to_ptr.hbm [resolvable:$true] %s23_s20 }
   0x4   :  { %s38_s17 = sshll.u32 %s7795_s16, 4  ;;  %s7796_s21 = smov 64   ;;  %s39_s17 = int_to_ptr.vmem [resolvable:$true] %s38_s17 }
   0x5   :  { %s7797_s22 = smov 4   ;;  %s7798_s23 = smov [#allocation2]  }
   0x6   :  { %44 = dma.hbm_to_vmem [thread:$0]  %s37_s15, 21504, %s39_s17, [#allocation6], %s7796_s21, %s7796_s21, %s7797_s22  }
   0x7   :  { %s25_s24 = sshll.u32 %s7798_s23, 4  ;;  %s7799_s25 = smov 384   ;;  %s26_s24 = int_to_ptr.vmem [resolvable:$true] %s25_s24 }
   0x8   :  { %s7800_s1 = smov 24   ;;  %s51_s28 = sshll.u32 %s9750_s3, 4  ;;  %s52_s28 = int_to_ptr.hbm [resolvable:$true] %s51_s28 }
   0x9   :  { %31 = dma.hbm_to_vmem [thread:$0]  %s24_s20, 2304, %s26_s24, [#allocation3], %s7799_s25, %s7799_s25, %s7800_s1  }
   0xa   :  { %s7801_s29 = smov [#allocation7]   ;;  %s66_s12 = sshll.u32 %s9752_s5, 4  ;;  %s67_s12 = int_to_ptr.hbm [resolvable:$true] %s66_s12 }
   0xb   :  { %s53_s30 = sshll.u32 %s7801_s29, 4  ;;  %s7802_s13 = smov 256   ;;  %s54_s30 = int_to_ptr.vmem [resolvable:$true] %s53_s30 }
   0xc   :  { %s7803_s14 = smov 16   ;;  %s7804_s15 = smov [#allocation8]  }
   0xd   :  { %59 = dma.hbm_to_vmem [thread:$0]  %s52_s28, 8192, %s54_s30, [#allocation6], %s7802_s13, %s7802_s13, %s7803_s14  }
   0xe   :  { %s68_s16 = sshll.u32 %s7804_s15, 4  ;;  %s69_s16 = int_to_ptr.vmem [resolvable:$true] %s68_s16 }
   0xf   :  { %74 = dma.hbm_to_vmem [thread:$0]  %s67_s12, 4096, %s69_s16, [#allocation9], %s7802_s13, %s7802_s13, %s7803_s14  }
  0x10   :  { %7787 = dma.done.wait [#allocation3], 2304  }
  0x11   :  { %7788 = vsyncadd [#allocation3], 4294964992 }
  0x12   :  { %7789 = dma.done.wait [#allocation6], 29696  }
  0x13   :  { %7790 = vsyncadd [#allocation6], 4294937600 }
  0x14   :  { %7791 = dma.done.wait [#allocation9], 4096  }
  0x15   :  { %7792 = vsyncadd [#allocation9], 4294963200  ;;  %v7063_v0 = vld [vmem:[#allocation5 + $0x38] sm:$0xff]  ;;  %v7062_v4 = vld [vmem:[#allocation5 + $0x30] sm:$0xff]  ;;  %vm413_vm0 = vsmask.f32 7424 }
  0x16   :  { %v7071_v1 = vld [vmem:[#allocation5 + $0x78] sm:$0xff]  ;;  %302 = vmatpush.bf16.msra.mxu0 %v7063_v0  ;;  %v7070_v5 = vld [vmem:[#allocation5 + $0x70] sm:$0xff]  ;;  %v7061_v8 = vld [vmem:[#allocation5 + $0x28] sm:$0xff]  ;;  %vm708_vm1 = vcmask 1046528   ;;  %vm970_vm2 = vsmask.f32 6400 }
  0x17   :  { %v7079_v2 = vld [vmem:[#allocation5 + $0xb8] sm:$0xff]  ;;  %316 = vmatpush.bf16.msra.mxu1 %v7071_v1  ;;  %v7078_v6 = vld [vmem:[#allocation5 + $0xb0] sm:$0xff]  ;;  %v7069_v9 = vld [vmem:[#allocation5 + $0x68] sm:$0xff]  ;;  %vm1280_vm3 = vcmask 1045504   ;;  %vm1542_vm4 = vsmask.f32 5376 }
  0x18   :  { %v7087_v3 = vld [vmem:[#allocation5 + $0xf8] sm:$0xff]  ;;  %330 = vmatpush.bf16.msra.mxu2 %v7079_v2  ;;  %v7086_v7 = vld [vmem:[#allocation5 + $0xf0] sm:$0xff]  ;;  %v7077_v10 = vld [vmem:[#allocation5 + $0xa8] sm:$0xff]  ;;  %vm1852_vm5 = vcmask 1044480   ;;  %s5938_s13 = sshll.u32 %s9757_s10, 4  ;;  %s5939_s13 = int_to_ptr.hbm [resolvable:$true] %s5938_s13 }
  0x19   :  { %597 = vmatpush.bf16.msra.mxu3 %v7087_v3  ;;  %v7085_v11 = vld [vmem:[#allocation5 + $0xe8] sm:$0xff]  ;;  %v7060_v12 = vld [vmem:[#allocation5 + $0x20] sm:$0xff]  ;;  %v7059_v16 = vld [vmem:[#allocation5 + $0x18] sm:$0xff] }
  0x1a   :  { %303 = vmatpush.bf16.msra.mxu0 %v7062_v4  ;;  %v7068_v13 = vld [vmem:[#allocation5 + $0x60] sm:$0xff]  ;;  %v7067_v17 = vld [vmem:[#allocation5 + $0x58] sm:$0xff]  ;;  %v7058_v20 = vld [vmem:[#allocation5 + $0x10] sm:$0xff] }
  0x1b   :  { %317 = vmatpush.bf16.msra.mxu1 %v7070_v5  ;;  %v7076_v14 = vld [vmem:[#allocation5 + $0xa0] sm:$0xff]  ;;  %v7075_v18 = vld [vmem:[#allocation5 + $0x98] sm:$0xff]  ;;  %v7066_v21 = vld [vmem:[#allocation5 + $0x50] sm:$0xff] }
  0x1c   :  { %331 = vmatpush.bf16.msra.mxu2 %v7078_v6  ;;  %v7084_v15 = vld [vmem:[#allocation5 + $0xe0] sm:$0xff]  ;;  %v7083_v19 = vld [vmem:[#allocation5 + $0xd8] sm:$0xff]  ;;  %v7074_v22 = vld [vmem:[#allocation5 + $0x90] sm:$0xff] }
  0x1d   :  { %598 = vmatpush.bf16.msra.mxu3 %v7086_v7  ;;  %v7082_v23 = vld [vmem:[#allocation5 + $0xd0] sm:$0xff]  ;;  %v7877_v24 = vld [vmem:[#allocation2 + $0x18] sm:$0xff]  ;;  %v355_v26 = vld [vmem:[#allocation2 + $0x30] sm:$0x1] }
  0x1e   :  { %304 = vmatpush.bf16.msra.mxu0 %v7061_v8  ;;  %v349_v25 = vld [vmem:[#allocation2] sm:$0xfe]  ;;  %v7057_v28 = vld [vmem:[#allocation5 + $0x8] sm:$0xff]  ;;  %v361_v30 = vpack.c.bf16 %v355_v26, %v355_v26  ;;  %v7056_v34 = vld [vmem:[#allocation5] sm:$0xff] }
  0x1f   :  { %318 = vmatpush.bf16.msra.mxu1 %v7069_v9  ;;  %v358_v27 = vpack.c.bf16 %v7877_v24, %v349_v25  ;;  %v7065_v29 = vld [vmem:[#allocation5 + $0x48] sm:$0xff]  ;;  %v7064_v35 = vld [vmem:[#allocation5 + $0x40] sm:$0xff]  ;;  %v7095_v37 = vld [vmem:[#allocation5 + $0x138] sm:$0xff] }
  0x20   :  { %332 = vmatpush.bf16.msra.mxu2 %v7077_v10  ;;  %v7073_v31 = vld [vmem:[#allocation5 + $0x88] sm:$0xff]  ;;  %v7072_v36 = vld [vmem:[#allocation5 + $0x80] sm:$0xff]  ;;  %v101_v38 = vld [vmem:[#allocation2] sm:$0xff]  ;;  %v422_v41 = vshll.u32 %v361_v30, 16 }
  0x21   :  { %599 = vmatpush.bf16.msra.mxu3 %v7085_v11  ;;  %v7081_v32 = vld [vmem:[#allocation5 + $0xc8] sm:$0xff]  ;;  %v417_v33 = vshll.u32 %v358_v27, 16  ;;  %v415_v39 = vshrl.u32 %v358_v27, 16  ;;  %v7103_v42 = vld [vmem:[#allocation5 + $0x178] sm:$0xff]  ;;  %v7880_v44 = vld [vmem:[#allocation2 + $0x20] sm:$0xff]  ;;  %v107_v49 = vpack.c.bf16 %v7877_v24, %v101_v38 }
  0x22   :  { %305 = vmatpush.bf16.msra.mxu0 %v7060_v12  ;;  %v102_v43 = vld [vmem:[#allocation2 + $0x8] sm:$0xff]  ;;  %v103_v46 = vld [vmem:[#allocation2 + $0x10] sm:$0xff]  ;;  %v424_v53 = vrot.slane %v422_v41, 1  ;;  %v7886_v54 = vld [vmem:[#allocation5 + $0x130] sm:$0xff] }
  0x23   :  { %319 = vmatpush.bf16.msra.mxu1 %v7068_v13  ;;  %v419_v40 = vrot.slane %v417_v33, 1  ;;  %v7111_v45 = vld [vmem:[#allocation5 + $0x1b8] sm:$0xff]  ;;  %v7080_v48 = vld [vmem:[#allocation5 + $0xc0] sm:$0xff]  ;;  %v108_v51 = vpack.c.bf16 %v7880_v44, %v102_v43  ;;  %v7889_v56 = vld [vmem:[#allocation5 + $0x170] sm:$0xff] }
  0x24   :  { %333 = vmatpush.bf16.msra.mxu2 %v7076_v14  ;;  %v7882_v47 = vld [vmem:[#allocation2 + $0x28] sm:$0xff]  ;;  %v7891_v57 = vld [vmem:[#allocation5 + $0x1b0] sm:$0xff]  ;;  %v7895_v60 = vld [vmem:[#allocation5 + $0x128] sm:$0xff] }
  0x25   :  { %600 = vmatpush.bf16.msra.mxu3 %v7084_v15  ;;  %v7119_v50 = vld [vmem:[#allocation5 + $0x1f8] sm:$0xff]  ;;  %v420_v52 = vor.u32 %v419_v40, %v415_v39  ;;  %v109_v55 = vpack.c.bf16 %v7882_v47, %v103_v46  ;;  %v7118_v58 = vld [vmem:[#allocation5 + $0x1f0] sm:$0xff]  ;;  %v7899_v61 = vld [vmem:[#allocation5 + $0x168] sm:$0xff] }
  0x26   :  { %306 = vmatpush.bf16.msra.mxu0 %v7059_v16  ;;  %v7901_v62 = vld [vmem:[#allocation5 + $0x1a8] sm:$0xff]  ;;  %v7904_v0 = vld [vmem:[#allocation5 + $0x120] sm:$0xff]  ;;  %v350_v3 = vld [vmem:[#allocation2 + $0x8] sm:$0xfe] }
  0x27   :  { %320 = vmatpush.bf16.msra.mxu1 %v7067_v17  ;;  %v425_v59 = vsel %vm413_vm0, %v420_v52, %v424_v53  ;;  %v7117_v63 = vld [vmem:[#allocation5 + $0x1e8] sm:$0xff]  ;;  %v7908_v1 = vld [vmem:[#allocation5 + $0x160] sm:$0xff]  ;;  %v7913_v6 = vld [vmem:[#allocation5 + $0x118] sm:$0xff]  ;;  %v359_v10 = vpack.c.bf16 %v7880_v44, %v350_v3 }
  0x28   :  { %334 = vmatpush.bf16.msra.mxu2 %v7075_v18  ;;  %v7910_v2 = vld [vmem:[#allocation5 + $0x1a0] sm:$0xff]  ;;  %v7917_v7 = vld [vmem:[#allocation5 + $0x158] sm:$0xff]  ;;  %v356_v9 = vld [vmem:[#allocation2 + $0x38] sm:$0x1] }
  0x29   :  { %601 = vmatpush.bf16.msra.mxu3 %v7083_v19  ;;  %v7116_v4 = vld [vmem:[#allocation5 + $0x1e0] sm:$0xff]  ;;  %v7919_v8 = vld [vmem:[#allocation5 + $0x198] sm:$0xff]  ;;  %v357_v13 = vld [vmem:[#allocation2 + $0x40] sm:$0x1]  ;;  %v362_v15 = vpack.c.bf16 %v356_v9, %v356_v9  ;;  %v429_v18 = vshll.u32 %v359_v10, 16 }
  0x2a   :  { %307 = vmatpush.bf16.msra.mxu0 %v7058_v20  ;;  %v351_v5 = vld [vmem:[#allocation2 + $0x10] sm:$0xfe]  ;;  %v7115_v12 = vld [vmem:[#allocation5 + $0x1d8] sm:$0xff]  ;;  %v7924_v14 = vld [vmem:[#allocation5 + $0x110] sm:$0xff]  ;;  %v363_v19 = vpack.c.bf16 %v357_v13, %v357_v13 }
  0x2b   :  { %321 = vmatpush.bf16.msra.mxu1 %v7066_v21  ;;  %v360_v11 = vpack.c.bf16 %v7882_v47, %v351_v5  ;;  %v7928_v16 = vld [vmem:[#allocation5 + $0x150] sm:$0xff]  ;;  %v7933_v25 = vld [vmem:[#allocation5 + $0x108] sm:$0xff]  ;;  %v431_v30 = vrot.slane %v429_v18, 1  ;;  %v7943_v39 = vld [vmem:[#allocation5 + $0x100] sm:$0xff] }
  0x2c   :  { %335 = vmatpush.bf16.msra.mxu2 %v7074_v22  ;;  %v7930_v17 = vld [vmem:[#allocation5 + $0x190] sm:$0xff]  ;;  %v7935_v26 = vld [vmem:[#allocation5 + $0x148] sm:$0xff]  ;;  %v7950_v43 = vld [vmem:[#allocation5 + $0x180] sm:$0xff] }
  0x2d   :  { %602 = vmatpush.bf16.msra.mxu3 %v7082_v23  ;;  %v441_v20 = vshll.u32 %v360_v11, 16  ;;  %v7114_v21 = vld [vmem:[#allocation5 + $0x1d0] sm:$0xff]  ;;  %v644_v23 = vld [vmem:[#allocation2 + $0x30] sm:$0x3]  ;;  %v7937_v27 = vld [vmem:[#allocation5 + $0x188] sm:$0xff] }
  0x2e   :  { %308 = vmatpush.bf16.msra.mxu0 %v7057_v28  ;;  %v641_v22 = vld [vmem:[#allocation2] sm:$0xfc]  ;;  %v427_v28 = vshrl.u32 %v359_v10, 16  ;;  %v645_v33 = vld [vmem:[#allocation2 + $0x38] sm:$0x3] }
  0x2f   :  { %322 = vmatpush.bf16.msra.mxu1 %v7065_v29  ;;  %v434_v29 = vshll.u32 %v362_v15, 16  ;;  %v7113_v38 = vld [vmem:[#allocation5 + $0x1c8] sm:$0xff]  ;;  %v651_v41 = vpack.c.bf16 %v645_v33, %v645_v33  ;;  %v7965_v9 = vld [vmem:[#allocation5 + $0x230] sm:$0xff] }
  0x30   :  { %336 = vmatpush.bf16.msra.mxu2 %v7073_v31  ;;  %v439_v31 = vshrl.u32 %v360_v11, 16  ;;  %v7967_v10 = vld [vmem:[#allocation5 + $0x270] sm:$0xff]  ;;  %v7976_v18 = vld [vmem:[#allocation5 + $0x228] sm:$0xff] }
  0x31   :  { %603 = vmatpush.bf16.msra.mxu3 %v7081_v32  ;;  %v642_v32 = vld [vmem:[#allocation2 + $0x8] sm:$0xfc]  ;;  %v436_v46 = vrot.slane %v434_v29, 1  ;;  %v713_v3 = vrot.slane %v651_v41, 1  ;;  %v7150_v13 = vld [vmem:[#allocation5 + $0x2f0] sm:$0xff]  ;;  %9856 = vst [vmem:[#allocation15_spill] sm:$0xff] %v7976_v18 }
  0x32   :  { %309 = vmatpush.bf16.msra.mxu0 %v7056_v34  ;;  %v443_v34 = vrot.slane %v441_v20, 1  ;;  %v648_v40 = vpack.c.bf16 %v7880_v44, %v642_v32  ;;  %v7981_v20 = vld [vmem:[#allocation5 + $0x2a8] sm:$0xff]  ;;  %v910_v29 = vld [vmem:[#allocation2 + $0x8] sm:$0xf8]  ;;  %v909_v33 = vld [vmem:[#allocation2] sm:$0xf8] }
  0x33   :  { %323 = vmatpush.bf16.msra.mxu1 %v7064_v35  ;;  %v446_v35 = vshll.u32 %v363_v19, 16  ;;  %v7978_v19 = vld [vmem:[#allocation5 + $0x268] sm:$0xff]  ;;  %9858 = vst [vmem:[#allocation17_spill] sm:$0xff] %v7981_v20  ;;  %v7992_v32 = vld [vmem:[#allocation5 + $0x218] sm:$0xff] }
  0x34   :  { %337 = vmatpush.bf16.msra.mxu2 %v7072_v36  ;;  %v647_v36 = vpack.c.bf16 %v7877_v24, %v641_v22  ;;  %9857 = vst [vmem:[#allocation16_spill] sm:$0xff] %v7978_v19  ;;  %v7985_v22 = vld [vmem:[#allocation5 + $0x220] sm:$0xff] }
  0x35   :  { %604 = vmatpush.bf16.msra.mxu3 %v7080_v48  ;;  %310 = vmatmul.bf16.vlgmr.msra.gmra.mxu0 %v107_v49  ;;  %v7952_v48 = vld [vmem:[#allocation5 + $0x238] sm:$0xff]  ;;  %9859 = vst [vmem:[#allocation18_spill] sm:$0xff] %v7985_v22 }
  0x36   :  { %611 = vmatpush.bf16.msrb.mxu0 %v7095_v37  ;;  %324 = vmatmul.bf16.vlgmr.msra.gmra.mxu1 %v108_v51  ;;  %v650_v37 = vpack.c.bf16 %v644_v23, %v644_v23  ;;  %v7954_v49 = vld [vmem:[#allocation5 + $0x278] sm:$0xff]  ;;  %v448_v51 = vrot.slane %v446_v35, 1  ;;  %v709_v52 = vrot.slane %v647_v36, 1  ;;  %v7987_v23 = vld [vmem:[#allocation5 + $0x260] sm:$0xff]  ;;  %9862 = vst [vmem:[#allocation21_spill] sm:$0xff] %v7992_v32  ;;  %v916_v36 = vpack.c.bf16 %v7880_v44, %v910_v29 }
  0x37   :  { %625 = vmatpush.bf16.msrb.mxu1 %v7103_v42  ;;  %338 = vmatmul.bf16.vlgmr.msra.gmra.mxu2 %v109_v55  ;;  %v7948_v42 = vld [vmem:[#allocation5 + $0x140] sm:$0xff]  ;;  %v7956_v55 = vld [vmem:[#allocation5 + $0x2b8] sm:$0xff]  ;;  %9860 = vst [vmem:[#allocation19_spill] sm:$0xff] %v7987_v23 }
  0x38   :  { %865 = vmatpush.bf16.msrb.mxu2 %v7111_v45  ;;  %605 = vmatmul.bf16.vlgmr.msra.gmra.mxu3 %v425_v59  ;;  %v432_v45 = vor.u32 %v431_v30, %v427_v28  ;;  %v710_v53 = vrot.slane %v650_v37, 1  ;;  %v7151_v59 = vld [vmem:[#allocation5 + $0x2f8] sm:$0xff]  ;;  %v7990_v28 = vld [vmem:[#allocation5 + $0x2a0] sm:$0xff] }
  0x39   :  { %879 = vmatpush.bf16.msrb.mxu3 %v7119_v50  ;;  %v444_v50 = vor.u32 %v443_v34, %v439_v31  ;;  %9861 = vst [vmem:[#allocation20_spill] sm:$0xff] %v7990_v28  ;;  %v7148_v30 = vld [vmem:[#allocation5 + $0x2e0] sm:$0xff]  ;;  %v913_v31 = vld [vmem:[#allocation2 + $0x38] sm:$0x7]  ;;  %v7996_v35 = vld [vmem:[#allocation5 + $0x258] sm:$0xff] }
  0x3a   :  { %612 = vmatpush.bf16.msrb.mxu0 %v7886_v54  ;;  %v711_v11 = vsel %vm708_vm1, %v709_v52, %v710_v53  ;;  %v912_v34 = vld [vmem:[#allocation2 + $0x30] sm:$0x7]  ;;  %9863 = vst [vmem:[#allocation22_spill] sm:$0xff] %v7996_v35  ;;  %v911_v37 = vld [vmem:[#allocation2 + $0x10] sm:$0xf8]  ;;  %v919_v41 = vpack.c.bf16 %v913_v31, %v913_v31  ;;  %v8006_v53 = vld [vmem:[#allocation5 + $0x210] sm:$0xff] }
  0x3b   :  { %626 = vmatpush.bf16.msrb.mxu1 %v7889_v56  ;;  %v449_v5 = vsel %vm413_vm0, %v444_v50, %v448_v51  ;;  %v918_v50 = vpack.c.bf16 %v912_v34, %v912_v34  ;;  %v917_v51 = vpack.c.bf16 %v7882_v47, %v911_v37  ;;  %9865 = vst [vmem:[#allocation24_spill] sm:$0xff] %v8006_v53 }
  0x3c   :  { %866 = vmatpush.bf16.msrb.mxu2 %v7891_v57 }
  0x3d   :  { %880 = vmatpush.bf16.msrb.mxu3 %v7118_v58  ;;  %v7112_v58 = vld [vmem:[#allocation5 + $0x1c0] sm:$0xff]  ;;  %v983_v31 = vshll.u32 %v918_v50, 16  ;;  %v1009_v34 = vshll.u32 %v917_v51, 16 }
  0x3e   :  { %613 = vmatpush.bf16.msrb.mxu0 %v7895_v60 }
  0x3f   :  { %627 = vmatpush.bf16.msrb.mxu1 %v7899_v61 }
  0x40   :  { %867 = vmatpush.bf16.msrb.mxu2 %v7901_v62 }
  0x41   :  { %881 = vmatpush.bf16.msrb.mxu3 %v7117_v63  ;;  %v712_v63 = vrot.slane %v648_v40, 1  ;;  %v8000_v40 = vld [vmem:[#allocation5 + $0x298] sm:$0xff] }
  0x42   :  { %614 = vmatpush.bf16.msrb.mxu0 %v7904_v0  ;;  %9864 = vst [vmem:[#allocation23_spill] sm:$0xff] %v8000_v40 }
  0x43   :  { %628 = vmatpush.bf16.msrb.mxu1 %v7908_v1  ;;  %v714_v15 = vsel %vm708_vm1, %v712_v63, %v713_v3  ;;  %v989_v63 = vshrl.u32 %v916_v36, 16  ;;  %v992_v3 = vshll.u32 %v916_v36, 16  ;;  %v8015_v36 = vld [vmem:[#allocation5 + $0x208] sm:$0xff] }
  0x44   :  { %868 = vmatpush.bf16.msrb.mxu2 %v7910_v2 }
  0x45   :  { %882 = vmatpush.bf16.msrb.mxu3 %v7116_v4  ;;  %v437_v4 = vsel %vm413_vm0, %v432_v45, %v436_v46  ;;  %v7147_v45 = vld [vmem:[#allocation5 + $0x2d8] sm:$0xff]  ;;  %v915_v46 = vpack.c.bf16 %v7877_v24, %v909_v33  ;;  %v1006_v33 = vshrl.u32 %v917_v51, 16 }
  0x46   :  { %615 = vmatpush.bf16.msrb.mxu0 %v7913_v6 }
  0x47   :  { %629 = vmatpush.bf16.msrb.mxu1 %v7917_v7  ;;  %v975_v29 = vshll.u32 %v915_v46, 16 }
  0x48   :  { %869 = vmatpush.bf16.msrb.mxu2 %v7919_v8 }
  0x49   :  { %883 = vmatpush.bf16.msrb.mxu3 %v7115_v12  ;;  %v7971_v12 = vld [vmem:[#allocation5 + $0x2b0] sm:$0xff] }
  0x4a   :  { %616 = vmatpush.bf16.msrb.mxu0 %v7924_v14 }
  0x4b   :  { %630 = vmatpush.bf16.msrb.mxu1 %v7928_v16 }
  0x4c   :  { %870 = vmatpush.bf16.msrb.mxu2 %v7930_v17 }
  0x4d   :  { %884 = vmatpush.bf16.msrb.mxu3 %v7114_v21  ;;  %v7149_v21 = vld [vmem:[#allocation5 + $0x2e8] sm:$0xff] }
  0x4e   :  { %617 = vmatpush.bf16.msrb.mxu0 %v7933_v25 }
  0x4f   :  { %631 = vmatpush.bf16.msrb.mxu1 %v7935_v26 }
  0x50   :  { %871 = vmatpush.bf16.msrb.mxu2 %v7937_v27 }
  0x51   :  { %885 = vmatpush.bf16.msrb.mxu3 %v7113_v38  ;;  %v914_v38 = vld [vmem:[#allocation2 + $0x40] sm:$0x7] }
  0x52   :  { %618 = vmatpush.bf16.msrb.mxu0 %v7943_v39  ;;  %v920_v52 = vpack.c.bf16 %v914_v38, %v914_v38 }
  0x53   :  { %632 = vmatpush.bf16.msrb.mxu1 %v7948_v42 }
  0x54   :  { %872 = vmatpush.bf16.msrb.mxu2 %v7950_v43  ;;  %v1014_v37 = vshrl.u32 %v920_v52, 16  ;;  %v1017_v38 = vshll.u32 %v920_v52, 16  ;;  %v7145_v52 = vld [vmem:[#allocation5 + $0x2c8] sm:$0xff] }
  0x55   :  { %886 = vmatpush.bf16.msrb.mxu3 %v7112_v58  ;;  %619 = vmatmul.bf16.vlgmr.msrb.gmra.mxu0 %v437_v4  ;;  %v8008_v58 = vld [vmem:[#allocation5 + $0x250] sm:$0xff]  ;;  %v643_v4 = vld [vmem:[#allocation2 + $0x10] sm:$0xfc] }
  0x56   :  { %893 = vmatpush.bf16.msra.mxu0 %v7952_v48  ;;  %633 = vmatmul.bf16.vlgmr.msrb.gmra.mxu1 %v449_v5  ;;  %9866 = vst [vmem:[#allocation25_spill] sm:$0xff] %v8008_v58  ;;  %v646_v5 = vld [vmem:[#allocation2 + $0x40] sm:$0x3] }
  0x57   :  { %1169 = vmatpush.bf16.msra.mxu1 %v7954_v49  ;;  %873 = vmatmul.bf16.vlgmr.msrb.gmra.mxu2 %v711_v11  ;;  %v997_v11 = vshrl.u32 %v919_v41, 16 }
  0x58   :  { %1183 = vmatpush.bf16.msra.mxu2 %v7956_v55  ;;  %887 = vmatmul.bf16.vlgmr.msrb.gmra.mxu3 %v714_v15  ;;  %v7146_v15 = vld [vmem:[#allocation5 + $0x2d0] sm:$0xff] }
  0x59   :  { %1197 = vmatpush.bf16.msra.mxu3 %v7151_v59  ;;  %v8010_v59 = vld [vmem:[#allocation5 + $0x290] sm:$0xff]  ;;  %v999_v51 = vrot.slane %v997_v11, 1  ;;  %v8030_v11 = vld [vmem:[#allocation5 + $0x280] sm:$0xff] }
  0x5a   :  { %894 = vmatpush.bf16.msra.mxu0 %v7965_v9  ;;  %9867 = vst [vmem:[#allocation26_spill] sm:$0xff] %v8030_v11 }
  0x5b   :  { %1170 = vmatpush.bf16.msra.mxu1 %v7967_v10 }
  0x5c   :  { %1184 = vmatpush.bf16.msra.mxu2 %v7971_v12 }
  0x5d   :  { %1198 = vmatpush.bf16.msra.mxu3 %v7150_v13  ;;  %v1000_v13 = vshll.u32 %v919_v41, 16  ;;  %v649_v41 = vpack.c.bf16 %v7882_v47, %v643_v4  ;;  %v8025_v4 = vld [vmem:[#allocation5 + $0x200] sm:$0xff] }
  0x5e   :  { %895 = vmatpush.bf16.msra.mxu0 %v7976_v18  ;;  %v1019_v18 = vrot.slane %v1017_v38, 2 }
  0x5f   :  { %1171 = vmatpush.bf16.msra.mxu1 %v7978_v19  ;;  %v1016_v19 = vrot.slane %v1014_v37, 1 }
  0x60   :  { %1185 = vmatpush.bf16.msra.mxu2 %v7981_v20  ;;  %v1011_v20 = vrot.slane %v1009_v34, 2  ;;  %v7144_v34 = vld [vmem:[#allocation5 + $0x2c0] sm:$0xff] }
  0x61   :  { %1199 = vmatpush.bf16.msra.mxu3 %v7149_v21  ;;  %v972_v21 = vshrl.u32 %v915_v46, 16  ;;  %v8021_v46 = vld [vmem:[#allocation5 + $0x288] sm:$0xff]  ;;  %v1020_v38 = vor.u32 %v1019_v18, %v1016_v19  ;;  %v8048_v18 = vld [vmem:[#allocation5 + $0x370] sm:$0xff] }
  0x62   :  { %896 = vmatpush.bf16.msra.mxu0 %v7985_v22  ;;  %v1008_v22 = vrot.slane %v1006_v33, 1  ;;  %9871 = vst [vmem:[#allocation30_spill] sm:$0xff] %v8048_v18 }
  0x63   :  { %1172 = vmatpush.bf16.msra.mxu1 %v7987_v23  ;;  %v985_v23 = vrot.slane %v983_v31, 2 }
  0x64   :  { %1186 = vmatpush.bf16.msra.mxu2 %v7990_v28  ;;  %v977_v28 = vrot.slane %v975_v29, 2  ;;  %v8034_v29 = vld [vmem:[#allocation5 + $0x378] sm:$0xff]  ;;  %v1012_v37 = vor.u32 %v1011_v20, %v1008_v22  ;;  %v8052_v22 = vld [vmem:[#allocation5 + $0x3b0] sm:$0xff] }
  0x65   :  { %1200 = vmatpush.bf16.msra.mxu3 %v7148_v30  ;;  %v980_v30 = vshrl.u32 %v918_v50, 16  ;;  %v991_v50 = vrot.slane %v989_v63, 1  ;;  %v8027_v63 = vld [vmem:[#allocation5 + $0x240] sm:$0xff]  ;;  %9868 = vst [vmem:[#allocation27_spill] sm:$0xff] %v8034_v29 }
  0x66   :  { %897 = vmatpush.bf16.msra.mxu0 %v7992_v32  ;;  %v1002_v32 = vrot.slane %v1000_v13, 2  ;;  %v8032_v13 = vld [vmem:[#allocation5 + $0x338] sm:$0xff]  ;;  %v1021_v20 = vsel %vm970_vm2, %v1012_v37, %v1020_v38  ;;  %9872 = vst [vmem:[#allocation31_spill] sm:$0xff] %v8052_v22 }
  0x67   :  { %1173 = vmatpush.bf16.msra.mxu1 %v7996_v35  ;;  %v994_v35 = vrot.slane %v992_v3, 2  ;;  %v715_v3 = vrot.slane %v649_v41, 1  ;;  %v7179_v37 = vld [vmem:[#allocation5 + $0x3d8] sm:$0xff] }
  0x68   :  { %1187 = vmatpush.bf16.msra.mxu2 %v8000_v40  ;;  %v8017_v40 = vld [vmem:[#allocation5 + $0x248] sm:$0xff] }
  0x69   :  { %1201 = vmatpush.bf16.msra.mxu3 %v7147_v45  ;;  %v652_v45 = vpack.c.bf16 %v646_v5, %v646_v5 }
  0x6a   :  { %898 = vmatpush.bf16.msra.mxu0 %v8006_v53  ;;  %v974_v53 = vrot.slane %v972_v21, 1  ;;  %v1003_v21 = vor.u32 %v1002_v32, %v999_v51  ;;  %v8064_v51 = vld [vmem:[#allocation5 + $0x320] sm:$0xff] }
  0x6b   :  { %1174 = vmatpush.bf16.msra.mxu1 %v8008_v58  ;;  %v982_v58 = vrot.slane %v980_v30, 1  ;;  %v716_v5 = vrot.slane %v652_v45, 1  ;;  %v8036_v30 = vld [vmem:[#allocation5 + $0x3b8] sm:$0xff]  ;;  %9876 = vst [vmem:[#allocation35_spill] sm:$0xff] %v8064_v51 }
  0x6c   :  { %1188 = vmatpush.bf16.msra.mxu2 %v8010_v59  ;;  %9869 = vst [vmem:[#allocation28_spill] sm:$0xff] %v8036_v30  ;;  %v978_v31 = vor.u32 %v977_v28, %v974_v53  ;;  %v7183_v45 = vld [vmem:[#allocation5 + $0x3f8] sm:$0xff]  ;;  %v8055_v28 = vld [vmem:[#allocation5 + $0x328] sm:$0xff] }
  0x6d   :  { %1202 = vmatpush.bf16.msra.mxu3 %v7146_v15  ;;  %v995_v15 = vor.u32 %v994_v35, %v991_v50  ;;  %v986_v33 = vor.u32 %v985_v23, %v982_v58  ;;  %v717_v41 = vsel %vm708_vm1, %v715_v3, %v716_v5  ;;  %v8044_v35 = vld [vmem:[#allocation5 + $0x330] sm:$0xff]  ;;  %9873 = vst [vmem:[#allocation32_spill] sm:$0xff] %v8055_v28  ;;  %v8058_v53 = vld [vmem:[#allocation5 + $0x368] sm:$0xff]  ;;  %v8070_v3 = vld [vmem:[#allocation5 + $0x3a0] sm:$0xff] }
  0x6e   :  { %899 = vmatpush.bf16.msra.mxu0 %v8015_v36  ;;  %9870 = vst [vmem:[#allocation29_spill] sm:$0xff] %v8044_v35  ;;  %v7182_v23 = vld [vmem:[#allocation5 + $0x3f0] sm:$0xff]  ;;  %v8061_v58 = vld [vmem:[#allocation5 + $0x3a8] sm:$0xff]  ;;  %v7180_v5 = vld [vmem:[#allocation5 + $0x3e0] sm:$0xff] }
  0x6f   :  { %1175 = vmatpush.bf16.msra.mxu1 %v8017_v40  ;;  %v1004_v32 = vsel %vm970_vm2, %v995_v15, %v1003_v21  ;;  %v987_v19 = vsel %vm970_vm2, %v978_v31, %v986_v33  ;;  %9874 = vst [vmem:[#allocation33_spill] sm:$0xff] %v8058_v53  ;;  %v7181_v50 = vld [vmem:[#allocation5 + $0x3e8] sm:$0xff]  ;;  %v8073_v15 = vld [vmem:[#allocation5 + $0x318] sm:$0xff]  ;;  %v1481_v33 = vld [vmem:[#allocation2] sm:$0xe0] }
  0x70   :  { %1189 = vmatpush.bf16.msra.mxu2 %v8021_v46  ;;  %9875 = vst [vmem:[#allocation34_spill] sm:$0xff] %v8061_v58  ;;  %v8076_v21 = vld [vmem:[#allocation5 + $0x358] sm:$0xff]  ;;  %v1487_v38 = vpack.c.bf16 %v7877_v24, %v1481_v33 }
  0x71   :  { %1203 = vmatpush.bf16.msra.mxu3 %v7145_v52  ;;  %v8067_v52 = vld [vmem:[#allocation5 + $0x360] sm:$0xff]  ;;  %9878 = vst [vmem:[#allocation37_spill] sm:$0xff] %v8070_v3  ;;  %v8079_v31 = vld [vmem:[#allocation5 + $0x398] sm:$0xff] }
  0x72   :  { %900 = vmatpush.bf16.msra.mxu0 %v8025_v4  ;;  %9877 = vst [vmem:[#allocation36_spill] sm:$0xff] %v8067_v52  ;;  %v1544_v33 = vshrl.u32 %v1487_v38, 16 }
  0x73   :  { %1176 = vmatpush.bf16.msra.mxu1 %v8027_v63  ;;  %9879 = vst [vmem:[#allocation38_spill] sm:$0xff] %v8073_v15 }
  0x74   :  { %1190 = vmatpush.bf16.msra.mxu2 %v8030_v11  ;;  %9880 = vst [vmem:[#allocation39_spill] sm:$0xff] %v8076_v21  ;;  %v8109_v11 = vld [vmem:[#allocation5 + $0x438] sm:$0xff] }
  0x75   :  { %1204 = vmatpush.bf16.msra.mxu3 %v7144_v34  ;;  %901 = vmatmul.bf16.vlgmr.msra.gmra.mxu0 %v717_v41  ;;  %9881 = vst [vmem:[#allocation40_spill] sm:$0xff] %v8079_v31  ;;  %v1484_v34 = vld [vmem:[#allocation2 + $0x30] sm:$0x1f] }
  0x76   :  { %1437 = vmatpush.bf16.msrb.mxu0 %v8032_v13  ;;  %1177 = vmatmul.bf16.vlgmr.msra.gmra.mxu1 %v987_v19  ;;  %v1490_v41 = vpack.c.bf16 %v1484_v34, %v1484_v34  ;;  %v8088_v19 = vld [vmem:[#allocation5 + $0x390] sm:$0xff]  ;;  %v1547_v34 = vshll.u32 %v1487_v38, 16  ;;  %9890 = vst [vmem:[#allocation49_spill] sm:$0xff] %v8109_v11 }
  0x77   :  { %1451 = vmatpush.bf16.msrb.mxu1 %v8034_v29  ;;  %1191 = vmatmul.bf16.vlgmr.msra.gmra.mxu2 %v1004_v32  ;;  %v8086_v32 = vld [vmem:[#allocation5 + $0x350] sm:$0xff]  ;;  %9884 = vst [vmem:[#allocation43_spill] sm:$0xff] %v8088_v19 }
  0x78   :  { %1465 = vmatpush.bf16.msrb.mxu2 %v8036_v30  ;;  %1205 = vmatmul.bf16.vlgmr.msra.gmra.mxu3 %v1021_v20  ;;  %9883 = vst [vmem:[#allocation42_spill] sm:$0xff] %v8086_v32  ;;  %v7178_v20 = vld [vmem:[#allocation5 + $0x3d0] sm:$0xff]  ;;  %v8103_v30 = vld [vmem:[#allocation5 + $0x300] sm:$0xff] }
  0x79   :  { %1741 = vmatpush.bf16.msrb.mxu3 %v7183_v45  ;;  %v8083_v45 = vld [vmem:[#allocation5 + $0x310] sm:$0xff]  ;;  %9888 = vst [vmem:[#allocation47_spill] sm:$0xff] %v8103_v30 }
  0x7a   :  { %1438 = vmatpush.bf16.msrb.mxu0 %v8044_v35  ;;  %9882 = vst [vmem:[#allocation41_spill] sm:$0xff] %v8083_v45 }
  0x7b   :  { %1452 = vmatpush.bf16.msrb.mxu1 %v8048_v18  ;;  %v1549_v18 = vrot.slane %v1547_v34, 3  ;;  %v8116_v34 = vld [vmem:[#allocation5 + $0x4b8] sm:$0xff] }
  0x7c   :  { %1466 = vmatpush.bf16.msrb.mxu2 %v8052_v22  ;;  %v1546_v22 = vrot.slane %v1544_v33, 2  ;;  %9893 = vst [vmem:[#allocation52_spill] sm:$0xff] %v8116_v34 }
  0x7d   :  { %1742 = vmatpush.bf16.msrb.mxu3 %v7182_v23  ;;  %v1215_v23 = vld [vmem:[#allocation2 + $0x10] sm:$0xf0] }
  0x7e   :  { %1439 = vmatpush.bf16.msrb.mxu0 %v8055_v28  ;;  %v1217_v28 = vld [vmem:[#allocation2 + $0x38] sm:$0xf]  ;;  %v1221_v38 = vpack.c.bf16 %v7882_v47, %v1215_v23  ;;  %v8112_v23 = vld [vmem:[#allocation5 + $0x380] sm:$0xff] }
  0x7f   :  { %1453 = vmatpush.bf16.msrb.mxu1 %v8058_v53  ;;  %v1214_v53 = vld [vmem:[#allocation2 + $0x8] sm:$0xf0]  ;;  %9891 = vst [vmem:[#allocation50_spill] sm:$0xff] %v8112_v23 }
  0x80   :  { %1467 = vmatpush.bf16.msrb.mxu2 %v8061_v58 }
  0x81   :  { %1743 = vmatpush.bf16.msrb.mxu3 %v7181_v50  ;;  %v1213_v50 = vld [vmem:[#allocation2] sm:$0xf0] }
  0x82   :  { %1440 = vmatpush.bf16.msrb.mxu0 %v8064_v51  ;;  %v8092_v51 = vld [vmem:[#allocation5 + $0x308] sm:$0xff]  ;;  %v1219_v58 = vpack.c.bf16 %v7877_v24, %v1213_v50  ;;  %v1220_v50 = vpack.c.bf16 %v7880_v44, %v1214_v53  ;;  %v1550_v53 = vor.u32 %v1549_v18, %v1546_v22  ;;  %v8127_v18 = vld [vmem:[#allocation5 + $0x470] sm:$0xff] }
  0x83   :  { %1454 = vmatpush.bf16.msrb.mxu1 %v8067_v52  ;;  %v1552_v52 = vshrl.u32 %v1490_v41, 16  ;;  %9885 = vst [vmem:[#allocation44_spill] sm:$0xff] %v8092_v51  ;;  %v8130_v22 = vld [vmem:[#allocation5 + $0x4b0] sm:$0xff] }
  0x84   :  { %1468 = vmatpush.bf16.msrb.mxu2 %v8070_v3  ;;  %v1218_v3 = vld [vmem:[#allocation2 + $0x40] sm:$0xf]  ;;  %9895 = vst [vmem:[#allocation54_spill] sm:$0xff] %v8127_v18 }
  0x85   :  { %1744 = vmatpush.bf16.msrb.mxu3 %v7180_v5  ;;  %v1216_v5 = vld [vmem:[#allocation2 + $0x30] sm:$0xf]  ;;  %v1554_v35 = vrot.slane %v1552_v52, 2  ;;  %v8114_v52 = vld [vmem:[#allocation5 + $0x478] sm:$0xff]  ;;  %9896 = vst [vmem:[#allocation55_spill] sm:$0xff] %v8130_v22 }
  0x86   :  { %1441 = vmatpush.bf16.msrb.mxu0 %v8073_v15  ;;  %v1555_v15 = vshll.u32 %v1490_v41, 16  ;;  %v1224_v41 = vpack.c.bf16 %v1218_v3, %v1218_v3  ;;  %v1281_v3 = vrot.slane %v1219_v58, 2  ;;  %9892 = vst [vmem:[#allocation51_spill] sm:$0xff] %v8114_v52  ;;  %v1284_v58 = vrot.slane %v1220_v50, 2  ;;  %v8135_v50 = vld [vmem:[#allocation5 + $0x428] sm:$0xff] }
  0x87   :  { %1455 = vmatpush.bf16.msrb.mxu1 %v8076_v21  ;;  %v8095_v21 = vld [vmem:[#allocation5 + $0x348] sm:$0xff]  ;;  %9897 = vst [vmem:[#allocation56_spill] sm:$0xff] %v8135_v50 }
  0x88   :  { %1469 = vmatpush.bf16.msrb.mxu2 %v8079_v31  ;;  %9886 = vst [vmem:[#allocation45_spill] sm:$0xff] %v8095_v21  ;;  %v1222_v31 = vpack.c.bf16 %v1216_v5, %v1216_v5  ;;  %v1223_v5 = vpack.c.bf16 %v1217_v28, %v1217_v28  ;;  %v1288_v33 = vrot.slane %v1224_v41, 2  ;;  %v7176_v28 = vld [vmem:[#allocation5 + $0x3c0] sm:$0xff]  ;;  %v7214_v41 = vld [vmem:[#allocation5 + $0x4f0] sm:$0xff] }
  0x89   :  { %1745 = vmatpush.bf16.msrb.mxu3 %v7179_v37  ;;  %v8099_v37 = vld [vmem:[#allocation5 + $0x388] sm:$0xff] }
  0x8a   :  { %1442 = vmatpush.bf16.msrb.mxu0 %v8083_v45  ;;  %9887 = vst [vmem:[#allocation46_spill] sm:$0xff] %v8099_v37  ;;  %v7177_v45 = vld [vmem:[#allocation5 + $0x3c8] sm:$0xff] }
  0x8b   :  { %1456 = vmatpush.bf16.msrb.mxu1 %v8086_v32  ;;  %v1557_v32 = vrot.slane %v1555_v15, 3  ;;  %v1287_v15 = vrot.slane %v1221_v38, 2 }
  0x8c   :  { %1470 = vmatpush.bf16.msrb.mxu2 %v8088_v19  ;;  %v8107_v19 = vld [vmem:[#allocation5 + $0x340] sm:$0xff] }
  0x8d   :  { %1746 = vmatpush.bf16.msrb.mxu3 %v7178_v20  ;;  %9889 = vst [vmem:[#allocation48_spill] sm:$0xff] %v8107_v19  ;;  %v1282_v20 = vrot.slane %v1222_v31, 2  ;;  %v1285_v31 = vrot.slane %v1223_v5, 2  ;;  %v8138_v5 = vld [vmem:[#allocation5 + $0x468] sm:$0xff] }
  0x8e   :  { %1443 = vmatpush.bf16.msrb.mxu0 %v8092_v51  ;;  %v7215_v51 = vld [vmem:[#allocation5 + $0x4f8] sm:$0xff]  ;;  %9898 = vst [vmem:[#allocation57_spill] sm:$0xff] %v8138_v5 }
  0x8f   :  { %1457 = vmatpush.bf16.msrb.mxu1 %v8095_v21  ;;  %v1558_v21 = vor.u32 %v1557_v32, %v1554_v35  ;;  %v1289_v35 = vsel %vm1280_vm3, %v1287_v15, %v1288_v33  ;;  %v1286_v38 = vsel %vm1280_vm3, %v1284_v58, %v1285_v31  ;;  %v1482_v15 = vld [vmem:[#allocation2 + $0x8] sm:$0xe0]  ;;  %v8150_v33 = vld [vmem:[#allocation5 + $0x4a0] sm:$0xff]  ;;  %v1486_v31 = vld [vmem:[#allocation2 + $0x40] sm:$0x1f] }
  0x90   :  { %1471 = vmatpush.bf16.msrb.mxu2 %v8099_v37  ;;  %v8121_v37 = vld [vmem:[#allocation5 + $0x430] sm:$0xff]  ;;  %9902 = vst [vmem:[#allocation61_spill] sm:$0xff] %v8150_v33  ;;  %v1483_v58 = vld [vmem:[#allocation2 + $0x10] sm:$0xe0] }
  0x91   :  { %1747 = vmatpush.bf16.msrb.mxu3 %v7177_v45  ;;  %9894 = vst [vmem:[#allocation53_spill] sm:$0xff] %v8121_v37  ;;  %v1283_v45 = vsel %vm1280_vm3, %v1281_v3, %v1282_v20  ;;  %v1559_v32 = vsel %vm1542_vm4, %v1550_v53, %v1558_v21  ;;  %v8141_v3 = vld [vmem:[#allocation5 + $0x4a8] sm:$0xff]  ;;  %v8144_v21 = vld [vmem:[#allocation5 + $0x420] sm:$0xff] }
  0x92   :  { %1444 = vmatpush.bf16.msrb.mxu0 %v8103_v30  ;;  %9899 = vst [vmem:[#allocation58_spill] sm:$0xff] %v8141_v3  ;;  %v8147_v20 = vld [vmem:[#allocation5 + $0x460] sm:$0xff] }
  0x93   :  { %1458 = vmatpush.bf16.msrb.mxu1 %v8107_v19  ;;  %9900 = vst [vmem:[#allocation59_spill] sm:$0xff] %v8144_v21  ;;  %v7212_v53 = vld [vmem:[#allocation5 + $0x4e0] sm:$0xff] }
  0x94   :  { %1472 = vmatpush.bf16.msrb.mxu2 %v8112_v23  ;;  %9901 = vst [vmem:[#allocation60_spill] sm:$0xff] %v8147_v20  ;;  %v1785_v23 = vld [vmem:[#allocation2] sm:$0xc0] }
  0x95   :  { %1748 = vmatpush.bf16.msrb.mxu3 %v7176_v28  ;;  %1445 = vmatmul.bf16.vlgmr.msrb.gmra.mxu0 %v1283_v45  ;;  %v1485_v28 = vld [vmem:[#allocation2 + $0x38] sm:$0x1f]  ;;  %v8153_v45 = vld [vmem:[#allocation5 + $0x418] sm:$0xff] }
  0x96   :  { %1755 = vmatpush.bf16.msra.mxu0 %v8109_v11  ;;  %1459 = vmatmul.bf16.vlgmr.msrb.gmra.mxu1 %v1286_v38  ;;  %9903 = vst [vmem:[#allocation62_spill] sm:$0xff] %v8153_v45  ;;  %v1491_v38 = vpack.c.bf16 %v1485_v28, %v1485_v28  ;;  %v1786_v11 = vld [vmem:[#allocation2 + $0x8] sm:$0xc0] }
  0x97   :  { %1769 = vmatpush.bf16.msra.mxu1 %v8114_v52  ;;  %1473 = vmatmul.bf16.vlgmr.msrb.gmra.mxu2 %v1289_v35  ;;  %v1488_v35 = vpack.c.bf16 %v7880_v44, %v1482_v15 }
  0x98   :  { %2009 = vmatpush.bf16.msra.mxu2 %v8116_v34  ;;  %1749 = vmatmul.bf16.vlgmr.msrb.gmra.mxu3 %v1559_v32  ;;  %v8157_v32 = vld [vmem:[#allocation5 + $0x458] sm:$0xff]  ;;  %v1569_v28 = vshrl.u32 %v1491_v38, 16 }
  0x99   :  { %2023 = vmatpush.bf16.msra.mxu3 %v7215_v51  ;;  %v7213_v51 = vld [vmem:[#allocation5 + $0x4e8] sm:$0xff]  ;;  %9904 = vst [vmem:[#allocation63_spill] sm:$0xff] %v8157_v32  ;;  %v1564_v15 = vshll.u32 %v1488_v35, 16 }
  0x9a   :  { %1756 = vmatpush.bf16.msra.mxu0 %v8121_v37  ;;  %v8174_v37 = vld [vmem:[#allocation5 + $0x448] sm:$0xff] }
  0x9b   :  { %1770 = vmatpush.bf16.msra.mxu1 %v8127_v18  ;;  %v8172_v18 = vld [vmem:[#allocation5 + $0x408] sm:$0xff] }
  0x9c   :  { %2010 = vmatpush.bf16.msra.mxu2 %v8130_v22  ;;  %v7211_v22 = vld [vmem:[#allocation5 + $0x4d8] sm:$0xff]  ;;  %9909 = vst [vmem:[#allocation68_spill] sm:$0xff] %v8172_v18 }
  0x9d   :  { %2024 = vmatpush.bf16.msra.mxu3 %v7214_v41  ;;  %v8160_v41 = vld [vmem:[#allocation5 + $0x498] sm:$0xff] }
  0x9e   :  { %1757 = vmatpush.bf16.msra.mxu0 %v8135_v50  ;;  %9905 = vst [vmem:[#allocation64_spill] sm:$0xff] %v8160_v41  ;;  %v1572_v50 = vshll.u32 %v1491_v38, 16  ;;  %v1788_v38 = vld [vmem:[#allocation2 + $0x30] sm:$0x3f] }
  0x9f   :  { %1771 = vmatpush.bf16.msra.mxu1 %v8138_v5  ;;  %v1561_v5 = vshrl.u32 %v1488_v35, 16 }
  0xa0   :  { %2011 = vmatpush.bf16.msra.mxu2 %v8141_v3  ;;  %v1492_v3 = vpack.c.bf16 %v1486_v31, %v1486_v31  ;;  %v1574_v52 = vrot.slane %v1572_v50, 3  ;;  %v1792_v50 = vpack.c.bf16 %v7880_v44, %v1786_v11 }
  0xa1   :  { %2025 = vmatpush.bf16.msra.mxu3 %v7213_v51  ;;  %v1489_v51 = vpack.c.bf16 %v7882_v47, %v1483_v58  ;;  %v1563_v35 = vrot.slane %v1561_v5, 2  ;;  %v1791_v5 = vpack.c.bf16 %v7877_v24, %v1785_v23 }
  0xa2   :  { %1758 = vmatpush.bf16.msra.mxu0 %v8144_v21  ;;  %v8164_v21 = vld [vmem:[#allocation5 + $0x410] sm:$0xff]  ;;  %v1589_v34 = vshll.u32 %v1492_v3, 16  ;;  %v1856_v44 = vrot.slane %v1792_v50, 3  ;;  %v7606_v50 = vld [vmem:[#allocation5 + $0x28] sm:$0xff] }
  0xa3   :  { %1772 = vmatpush.bf16.msra.mxu1 %v8147_v20  ;;  %9906 = vst [vmem:[#allocation65_spill] sm:$0xff] %v8164_v21  ;;  %v8167_v20 = vld [vmem:[#allocation5 + $0x450] sm:$0xff]  ;;  %v1578_v58 = vshrl.u32 %v1489_v51, 16  ;;  %v1581_v31 = vshll.u32 %v1489_v51, 16  ;;  %v1789_v51 = vld [vmem:[#allocation2 + $0x38] sm:$0x3f] }
  0xa4   :  { %2012 = vmatpush.bf16.msra.mxu2 %v8150_v33  ;;  %9907 = vst [vmem:[#allocation66_spill] sm:$0xff] %v8167_v20  ;;  %v8170_v33 = vld [vmem:[#allocation5 + $0x490] sm:$0xff]  ;;  %v1591_v29 = vrot.slane %v1589_v34, 3 }
  0xa5   :  { %2026 = vmatpush.bf16.msra.mxu3 %v7212_v53  ;;  %9908 = vst [vmem:[#allocation67_spill] sm:$0xff] %v8170_v33  ;;  %v1586_v53 = vshrl.u32 %v1492_v3, 16  ;;  %v1580_v3 = vrot.slane %v1578_v58, 2  ;;  %v1583_v19 = vrot.slane %v1581_v31, 3  ;;  %v8189_v58 = vld [vmem:[#allocation5 + $0x538] sm:$0xff] }
  0xa6   :  { %1759 = vmatpush.bf16.msra.mxu0 %v8153_v45  ;;  %v7210_v45 = vld [vmem:[#allocation5 + $0x4d0] sm:$0xff] }
  0xa7   :  { %1773 = vmatpush.bf16.msra.mxu1 %v8157_v32  ;;  %v1566_v32 = vrot.slane %v1564_v15, 3  ;;  %v1588_v30 = vrot.slane %v1586_v53, 2  ;;  %v1794_v15 = vpack.c.bf16 %v1788_v38, %v1788_v38  ;;  %v1584_v24 = vor.u32 %v1583_v19, %v1580_v3  ;;  %v7208_v53 = vld [vmem:[#allocation5 + $0x4c0] sm:$0xff]  ;;  %v7601_v19 = vld [vmem:[#allocation5 + $0x78] sm:$0xff]  ;;  %v7603_v3 = vld [vmem:[#allocation5 + $0x30] sm:$0xff] }
  0xa8   :  { %2013 = vmatpush.bf16.msra.mxu2 %v8160_v41  ;;  %v1571_v41 = vrot.slane %v1569_v28, 2  ;;  %v1795_v28 = vpack.c.bf16 %v1789_v51, %v1789_v51  ;;  %v1853_v38 = vrot.slane %v1791_v5, 3  ;;  %v8205_v51 = vld [vmem:[#allocation5 + $0x528] sm:$0xff]  ;;  %v7604_v5 = vld [vmem:[#allocation5 + $0x70] sm:$0xff] }
  0xa9   :  { %2027 = vmatpush.bf16.msra.mxu3 %v7211_v22  ;;  %v8179_v22 = vld [vmem:[#allocation5 + $0x488] sm:$0xff]  ;;  %v1567_v31 = vor.u32 %v1566_v32, %v1563_v35  ;;  %v1592_v23 = vor.u32 %v1591_v29, %v1588_v30  ;;  %v8198_v32 = vld [vmem:[#allocation5 + $0x530] sm:$0xff]  ;;  %v7600_v29 = vld [vmem:[#allocation5 + $0x38] sm:$0xff] }
  0xaa   :  { %1760 = vmatpush.bf16.msra.mxu0 %v8164_v21  ;;  %v7209_v21 = vld [vmem:[#allocation5 + $0x4c8] sm:$0xff]  ;;  %v1575_v34 = vor.u32 %v1574_v52, %v1571_v41  ;;  %v1857_v11 = vrot.slane %v1795_v28, 3  ;;  %v7602_v41 = vld [vmem:[#allocation5 + $0xb8] sm:$0xff] }
  0xab   :  { %1774 = vmatpush.bf16.msra.mxu1 %v8167_v20  ;;  %v8183_v20 = vld [vmem:[#allocation5 + $0x400] sm:$0xff]  ;;  %v1593_v30 = vsel %vm1542_vm4, %v1584_v24, %v1592_v23  ;;  %v7607_v28 = vld [vmem:[#allocation5 + $0x68] sm:$0xff] }
  0xac   :  { %2014 = vmatpush.bf16.msra.mxu2 %v8170_v33  ;;  %v8187_v33 = vld [vmem:[#allocation5 + $0x440] sm:$0xff]  ;;  %v1576_v52 = vsel %vm1542_vm4, %v1567_v31, %v1575_v34  ;;  %v1858_v35 = vsel %vm1852_vm5, %v1856_v44, %v1857_v11  ;;  %v7608_v31 = vld [vmem:[#allocation5 + $0xa8] sm:$0xff]  ;;  %v8211_v34 = vld [vmem:[#allocation5 + $0x518] sm:$0xff] }
  0xad   :  { %2028 = vmatpush.bf16.msra.mxu3 %v7210_v45  ;;  %v8192_v45 = vld [vmem:[#allocation5 + $0x480] sm:$0xff]  ;;  %9911 = vst [vmem:[#allocation70_spill] sm:$0xff] %v8211_v34  ;;  %v7612_v44 = vld [vmem:[#allocation5 + $0x18] sm:$0xff] }
  0xae   :  { %1761 = vmatpush.bf16.msra.mxu0 %v8172_v18  ;;  %v1854_v18 = vrot.slane %v1794_v15, 3  ;;  %v7605_v15 = vld [vmem:[#allocation5 + $0xb0] sm:$0xff]  ;;  %v7609_v24 = vld [vmem:[#allocation5 + $0x20] sm:$0xff]  ;;  %v7613_v11 = vld [vmem:[#allocation5 + $0x58] sm:$0xff] }
  0xaf   :  { %1775 = vmatpush.bf16.msra.mxu1 %v8174_v37  ;;  %v7610_v23 = vld [vmem:[#allocation5 + $0x60] sm:$0xff] }
  0xb0   :  { %2015 = vmatpush.bf16.msra.mxu2 %v8179_v22 }
  0xb1   :  { %2029 = vmatpush.bf16.msra.mxu3 %v7209_v21  ;;  %v1855_v21 = vsel %vm1852_vm5, %v1853_v38, %v1854_v18  ;;  %v8208_v18 = vld [vmem:[#allocation5 + $0x520] sm:$0xff]  ;;  %v8214_v38 = vld [vmem:[#allocation5 + $0x510] sm:$0xff] }
  0xb2   :  { %1762 = vmatpush.bf16.msra.mxu0 %v8183_v20  ;;  %9910 = vst [vmem:[#allocation69_spill] sm:$0xff] %v8208_v18 }
  0xb3   :  { %1776 = vmatpush.bf16.msra.mxu1 %v8187_v33  ;;  %9912 = vst [vmem:[#allocation71_spill] sm:$0xff] %v8214_v38 }
  0xb4   :  { %2016 = vmatpush.bf16.msra.mxu2 %v8192_v45 }
  0xb5   :  { %2030 = vmatpush.bf16.msra.mxu3 %v7208_v53  ;;  %1763 = vmatmul.bf16.vlgmr.msra.gmra.mxu0 %v1576_v52  ;;  %v7611_v53 = vld [vmem:[#allocation5 + $0xa0] sm:$0xff] }
  0xb6   :  { %2037 = vmatpush.bf16.msrb.mxu0 %v8189_v58  ;;  %1777 = vmatmul.bf16.vlgmr.msra.gmra.mxu1 %v1593_v30  ;;  %v1787_v52 = vld [vmem:[#allocation2 + $0x10] sm:$0xc0]  ;;  %v7614_v30 = vld [vmem:[#allocation5 + $0x98] sm:$0xff] }
  0xb7   :  { %2065 = vmatpush.bf16.msrb.mxu1 %v7600_v29  ;;  %2017 = vmatmul.bf16.vlgmr.msra.gmra.mxu2 %v1855_v21  ;;  %v1790_v29 = vld [vmem:[#allocation2 + $0x40] sm:$0x3f] }
  0xb8   :  { %2079 = vmatpush.bf16.msrb.mxu2 %v7601_v19  ;;  %2031 = vmatmul.bf16.vlgmr.msra.gmra.mxu3 %v1858_v35  ;;  %v8217_v19 = vld [vmem:[#allocation5 + $0x508] sm:$0xff]  ;;  %v7615_v21 = vld [vmem:[#allocation5 + $0x10] sm:$0xff]  ;;  %v1796_v35 = vpack.c.bf16 %v1790_v29, %v1790_v29 }
  0xb9   :  { %2093 = vmatpush.bf16.msrb.mxu3 %v7602_v41  ;;  %9913 = vst [vmem:[#allocation72_spill] sm:$0xff] %v8217_v19  ;;  %v1793_v41 = vpack.c.bf16 %v7882_v47, %v1787_v52  ;;  %v2058_v47 = vld [vmem:[#allocation2 + $0x58] sm:$0xff]  ;;  %v2056_v52 = vld [vmem:[#allocation2 + $0x48] sm:$0xff]  ;;  %v8228_v29 = vld [vmem:[#allocation2 + $0x60] sm:$0xff] }
  0xba   :  { %2038 = vmatpush.bf16.msrb.mxu0 %v8198_v32 }
  0xbb   :  { %2066 = vmatpush.bf16.msrb.mxu1 %v7603_v3  ;;  %v7616_v3 = vld [vmem:[#allocation5 + $0x50] sm:$0xff] }
  0xbc   :  { %2080 = vmatpush.bf16.msrb.mxu2 %v7604_v5  ;;  %v7617_v5 = vld [vmem:[#allocation5 + $0x90] sm:$0xff] }
  0xbd   :  { %2094 = vmatpush.bf16.msrb.mxu3 %v7605_v15  ;;  %v8221_v15 = vld [vmem:[#allocation5 + $0x500] sm:$0xff] }
  0xbe   :  { %2039 = vmatpush.bf16.msrb.mxu0 %v8205_v51  ;;  %9914 = vst [vmem:[#allocation73_spill] sm:$0xff] %v8221_v15 }
  0xbf   :  { %2067 = vmatpush.bf16.msrb.mxu1 %v7606_v50  ;;  %v7618_v50 = vld [vmem:[#allocation5 + $0x8] sm:$0xff] }
  0xc0   :  { %2081 = vmatpush.bf16.msrb.mxu2 %v7607_v28  ;;  %v1859_v28 = vrot.slane %v1793_v41, 3 }
  0xc1   :  { %2095 = vmatpush.bf16.msrb.mxu3 %v7608_v31  ;;  %v1860_v31 = vrot.slane %v1796_v35, 3 }
  0xc2   :  { %2040 = vmatpush.bf16.msrb.mxu0 %v8208_v18  ;;  %v9972_v18 = vld [vmem:[#allocation64_spill] sm:$0xff] }
  0xc3   :  { %2068 = vmatpush.bf16.msrb.mxu1 %v7609_v24  ;;  %v7619_v24 = vld [vmem:[#allocation5 + $0x48] sm:$0xff]  ;;  %v1861_v41 = vsel %vm1852_vm5, %v1859_v28, %v1860_v31  ;;  %v2109_v31 = vld [vmem:[#allocation2 + $0x48] sm:$0xfe] }
  0xc4   :  { %2082 = vmatpush.bf16.msrb.mxu2 %v7610_v23  ;;  %v2057_v23 = vld [vmem:[#allocation2 + $0x50] sm:$0xff]  ;;  %v7629_v28 = vld [vmem:[#allocation5 + $0xe8] sm:$0xff] }
  0xc5   :  { %2096 = vmatpush.bf16.msrb.mxu3 %v7611_v53  ;;  %v8223_v53 = vld [vmem:[#allocation2 + $0x68] sm:$0xff] }
  0xc6   :  { %2041 = vmatpush.bf16.msrb.mxu0 %v8211_v34  ;;  %9915 = vst [vmem:[#allocation74_spill] sm:$0xff] %v8223_v53  ;;  %v2063_v35 = vpack.c.bf16 %v8223_v53, %v2057_v23  ;;  %v2111_v23 = vld [vmem:[#allocation2 + $0x58] sm:$0xfe]  ;;  %v9969_v34 = vld [vmem:[#allocation65_spill] sm:$0xff] }
  0xc7   :  { %2069 = vmatpush.bf16.msrb.mxu1 %v7612_v44  ;;  %v7620_v44 = vld [vmem:[#allocation5 + $0x88] sm:$0xff] }
  0xc8   :  { %2083 = vmatpush.bf16.msrb.mxu2 %v7613_v11  ;;  %v8225_v11 = vld [vmem:[#allocation2 + $0x70] sm:$0xff] }
  0xc9   :  { %2097 = vmatpush.bf16.msrb.mxu3 %v7614_v30  ;;  %9916 = vst [vmem:[#allocation75_spill] sm:$0xff] %v8225_v11  ;;  %v7621_v30 = vld [vmem:[#allocation5] sm:$0xff] }
  0xca   :  { %2042 = vmatpush.bf16.msrb.mxu0 %v8214_v38  ;;  %v7656_v38 = vld [vmem:[#allocation5 + $0x3d0] sm:$0xff] }
  0xcb   :  { %2070 = vmatpush.bf16.msrb.mxu1 %v7615_v21  ;;  %v7622_v21 = vld [vmem:[#allocation5 + $0xf8] sm:$0xff] }
  0xcc   :  { %2084 = vmatpush.bf16.msrb.mxu2 %v7616_v3  ;;  %v7623_v3 = vld [vmem:[#allocation5 + $0x40] sm:$0xff] }
  0xcd   :  { %2098 = vmatpush.bf16.msrb.mxu3 %v7617_v5  ;;  %v7624_v5 = vld [vmem:[#allocation5 + $0x138] sm:$0xff] }
  0xce   :  { %2043 = vmatpush.bf16.msrb.mxu0 %v8217_v19 }
  0xcf   :  { %2071 = vmatpush.bf16.msrb.mxu1 %v7618_v50  ;;  %v2064_v50 = vpack.c.bf16 %v8225_v11, %v2058_v47  ;;  %v7630_v47 = vld [vmem:[#allocation5 + $0xe0] sm:$0xff] }
  0xd0   :  { %2085 = vmatpush.bf16.msrb.mxu2 %v7619_v24  ;;  %v7625_v24 = vld [vmem:[#allocation5 + $0x178] sm:$0xff] }
  0xd1   :  { %2099 = vmatpush.bf16.msrb.mxu3 %v7620_v44  ;;  %v7626_v44 = vld [vmem:[#allocation5 + $0x80] sm:$0xff] }
  0xd2   :  { %2044 = vmatpush.bf16.msrb.mxu0 %v8221_v15  ;;  %v2062_v15 = vpack.c.bf16 %v8228_v29, %v2056_v52 }
  0xd3   :  { %2072 = vmatpush.bf16.msrb.mxu1 %v7621_v30  ;;  %v7627_v30 = vld [vmem:[#allocation5 + $0x1b8] sm:$0xff] }
  0xd4   :  { %2086 = vmatpush.bf16.msrb.mxu2 %v7623_v3 }
  0xd5   :  { %2100 = vmatpush.bf16.msrb.mxu3 %v7626_v44  ;;  %2045 = vmatmul.bf16.vlgmr.msrb.gmra.mxu0 %v1861_v41 }
  0xd6   :  { %2163 = vmatpush.bf16.msra.mxu0 %v7622_v21  ;;  %v7628_v21 = vld [vmem:[#allocation5 + $0xf0] sm:$0xff]  ;;  %2073 = vmatmul.bf16.vlgmr.msrb.gmra.mxu1 %v2062_v15  ;;  %v2115_v15 = vld [vmem:[#allocation2 + $0x78] sm:$0x1] }
  0xd7   :  { %2177 = vmatpush.bf16.msra.mxu1 %v7624_v5  ;;  %2087 = vmatmul.bf16.vlgmr.msrb.gmra.mxu2 %v2063_v35  ;;  %v2121_v52 = vpack.c.bf16 %v2115_v15, %v2115_v15 }
  0xd8   :  { %2191 = vmatpush.bf16.msra.mxu2 %v7625_v24  ;;  %2101 = vmatmul.bf16.vlgmr.msrb.gmra.mxu3 %v2064_v50  ;;  %v2207_v50 = vld [vmem:[#allocation2 + $0x48] sm:$0xfc]  ;;  %v2210_v24 = vld [vmem:[#allocation2 + $0x78] sm:$0x3] }
  0xd9   :  { %2237 = vmatpush.bf16.msra.mxu3 %v7627_v30 }
  0xda   :  { %2164 = vmatpush.bf16.msra.mxu0 %v7628_v21 }
  0xdb   :  { %2178 = vmatpush.bf16.msra.mxu1 %v7886_v54  ;;  %v2118_v54 = vpack.c.bf16 %v8228_v29, %v2109_v31  ;;  %v2216_v31 = vpack.c.bf16 %v2210_v24, %v2210_v24 }
  0xdc   :  { %2192 = vmatpush.bf16.msra.mxu2 %v7889_v56  ;;  %v2110_v56 = vld [vmem:[#allocation2 + $0x50] sm:$0xfe] }
  0xdd   :  { %2238 = vmatpush.bf16.msra.mxu3 %v7891_v57  ;;  %v2120_v57 = vpack.c.bf16 %v8225_v11, %v2111_v23  ;;  %v2127_v41 = vshll.u32 %v2118_v54, 16  ;;  %v2125_v44 = vshrl.u32 %v2118_v54, 16  ;;  %v7633_v23 = vld [vmem:[#allocation5 + $0xc8] sm:$0xff] }
  0xde   :  { %2165 = vmatpush.bf16.msra.mxu0 %v7629_v28 }
  0xdf   :  { %2179 = vmatpush.bf16.msra.mxu1 %v7895_v60  ;;  %v2117_v60 = vld [vmem:[#allocation2 + $0x88] sm:$0x1]  ;;  %v2151_v3 = vshll.u32 %v2120_v57, 16  ;;  %v2129_v30 = vrot.slane %v2127_v41, 1  ;;  %v2149_v21 = vshrl.u32 %v2120_v57, 16 }
  0xe0   :  { %2193 = vmatpush.bf16.msra.mxu2 %v7899_v61  ;;  %v7631_v61 = vld [vmem:[#allocation5 + $0xd8] sm:$0xff]  ;;  %v2123_v35 = vpack.c.bf16 %v2117_v60, %v2117_v60 }
  0xe1   :  { %2239 = vmatpush.bf16.msra.mxu3 %v7901_v62  ;;  %v2119_v62 = vpack.c.bf16 %v8223_v53, %v2110_v56  ;;  %v2153_v28 = vrot.slane %v2151_v3, 1  ;;  %v2281_v3 = vld [vmem:[#allocation2 + $0x48] sm:$0xf8] }
  0xe2   :  { %2166 = vmatpush.bf16.msra.mxu0 %v7630_v47 }
  0xe3   :  { %2180 = vmatpush.bf16.msra.mxu1 %v7904_v0  ;;  %v2116_v0 = vld [vmem:[#allocation2 + $0x80] sm:$0x1]  ;;  %v2137_v47 = vshrl.u32 %v2119_v62, 16 }
  0xe4   :  { %2194 = vmatpush.bf16.msra.mxu2 %v7908_v1  ;;  %v7632_v1 = vld [vmem:[#allocation5 + $0xd0] sm:$0xff]  ;;  %v2122_v5 = vpack.c.bf16 %v2116_v0, %v2116_v0 }
  0xe5   :  { %2240 = vmatpush.bf16.msra.mxu3 %v7910_v2  ;;  %v2139_v2 = vshll.u32 %v2119_v62, 16  ;;  %v7635_v62 = vld [vmem:[#allocation5 + $0x1f8] sm:$0xff]  ;;  %v7636_v0 = vld [vmem:[#allocation5 + $0x1f0] sm:$0xff] }
  0xe6   :  { %2167 = vmatpush.bf16.msra.mxu0 %v7631_v61  ;;  %v2144_v15 = vshll.u32 %v2122_v5, 16  ;;  %v7634_v61 = vld [vmem:[#allocation5 + $0xc0] sm:$0xff] }
  0xe7   :  { %2181 = vmatpush.bf16.msra.mxu1 %v7913_v6  ;;  %v2132_v6 = vshll.u32 %v2121_v52, 16  ;;  %v2141_v56 = vrot.slane %v2139_v2, 1  ;;  %v2282_v5 = vld [vmem:[#allocation2 + $0x50] sm:$0xf8]  ;;  %v2285_v2 = vld [vmem:[#allocation2 + $0x80] sm:$0x7] }
  0xe8   :  { %2195 = vmatpush.bf16.msra.mxu2 %v7917_v7  ;;  %v2156_v7 = vshll.u32 %v2123_v35, 16  ;;  %v2146_v41 = vrot.slane %v2144_v15, 1  ;;  %v7638_v35 = vld [vmem:[#allocation5 + $0x1e0] sm:$0xff]  ;;  %v2209_v15 = vld [vmem:[#allocation2 + $0x58] sm:$0xfc] }
  0xe9   :  { %2241 = vmatpush.bf16.msra.mxu3 %v7919_v8  ;;  %v2213_v8 = vpack.c.bf16 %v8228_v29, %v2207_v50  ;;  %v2134_v54 = vrot.slane %v2132_v6, 1  ;;  %v2142_v52 = vor.u32 %v2141_v56, %v2137_v47  ;;  %v9922_v50 = vld [vmem:[#allocation20_spill] sm:$0xff]  ;;  %v7639_v6 = vld [vmem:[#allocation5 + $0x1d8] sm:$0xff]  ;;  %v2208_v47 = vld [vmem:[#allocation2 + $0x50] sm:$0xfc] }
  0xea   :  { %2168 = vmatpush.bf16.msra.mxu0 %v7632_v1  ;;  %v2158_v57 = vrot.slane %v2156_v7, 1  ;;  %v9920_v1 = vld [vmem:[#allocation18_spill] sm:$0xff]  ;;  %v8283_v7 = vpop.f32.mrf.mxu2  ;;  %v2211_v56 = vld [vmem:[#allocation2 + $0x80] sm:$0x3] }
  0xeb   :  { %2182 = vmatpush.bf16.msra.mxu1 %v7924_v14  ;;  %v2130_v14 = vor.u32 %v2129_v30, %v2125_v44  ;;  %v2225_v60 = vrot.slane %v2213_v8, 1  ;;  %v8278_v44 = vpop.f32.mrf.mxu1  ;;  %v8285_v8 = vpop.f32.mrf.mxu3 }
  0xec   :  { %2196 = vmatpush.bf16.msra.mxu2 %v7928_v16  ;;  %v2154_v16 = vor.u32 %v2153_v28, %v2149_v21  ;;  %v2288_v21 = vpack.c.bf16 %v8223_v53, %v2282_v5  ;;  %v2291_v28 = vpack.c.bf16 %v2285_v2, %v2285_v2 }
  0xed   :  { %2242 = vmatpush.bf16.msra.mxu3 %v7930_v17  ;;  %v2226_v17 = vrot.slane %v2216_v31, 1  ;;  %v9923_v31 = vld [vmem:[#allocation21_spill] sm:$0xff] }
  0xee   :  { %2169 = vmatpush.bf16.msra.mxu0 %v7633_v23  ;;  %v9924_v23 = vld [vmem:[#allocation22_spill] sm:$0xff] }
  0xef   :  { %2183 = vmatpush.bf16.msra.mxu1 %v7933_v25  ;;  %v2135_v25 = vsel %vm413_vm0, %v2130_v14, %v2134_v54  ;;  %v9925_v14 = vld [vmem:[#allocation23_spill] sm:$0xff]  ;;  %v2212_v54 = vld [vmem:[#allocation2 + $0x88] sm:$0x3] }
  0xf0   :  { %2197 = vmatpush.bf16.msra.mxu2 %v7935_v26  ;;  %v2159_v26 = vsel %vm413_vm0, %v2154_v16, %v2158_v57 }
  0xf1   :  { %2243 = vmatpush.bf16.msra.mxu3 %v7937_v27  ;;  %v2227_v27 = vsel %vm708_vm1, %v2225_v60, %v2226_v17 }
  0xf2   :  { %2170 = vmatpush.bf16.msra.mxu0 %v7634_v61  ;;  %v7640_v61 = vld [vmem:[#allocation5 + $0x1d0] sm:$0xff] }
  0xf3   :  { %2184 = vmatpush.bf16.msra.mxu1 %v7943_v39  ;;  %v2147_v39 = vsel %vm413_vm0, %v2142_v52, %v2146_v41  ;;  %v2311_v52 = vshrl.u32 %v2288_v21, 16  ;;  %v2314_v41 = vshll.u32 %v2288_v21, 16 }
  0xf4   :  { %2198 = vmatpush.bf16.msra.mxu2 %v7948_v42  ;;  %v8267_v42 = vpop.f32.mrf.mxu0 }
  0xf5   :  { %2244 = vmatpush.bf16.msra.mxu3 %v7950_v43  ;;  %2171 = vmatmul.bf16.vlgmr.msra.gmra.mxu0 %v2135_v25  ;;  %v7637_v43 = vld [vmem:[#allocation5 + $0x1e8] sm:$0xff]  ;;  %v2322_v25 = vshll.u32 %v2291_v28, 16  ;;  %v2316_v5 = vrot.slane %v2314_v41, 2 }
  0xf6   :  { %2251 = vmatpush.bf16.msrb.mxu0 %v7635_v62  ;;  %2185 = vmatmul.bf16.vlgmr.msra.gmra.mxu1 %v2147_v39  ;;  %v2319_v62 = vshrl.u32 %v2291_v28, 16  ;;  %v2217_v39 = vpack.c.bf16 %v2211_v56, %v2211_v56  ;;  %v8301_v28 = vpop.f32.mrf.mxu2  ;;  %v7642_v56 = vld [vmem:[#allocation5 + $0x1c0] sm:$0xff] }
  0xf7   :  { %2265 = vmatpush.bf16.msrb.mxu1 %v7952_v48  ;;  %2199 = vmatmul.bf16.vlgmr.msra.gmra.mxu2 %v2159_v26  ;;  %v9917_v48 = vld [vmem:[#allocation15_spill] sm:$0xff]  ;;  %v9926_v26 = vld [vmem:[#allocation24_spill] sm:$0xff] }
  0xf8   :  { %2347 = vmatpush.bf16.msrb.mxu2 %v7954_v49  ;;  %2245 = vmatmul.bf16.vlgmr.msra.gmra.mxu3 %v2227_v27  ;;  %v9918_v49 = vld [vmem:[#allocation16_spill] sm:$0xff]  ;;  %v2214_v27 = vpack.c.bf16 %v8223_v53, %v2208_v47  ;;  %v2321_v2 = vrot.slane %v2319_v62, 1 }
  0xf9   :  { %2361 = vmatpush.bf16.msrb.mxu3 %v7956_v55  ;;  %v9919_v55 = vld [vmem:[#allocation17_spill] sm:$0xff] }
  0xfa   :  { %2252 = vmatpush.bf16.msrb.mxu0 %v7636_v0  ;;  %v9927_v0 = vld [vmem:[#allocation25_spill] sm:$0xff] }
  0xfb   :  { %2266 = vmatpush.bf16.msrb.mxu1 %v7965_v9  ;;  %v2284_v9 = vld [vmem:[#allocation2 + $0x78] sm:$0x7] }
  0xfc   :  { %2348 = vmatpush.bf16.msrb.mxu2 %v7967_v10  ;;  %v9921_v10 = vld [vmem:[#allocation19_spill] sm:$0xff]  ;;  %v2290_v24 = vpack.c.bf16 %v2284_v9, %v2284_v9  ;;  %v8280_v30 = vpop.f32.mrf.mxu0 }
  0xfd   :  { %2362 = vmatpush.bf16.msrb.mxu3 %v7971_v12  ;;  %v2287_v12 = vpack.c.bf16 %v8228_v29, %v2281_v3  ;;  %v7641_v9 = vld [vmem:[#allocation5 + $0x1c8] sm:$0xff] }
  0xfe   :  { %2253 = vmatpush.bf16.msrb.mxu0 %v7637_v43  ;;  %v2302_v60 = vshrl.u32 %v2290_v24, 16  ;;  %v2305_v17 = vshll.u32 %v2290_v24, 16  ;;  %v2215_v43 = vpack.c.bf16 %v8225_v11, %v2209_v15  ;;  %v8296_v24 = vpop.f32.mrf.mxu1 }
  0xff   :  { %2267 = vmatpush.bf16.msrb.mxu1 %v9917_v48  ;;  %v2294_v16 = vshrl.u32 %v2287_v12, 16  ;;  %v2297_v57 = vshll.u32 %v2287_v12, 16  ;;  %v2218_v48 = vpack.c.bf16 %v2212_v54, %v2212_v54  ;;  %v2229_v12 = vrot.slane %v2217_v39, 1  ;;  %v2283_v39 = vld [vmem:[#allocation2 + $0x58] sm:$0xf8] }
 0x100   :  { %2349 = vmatpush.bf16.msrb.mxu2 %v9918_v49  ;;  %v2307_v3 = vrot.slane %v2305_v17, 2  ;;  %v7644_v17 = vld [vmem:[#allocation5 + $0x2f0] sm:$0xff] }
 0x101   :  { %2363 = vmatpush.bf16.msrb.mxu3 %v9919_v55  ;;  %v2296_v49 = vrot.slane %v2294_v16, 1  ;;  %v2299_v55 = vrot.slane %v2297_v57, 2  ;;  %v2232_v21 = vrot.slane %v2218_v48, 1  ;;  %v9928_v16 = vld [vmem:[#allocation27_spill] sm:$0xff]  ;;  %v9936_v48 = vld [vmem:[#allocation34_spill] sm:$0xff] }
 0x102   :  { %2254 = vmatpush.bf16.msrb.mxu0 %v7638_v35  ;;  %v2304_v35 = vrot.slane %v2302_v60, 1  ;;  %v9930_v60 = vld [vmem:[#allocation28_spill] sm:$0xff] }
 0x103   :  { %2268 = vmatpush.bf16.msrb.mxu1 %v9920_v1  ;;  %v2313_v1 = vrot.slane %v2311_v52, 1  ;;  %v9932_v52 = vld [vmem:[#allocation30_spill] sm:$0xff] }
 0x104   :  { %2350 = vmatpush.bf16.msrb.mxu2 %v9921_v10  ;;  %v2324_v10 = vrot.slane %v2322_v25, 2  ;;  %v2308_v47 = vor.u32 %v2307_v3, %v2304_v35  ;;  %v9933_v25 = vld [vmem:[#allocation31_spill] sm:$0xff] }
 0x105   :  { %2364 = vmatpush.bf16.msrb.mxu3 %v9922_v50  ;;  %v2228_v50 = vrot.slane %v2214_v27, 1  ;;  %v9934_v27 = vld [vmem:[#allocation32_spill] sm:$0xff]  ;;  %v9937_v35 = vld [vmem:[#allocation35_spill] sm:$0xff] }
 0x106   :  { %2255 = vmatpush.bf16.msrb.mxu0 %v7639_v6  ;;  %v8298_v6 = vpop.f32.mrf.mxu0  ;;  %v2325_v15 = vor.u32 %v2324_v10, %v2321_v2  ;;  %v8322_v41 = vpop.f32.mrf.mxu1 }
 0x107   :  { %2269 = vmatpush.bf16.msrb.mxu1 %v9923_v31  ;;  %v8303_v31 = vpop.f32.mrf.mxu3 }
 0x108   :  { %2351 = vmatpush.bf16.msrb.mxu2 %v9924_v23  ;;  %v2300_v23 = vor.u32 %v2299_v55, %v2296_v49  ;;  %v7646_v49 = vld [vmem:[#allocation5 + $0x2e0] sm:$0xff]  ;;  %v2289_v55 = vpack.c.bf16 %v8225_v11, %v2283_v39 }
 0x109   :  { %2365 = vmatpush.bf16.msrb.mxu3 %v9925_v14  ;;  %v7643_v14 = vld [vmem:[#allocation5 + $0x2f8] sm:$0xff] }
 0x10a   :  { %2256 = vmatpush.bf16.msrb.mxu0 %v7640_v61  ;;  %v2309_v57 = vsel %vm970_vm2, %v2300_v23, %v2308_v47  ;;  %v9931_v61 = vld [vmem:[#allocation29_spill] sm:$0xff]  ;;  %v9940_v23 = vld [vmem:[#allocation38_spill] sm:$0xff] }
 0x10b   :  { %2270 = vmatpush.bf16.msrb.mxu1 %v9926_v26  ;;  %v7645_v26 = vld [vmem:[#allocation5 + $0x2e8] sm:$0xff]  ;;  %v9944_v39 = vld [vmem:[#allocation42_spill] sm:$0xff] }
 0x10c   :  { %2352 = vmatpush.bf16.msrb.mxu2 %v9927_v0  ;;  %v9935_v0 = vld [vmem:[#allocation33_spill] sm:$0xff] }
 0x10d   :  { %2366 = vmatpush.bf16.msrb.mxu3 %v8010_v59  ;;  %v2231_v59 = vrot.slane %v2215_v43, 1  ;;  %v2286_v43 = vld [vmem:[#allocation2 + $0x88] sm:$0x7] }
 0x10e   :  { %2257 = vmatpush.bf16.msrb.mxu0 %v7641_v9  ;;  %v8324_v62 = vpop.f32.mrf.mxu0  ;;  %v2292_v3 = vpack.c.bf16 %v2286_v43, %v2286_v43  ;;  %v9938_v9 = vld [vmem:[#allocation36_spill] sm:$0xff] }
 0x10f   :  { %2271 = vmatpush.bf16.msrb.mxu1 %v8015_v36  ;;  %v2317_v36 = vor.u32 %v2316_v5, %v2313_v1  ;;  %v2233_v54 = vsel %vm708_vm1, %v2231_v59, %v2232_v21  ;;  %v9939_v5 = vld [vmem:[#allocation37_spill] sm:$0xff]  ;;  %v2331_v59 = vshll.u32 %v2289_v55, 16  ;;  %v8340_v21 = vpop.f32.mrf.mxu1 }
 0x110   :  { %2353 = vmatpush.bf16.msrb.mxu2 %v8017_v40  ;;  %v2230_v40 = vsel %vm708_vm1, %v2228_v50, %v2229_v12  ;;  %v7647_v50 = vld [vmem:[#allocation5 + $0x2d8] sm:$0xff]  ;;  %v2328_v12 = vshrl.u32 %v2289_v55, 16  ;;  %v2336_v47 = vshrl.u32 %v2292_v3, 16 }
 0x111   :  { %2367 = vmatpush.bf16.msrb.mxu3 %v8021_v46  ;;  %v9929_v46 = vld [vmem:[#allocation26_spill] sm:$0xff] }
 0x112   :  { %2258 = vmatpush.bf16.msrb.mxu0 %v7642_v56  ;;  %v2339_v56 = vshll.u32 %v2292_v3, 16 }
 0x113   :  { %2272 = vmatpush.bf16.msrb.mxu1 %v8025_v4  ;;  %v2326_v4 = vsel %vm970_vm2, %v2317_v36, %v2325_v15  ;;  %v9941_v36 = vld [vmem:[#allocation39_spill] sm:$0xff]  ;;  %v2391_v15 = vld [vmem:[#allocation2 + $0x48] sm:$0xf0] }
 0x114   :  { %2354 = vmatpush.bf16.msrb.mxu2 %v8027_v63  ;;  %v8317_v63 = vpop.f32.mrf.mxu2 }
 0x115   :  { %2368 = vmatpush.bf16.msrb.mxu3 %v9929_v46  ;;  %2259 = vmatmul.bf16.vlgmr.msrb.gmra.mxu0 %v2230_v40  ;;  %v9942_v40 = vld [vmem:[#allocation40_spill] sm:$0xff] }
 0x116   :  { %2375 = vmatpush.bf16.msra.mxu0 %v7643_v14  ;;  %2273 = vmatmul.bf16.vlgmr.msrb.gmra.mxu1 %v2233_v54  ;;  %v8333_v1 = vpop.f32.mrf.mxu0  ;;  %v2394_v14 = vld [vmem:[#allocation2 + $0x78] sm:$0xf]  ;;  %v2392_v54 = vld [vmem:[#allocation2 + $0x50] sm:$0xf0]  ;;  %v7648_v46 = vld [vmem:[#allocation5 + $0x2d0] sm:$0xff] }
 0x117   :  { %2421 = vmatpush.bf16.msra.mxu1 %v8032_v13  ;;  %2355 = vmatmul.bf16.vlgmr.msrb.gmra.mxu2 %v2309_v57  ;;  %v8319_v13 = vpop.f32.mrf.mxu3  ;;  %v2330_v57 = vrot.slane %v2328_v12, 1  ;;  %v8351_v3 = vpop.f32.mrf.mxu1 }
 0x118   :  { %2435 = vmatpush.bf16.msra.mxu2 %v9928_v16  ;;  %2369 = vmatmul.bf16.vlgmr.msrb.gmra.mxu3 %v2326_v4  ;;  %v2395_v16 = vld [vmem:[#allocation2 + $0x80] sm:$0xf]  ;;  %v2393_v4 = vld [vmem:[#allocation2 + $0x58] sm:$0xf0] }
 0x119   :  { %2449 = vmatpush.bf16.msra.mxu3 %v9930_v60  ;;  %v2333_v60 = vrot.slane %v2331_v59, 2  ;;  %v2401_v43 = vpack.c.bf16 %v2395_v16, %v2395_v16 }
 0x11a   :  { %2376 = vmatpush.bf16.msra.mxu0 %v7644_v17  ;;  %v2396_v17 = vld [vmem:[#allocation2 + $0x88] sm:$0xf] }
 0x11b   :  { %2422 = vmatpush.bf16.msra.mxu1 %v9931_v61  ;;  %v9943_v61 = vld [vmem:[#allocation41_spill] sm:$0xff]  ;;  %v2402_v55 = vpack.c.bf16 %v2396_v17, %v2396_v17 }
 0x11c   :  { %2436 = vmatpush.bf16.msra.mxu2 %v9932_v52  ;;  %v8336_v2 = vpop.f32.mrf.mxu2  ;;  %v2338_v52 = vrot.slane %v2336_v47, 1 }
 0x11d   :  { %2450 = vmatpush.bf16.msra.mxu3 %v9933_v25  ;;  %v2341_v25 = vrot.slane %v2339_v56, 2  ;;  %v2416_v16 = vrot.slane %v2402_v55, 2  ;;  %v9956_v55 = vld [vmem:[#allocation54_spill] sm:$0xff] }
 0x11e   :  { %2377 = vmatpush.bf16.msra.mxu0 %v7645_v26  ;;  %v2397_v26 = vpack.c.bf16 %v8228_v29, %v2391_v15 }
 0x11f   :  { %2423 = vmatpush.bf16.msra.mxu1 %v9934_v27  ;;  %v8338_v10 = vpop.f32.mrf.mxu3  ;;  %v2400_v27 = vpack.c.bf16 %v2394_v14, %v2394_v14  ;;  %v2342_v12 = vor.u32 %v2341_v25, %v2338_v52  ;;  %v2413_v14 = vrot.slane %v2401_v43, 2  ;;  %v9952_v52 = vld [vmem:[#allocation49_spill] sm:$0xff] }
 0x120   :  { %2437 = vmatpush.bf16.msra.mxu2 %v9935_v0  ;;  %v2398_v0 = vpack.c.bf16 %v8223_v53, %v2392_v54  ;;  %v2409_v59 = vrot.slane %v2397_v26, 2  ;;  %v9953_v26 = vld [vmem:[#allocation51_spill] sm:$0xff]  ;;  %v7652_v43 = vld [vmem:[#allocation5 + $0x3f0] sm:$0xff] }
 0x121   :  { %2451 = vmatpush.bf16.msra.mxu3 %v9936_v48  ;;  %v9945_v48 = vld [vmem:[#allocation43_spill] sm:$0xff] }
 0x122   :  { %2378 = vmatpush.bf16.msra.mxu0 %v7646_v49  ;;  %v2399_v49 = vpack.c.bf16 %v8225_v11, %v2393_v4  ;;  %v2412_v15 = vrot.slane %v2398_v0, 2  ;;  %v9950_v4 = vld [vmem:[#allocation47_spill] sm:$0xff] }
 0x123   :  { %2424 = vmatpush.bf16.msra.mxu1 %v9937_v35  ;;  %v7649_v35 = vld [vmem:[#allocation5 + $0x2c8] sm:$0xff] }
 0x124   :  { %2438 = vmatpush.bf16.msra.mxu2 %v9938_v9  ;;  %v8353_v9 = vpop.f32.mrf.mxu0  ;;  %v8356_v47 = vpop.f32.mrf.mxu2  ;;  %v2415_v54 = vrot.slane %v2399_v49, 2  ;;  %v2414_v25 = vsel %vm1280_vm3, %v2412_v15, %v2413_v14  ;;  %v9959_v15 = vld [vmem:[#allocation57_spill] sm:$0xff]  ;;  %v9960_v14 = vld [vmem:[#allocation55_spill] sm:$0xff] }
 0x125   :  { %2452 = vmatpush.bf16.msra.mxu3 %v9939_v5  ;;  %v9946_v5 = vld [vmem:[#allocation44_spill] sm:$0xff]  ;;  %v8374_v49 = vpop.f32.mrf.mxu1 }
 0x126   :  { %2379 = vmatpush.bf16.msra.mxu0 %v7647_v50  ;;  %v2334_v50 = vor.u32 %v2333_v60, %v2330_v57  ;;  %v7651_v57 = vld [vmem:[#allocation5 + $0x3f8] sm:$0xff] }
 0x127   :  { %2425 = vmatpush.bf16.msra.mxu1 %v9940_v23  ;;  %v2410_v23 = vrot.slane %v2400_v27, 2  ;;  %v8358_v56 = vpop.f32.mrf.mxu3  ;;  %v9954_v27 = vld [vmem:[#allocation50_spill] sm:$0xff] }
 0x128   :  { %2439 = vmatpush.bf16.msra.mxu2 %v9941_v36  ;;  %9947 = vst [vmem:[#allocation15_spill] sm:$0xff] %v8358_v56  ;;  %v9948_v36 = vld [vmem:[#allocation45_spill] sm:$0xff]  ;;  %v2343_v60 = vsel %vm970_vm2, %v2334_v50, %v2342_v12  ;;  %v7653_v12 = vld [vmem:[#allocation5 + $0x3e8] sm:$0xff] }
 0x129   :  { %2453 = vmatpush.bf16.msra.mxu3 %v9942_v40  ;;  %v9949_v40 = vld [vmem:[#allocation46_spill] sm:$0xff]  ;;  %v2411_v17 = vsel %vm1280_vm3, %v2409_v59, %v2410_v23  ;;  %v9958_v59 = vld [vmem:[#allocation56_spill] sm:$0xff] }
 0x12a   :  { %2380 = vmatpush.bf16.msra.mxu0 %v7648_v46  ;;  %v7650_v46 = vld [vmem:[#allocation5 + $0x2c0] sm:$0xff]  ;;  %v2465_v23 = vld [vmem:[#allocation2 + $0x48] sm:$0xe0] }
 0x12b   :  { %2426 = vmatpush.bf16.msra.mxu1 %v9943_v61  ;;  %v9951_v61 = vld [vmem:[#allocation48_spill] sm:$0xff] }
 0x12c   :  { %2440 = vmatpush.bf16.msra.mxu2 %v9944_v39  ;;  %v2417_v39 = vsel %vm1280_vm3, %v2415_v54, %v2416_v16  ;;  %v8371_v0 = vpop.f32.mrf.mxu0  ;;  %v2469_v54 = vld [vmem:[#allocation2 + $0x80] sm:$0x1f]  ;;  %v2467_v16 = vld [vmem:[#allocation2 + $0x58] sm:$0xe0] }
 0x12d   :  { %2454 = vmatpush.bf16.msra.mxu3 %v9945_v48  ;;  %v9955_v48 = vld [vmem:[#allocation53_spill] sm:$0xff] }
 0x12e   :  { %2381 = vmatpush.bf16.msra.mxu0 %v7649_v35  ;;  %v9957_v35 = vld [vmem:[#allocation52_spill] sm:$0xff] }
 0x12f   :  { %2427 = vmatpush.bf16.msra.mxu1 %v9946_v5  ;;  %v8378_v5 = vpop.f32.mrf.mxu2  ;;  %v8380_v50 = vpop.f32.mrf.mxu3 }
 0x130   :  { %2441 = vmatpush.bf16.msra.mxu2 %v9948_v36  ;;  %v2468_v36 = vld [vmem:[#allocation2 + $0x78] sm:$0x1f] }
 0x131   :  { %2455 = vmatpush.bf16.msra.mxu3 %v9949_v40  ;;  %v2466_v40 = vld [vmem:[#allocation2 + $0x50] sm:$0xe0] }
 0x132   :  { %2382 = vmatpush.bf16.msra.mxu0 %v7650_v46  ;;  %v2470_v46 = vld [vmem:[#allocation2 + $0x88] sm:$0x1f] }
 0x133   :  { %2428 = vmatpush.bf16.msra.mxu1 %v9950_v4  ;;  %v7654_v4 = vld [vmem:[#allocation5 + $0x3e0] sm:$0xff] }
 0x134   :  { %2442 = vmatpush.bf16.msra.mxu2 %v9951_v61  ;;  %v2472_v61 = vpack.c.bf16 %v8223_v53, %v2466_v40 }
 0x135   :  { %2456 = vmatpush.bf16.msra.mxu3 %v9954_v27  ;;  %2383 = vmatmul.bf16.vlgmr.msra.gmra.mxu0 %v2343_v60  ;;  %v2474_v60 = vpack.c.bf16 %v2468_v36, %v2468_v36  ;;  %v9962_v27 = vld [vmem:[#allocation60_spill] sm:$0xff] }
 0x136   :  { %2531 = vmatpush.bf16.msrb.mxu0 %v7651_v57  ;;  %2429 = vmatmul.bf16.vlgmr.msra.gmra.mxu1 %v2411_v17  ;;  %v2471_v57 = vpack.c.bf16 %v8228_v29, %v2465_v23  ;;  %v9961_v17 = vld [vmem:[#allocation59_spill] sm:$0xff]  ;;  %v2495_v40 = vshrl.u32 %v2472_v61, 16 }
 0x137   :  { %2545 = vmatpush.bf16.msrb.mxu1 %v9952_v52  ;;  %2443 = vmatmul.bf16.vlgmr.msra.gmra.mxu2 %v2414_v25  ;;  %v2475_v52 = vpack.c.bf16 %v2469_v54, %v2469_v54  ;;  %v8388_v25 = vpop.f32.mrf.mxu1  ;;  %v2486_v36 = vshrl.u32 %v2474_v60, 16  ;;  %v2498_v54 = vshll.u32 %v2472_v61, 16 }
 0x138   :  { %2559 = vmatpush.bf16.msrb.mxu2 %v9953_v26  ;;  %2457 = vmatmul.bf16.vlgmr.msra.gmra.mxu3 %v2417_v39  ;;  %v8390_v26 = vpop.f32.mrf.mxu0  ;;  %v9963_v39 = vld [vmem:[#allocation58_spill] sm:$0xff]  ;;  %v2481_v23 = vshll.u32 %v2471_v57, 16 }
 0x139   :  { %2605 = vmatpush.bf16.msrb.mxu3 %v9957_v35  ;;  %v8397_v35 = vpop.f32.mrf.mxu3  ;;  %v2488_v53 = vrot.slane %v2486_v36, 2  ;;  %v2500_v61 = vrot.slane %v2498_v54, 3 }
 0x13a   :  { %2532 = vmatpush.bf16.msrb.mxu0 %v7652_v43  ;;  %v2473_v43 = vpack.c.bf16 %v8225_v11, %v2467_v16  ;;  %9965 = vst [vmem:[#allocation17_spill] sm:$0xff] %v8397_v35  ;;  %v9968_v16 = vld [vmem:[#allocation61_spill] sm:$0xff] }
 0x13b   :  { %2546 = vmatpush.bf16.msrb.mxu1 %v9955_v48  ;;  %v2476_v48 = vpack.c.bf16 %v2470_v46, %v2470_v46 }
 0x13c   :  { %2560 = vmatpush.bf16.msrb.mxu2 %v9956_v55  ;;  %v8395_v55 = vpop.f32.mrf.mxu2  ;;  %v2512_v46 = vshrl.u32 %v2473_v43, 16 }
 0x13d   :  { %2606 = vmatpush.bf16.msrb.mxu3 %v9960_v14  ;;  %9964 = vst [vmem:[#allocation16_spill] sm:$0xff] %v8395_v55  ;;  %v9966_v14 = vld [vmem:[#allocation62_spill] sm:$0xff]  ;;  %v2520_v19 = vshrl.u32 %v2476_v48, 16  ;;  %v2523_v11 = vshll.u32 %v2476_v48, 16 }
 0x13e   :  { %2533 = vmatpush.bf16.msrb.mxu0 %v7653_v12  ;;  %v7655_v12 = vld [vmem:[#allocation5 + $0x3d8] sm:$0xff] }
 0x13f   :  { %2547 = vmatpush.bf16.msrb.mxu1 %v9958_v59  ;;  %v2478_v59 = vshrl.u32 %v2471_v57, 16  ;;  %v2483_v57 = vrot.slane %v2481_v23, 3  ;;  %v2522_v56 = vrot.slane %v2520_v19, 2  ;;  %v2525_v48 = vrot.slane %v2523_v11, 3  ;;  %v6736_v23 = vld [vmem:[#allocation7 + $0xe0] sm:$0xf] }
 0x140   :  { %2561 = vmatpush.bf16.msrb.mxu2 %v9959_v15  ;;  %v2489_v15 = vshll.u32 %v2474_v60, 16  ;;  %v8403_v35 = vpop.f32.mrf.mxu0  ;;  %v2575_v19 = vld [vmem:[#allocation2 + $0x48] sm:$0xc0]  ;;  %v2578_v11 = vld [vmem:[#allocation2 + $0x78] sm:$0x3f] }
 0x141   :  { %2607 = vmatpush.bf16.msrb.mxu3 %v9963_v39  ;;  %v2515_v39 = vshll.u32 %v2473_v43, 16  ;;  %9970 = vst [vmem:[#allocation18_spill] sm:$0xff] %v8403_v35  ;;  %v8411_v54 = vpop.f32.mrf.mxu3  ;;  %v7658_v35 = vld [vmem:[#allocation5 + $0x3c0] sm:$0xff] }
 0x142   :  { %2534 = vmatpush.bf16.msrb.mxu0 %v7654_v4  ;;  %v2503_v4 = vshrl.u32 %v2475_v52, 16  ;;  %v2491_v60 = vrot.slane %v2489_v15, 3 }
 0x143   :  { %2548 = vmatpush.bf16.msrb.mxu1 %v9961_v17  ;;  %v2506_v17 = vshll.u32 %v2475_v52, 16  ;;  %v2517_v43 = vrot.slane %v2515_v39, 3  ;;  %v2526_v39 = vor.u32 %v2525_v48, %v2522_v56  ;;  %v326_v56 = vadd.f32 %v8278_v44, %v8267_v42  ;;  %v6704_v42 = vld [vmem:[#allocation7 + $0xa0] sm:$0xf]  ;;  %v7246_v44 = vld [vmem:[#allocation7 + $0xac] sm:$0xf0] }
 0x144   :  { %2562 = vmatpush.bf16.msrb.mxu2 %v9962_v27  ;;  %v9967_v27 = vld [vmem:[#allocation63_spill] sm:$0xff]  ;;  %v2505_v55 = vrot.slane %v2503_v4, 2  ;;  %v2492_v15 = vor.u32 %v2491_v60, %v2488_v53  ;;  %v9973_v4 = vld [vmem:[#allocation68_spill] sm:$0xff]  ;;  %v2581_v60 = vpack.c.bf16 %v8228_v29, %v2575_v19  ;;  %v621_v48 = vadd.f32 %v8298_v6, %v8285_v8 }
 0x145   :  { %2608 = vmatpush.bf16.msrb.mxu3 %v9968_v16  ;;  %v2508_v52 = vrot.slane %v2506_v17, 3  ;;  %v2514_v16 = vrot.slane %v2512_v46, 2  ;;  %v6720_v53 = vld [vmem:[#allocation7 + $0xc0] sm:$0xf]  ;;  %v1195_v8 = vadd.f32 %v8378_v5, %v8374_v49 }
 0x146   :  { %2535 = vmatpush.bf16.msrb.mxu0 %v7655_v12  ;;  %v2480_v12 = vrot.slane %v2478_v59, 2  ;;  %v7657_v59 = vld [vmem:[#allocation5 + $0x3c8] sm:$0xff]  ;;  %v6672_v5 = vld [vmem:[#allocation7 + $0x60] sm:$0xf] }
 0x147   :  { %2549 = vmatpush.bf16.msrb.mxu1 %v9966_v14  ;;  %v2497_v14 = vrot.slane %v2495_v40, 2  ;;  %v8409_v40 = vpop.f32.mrf.mxu2  ;;  %v2509_v46 = vor.u32 %v2508_v52, %v2505_v55  ;;  %v7659_v55 = vld [vmem:[#allocation5 + $0x4f8] sm:$0xff] }
 0x148   :  { %2563 = vmatpush.bf16.msrb.mxu2 %v9967_v27  ;;  %v9971_v27 = vld [vmem:[#allocation66_spill] sm:$0xff]  ;;  %v2484_v36 = vor.u32 %v2483_v57, %v2480_v12  ;;  %v7250_v12 = vld [vmem:[#allocation7 + $0xcc] sm:$0xf0]  ;;  %v1766_v52 = vpop.f32.mrf.mxu0 }
 0x149   :  { %2609 = vmatpush.bf16.msrb.mxu3 %v9972_v18  ;;  %v2501_v17 = vor.u32 %v2500_v61, %v2497_v14  ;;  %v2518_v18 = vor.u32 %v2517_v43, %v2514_v16  ;;  %v328_v14 = vadd.f32 %v8296_v24, %v8280_v30  ;;  %v6721_v29 = vor.u32 %v7250_v12, %v6720_v53  ;;  %v2032_v16 = vpop.f32.mrf.mxu3  ;;  %v9977_v53 = vld [vmem:[#allocation17_spill] sm:$0xff] }
 0x14a   :  { %2536 = vmatpush.bf16.msrb.mxu0 %v7656_v38  ;;  %v8407_v38 = vpop.f32.mrf.mxu1  ;;  %v2493_v57 = vsel %vm1542_vm4, %v2484_v36, %v2492_v15  ;;  %v2593_v30 = vrot.slane %v2581_v60, 3  ;;  %v340_v43 = vadd.f32 %v8283_v7, %v326_v56  ;;  %v6688_v7 = vld [vmem:[#allocation7 + $0x80] sm:$0xf]  ;;  %v7242_v36 = vld [vmem:[#allocation7 + $0x8c] sm:$0xf0]  ;;  %v7663_v56 = vld [vmem:[#allocation5 + $0x4d8] sm:$0xff] }
 0x14b   :  { %2550 = vmatpush.bf16.msrb.mxu1 %v9969_v34  ;;  %v7254_v34 = vld [vmem:[#allocation7 + $0xec] sm:$0xf0] }
 0x14c   :  { %2564 = vmatpush.bf16.msrb.mxu2 %v9971_v27  ;;  %v9974_v27 = vld [vmem:[#allocation67_spill] sm:$0xff]  ;;  %v7234_v12 = vld [vmem:[#allocation7 + $0x4c] sm:$0xf0] }
 0x14d   :  { %2610 = vmatpush.bf16.msrb.mxu3 %v9974_v27 }
 0x14e   :  { %2537 = vmatpush.bf16.msrb.mxu0 %v7657_v59  ;;  %v6737_v59 = vor.u32 %v7254_v34, %v6736_v23  ;;  %v6705_v23 = vor.u32 %v7246_v44, %v6704_v42 }
 0x14f   :  { %2551 = vmatpush.bf16.msrb.mxu1 %v9973_v4  ;;  %v2584_v4 = vpack.c.bf16 %v2578_v11, %v2578_v11  ;;  %v2018_v24 = vpop.f32.mrf.mxu2 }
 0x150   :  { %2565 = vmatpush.bf16.msrb.mxu2 %v8174_v37  ;;  %v2510_v37 = vsel %vm1542_vm4, %v2501_v17, %v2509_v46  ;;  %v7238_v17 = vld [vmem:[#allocation7 + $0x6c] sm:$0xf0] }
 0x151   :  { %2611 = vmatpush.bf16.msrb.mxu3 %v8179_v22  ;;  %v891_v22 = vadd.f32 %v8338_v10, %v8336_v2  ;;  %v635_v10 = vadd.f32 %v8322_v41, %v621_v48  ;;  %v1209_v41 = vadd.f32 %v8380_v50, %v1195_v8  ;;  %v9983_v8 = vld [vmem:[#allocation75_spill] sm:$0xff] }
 0x152   :  { %2538 = vmatpush.bf16.msrb.mxu0 %v7658_v35  ;;  %v2527_v35 = vsel %vm1542_vm4, %v2518_v18, %v2526_v39  ;;  %v8429_v61 = vpop.f32.mrf.mxu1  ;;  %v9976_v18 = vld [vmem:[#allocation15_spill] sm:$0xff] }
 0x153   :  { %2552 = vmatpush.bf16.msrb.mxu1 %v8183_v20  ;;  %v623_v20 = vadd.f32 %v8324_v62, %v8303_v31  ;;  %v8436_v31 = vld [vmem:[%s9749_s2] ss:$0 sm:$0xff]  ;;  %v342_v62 = vadd.f32 %v8301_v28, %v328_v14  ;;  %v889_v28 = vadd.f32 %v8319_v13, %v8317_v63  ;;  %v1463_v63 = vadd.f32 %v8407_v38, %v8390_v26  ;;  %v9975_v38 = vld [vmem:[#allocation69_spill] sm:$0xff] }
 0x154   :  { %2566 = vmatpush.bf16.msrb.mxu2 %v8187_v33  ;;  %v2594_v33 = vrot.slane %v2584_v4, 3  ;;  %v347_v6 = vadd.f32 %v8436_v31, %v340_v43  ;;  %v6689_v13 = vor.u32 %v7242_v36, %v6688_v7  ;;  %v9979_v4 = vld [vmem:[#allocation16_spill] sm:$0xff]  ;;  %v2033_v14 = vadd.f32 %v2032_v16, %v2018_v24  ;;  %v6640_v43 = vld [vmem:[#allocation7 + $0x20] sm:$0xf] }
 0x155   :  { %2539 = vmatmul.bf16.vlgmr.msrb.gmra.mxu0 %v2493_v57  ;;  %v637_v34 = vadd.f32 %v8340_v21, %v623_v20  ;;  %2612 = vmatpush.bf16.msrb.mxu3 %v8192_v45  ;;  %v348_v2 = vadd.f32 %v8436_v31, %v342_v62  ;;  %v1193_v21 = vadd.f32 %v8356_v47, %v8351_v3  ;;  %v2046_v47 = vpop.f32.mrf.mxu0  ;;  %v2579_v20 = vld [vmem:[#allocation2 + $0x80] sm:$0x3f]  ;;  %v9981_v24 = vld [vmem:[#allocation74_spill] sm:$0xff] }
 0x156   :  { %2619 = vmatpush.bf16.msra.mxu0 %v7659_v55  ;;  %2553 = vmatmul.bf16.vlgmr.msrb.gmra.mxu1 %v2510_v37  ;;  %v2595_v15 = vsel %vm1852_vm5, %v2593_v30, %v2594_v33  ;;  %v905_v45 = vadd.f32 %v8353_v9, %v891_v22  ;;  %v903_v46 = vadd.f32 %v8333_v1, %v889_v28  ;;  %v7662_v9 = vld [vmem:[#allocation5 + $0x4e0] sm:$0xff]  ;;  %v2577_v30 = vld [vmem:[#allocation2 + $0x58] sm:$0xc0]  ;;  %v2580_v33 = vld [vmem:[#allocation2 + $0x88] sm:$0x3f] }
 0x157   :  { %2633 = vmatpush.bf16.msra.mxu1 %v8189_v58  ;;  %2567 = vmatmul.bf16.vlgmr.msrb.gmra.mxu2 %v2527_v35  ;;  %v7660_v58 = vld [vmem:[#allocation5 + $0x4f0] sm:$0xff]  ;;  %v640_v49 = vadd.f32 %v637_v34, %v348_v2  ;;  %v1461_v3 = vadd.f32 %v8388_v25, %v8371_v0  ;;  %v639_v19 = vadd.f32 %v635_v10, %v347_v6  ;;  %v2020_v50 = vpop.f32.mrf.mxu2  ;;  %v9978_v0 = vld [vmem:[#allocation18_spill] sm:$0xff]  ;;  %v9982_v28 = vld [vmem:[#allocation71_spill] sm:$0xff] }
 0x158   :  { %3047 = vmatpush.bf16.msra.mxu2 %v6737_v59  ;;  %2613 = vmatmul.bf16.vlgmr.msrb.gmra.mxu3 %v2595_v15  ;;  %v1207_v39 = vadd.f32 %v9976_v18, %v1193_v21  ;;  %v1477_v27 = vadd.f32 %v8409_v40, %v1463_v63  ;;  %v6673_v1 = vor.u32 %v7238_v17, %v6672_v5  ;;  %v2034_v59 = vpop.f32.mrf.mxu3  ;;  %v9980_v35 = vld [vmem:[#allocation70_spill] sm:$0xff]  ;;  %v7230_v62 = vld [vmem:[#allocation7 + $0x2c] sm:$0xf0]  ;;  %v6738_v10 = vld [vmem:[#allocation7 + $0xf0] sm:$0xf0] }
 0x159   :  { %v908_v11 = vadd.f32 %v905_v45, %v640_v49  ;;  %v1765_v25 = vadd.f32 %v9978_v0, %v9977_v53  ;;  %v907_v57 = vadd.f32 %v903_v46, %v639_v19  ;;  %v1475_v55 = vadd.f32 %v9979_v4, %v1461_v3  ;;  %v7664_v34 = vld [vmem:[#allocation5 + $0x4d0] sm:$0xff]  ;;  %v6624_v63 = vld [vmem:[#allocation7] sm:$0xf]  ;;  %v7665_v49 = vld [vmem:[#allocation5 + $0x4c8] sm:$0xff] }
 0x15a   :  { %2620 = vmatpush.bf16.msra.mxu0 %v7660_v58  ;;  %v1780_v26 = vpop.f32.mrf.mxu1  ;;  %v2035_v40 = vadd.f32 %v2034_v59, %v2020_v50  ;;  %v2585_v7 = vpack.c.bf16 %v2579_v20, %v2579_v20  ;;  %v2047_v36 = vadd.f32 %v2046_v47, %v2033_v14  ;;  %v2586_v6 = vpack.c.bf16 %v2580_v33, %v2580_v33  ;;  %v6744_v5 = vld [vmem:[#allocation7 + $0xe8] sm:$0xf]  ;;  %v7255_v17 = vld [vmem:[#allocation7 + $0xf4] sm:$0xf0]  ;;  %v7240_v14 = vld [vmem:[#allocation7 + $0x84] sm:$0xf] }
 0x15b   :  { %2634 = vmatpush.bf16.msra.mxu1 %v8198_v32  ;;  %v7661_v32 = vld [vmem:[#allocation5 + $0x4e8] sm:$0xff]  ;;  %v1212_v60 = vadd.f32 %v1209_v41, %v908_v11  ;;  %v1779_v58 = vadd.f32 %v8429_v61, %v1765_v25  ;;  %v6641_v2 = vor.u32 %v7230_v62, %v6640_v43  ;;  %v7252_v61 = vld [vmem:[#allocation7 + $0xe4] sm:$0xf]  ;;  %v6722_v11 = vld [vmem:[#allocation7 + $0xd0] sm:$0xf0] }
 0x15c   :  { %3048 = vmatpush.bf16.msra.mxu2 %v6721_v29  ;;  %v2576_v29 = vld [vmem:[#allocation2 + $0x50] sm:$0xc0]  ;;  %v2597_v41 = vrot.slane %v2585_v7, 3  ;;  %v6741_v47 = vor.u32 %v7252_v61, %v6738_v10  ;;  %v2600_v19 = vrot.slane %v2586_v6, 3  ;;  %v6728_v50 = vld [vmem:[#allocation7 + $0xc8] sm:$0xf] }
 0x15d   :  { %v1480_v42 = vadd.f32 %v1477_v27, %v1212_v60  ;;  %v2582_v16 = vpack.c.bf16 %v9981_v24, %v2576_v29  ;;  %v7666_v27 = vld [vmem:[#allocation5 + $0x4c0] sm:$0xff]  ;;  %v7251_v59 = vld [vmem:[#allocation7 + $0xd4] sm:$0xf0]  ;;  %v6696_v29 = vld [vmem:[#allocation7 + $0x88] sm:$0xf] }
 0x15e   :  { %2621 = vmatpush.bf16.msra.mxu0 %v7661_v32  ;;  %v2583_v32 = vpack.c.bf16 %v9983_v8, %v2577_v30  ;;  %v9985_v0 = vld [vmem:[#allocation73_spill] sm:$0xff]  ;;  %v6729_v4 = vor.u32 %v7251_v59, %v6728_v50  ;;  %v6680_v33 = vld [vmem:[#allocation7 + $0x68] sm:$0xf]  ;;  %v7232_v62 = vld [vmem:[#allocation7 + $0x44] sm:$0xf] }
 0x15f   :  { %2635 = vmatpush.bf16.msra.mxu1 %v8205_v51  ;;  %v1767_v51 = vadd.f32 %v1766_v52, %v8411_v54  ;;  %v6656_v54 = vld [vmem:[#allocation7 + $0x40] sm:$0xf]  ;;  %v1211_v52 = vadd.f32 %v1207_v39, %v907_v57  ;;  %v2596_v46 = vrot.slane %v2582_v16, 3  ;;  %v6745_v39 = vor.u32 %v7255_v17, %v6744_v5  ;;  %v6706_v57 = vld [vmem:[#allocation7 + $0xb0] sm:$0xf0] }
 0x160   :  { %3049 = vmatpush.bf16.msra.mxu2 %v6705_v23  ;;  %v6657_v44 = vor.u32 %v7234_v12, %v6656_v54  ;;  %v2048_v23 = vpop.f32.mrf.mxu0  ;;  %v7244_v12 = vld [vmem:[#allocation7 + $0xa4] sm:$0xf]  ;;  %v7243_v20 = vld [vmem:[#allocation7 + $0x94] sm:$0xf0]  ;;  %v6642_v7 = vld [vmem:[#allocation7 + $0x30] sm:$0xf0] }
 0x161   :  { %v1781_v37 = vadd.f32 %v1780_v26, %v1767_v51  ;;  %v1479_v48 = vadd.f32 %v1475_v55, %v1211_v52  ;;  %v2049_v15 = vadd.f32 %v2048_v23, %v2035_v40  ;;  %v9984_v51 = vld [vmem:[#allocation72_spill] sm:$0xff]  ;;  %v6697_v30 = vor.u32 %v7243_v20, %v6696_v29  ;;  %v7228_v16 = vld [vmem:[#allocation7 + $0x24] sm:$0xf]  ;;  %v6626_v6 = vld [vmem:[#allocation7 + $0x10] sm:$0xf0] }
 0x162   :  { %2622 = vmatpush.bf16.msra.mxu0 %v7662_v9  ;;  %v2599_v9 = vrot.slane %v2583_v32, 3  ;;  %v6712_v55 = vld [vmem:[#allocation7 + $0xa8] sm:$0xf]  ;;  %v6645_v8 = vor.u32 %v7228_v16, %v6642_v7  ;;  %v7224_v32 = vld [vmem:[#allocation7 + $0x4] sm:$0xf] }
 0x163   :  { %2636 = vmatpush.bf16.msra.mxu1 %v9975_v38  ;;  %v1784_v22 = vadd.f32 %v1781_v37, %v1480_v42  ;;  %v1783_v21 = vadd.f32 %v1779_v58, %v1479_v48  ;;  %v7248_v38 = vld [vmem:[#allocation7 + $0xc4] sm:$0xf]  ;;  %v7247_v37 = vld [vmem:[#allocation7 + $0xb4] sm:$0xf0]  ;;  %v6658_v48 = vld [vmem:[#allocation7 + $0x50] sm:$0xf0] }
 0x164   :  { %3050 = vmatpush.bf16.msra.mxu2 %v6689_v13  ;;  %v7226_v13 = vld [vmem:[#allocation7 + $0xc] sm:$0xf0]  ;;  %v2601_v25 = vsel %vm1852_vm5, %v2599_v9, %v2600_v19  ;;  %v6725_v54 = vor.u32 %v7248_v38, %v6722_v11  ;;  %v6713_v40 = vor.u32 %v7247_v37, %v6712_v55  ;;  %v7236_v42 = vld [vmem:[#allocation7 + $0x64] sm:$0xf]  ;;  %v7239_v58 = vld [vmem:[#allocation7 + $0x74] sm:$0xf0]  ;;  %v6661_v24 = vor.u32 %v7232_v62, %v6658_v48  ;;  %v8485_v19 = vpop.f32.mrf.mxu1 }
 0x165   :  { %v2052_v45 = vadd.f32 %v2049_v15, %v1784_v22  ;;  %v2051_v3 = vadd.f32 %v2047_v36, %v1783_v21  ;;  %v6625_v26 = vor.u32 %v7226_v13, %v6624_v63  ;;  %v6681_v22 = vor.u32 %v7239_v58, %v6680_v33  ;;  %v6664_v23 = vld [vmem:[#allocation7 + $0x48] sm:$0xf]  ;;  %v7253_v61 = vld [vmem:[#allocation7 + $0xec] sm:$0xf]  ;;  %v6746_v10 = vld [vmem:[#allocation7 + $0xf8] sm:$0xf0] }
 0x166   :  { %2623 = vmatpush.bf16.msra.mxu0 %v7663_v56  ;;  %v6709_v56 = vor.u32 %v7244_v12, %v6706_v57  ;;  %v6648_v15 = vld [vmem:[#allocation7 + $0x28] sm:$0xf]  ;;  %v6629_v63 = vor.u32 %v7224_v32, %v6626_v6  ;;  %v6749_v13 = vor.u32 %v7253_v61, %v6746_v10  ;;  %v7249_v5 = vld [vmem:[#allocation7 + $0xcc] sm:$0xf]  ;;  %v6730_v17 = vld [vmem:[#allocation7 + $0xd8] sm:$0xf0]  ;;  %v8491_v57 = vpop.f32.mrf.mxu3 }
 0x167   :  { %2637 = vmatpush.bf16.msra.mxu1 %v9980_v35  ;;  %v2054_v18 = vmax.f32 %v2052_v45, 0.0  ;;  %v2053_v53 = vmax.f32 %v2051_v3, 0.0  ;;  %v6690_v35 = vld [vmem:[#allocation7 + $0x90] sm:$0xf0]  ;;  %v6632_v21 = vld [vmem:[#allocation7 + $0x8] sm:$0xf] }
 0x168   :  { %3051 = vmatpush.bf16.msra.mxu2 %v6673_v1  ;;  %v2598_v1 = vsel %vm1852_vm5, %v2596_v46, %v2597_v41  ;;  %v6693_v52 = vor.u32 %v7240_v14, %v6690_v35  ;;  %v7227_v45 = vld [vmem:[#allocation7 + $0x14] sm:$0xf0]  ;;  %v6733_v46 = vor.u32 %v7249_v5, %v6730_v17  ;;  %v7245_v41 = vld [vmem:[#allocation7 + $0xac] sm:$0xf]  ;;  %v6714_v3 = vld [vmem:[#allocation7 + $0xb8] sm:$0xf0] }
 0x169   :  { %v8480_v60 = vpack.c.bf16 %v2054_v18, %v2053_v53  ;;  %v6698_v9 = vld [vmem:[#allocation7 + $0x98] sm:$0xf0]  ;;  %v7237_v38 = vld [vmem:[#allocation7 + $0x6c] sm:$0xf]  ;;  %v6864_v14 = vld [vmem:[#allocation7 + $0x1e0] sm:$0xf] }
 0x16a   :  { %2624 = vmatpush.bf16.msra.mxu0 %v7664_v34  ;;  %v7235_v34 = vld [vmem:[#allocation7 + $0x54] sm:$0xf0]  ;;  %v6682_v11 = vld [vmem:[#allocation7 + $0x78] sm:$0xf0]  ;;  %v7229_v53 = vld [vmem:[#allocation7 + $0x2c] sm:$0xf] }
 0x16b   :  { %2638 = vmatpush.bf16.msra.mxu1 %v9982_v28  ;;  %v6665_v36 = vor.u32 %v7235_v34, %v6664_v23  ;;  %v7231_v28 = vld [vmem:[#allocation7 + $0x34] sm:$0xf0]  ;;  %v6685_v18 = vor.u32 %v7237_v38, %v6682_v11  ;;  %v6634_v12 = vld [vmem:[#allocation7 + $0x18] sm:$0xf0]  ;;  %v7286_v35 = vld [vmem:[#allocation7 + $0x1ec] sm:$0xf0] }
 0x16c   :  { %3052 = vmatpush.bf16.msra.mxu2 %v6657_v44  ;;  %v6674_v44 = vld [vmem:[#allocation7 + $0x70] sm:$0xf0]  ;;  %v8489_v59 = vpop.f32.mrf.mxu1  ;;  %v6865_v29 = vor.u32 %v7286_v35, %v6864_v14  ;;  %v6832_v62 = vld [vmem:[#allocation7 + $0x1a0] sm:$0xf]  ;;  %v7278_v48 = vld [vmem:[#allocation7 + $0x1ac] sm:$0xf0] }
 0x16d   :  { %v6677_v43 = vor.u32 %v7236_v42, %v6674_v44  ;;  %v6866_v20 = vld [vmem:[#allocation7 + $0x1f0] sm:$0xf0]  ;;  %v6848_v42 = vld [vmem:[#allocation7 + $0x1c0] sm:$0xf]  ;;  %v7282_v44 = vld [vmem:[#allocation7 + $0x1cc] sm:$0xf0] }
 0x16e   :  { %2625 = vmatpush.bf16.msra.mxu0 %v7665_v49  ;;  %v6633_v49 = vor.u32 %v7227_v45, %v6632_v21  ;;  %3061 = vmatpush.bf16.msra.mxu3 %v6865_v29  ;;  %v6849_v33 = vor.u32 %v7282_v44, %v6848_v42  ;;  %v6850_v58 = vld [vmem:[#allocation7 + $0x1d0] sm:$0xf0]  ;;  %v7276_v23 = vld [vmem:[#allocation7 + $0x1a4] sm:$0xf]  ;;  %v6816_v7 = vld [vmem:[#allocation7 + $0x180] sm:$0xf] }
 0x16f   :  { %2639 = vmatpush.bf16.msra.mxu1 %v9984_v51  ;;  %v6717_v51 = vor.u32 %v7245_v41, %v6714_v3  ;;  %v6834_v34 = vld [vmem:[#allocation7 + $0x1b0] sm:$0xf0]  ;;  %v6800_v10 = vld [vmem:[#allocation7 + $0x160] sm:$0xf]  ;;  %v7270_v21 = vld [vmem:[#allocation7 + $0x16c] sm:$0xf0] }
 0x170   :  { %3053 = vmatpush.bf16.msra.mxu2 %v6641_v2  ;;  %v6649_v2 = vor.u32 %v7231_v28, %v6648_v15  ;;  %v6837_v16 = vor.u32 %v7276_v23, %v6834_v34  ;;  %v7268_v45 = vld [vmem:[#allocation7 + $0x164] sm:$0xf]  ;;  %v6784_v41 = vld [vmem:[#allocation7 + $0x140] sm:$0xf]  ;;  %v7266_v3 = vld [vmem:[#allocation7 + $0x14c] sm:$0xf0] }
 0x171   :  { %v6768_v11 = vld [vmem:[#allocation7 + $0x120] sm:$0xf]  ;;  %v7256_v14 = vld [vmem:[#allocation7 + $0x104] sm:$0xf]  ;;  %v6872_v29 = vld [vmem:[#allocation7 + $0x1e8] sm:$0xf] }
 0x172   :  { %2626 = vmatpush.bf16.msra.mxu0 %v7666_v27  ;;  %v6666_v27 = vld [vmem:[#allocation7 + $0x58] sm:$0xf0]  ;;  %v8495_v37 = vpop.f32.mrf.mxu0  ;;  %3062 = vmatpush.bf16.msra.mxu3 %v6849_v33  ;;  %v7285_v44 = vld [vmem:[#allocation7 + $0x1ec] sm:$0xf]  ;;  %v6856_v33 = vld [vmem:[#allocation7 + $0x1c8] sm:$0xf] }
 0x173   :  { %2640 = vmatpush.bf16.msra.mxu1 %v9985_v0  ;;  %v6650_v0 = vld [vmem:[#allocation7 + $0x38] sm:$0xf0] }
 0x174   :  { %3054 = vmatpush.bf16.msra.mxu2 %v6625_v26  ;;  %v6858_v23 = vld [vmem:[#allocation7 + $0x1d8] sm:$0xf0] }
 0x175   :  { %2627 = vmatmul.bf16.vlgmr.msra.gmra.mxu0 %v2598_v1  ;;  %v8487_v1 = vpop.f32.mrf.mxu2 }
 0x176   :  { %3075 = vmatpush.bf16.msrb.mxu0 %v6741_v47  ;;  %2641 = vmatmul.bf16.vlgmr.msra.gmra.mxu1 %v2601_v25  ;;  %v7241_v47 = vld [vmem:[#allocation7 + $0x8c] sm:$0xf]  ;;  %v6653_v25 = vor.u32 %v7229_v53, %v6650_v0 }
 0x177   :  { %3055 = vmatmul.bf16.vlgmr.msra.gmra.mxu2 %v8480_v60  ;;  %v6701_v26 = vor.u32 %v7241_v47, %v6698_v9  ;;  %v6785_v47 = vor.u32 %v7266_v3, %v6784_v41  ;;  %v6786_v9 = vld [vmem:[#allocation7 + $0x150] sm:$0xf0]  ;;  %v6824_v41 = vld [vmem:[#allocation7 + $0x188] sm:$0xf]  ;;  %v7275_v3 = vld [vmem:[#allocation7 + $0x194] sm:$0xf0] }
 0x178   :  { %3103 = vmatpush.bf16.msrb.mxu2 %v6745_v39  ;;  %v7233_v39 = vld [vmem:[#allocation7 + $0x4c] sm:$0xf] }
 0x179   :  { %v6669_v50 = vor.u32 %v7233_v39, %v6666_v27  ;;  %v7260_v39 = vld [vmem:[#allocation7 + $0x124] sm:$0xf] }
 0x17a   :  { %3076 = vmatpush.bf16.msrb.mxu0 %v6725_v54  ;;  %v7225_v54 = vld [vmem:[#allocation7 + $0xc] sm:$0xf]  ;;  %v8504_v28 = vpop.f32.mrf.mxu0 }
 0x17c   :  { %3104 = vmatpush.bf16.msrb.mxu2 %v6729_v4  ;;  %v6637_v4 = vor.u32 %v7225_v54, %v6634_v12  ;;  %v6752_v12 = vld [vmem:[#allocation7 + $0x100] sm:$0xf] }
 0x17d   :  { %v8493_v55 = vpop.f32.mrf.mxu2 }
 0x17e   :  { %3077 = vmatpush.bf16.msrb.mxu0 %v6709_v56  ;;  %v8497_v56 = vpop.f32.mrf.mxu1 }
 0x180   :  { %3105 = vmatpush.bf16.msrb.mxu2 %v6713_v40  ;;  %v7284_v40 = vld [vmem:[#allocation7 + $0x1e4] sm:$0xf] }
 0x182   :  { %3078 = vmatpush.bf16.msrb.mxu0 %v6693_v52  ;;  %v6869_v52 = vor.u32 %v7284_v40, %v6866_v20  ;;  %v6754_v40 = vld [vmem:[#allocation7 + $0x110] sm:$0xf0]  ;;  %v7287_v20 = vld [vmem:[#allocation7 + $0x1f4] sm:$0xf0] }
 0x183   :  { %v6873_v42 = vor.u32 %v7287_v20, %v6872_v29  ;;  %v6960_v20 = vld [vmem:[#allocation8 + $0xa0] sm:$0xf] }
 0x184   :  { %3106 = vmatpush.bf16.msrb.mxu2 %v6697_v30  ;;  %v7280_v30 = vld [vmem:[#allocation7 + $0x1c4] sm:$0xf]  ;;  %3089 = vmatpush.bf16.msrb.mxu1 %v6869_v52  ;;  %v6757_v52 = vor.u32 %v7256_v14, %v6754_v40  ;;  %v7269_v14 = vld [vmem:[#allocation7 + $0x16c] sm:$0xf] }
 0x185   :  { %v8502_v15 = vpop.f32.mrf.mxu2 }
 0x186   :  { %3079 = vmatpush.bf16.msrb.mxu0 %v6677_v43  ;;  %v6853_v43 = vor.u32 %v7280_v30, %v6850_v58  ;;  %v8506_v32 = vpop.f32.mrf.mxu1  ;;  %v6874_v30 = vld [vmem:[#allocation7 + $0x1f8] sm:$0xf0] }
 0x188   :  { %3107 = vmatpush.bf16.msrb.mxu2 %v6681_v22  ;;  %v8500_v22 = vpop.f32.mrf.mxu3  ;;  %3090 = vmatpush.bf16.msrb.mxu1 %v6853_v43  ;;  %v6877_v43 = vor.u32 %v7285_v44, %v6874_v30  ;;  %v6792_v44 = vld [vmem:[#allocation7 + $0x148] sm:$0xf]  ;;  %v7267_v30 = vld [vmem:[#allocation7 + $0x154] sm:$0xf0] }
 0x18a   :  { %3080 = vmatpush.bf16.msrb.mxu0 %v6661_v24  ;;  %v6833_v24 = vor.u32 %v7278_v48, %v6832_v62  ;;  %v7283_v62 = vld [vmem:[#allocation7 + $0x1d4] sm:$0xf0]  ;;  %v7281_v48 = vld [vmem:[#allocation7 + $0x1cc] sm:$0xf] }
 0x18b   :  { %v6857_v34 = vor.u32 %v7283_v62, %v6856_v33  ;;  %v7265_v33 = vld [vmem:[#allocation7 + $0x14c] sm:$0xf]  ;;  %v6794_v62 = vld [vmem:[#allocation7 + $0x158] sm:$0xf0] }
 0x18c   :  { %3108 = vmatpush.bf16.msrb.mxu2 %v6665_v36  ;;  %v7274_v36 = vld [vmem:[#allocation7 + $0x18c] sm:$0xf0]  ;;  %3063 = vmatpush.bf16.msra.mxu3 %v6833_v24  ;;  %v6861_v24 = vor.u32 %v7281_v48, %v6858_v23  ;;  %v6797_v23 = vor.u32 %v7265_v33, %v6794_v62  ;;  %v2187_v62 = vadd.f32 %v8497_v56, %v8495_v37 }
 0x18d   :  { %v6817_v6 = vor.u32 %v7274_v36, %v6816_v7  ;;  %3091 = vmatpush.bf16.msrb.mxu1 %v6837_v16  ;;  %v6840_v16 = vld [vmem:[#allocation7 + $0x1a8] sm:$0xf]  ;;  %v7279_v7 = vld [vmem:[#allocation7 + $0x1b4] sm:$0xf0]  ;;  %v7277_v36 = vld [vmem:[#allocation7 + $0x1ac] sm:$0xf] }
 0x18e   :  { %3081 = vmatpush.bf16.msrb.mxu0 %v6645_v8  ;;  %v7272_v8 = vld [vmem:[#allocation7 + $0x184] sm:$0xf] }
 0x190   :  { %3109 = vmatpush.bf16.msrb.mxu2 %v6649_v2  ;;  %v8508_v61 = vpop.f32.mrf.mxu3  ;;  %3064 = vmatpush.bf16.msra.mxu3 %v6817_v6 }
 0x192   :  { %3082 = vmatpush.bf16.msrb.mxu0 %v6629_v63  ;;  %v8510_v63 = vpop.f32.mrf.mxu0 }
 0x193   :  { %v8512_v5 = vpop.f32.mrf.mxu1 }
 0x194   :  { %3110 = vmatpush.bf16.msrb.mxu2 %v6633_v49  ;;  %v6802_v49 = vld [vmem:[#allocation7 + $0x170] sm:$0xf0] }
 0x195   :  { %3083 = vmatmul.bf16.vlgmr.msrb.gmra.mxu0 %v8480_v60  ;;  %v6805_v17 = vor.u32 %v7268_v45, %v6802_v49  ;;  %v6992_v45 = vld [vmem:[#allocation8 + $0xe0] sm:$0xf] }
 0x196   :  { %3131 = vmatpush.bf16.msra.mxu0 %v6749_v13  ;;  %v6801_v13 = vor.u32 %v7270_v21, %v6800_v10 }
 0x197   :  { %3111 = vmatmul.bf16.vlgmr.msrb.gmra.mxu2 %v8480_v60 }
 0x198   :  { %3065 = vmatpush.bf16.msra.mxu3 %v6801_v13  ;;  %v8516_v38 = vpop.f32.mrf.mxu3  ;;  %v7318_v13 = vld [vmem:[#allocation8 + $0xec] sm:$0xf0] }
 0x199   :  { %v8532_v49 = vor.u32 %v7318_v13, %v6992_v45  ;;  %v6778_v13 = vld [vmem:[#allocation7 + $0x138] sm:$0xf0] }
 0x19a   :  { %3132 = vmatpush.bf16.msra.mxu0 %v6733_v46  ;;  %v8514_v46 = vpop.f32.mrf.mxu2  ;;  %v8518_v0 = vpop.f32.mrf.mxu0 }
 0x19b   :  { %v8522_v54 = vpop.f32.mrf.mxu1  ;;  %3424 = vmatpush.bf16.msra.mxu2 %v8532_v49 }
 0x19c   :  { %3066 = vmatpush.bf16.msra.mxu3 %v6785_v47  ;;  %v6825_v47 = vor.u32 %v7275_v3, %v6824_v41  ;;  %v6928_v3 = vld [vmem:[#allocation8 + $0x60] sm:$0xf] }
 0x19e   :  { %3133 = vmatpush.bf16.msra.mxu0 %v6717_v51  ;;  %v7264_v51 = vld [vmem:[#allocation7 + $0x144] sm:$0xf] }
 0x1a0   :  { %v8524_v58 = vpop.f32.mrf.mxu3 }
 0x1a2   :  { %3134 = vmatpush.bf16.msra.mxu0 %v6701_v26  ;;  %v6789_v26 = vor.u32 %v7264_v51, %v6786_v9  ;;  %v7273_v51 = vld [vmem:[#allocation7 + $0x18c] sm:$0xf]  ;;  %v6826_v9 = vld [vmem:[#allocation7 + $0x198] sm:$0xf0] }
 0x1a6   :  { %3135 = vmatpush.bf16.msra.mxu0 %v6685_v18  ;;  %v7262_v18 = vld [vmem:[#allocation7 + $0x12c] sm:$0xf0] }
 0x1a7   :  { %v6769_v27 = vor.u32 %v7262_v18, %v6768_v11  ;;  %v6976_v11 = vld [vmem:[#allocation8 + $0xc0] sm:$0xf]  ;;  %v7314_v18 = vld [vmem:[#allocation8 + $0xcc] sm:$0xf0] }
 0x1a9   :  { %3067 = vmatpush.bf16.msra.mxu3 %v6769_v27 }
 0x1aa   :  { %3136 = vmatpush.bf16.msra.mxu0 %v6669_v50  ;;  %v6770_v50 = vld [vmem:[#allocation7 + $0x130] sm:$0xf0] }
 0x1ab   :  { %v6773_v53 = vor.u32 %v7260_v39, %v6770_v50  ;;  %v8537_v39 = vor.u32 %v7314_v18, %v6976_v11  ;;  %v6808_v50 = vld [vmem:[#allocation7 + $0x168] sm:$0xf]  ;;  %v7259_v11 = vld [vmem:[#allocation7 + $0x114] sm:$0xf0]  ;;  %v7257_v18 = vld [vmem:[#allocation7 + $0x10c] sm:$0xf] }
 0x1ad   :  { %3425 = vmatpush.bf16.msra.mxu2 %v8537_v39 }
 0x1ae   :  { %3137 = vmatpush.bf16.msra.mxu0 %v6653_v25  ;;  %v8520_v25 = vpop.f32.mrf.mxu2 }
 0x1b2   :  { %3138 = vmatpush.bf16.msra.mxu0 %v6637_v4  ;;  %v7258_v4 = vld [vmem:[#allocation7 + $0x10c] sm:$0xf0] }
 0x1b3   :  { %v6753_v35 = vor.u32 %v7258_v4, %v6752_v12  ;;  %v8528_v6 = vpop.f32.mrf.mxu1 }
 0x1b5   :  { %3139 = vmatmul.bf16.vlgmr.msra.gmra.mxu0 %v8480_v60  ;;  %v6818_v60 = vld [vmem:[#allocation7 + $0x190] sm:$0xf0]  ;;  %3068 = vmatpush.bf16.msra.mxu3 %v6753_v35  ;;  %v6810_v35 = vld [vmem:[#allocation7 + $0x178] sm:$0xf0] }
 0x1b6   :  { %v6821_v2 = vor.u32 %v7272_v8, %v6818_v60  ;;  %v6842_v8 = vld [vmem:[#allocation7 + $0x1b8] sm:$0xf0]  ;;  %v8526_v60 = vpop.f32.mrf.mxu0  ;;  %v8530_v10 = vpop.f32.mrf.mxu2  ;;  %v6813_v29 = vor.u32 %v7269_v14, %v6810_v35  ;;  %v6912_v14 = vld [vmem:[#allocation8 + $0x40] sm:$0xf]  ;;  %v7298_v35 = vld [vmem:[#allocation8 + $0x4c] sm:$0xf0] }
 0x1b7   :  { %v6845_v21 = vor.u32 %v7277_v36, %v6842_v8  ;;  %v6776_v36 = vld [vmem:[#allocation7 + $0x128] sm:$0xf]  ;;  %v7263_v8 = vld [vmem:[#allocation7 + $0x134] sm:$0xf0] }
 0x1b8   :  { %3092 = vmatpush.bf16.msrb.mxu1 %v6821_v2  ;;  %v6841_v2 = vor.u32 %v7279_v7, %v6840_v16  ;;  %v6777_v45 = vor.u32 %v7263_v8, %v6776_v36  ;;  %v7315_v8 = vld [vmem:[#allocation8 + $0xd4] sm:$0xf0] }
 0x1b9   :  { %3117 = vmatpush.bf16.msrb.mxu3 %v6873_v42 }
 0x1bb   :  { %v8541_v12 = vpop.f32.mrf.mxu1 }
 0x1bc   :  { %3093 = vmatpush.bf16.msrb.mxu1 %v6805_v17  ;;  %v8534_v17 = vpop.f32.mrf.mxu3 }
 0x1bd   :  { %3118 = vmatpush.bf16.msrb.mxu3 %v6857_v34  ;;  %v6944_v34 = vld [vmem:[#allocation8 + $0x80] sm:$0xf] }
 0x1be   :  { %v8539_v27 = vpop.f32.mrf.mxu0  ;;  %v8544_v40 = vpop.f32.mrf.mxu2 }
 0x1c0   :  { %3094 = vmatpush.bf16.msrb.mxu1 %v6789_v26  ;;  %v6829_v26 = vor.u32 %v7273_v51, %v6826_v9  ;;  %v7302_v51 = vld [vmem:[#allocation8 + $0x6c] sm:$0xf0] }
 0x1c1   :  { %3119 = vmatpush.bf16.msrb.mxu3 %v6841_v2  ;;  %v7261_v2 = vld [vmem:[#allocation7 + $0x12c] sm:$0xf] }
 0x1c2   :  { %v6781_v41 = vor.u32 %v7261_v2, %v6778_v13  ;;  %v2201_v13 = vadd.f32 %v8502_v15, %v2187_v62 }
 0x1c4   :  { %3095 = vmatpush.bf16.msrb.mxu1 %v6773_v53  ;;  %v7271_v53 = vld [vmem:[#allocation7 + $0x174] sm:$0xf0]  ;;  %v8549_v48 = vpop.f32.mrf.mxu3 }
 0x1c5   :  { %3120 = vmatpush.bf16.msrb.mxu3 %v6825_v47  ;;  %v6809_v4 = vor.u32 %v7271_v53, %v6808_v50  ;;  %v8558_v47 = vor.u32 %v7302_v51, %v6928_v3  ;;  %v6762_v53 = vld [vmem:[#allocation7 + $0x118] sm:$0xf0]  ;;  %v7290_v3 = vld [vmem:[#allocation8 + $0xc] sm:$0xf0]  ;;  %v7311_v51 = vld [vmem:[#allocation8 + $0xb4] sm:$0xf0] }
 0x1c6   :  { %v2446_v9 = vpop.f32.mrf.mxu2 }
 0x1c8   :  { %3096 = vmatpush.bf16.msrb.mxu1 %v6757_v52  ;;  %v7310_v52 = vld [vmem:[#allocation8 + $0xac] sm:$0xf0] }
 0x1c9   :  { %3121 = vmatpush.bf16.msrb.mxu3 %v6809_v4  ;;  %v8546_v42 = vor.u32 %v7310_v52, %v6960_v20  ;;  %v6765_v4 = vor.u32 %v7257_v18, %v6762_v53  ;;  %v7319_v20 = vld [vmem:[#allocation8 + $0xf4] sm:$0xf0]  ;;  %v2089_v52 = vadd.f32 %v8487_v1, %v8485_v19  ;;  %v7294_v19 = vld [vmem:[#allocation8 + $0x2c] sm:$0xf0]  ;;  %v6984_v1 = vld [vmem:[#allocation8 + $0xc8] sm:$0xf] }
 0x1ca   :  { %v8582_v56 = vor.u32 %v7315_v8, %v6984_v1  ;;  %v7307_v53 = vld [vmem:[#allocation8 + $0x94] sm:$0xf0] }
 0x1cb   :  { %3426 = vmatpush.bf16.msra.mxu2 %v8546_v42  ;;  %v2103_v2 = vadd.f32 %v8491_v57, %v2089_v52  ;;  %v6880_v57 = vld [vmem:[#allocation8] sm:$0xf]  ;;  %v6936_v52 = vld [vmem:[#allocation8 + $0x68] sm:$0xf] }
 0x1cc   :  { %3145 = vmatpush.bf16.msra.mxu1 %v6877_v43  ;;  %v6793_v43 = vor.u32 %v7267_v30, %v6792_v44  ;;  %v8563_v44 = vpop.f32.mrf.mxu3  ;;  %v8565_v30 = vor.u32 %v7298_v35, %v6912_v14  ;;  %v7805_v35 = vmov 0  }
 0x1ce   :  { %3122 = vmatpush.bf16.msrb.mxu3 %v6793_v43  ;;  %v2091_v43 = vadd.f32 %v8493_v55, %v8489_v59  ;;  %v2189_v59 = vadd.f32 %v8506_v32, %v8504_v28  ;;  %v2261_v55 = vadd.f32 %v8510_v63, %v8508_v61  ;;  %v2371_v28 = vadd.f32 %v8524_v58, %v8520_v25 }
 0x1cf   :  { %v8592_v32 = vor.u32 %v7290_v3, %v6880_v57  ;;  %v2107_v61 = vadd.f32 %v8436_v31, %v2103_v2  ;;  %v2373_v63 = vadd.f32 %v8534_v17, %v8530_v10  ;;  %v7316_v57 = vld [vmem:[#allocation8 + $0xe4] sm:$0xf] }
 0x1d0   :  { %3146 = vmatpush.bf16.msra.mxu1 %v6861_v24  ;;  %v7306_v24 = vld [vmem:[#allocation8 + $0x8c] sm:$0xf0]  ;;  %v2275_v15 = vadd.f32 %v8512_v5, %v2261_v55  ;;  %v2385_v5 = vadd.f32 %v8526_v60, %v2371_v28  ;;  %v7299_v55 = vld [vmem:[#allocation8 + $0x54] sm:$0xf0]  ;;  %v6994_v28 = vld [vmem:[#allocation8 + $0xf0] sm:$0xf0] }
 0x1d1   :  { %v8551_v16 = vor.u32 %v7306_v24, %v6944_v34  ;;  %v6896_v34 = vld [vmem:[#allocation8 + $0x20] sm:$0xf]  ;;  %v2205_v58 = vadd.f32 %v2201_v13, %v2107_v61  ;;  %v7317_v61 = vld [vmem:[#allocation8 + $0xec] sm:$0xf] }
 0x1d2   :  { %v8553_v7 = vpop.f32.mrf.mxu0  ;;  %3123 = vmatpush.bf16.msrb.mxu3 %v6777_v45  ;;  %v8575_v36 = vor.u32 %v7294_v19, %v6896_v34  ;;  %v2105_v45 = vadd.f32 %v8500_v22, %v2091_v43  ;;  %v2203_v22 = vadd.f32 %v8514_v46, %v2189_v59  ;;  %v2447_v46 = vadd.f32 %v2446_v9, %v8541_v12  ;;  %v6920_v59 = vld [vmem:[#allocation8 + $0x48] sm:$0xf] }
 0x1d3   :  { %3427 = vmatpush.bf16.msra.mxu2 %v8551_v16 }
 0x1d4   :  { %3147 = vmatpush.bf16.msra.mxu1 %v6845_v21  ;;  %v8555_v21 = vpop.f32.mrf.mxu1  ;;  %v2108_v25 = vadd.f32 %v8436_v31, %v2105_v45  ;;  %v2279_v31 = vadd.f32 %v2275_v15, %v2205_v58  ;;  %v6904_v15 = vld [vmem:[#allocation8 + $0x28] sm:$0xf]  ;;  %v7312_v58 = vld [vmem:[#allocation8 + $0xc4] sm:$0xf] }
 0x1d5   :  { %v2555_v10 = vadd.f32 %v8555_v21, %v8553_v7 }
 0x1d6   :  { %v2389_v9 = vadd.f32 %v2385_v5, %v2279_v31  ;;  %v7313_v5 = vld [vmem:[#allocation8 + $0xcc] sm:$0xf] }
 0x1d7   :  { %3428 = vmatpush.bf16.msra.mxu2 %v8558_v47 }
 0x1d8   :  { %3148 = vmatpush.bf16.msra.mxu1 %v6829_v26  ;;  %v6760_v26 = vld [vmem:[#allocation7 + $0x108] sm:$0xf] }
 0x1d9   :  { %v6761_v50 = vor.u32 %v7259_v11, %v6760_v26  ;;  %v2445_v26 = vadd.f32 %v8544_v40, %v8528_v6  ;;  %v2206_v6 = vadd.f32 %v2203_v22, %v2108_v25  ;;  %v2387_v40 = vadd.f32 %v8539_v27, %v2373_v63  ;;  %v7002_v22 = vld [vmem:[#allocation8 + $0xf8] sm:$0xf0]  ;;  %v7295_v63 = vld [vmem:[#allocation8 + $0x34] sm:$0xf0] }
 0x1da   :  { %v2568_v37 = vpop.f32.mrf.mxu2  ;;  %v8632_v25 = vor.u32 %v7317_v61, %v7002_v22  ;;  %v7288_v61 = vld [vmem:[#allocation8 + $0x4] sm:$0xf]  ;;  %v6882_v22 = vld [vmem:[#allocation8 + $0x10] sm:$0xf0] }
 0x1db   :  { %3124 = vmatpush.bf16.msrb.mxu3 %v6761_v50  ;;  %3429 = vmatpush.bf16.msra.mxu2 %v8565_v30 }
 0x1dc   :  { %3149 = vmatpush.bf16.msra.mxu1 %v6813_v29  ;;  %v7000_v29 = vld [vmem:[#allocation8 + $0xe8] sm:$0xf]  ;;  %v2556_v24 = vpop.f32.mrf.mxu1 }
 0x1dd   :  { %v8567_v33 = vor.u32 %v7319_v20, %v7000_v29  ;;  %v2461_v29 = vadd.f32 %v8563_v44, %v2447_v46  ;;  %v2569_v20 = vadd.f32 %v2568_v37, %v2555_v10  ;;  %v6986_v46 = vld [vmem:[#allocation8 + $0xd8] sm:$0xf0]  ;;  %v6888_v10 = vld [vmem:[#allocation8 + $0x8] sm:$0xf] }
 0x1df   :  { %3450 = vmatpush.bf16.msrb.mxu0 %v8567_v33  ;;  %3430 = vmatpush.bf16.msra.mxu2 %v8575_v36 }
 0x1e0   :  { %3150 = vmatpush.bf16.msra.mxu1 %v6797_v23  ;;  %v2542_v23 = vpop.f32.mrf.mxu0 }
 0x1e1   :  { %v2557_v14 = vadd.f32 %v2556_v24, %v2542_v23 }
 0x1e2   :  { %v2570_v21 = vpop.f32.mrf.mxu2 }
 0x1e3   :  { %3451 = vmatpush.bf16.msrb.mxu0 %v8582_v56  ;;  %3431 = vmatpush.bf16.msra.mxu2 %v8592_v32  ;;  %v2571_v62 = vadd.f32 %v2570_v21, %v2557_v14  ;;  %v6970_v14 = vld [vmem:[#allocation8 + $0xb8] sm:$0xf0]  ;;  %v7304_v21 = vld [vmem:[#allocation8 + $0x84] sm:$0xf] }
 0x1e4   :  { %3151 = vmatpush.bf16.msra.mxu1 %v6781_v41  ;;  %v2263_v41 = vadd.f32 %v8518_v0, %v8516_v38  ;;  %v2614_v38 = vpop.f32.mrf.mxu3  ;;  %v6968_v0 = vld [vmem:[#allocation8 + $0xa8] sm:$0xf] }
 0x1e5   :  { %v8601_v11 = vor.u32 %v7311_v51, %v6968_v0  ;;  %v8628_v51 = vor.u32 %v7295_v63, %v6904_v15  ;;  %v7289_v15 = vld [vmem:[#allocation8 + $0xc] sm:$0xf]  ;;  %v6890_v63 = vld [vmem:[#allocation8 + $0x18] sm:$0xf0] }
 0x1e6   :  { %v2277_v18 = vadd.f32 %v8522_v54, %v2263_v41  ;;  %v6952_v54 = vld [vmem:[#allocation8 + $0x88] sm:$0xf]  ;;  %3432 = vmatmul.bf16.vlgmr.msra.gmra.mxu2 %v7805_v35  ;;  %v8624_v41 = vor.u32 %v7299_v55, %v6920_v59 }
 0x1e7   :  { %3452 = vmatpush.bf16.msrb.mxu0 %v8601_v11  ;;  %3556 = vmatpush.bf16.msrb.mxu2 %v8532_v49  ;;  %v8615_v12 = vor.u32 %v7307_v53, %v6952_v54  ;;  %v7308_v54 = vld [vmem:[#allocation8 + $0xa4] sm:$0xf]  ;;  %v6962_v53 = vld [vmem:[#allocation8 + $0xb0] sm:$0xf0] }
 0x1e8   :  { %3152 = vmatpush.bf16.msra.mxu1 %v6765_v4  ;;  %v2459_v4 = vadd.f32 %v8549_v48, %v2445_v26  ;;  %v2280_v7 = vadd.f32 %v2277_v18, %v2206_v6  ;;  %v7303_v48 = vld [vmem:[#allocation8 + $0x74] sm:$0xf0]  ;;  %v8630_v26 = vor.u32 %v7316_v57, %v6994_v28  ;;  %v6906_v57 = vld [vmem:[#allocation8 + $0x38] sm:$0xf0] }
 0x1e9   :  { %v8620_v34 = vor.u32 %v7303_v48, %v6936_v52  ;;  %v7300_v48 = vld [vmem:[#allocation8 + $0x64] sm:$0xf] }
 0x1ea   :  { %v2390_v27 = vadd.f32 %v2387_v40, %v2280_v7  ;;  %v2463_v43 = vadd.f32 %v2459_v4, %v2389_v9  ;;  %v8642_v40 = vor.u32 %v7313_v5, %v6986_v46  ;;  %v7309_v4 = vld [vmem:[#allocation8 + $0xac] sm:$0xf]  ;;  %v6946_v9 = vld [vmem:[#allocation8 + $0x90] sm:$0xf0] }
 0x1eb   :  { %3453 = vmatpush.bf16.msrb.mxu0 %v8615_v12  ;;  %3557 = vmatpush.bf16.msrb.mxu2 %v8537_v39  ;;  %v8651_v7 = vor.u32 %v7309_v4, %v6970_v14 }
 0x1ec   :  { %v2616_v19 = vpop.f32.mrf.mxu3  ;;  %v2464_v24 = vadd.f32 %v2461_v29, %v2390_v27  ;;  %v2573_v8 = vadd.f32 %v2569_v20, %v2463_v43  ;;  %v7305_v29 = vld [vmem:[#allocation8 + $0x8c] sm:$0xf]  ;;  %v6954_v20 = vld [vmem:[#allocation8 + $0x98] sm:$0xf0]  ;;  %v8658_v27 = vor.u32 %v7304_v21, %v6946_v9  ;;  %v6930_v43 = vld [vmem:[#allocation8 + $0x70] sm:$0xf0] }
 0x1ed   :  { %v8660_v52 = vor.u32 %v7305_v29, %v6954_v20  ;;  %v8756_v21 = vld [vmem:[%s9751_s4] sm:$0xf] }
 0x1ee   :  { %v2574_v37 = vadd.f32 %v2571_v62, %v2464_v24  ;;  %v7301_v62 = vld [vmem:[#allocation8 + $0x6c] sm:$0xf]  ;;  %v7296_v24 = vld [vmem:[#allocation8 + $0x44] sm:$0xf]  ;;  %v2720_v9 = vperm.slane %v8756_v21, 1 }
 0x1ef   :  { %3454 = vmatpush.bf16.msrb.mxu0 %v8620_v34  ;;  %3558 = vmatpush.bf16.msrb.mxu2 %v8546_v42 }
 0x1f2   :  { %v2628_v50 = vpop.f32.mrf.mxu0 }
 0x1f3   :  { %v2642_v17 = vpop.f32.mrf.mxu1  ;;  %v2629_v60 = vadd.f32 %v2628_v50, %v2614_v38  ;;  %3455 = vmatpush.bf16.msrb.mxu0 %v8624_v41  ;;  %3559 = vmatpush.bf16.msrb.mxu2 %v8551_v16  ;;  %v6978_v50 = vld [vmem:[#allocation8 + $0xd0] sm:$0xf0] }
 0x1f4   :  { %v8640_v31 = vor.u32 %v7312_v58, %v6978_v50 }
 0x1f5   :  { %v2643_v23 = vadd.f32 %v2642_v17, %v2629_v60  ;;  %v7291_v17 = vld [vmem:[#allocation8 + $0x14] sm:$0xf0]  ;;  %v8649_v60 = vor.u32 %v7308_v54, %v6962_v53  ;;  %v3159_v54 = vlaneseq }
 0x1f6   :  { %v8636_v6 = vor.u32 %v7291_v17, %v6888_v10 }
 0x1f7   :  { %v2647_v45 = vadd.f32 %v2643_v23, %v2573_v8  ;;  %3456 = vmatpush.bf16.msrb.mxu0 %v8628_v51  ;;  %3560 = vmatpush.bf16.msrb.mxu2 %v8558_v47  ;;  %v6938_v23 = vld [vmem:[#allocation8 + $0x78] sm:$0xf0]  ;;  %v6914_v8 = vld [vmem:[#allocation8 + $0x50] sm:$0xf0]  ;;  %v8749_v53 = vand.u32 127, %v3159_v54 }
 0x1f8   :  { %v8675_v59 = vor.u32 %v7296_v24, %v6914_v8 }
 0x1f9   :  { %v2649_v38 = vmax.f32 %v2647_v45, 0.0  ;;  %v6898_v45 = vld [vmem:[#allocation8 + $0x30] sm:$0xf0]  ;;  %v3161_v20 = vadd.s32 128, %v8749_v53  ;;  %vm3212_vm7 = vcmp.lt.s32.totalorder %v8749_v53, 64 }
 0x1fa   :  { %v2630_v1 = vpop.f32.mrf.mxu0 }
 0x1fb   :  { %v2631_v2 = vadd.f32 %v2630_v1, %v2616_v19  ;;  %v2644_v44 = vpop.f32.mrf.mxu1  ;;  %3457 = vmatpush.bf16.msrb.mxu0 %v8636_v6  ;;  %3561 = vmatpush.bf16.msrb.mxu2 %v8565_v30  ;;  %v8667_v19 = vor.u32 %v7300_v48, %v6930_v43  ;;  %v8669_v1 = vor.u32 %v7301_v62, %v6938_v23  ;;  %v2719_v43 = vperm.slane %v8756_v21, 0 }
 0x1fc   :  { %v3175_v62 = vand.u32 127, %v3161_v20 }
 0x1fd   :  { %v2645_v13 = vadd.f32 %v2644_v44, %v2631_v2  ;;  %v7297_v2 = vld [vmem:[#allocation8 + $0x4c] sm:$0xf]  ;;  %v6922_v44 = vld [vmem:[#allocation8 + $0x58] sm:$0xf0] }
 0x1fe   :  { %3458 = vmatmul.bf16.vlgmr.msrb.gmra.mxu0 %v7805_v35  ;;  %v8677_v55 = vor.u32 %v7297_v2, %v6922_v44  ;;  %vm8767_vm6 = vcmp.lt.s32.totalorder %v3175_v62, 64 }
 0x1ff   :  { %v2648_v3 = vadd.f32 %v2645_v13, %v2574_v37  ;;  %3582 = vmatpush.bf16.msra.mxu0 %v8567_v33  ;;  %3562 = vmatpush.bf16.msrb.mxu2 %v8575_v36  ;;  %v7292_v37 = vld [vmem:[#allocation8 + $0x24] sm:$0xf]  ;;  %v7293_v13 = vld [vmem:[#allocation8 + $0x2c] sm:$0xf] }
 0x200   :  { %v8685_v28 = vor.u32 %v7293_v13, %v6906_v57 }
 0x201   :  { %v2650_v0 = vmax.f32 %v2648_v3, 0.0  ;;  %v8683_v3 = vor.u32 %v7292_v37, %v6898_v45 }
 0x203   :  { %v2652_v18 = vpack.c.bf16 %v2650_v0, %v2649_v38  ;;  %3583 = vmatpush.bf16.msra.mxu0 %v8582_v56  ;;  %3563 = vmatpush.bf16.msrb.mxu2 %v8592_v32  ;;  %v8691_v38 = vor.u32 %v7288_v61, %v6882_v22  ;;  %v8693_v0 = vor.u32 %v7289_v15, %v6890_v63 }
 0x205   :  { %3069 = vmatmul.bf16.vlgmr.msra.gmra.mxu3 %v2652_v18  ;;  %3097 = vmatmul.bf16.vlgmr.msrb.gmra.mxu1 %v2652_v18 }
 0x206   :  { %3437 = vmatpush.bf16.msra.mxu3 %v8630_v26  ;;  %3463 = vmatpush.bf16.msrb.mxu1 %v8632_v25 }
 0x207   :  { %3584 = vmatpush.bf16.msra.mxu0 %v8601_v11  ;;  %3707 = vmatpush.bf16.msra.mxu2 %v8532_v49 }
 0x20a   :  { %3438 = vmatpush.bf16.msra.mxu3 %v8640_v31  ;;  %3464 = vmatpush.bf16.msrb.mxu1 %v8642_v40 }
 0x20b   :  { %3585 = vmatpush.bf16.msra.mxu0 %v8615_v12  ;;  %3708 = vmatpush.bf16.msra.mxu2 %v8537_v39 }
 0x20e   :  { %3439 = vmatpush.bf16.msra.mxu3 %v8649_v60  ;;  %3465 = vmatpush.bf16.msrb.mxu1 %v8651_v7 }
 0x20f   :  { %3586 = vmatpush.bf16.msra.mxu0 %v8620_v34  ;;  %3709 = vmatpush.bf16.msra.mxu2 %v8546_v42 }
 0x212   :  { %3440 = vmatpush.bf16.msra.mxu3 %v8658_v27  ;;  %3466 = vmatpush.bf16.msrb.mxu1 %v8660_v52 }
 0x213   :  { %3587 = vmatpush.bf16.msra.mxu0 %v8624_v41  ;;  %3710 = vmatpush.bf16.msra.mxu2 %v8551_v16 }
 0x215   :  { %3125 = vmatmul.bf16.vlgmr.msrb.gmra.mxu3 %v2652_v18  ;;  %3153 = vmatmul.bf16.vlgmr.msra.gmra.mxu1 %v2652_v18  ;;  %v3084_v18 = vpop.f32.mrf.mxu0 }
 0x216   :  { %3441 = vmatpush.bf16.msra.mxu3 %v8667_v19  ;;  %3467 = vmatpush.bf16.msrb.mxu1 %v8669_v1  ;;  %v3085_v48 = vadd.f32 %v3084_v18, %v2720_v9 }
 0x217   :  { %3588 = vmatpush.bf16.msra.mxu0 %v8628_v51  ;;  %3711 = vmatpush.bf16.msra.mxu2 %v8558_v47 }
 0x21a   :  { %3442 = vmatpush.bf16.msra.mxu3 %v8675_v59  ;;  %3468 = vmatpush.bf16.msrb.mxu1 %v8677_v55 }
 0x21b   :  { %3589 = vmatpush.bf16.msra.mxu0 %v8636_v6  ;;  %3712 = vmatpush.bf16.msra.mxu2 %v8565_v30 }
 0x21d   :  { %v3086_v5 = vpop.f32.mrf.mxu0 }
 0x21e   :  { %3443 = vmatpush.bf16.msra.mxu3 %v8683_v3  ;;  %3469 = vmatpush.bf16.msrb.mxu1 %v8685_v28  ;;  %v3087_v2 = vadd.f32 %v3086_v5, %v2720_v9 }
 0x21f   :  { %3733 = vmatpush.bf16.msrb.mxu0 %v8567_v33  ;;  %3713 = vmatpush.bf16.msra.mxu2 %v8575_v36 }
 0x222   :  { %3444 = vmatpush.bf16.msra.mxu3 %v8691_v38  ;;  %3470 = vmatpush.bf16.msrb.mxu1 %v8693_v0 }
 0x223   :  { %3734 = vmatpush.bf16.msrb.mxu0 %v8582_v56  ;;  %3714 = vmatpush.bf16.msra.mxu2 %v8592_v32 }
 0x225   :  { %3445 = vmatmul.bf16.vlgmr.msra.gmra.mxu3 %v7805_v35  ;;  %3471 = vmatmul.bf16.vlgmr.msrb.gmra.mxu1 %v7805_v35  ;;  %v3056_v35 = vpop.f32.mrf.mxu2 }
 0x226   :  { %3569 = vmatpush.bf16.msrb.mxu3 %v8630_v26  ;;  %3595 = vmatpush.bf16.msra.mxu1 %v8632_v25  ;;  %v3057_v37 = vadd.f32 %v3056_v35, %v2719_v43 }
 0x227   :  { %3735 = vmatpush.bf16.msrb.mxu0 %v8601_v11 }
 0x22a   :  { %3570 = vmatpush.bf16.msrb.mxu3 %v8640_v31  ;;  %3596 = vmatpush.bf16.msra.mxu1 %v8642_v40 }
 0x22b   :  { %3736 = vmatpush.bf16.msrb.mxu0 %v8615_v12 }
 0x22d   :  { %v3058_v58 = vpop.f32.mrf.mxu2 }
 0x22e   :  { %3571 = vmatpush.bf16.msrb.mxu3 %v8649_v60  ;;  %3597 = vmatpush.bf16.msra.mxu1 %v8651_v7  ;;  %v3059_v20 = vadd.f32 %v3058_v58, %v2719_v43  ;;  %v2722_v58 = vperm.slane %v8756_v21, 3 }
 0x22f   :  { %3737 = vmatpush.bf16.msrb.mxu0 %v8620_v34 }
 0x232   :  { %3572 = vmatpush.bf16.msrb.mxu3 %v8658_v27  ;;  %3598 = vmatpush.bf16.msra.mxu1 %v8660_v52  ;;  %v3140_v10 = vpop.f32.mrf.mxu0 }
 0x233   :  { %3738 = vmatpush.bf16.msrb.mxu0 %v8624_v41 }
 0x235   :  { %v8745_v50 = vpop.f32.mrf.mxu2 }
 0x236   :  { %3573 = vmatpush.bf16.msrb.mxu3 %v8667_v19  ;;  %3599 = vmatpush.bf16.msra.mxu1 %v8669_v1 }
 0x237   :  { %3739 = vmatpush.bf16.msrb.mxu0 %v8628_v51 }
 0x23a   :  { %3574 = vmatpush.bf16.msrb.mxu3 %v8675_v59  ;;  %3600 = vmatpush.bf16.msra.mxu1 %v8677_v55  ;;  %v8751_v4 = vpop.f32.mrf.mxu0 }
 0x23b   :  { %3740 = vmatpush.bf16.msrb.mxu0 %v8636_v6 }
 0x23d   :  { %v8747_v46 = vpop.f32.mrf.mxu2 }
 0x23e   :  { %3575 = vmatpush.bf16.msrb.mxu3 %v8683_v3  ;;  %3601 = vmatpush.bf16.msra.mxu1 %v8685_v28 }
 0x242   :  { %3576 = vmatpush.bf16.msrb.mxu3 %v8691_v38  ;;  %3602 = vmatpush.bf16.msra.mxu1 %v8693_v0 }
 0x246   :  { %3720 = vmatpush.bf16.msra.mxu3 %v8630_v26  ;;  %3746 = vmatpush.bf16.msrb.mxu1 %v8632_v25 }
 0x24a   :  { %3721 = vmatpush.bf16.msra.mxu3 %v8640_v31  ;;  %3747 = vmatpush.bf16.msrb.mxu1 %v8642_v40 }
 0x24e   :  { %3722 = vmatpush.bf16.msra.mxu3 %v8649_v60  ;;  %3748 = vmatpush.bf16.msrb.mxu1 %v8651_v7 }
 0x252   :  { %3723 = vmatpush.bf16.msra.mxu3 %v8658_v27  ;;  %3749 = vmatpush.bf16.msrb.mxu1 %v8660_v52 }
 0x256   :  { %3724 = vmatpush.bf16.msra.mxu3 %v8667_v19  ;;  %3750 = vmatpush.bf16.msrb.mxu1 %v8669_v1 }
 0x25a   :  { %3725 = vmatpush.bf16.msra.mxu3 %v8675_v59  ;;  %3751 = vmatpush.bf16.msrb.mxu1 %v8677_v55 }
 0x25e   :  { %3726 = vmatpush.bf16.msra.mxu3 %v8683_v3  ;;  %3752 = vmatpush.bf16.msrb.mxu1 %v8685_v28 }
 0x262   :  { %3727 = vmatpush.bf16.msra.mxu3 %v8691_v38  ;;  %3753 = vmatpush.bf16.msrb.mxu1 %v8693_v0 }
 0x269   :  { %v3433_v17 = vpop.f32.mrf.mxu2 }
 0x271   :  { %v3435_v14 = vpop.f32.mrf.mxu2 }
 0x27b   :  { %v8763_v8 = vpop.f32.mrf.mxu0 }
 0x282   :  { %v3098_v29 = vpop.f32.mrf.mxu1 }
 0x283   :  { %v8761_v23 = vadd.f32 %v3098_v29, %v3085_v48 }
 0x285   :  { %v4552_v57 = vrot.slane %v8761_v23, 7  ;;  %v4692_v61 = vrot.slane %v8761_v23, 5  ;;  %v4839_v22 = vrot.slane %v8761_v23, 3  ;;  %v4990_v15 = vrot.slane %v8761_v23, 1 }
 0x288   :  { %v3070_v24 = vpop.f32.mrf.mxu3 }
 0x289   :  { %v3071_v63 = vadd.f32 %v3070_v24, %v3057_v37 }
 0x28a   :  { %v3100_v44 = vpop.f32.mrf.mxu1 }
 0x28b   :  { %v8765_v45 = vadd.f32 %v3100_v44, %v3087_v2  ;;  %v3461_v44 = vpop.f32.mrf.mxu0 }
 0x28d   :  { %v3544_v18 = vrot.slane %v8765_v45, 5  ;;  %v3691_v5 = vrot.slane %v8765_v45, 3  ;;  %v3842_v35 = vrot.slane %v8765_v45, 1  ;;  %v8781_v54 = vsel %vm8767_vm6, %v8765_v45, %v4552_v57 }
 0x28e   :  { %9988 = vst [vmem:[#allocation19_spill] sm:$0xff] %v8781_v54  ;;  %v8786_v14 = vsel %vm8767_vm6, %v8765_v45, %v4692_v61  ;;  %v8791_v9 = vsel %vm8767_vm6, %v8765_v45, %v4839_v22  ;;  %v8796_v29 = vsel %vm8767_vm6, %v8765_v45, %v4990_v15  ;;  %v4551_v57 = vrot.slane %v3071_v63, 7 }
 0x28f   :  { %9989 = vst [vmem:[#allocation20_spill] sm:$0xff] %v8786_v14  ;;  %v8801_v48 = vsel %vm8767_vm6, %v8761_v23, %v3544_v18  ;;  %v8806_v62 = vsel %vm8767_vm6, %v8761_v23, %v3691_v5  ;;  %v8811_v24 = vsel %vm8767_vm6, %v8761_v23, %v3842_v35  ;;  %v4691_v61 = vrot.slane %v3071_v63, 5 }
 0x290   :  { %9990 = vst [vmem:[#allocation21_spill] sm:$0xff] %v8791_v9  ;;  %v3072_v2 = vpop.f32.mrf.mxu3  ;;  %v4838_v22 = vrot.slane %v3071_v63, 3  ;;  %v3163_v18 = vadd.s32 384, %v8749_v53  ;;  %v4989_v54 = vrot.slane %v3071_v63, 1 }
 0x291   :  { %9991 = vst [vmem:[#allocation22_spill] sm:$0xff] %v8796_v29  ;;  %v3073_v37 = vadd.f32 %v3072_v2, %v3059_v20 }
 0x292   :  { %9992 = vst [vmem:[#allocation23_spill] sm:$0xff] %v8801_v48  ;;  %v3154_v43 = vpop.f32.mrf.mxu1 }
 0x293   :  { %9993 = vst [vmem:[#allocation24_spill] sm:$0xff] %v8806_v62  ;;  %v3252_v15 = vrot.slane %v3073_v37, 7  ;;  %v3543_v5 = vrot.slane %v3073_v37, 5  ;;  %v3690_v29 = vrot.slane %v3073_v37, 3  ;;  %v3841_v9 = vrot.slane %v3073_v37, 1 }
 0x294   :  { %9994 = vst [vmem:[#allocation25_spill] sm:$0xff] %v8811_v24  ;;  %v8818_v35 = vsel %vm3212_vm7, %v3073_v37, %v4551_v57  ;;  %v8822_v20 = vsel %vm3212_vm7, %v3073_v37, %v4691_v61  ;;  %v8826_v2 = vsel %vm3212_vm7, %v3073_v37, %v4838_v22  ;;  %v2721_v61 = vperm.slane %v8756_v21, 2 }
 0x295   :  { %9995 = vst [vmem:[#allocation27_spill] sm:$0xff] %v8818_v35  ;;  %v8830_v44 = vsel %vm3212_vm7, %v3071_v63, %v3252_v15  ;;  %v8834_v14 = vsel %vm3212_vm7, %v3071_v63, %v3543_v5  ;;  %v8838_v57 = vsel %vm3212_vm7, %v3071_v63, %v3690_v29  ;;  %v8844_v22 = vsel %vm3212_vm7, %v3071_v63, %v3841_v9 }
 0x296   :  { %9996 = vst [vmem:[#allocation26_spill] sm:$0xff] %v8822_v20  ;;  %v3141_v20 = vadd.f32 %v3140_v10, %v2722_v58  ;;  %v3476_v35 = vadd.f32 %v3433_v17, %v8830_v44  ;;  %v3189_v15 = vand.u32 127, %v3163_v18  ;;  %v8849_v5 = vsel %vm3212_vm7, %v3073_v37, %v4989_v54 }
 0x297   :  { %9997 = vst [vmem:[#allocation28_spill] sm:$0xff] %v8826_v2  ;;  %v3162_v2 = vadd.s32 256, %v8749_v53  ;;  %v3113_v10 = vadd.f32 %v8745_v50, %v2721_v61  ;;  %v3115_v21 = vadd.f32 %v8747_v46, %v2721_v61 }
 0x298   :  { %9998 = vst [vmem:[#allocation29_spill] sm:$0xff] %v8830_v44  ;;  %v3155_v24 = vadd.f32 %v3154_v43, %v3141_v20  ;;  %v7006_v29 = vmul.f32 -1.442695, %v3476_v35  ;;  %v3126_v62 = vpop.f32.mrf.mxu3  ;;  %vm8854_vm8 = vcmp.lt.s32.totalorder %v3189_v15, 64 }
 0x299   :  { %9999 = vst [vmem:[#allocation30_spill] sm:$0xff] %v8838_v57  ;;  %v3143_v57 = vadd.f32 %v8751_v4, %v2722_v58  ;;  %v3182_v18 = vand.u32 127, %v3162_v2 }
 0x29a   :  { %10000 = vst [vmem:[#allocation31_spill] sm:$0xff] %v8844_v22  ;;  %7336 = vpow2.f32 %v7006_v29  ;;  %v3156_v17 = vpop.f32.mrf.mxu1  ;;  %v4554_v53 = vrot.slane %v3155_v24, 7  ;;  %v4694_v54 = vrot.slane %v3155_v24, 5  ;;  %v4841_v37 = vrot.slane %v3155_v24, 3 }
 0x29b   :  { %10001 = vst [vmem:[#allocation32_spill] sm:$0xff] %v8849_v5  ;;  %v3157_v63 = vadd.f32 %v3156_v17, %v3143_v57  ;;  %v4992_v43 = vrot.slane %v3155_v24, 1  ;;  %v3127_v57 = vadd.f32 %v3126_v62, %v3113_v10  ;;  %vm8890_vm9 = vcmp.lt.s32.totalorder %v3182_v18, 64 }
 0x29d   :  { %v3255_v35 = vrot.slane %v3157_v63, 7  ;;  %v3546_v20 = vrot.slane %v3157_v63, 5  ;;  %v3693_v5 = vrot.slane %v3157_v63, 3  ;;  %v3844_v4 = vrot.slane %v3157_v63, 1 }
 0x29e   :  { %v8860_v50 = vsel %vm8854_vm8, %v3157_v63, %v4554_v53  ;;  %v8864_v46 = vsel %vm8854_vm8, %v3157_v63, %v4694_v54  ;;  %v8868_v58 = vsel %vm8854_vm8, %v3157_v63, %v4841_v37  ;;  %v8872_v2 = vsel %vm8854_vm8, %v3157_v63, %v4992_v43 }
 0x29f   :  { %10004 = vst [vmem:[#allocation33_spill] sm:$0xff] %v8860_v50  ;;  %v8876_v61 = vsel %vm8854_vm8, %v3155_v24, %v3546_v20  ;;  %v8880_v15 = vsel %vm8854_vm8, %v3155_v24, %v3693_v5  ;;  %v8884_v29 = vsel %vm8854_vm8, %v3155_v24, %v3844_v4  ;;  %v8888_v63 = vsel %vm8854_vm8, %v3155_v24, %v3255_v35 }
 0x2a0   :  { %10005 = vst [vmem:[#allocation34_spill] sm:$0xff] %v8864_v46  ;;  %v7337_v17 = vpop.eup %7336  ;;  %v3128_v53 = vpop.f32.mrf.mxu3  ;;  %v4553_v43 = vrot.slane %v3127_v57, 7  ;;  %v3253_v20 = vrot.slane %v8765_v45, 7  ;;  %v4693_v24 = vrot.slane %v3127_v57, 5  ;;  %v4840_v18 = vrot.slane %v3127_v57, 3 }
 0x2a1   :  { %10006 = vst [vmem:[#allocation35_spill] sm:$0xff] %v8868_v58  ;;  %v3129_v54 = vadd.f32 %v3128_v53, %v3115_v21  ;;  %v3483_v37 = vadd.f32 1.0, %v7337_v17  ;;  %v4991_v35 = vrot.slane %v3127_v57, 1 }
 0x2a2   :  { %10007 = vst [vmem:[#allocation36_spill] sm:$0xff] %v8872_v2  ;;  %v3472_v62 = vpop.f32.mrf.mxu1 }
 0x2a3   :  { %10008 = vst [vmem:[#allocation37_spill] sm:$0xff] %v8884_v29  ;;  %v3479_v5 = vadd.f32 %v3472_v62, %v8888_v63  ;;  %v3545_v4 = vrot.slane %v3129_v54, 5  ;;  %v3692_v2 = vrot.slane %v3129_v54, 3  ;;  %v3843_v46 = vrot.slane %v3129_v54, 1 }
 0x2a4   :  { %10009 = vst [vmem:[#allocation38_spill] sm:$0xff] %v8888_v63  ;;  %v8898_v21 = vsel %vm8890_vm9, %v3129_v54, %v4553_v43  ;;  %7338 = vrcp.f32 %v3483_v37  ;;  %v8914_v53 = vsel %vm8890_vm9, %v3129_v54, %v4693_v24  ;;  %v8919_v62 = vsel %vm8767_vm6, %v8761_v23, %v3253_v20 }
 0x2a5   :  { %v7008_v58 = vmul.f32 -1.442695, %v3479_v5  ;;  %10012 = vst [vmem:[#allocation39_spill] sm:$0xff] %v8898_v21  ;;  %v8902_v9 = vsel %vm8890_vm9, %v3127_v57, %v3545_v4  ;;  %v8906_v17 = vsel %vm8890_vm9, %v3127_v57, %v3692_v2  ;;  %v8910_v45 = vsel %vm8890_vm9, %v3127_v57, %v3843_v46 }
 0x2a6   :  { %10013 = vst [vmem:[#allocation40_spill] sm:$0xff] %v8902_v9  ;;  %v8923_v43 = vsel %vm8890_vm9, %v3129_v54, %v4840_v18  ;;  %v8927_v2 = vsel %vm8890_vm9, %v3129_v54, %v4991_v35  ;;  %v3254_v18 = vrot.slane %v3129_v54, 7  ;;  %vm3489_vm11 = vweird.f32 %v3483_v37 }
 0x2a7   :  { %10014 = vst [vmem:[#allocation41_spill] sm:$0xff] %v8906_v17  ;;  %7340 = vpow2.f32 %v7008_v58 }
 0x2a8   :  { %10015 = vst [vmem:[#allocation42_spill] sm:$0xff] %v8910_v45  ;;  %v3446_v5 = vpop.f32.mrf.mxu3  ;;  %v8932_v35 = vsel %vm8890_vm9, %v3127_v57, %v3254_v18 }
 0x2a9   :  { %10016 = vst [vmem:[#allocation43_spill] sm:$0xff] %v8914_v53  ;;  %v3477_v46 = vadd.f32 %v3446_v5, %v8919_v62 }
 0x2aa   :  { %10017 = vst [vmem:[#allocation44_spill] sm:$0xff] %v8919_v62  ;;  %v3474_v4 = vpop.f32.mrf.mxu1  ;;  %v7339_v53 = vpop.eup %7338 }
 0x2ab   :  { %10018 = vst [vmem:[#allocation45_spill] sm:$0xff] %v8923_v43  ;;  %v7007_v24 = vmul.f32 -1.442695, %v3477_v46  ;;  %v3485_v13 = vmul.f32 %v7339_v53, %v3483_v37  ;;  %v3478_v46 = vadd.f32 %v8763_v8, %v8932_v35  ;;  %vm3490_vm10 = vweird.f32 %v7339_v53 }
 0x2ac   :  { %10019 = vst [vmem:[#allocation46_spill] sm:$0xff] %v8927_v2  ;;  %v3495_v43 = vand.u32 2147483648, %v3483_v37  ;;  %vm3491_vm12 = vmor %vm3489_vm11, %vm3490_vm10 }
 0x2ad   :  { %7342 = vpow2.f32 %v7007_v24  ;;  %v7341_v58 = vpop.eup %7340  ;;  %v3486_v44 = vsub.f32 1.0, %v3485_v13  ;;  %10020 = vst [vmem:[#allocation47_spill] sm:$0xff] %v8932_v35  ;;  %v3493_v13 = vand.u32 2147483647, %v3483_v37 }
 0x2ae   :  { %v3522_v23 = vadd.f32 1.0, %v7341_v58  ;;  %v3496_v62 = vor.u32 1.1754944e-38, %v3495_v43 }
 0x2af   :  { %v3487_v2 = vmul.f32 %v7339_v53, %v3486_v44  ;;  %vm3494_vm14 = vcmp.eq.f32.partialorder %v3493_v13, 8.507059e+37 }
 0x2b0   :  { %v3448_v21 = vpop.f32.mrf.mxu3  ;;  %7344 = vrcp.f32 %v3522_v23  ;;  %vm3528_vm6 = vweird.f32 %v3522_v23  ;;  %v3532_v43 = vand.u32 2147483647, %v3522_v23 }
 0x2b1   :  { %v3488_v24 = vadd.f32 %v7339_v53, %v3487_v2 }
 0x2b2   :  { %vm3533_vm8 = vcmp.eq.f32.partialorder %v3532_v43, 8.507059e+37 }
 0x2b3   :  { %v7343_v20 = vpop.eup %7342  ;;  %v3492_v10 = vsel %vm3491_vm12, %v7339_v53, %v3488_v24  ;;  %v3534_v24 = vand.u32 2147483648, %v3522_v23 }
 0x2b4   :  { %v3502_v50 = vadd.f32 1.0, %v7343_v20  ;;  %v3497_v8 = vsel %vm3494_vm14, %v3496_v62, %v3492_v10 }
 0x2b5   :  { %v3535_v62 = vor.u32 1.1754944e-38, %v3534_v24 }
 0x2b6   :  { %7346 = vrcp.f32 %v3502_v50  ;;  %v7345_v5 = vpop.eup %7344  ;;  %v3514_v54 = vand.u32 2147483648, %v3502_v50  ;;  %v3512_v44 = vand.u32 2147483647, %v3502_v50  ;;  %vm3508_vm15 = vweird.f32 %v3502_v50 }
 0x2b7   :  { %v3524_v58 = vmul.f32 %v7345_v5, %v3522_v23  ;;  %7348 = vtanh.f32 %v3478_v46  ;;  %vm3529_vm4 = vweird.f32 %v7345_v5 }
 0x2b8   :  { %v3515_v2 = vor.u32 1.1754944e-38, %v3514_v54  ;;  %vm3513_vm2 = vcmp.eq.f32.partialorder %v3512_v44, 8.507059e+37  ;;  %vm3530_vm7 = vmor %vm3528_vm6, %vm3529_vm4 }
 0x2b9   :  { %v3525_v18 = vsub.f32 1.0, %v3524_v58 }
 0x2bb   :  { %v3526_v37 = vmul.f32 %v7345_v5, %v3525_v18 }
 0x2bc   :  { %v7347_v4 = vpop.eup %7346 }
 0x2bd   :  { %v3504_v21 = vmul.f32 %v7347_v4, %v3502_v50  ;;  %vm3509_vm13 = vweird.f32 %v7347_v4  ;;  %v7349_v45 = vpop.eup %7348  ;;  %v3527_v53 = vadd.f32 %v7345_v5, %v3526_v37 }
 0x2be   :  { %vm3510_vm0 = vmor %vm3508_vm15, %vm3509_vm13  ;;  %v3539_v22 = vmul.f32 %v7349_v45, %v3497_v8 }
 0x2bf   :  { %v3505_v20 = vsub.f32 1.0, %v3504_v21  ;;  %v3531_v50 = vsel %vm3530_vm7, %v7345_v5, %v3527_v53 }
 0x2c1   :  { %v3506_v57 = vmul.f32 %v7347_v4, %v3505_v20 }
 0x2c3   :  { %v3507_v63 = vadd.f32 %v7347_v4, %v3506_v57 }
 0x2c5   :  { %v3511_v35 = vsel %vm3510_vm0, %v7347_v4, %v3507_v63  ;;  %v3536_v4 = vsel %vm3533_vm8, %v3535_v62, %v3531_v50 }
 0x2c6   :  { %v3516_v21 = vsel %vm3513_vm2, %v3515_v2, %v3511_v35 }
 0x2c7   :  { %v3538_v46 = vmul.f32 0.0, %v3516_v21 }
 0x2c9   :  { %v8936_v29 = vadd.f32 %v3539_v22, %v3538_v46 }
 0x2cb   :  { %7350 = vtanh.f32 %v8936_v29 }
 0x2d1   :  { %v7351_v63 = vpop.eup %7350 }
 0x2d2   :  { %v8939_v58 = vmul.f32 %v7351_v63, %v3536_v4 }
 0x2d4   :  { %10021 = vst [vmem:[#allocation48_spill] sm:$0xff] %v8939_v58  ;;  %v3555_v45 = vpack.c.bf16 %v8939_v58, %v8939_v58 }
 0x2d6   :  { %3564 = vmatmul.bf16.vlgmr.msrb.gmra.mxu2 %v3555_v45  ;;  %3577 = vmatmul.bf16.vlgmr.msrb.gmra.mxu3 %v3555_v45 }
 0x2d7   :  { %3590 = vmatmul.bf16.vlgmr.msra.gmra.mxu0 %v3555_v45  ;;  %3603 = vmatmul.bf16.vlgmr.msra.gmra.mxu1 %v3555_v45 }
 0x2d8   :  { %3857 = vmatpush.bf16.msrb.mxu2 %v8532_v49  ;;  %3870 = vmatpush.bf16.msrb.mxu3 %v8630_v26 }
 0x2d9   :  { %3883 = vmatpush.bf16.msra.mxu0 %v8567_v33  ;;  %3896 = vmatpush.bf16.msra.mxu1 %v8632_v25 }
 0x2dc   :  { %3858 = vmatpush.bf16.msrb.mxu2 %v8537_v39  ;;  %3871 = vmatpush.bf16.msrb.mxu3 %v8640_v31 }
 0x2dd   :  { %3884 = vmatpush.bf16.msra.mxu0 %v8582_v56  ;;  %3897 = vmatpush.bf16.msra.mxu1 %v8642_v40 }
 0x2e0   :  { %3859 = vmatpush.bf16.msrb.mxu2 %v8546_v42  ;;  %3872 = vmatpush.bf16.msrb.mxu3 %v8649_v60 }
 0x2e1   :  { %3885 = vmatpush.bf16.msra.mxu0 %v8601_v11  ;;  %3898 = vmatpush.bf16.msra.mxu1 %v8651_v7 }
 0x2e4   :  { %3860 = vmatpush.bf16.msrb.mxu2 %v8551_v16  ;;  %3873 = vmatpush.bf16.msrb.mxu3 %v8658_v27 }
 0x2e5   :  { %3886 = vmatpush.bf16.msra.mxu0 %v8615_v12  ;;  %3899 = vmatpush.bf16.msra.mxu1 %v8660_v52 }
 0x2e8   :  { %3861 = vmatpush.bf16.msrb.mxu2 %v8558_v47  ;;  %3874 = vmatpush.bf16.msrb.mxu3 %v8667_v19 }
 0x2e9   :  { %3887 = vmatpush.bf16.msra.mxu0 %v8620_v34  ;;  %3900 = vmatpush.bf16.msra.mxu1 %v8669_v1 }
 0x2ec   :  { %3862 = vmatpush.bf16.msrb.mxu2 %v8565_v30  ;;  %3875 = vmatpush.bf16.msrb.mxu3 %v8675_v59 }
 0x2ed   :  { %3888 = vmatpush.bf16.msra.mxu0 %v8624_v41  ;;  %3901 = vmatpush.bf16.msra.mxu1 %v8677_v55 }
 0x2f0   :  { %3863 = vmatpush.bf16.msrb.mxu2 %v8575_v36  ;;  %3876 = vmatpush.bf16.msrb.mxu3 %v8683_v3 }
 0x2f1   :  { %3889 = vmatpush.bf16.msra.mxu0 %v8628_v51  ;;  %3902 = vmatpush.bf16.msra.mxu1 %v8685_v28 }
 0x2f4   :  { %3864 = vmatpush.bf16.msrb.mxu2 %v8592_v32  ;;  %3877 = vmatpush.bf16.msrb.mxu3 %v8691_v38 }
 0x2f5   :  { %3890 = vmatpush.bf16.msra.mxu0 %v8636_v6  ;;  %3903 = vmatpush.bf16.msra.mxu1 %v8693_v0 }
 0x354   :  { %v3591_v22 = vpop.f32.mrf.mxu0  ;;  %v3604_v23 = vpop.f32.mrf.mxu1 }
 0x355   :  { %v3615_v35 = vrot.slane %v3604_v23, 7  ;;  %v3614_v45 = vrot.slane %v3591_v22, 7 }
 0x357   :  { %v3623_v5 = vadd.f32 %v3615_v35, %v8876_v61 }
 0x359   :  { %v7011_v13 = vmul.f32 -1.442695, %v3623_v5  ;;  %v3565_v20 = vpop.f32.mrf.mxu2  ;;  %v3578_v54 = vpop.f32.mrf.mxu3  ;;  %v3622_v5 = vadd.f32 %v3614_v45, %v8902_v9 }
 0x35a   :  { %v3612_v10 = vrot.slane %v3565_v20, 7  ;;  %v3613_v57 = vrot.slane %v3578_v54, 7 }
 0x35b   :  { %7352 = vpow2.f32 %v7011_v13 }
 0x35c   :  { %v3620_v44 = vadd.f32 %v3612_v10, %v8834_v14  ;;  %v3621_v18 = vadd.f32 %v3613_v57, %v8801_v48  ;;  %v3593_v8 = vpop.f32.mrf.mxu0  ;;  %v3606_v2 = vpop.f32.mrf.mxu1 }
 0x35e   :  { %v7009_v37 = vmul.f32 -1.442695, %v3620_v44  ;;  %v7010_v21 = vmul.f32 -1.442695, %v3621_v18 }
 0x360   :  { %7354 = vpow2.f32 %v7009_v37 }
 0x361   :  { %v7353_v46 = vpop.eup %7352  ;;  %7356 = vpow2.f32 %v7010_v21  ;;  %v3567_v53 = vpop.f32.mrf.mxu2 }
 0x362   :  { %v3580_v24 = vpop.f32.mrf.mxu3  ;;  %v3666_v43 = vadd.f32 1.0, %v7353_v46 }
 0x364   :  { %7358 = vrcp.f32 %v3666_v43  ;;  %vm3672_vm4 = vweird.f32 %v3666_v43 }
 0x366   :  { %v7355_v50 = vpop.eup %7354 }
 0x367   :  { %v7357_v62 = vpop.eup %7356  ;;  %v3627_v63 = vadd.f32 1.0, %v7355_v50 }
 0x368   :  { %v3646_v4 = vadd.f32 1.0, %v7357_v62 }
 0x369   :  { %7360 = vrcp.f32 %v3627_v63  ;;  %v3639_v44 = vand.u32 2147483648, %v3627_v63  ;;  %v3637_v2 = vand.u32 2147483647, %v3627_v63  ;;  %vm3633_vm11 = vweird.f32 %v3627_v63 }
 0x36a   :  { %7362 = vrcp.f32 %v3646_v4  ;;  %v7359_v23 = vpop.eup %7358  ;;  %v3658_v37 = vand.u32 2147483648, %v3646_v4  ;;  %v3656_v46 = vand.u32 2147483647, %v3646_v4  ;;  %vm3652_vm13 = vweird.f32 %v3646_v4 }
 0x36b   :  { %v3668_v10 = vmul.f32 %v7359_v23, %v3666_v43  ;;  %7364 = vtanh.f32 %v3622_v5  ;;  %v3640_v24 = vor.u32 1.1754944e-38, %v3639_v44  ;;  %vm3638_vm14 = vcmp.eq.f32.partialorder %v3637_v2, 8.507059e+37 }
 0x36c   :  { %v3659_v45 = vor.u32 1.1754944e-38, %v3658_v37  ;;  %vm3657_vm0 = vcmp.eq.f32.partialorder %v3656_v46, 8.507059e+37  ;;  %vm3673_vm2 = vweird.f32 %v7359_v23  ;;  %v3678_v44 = vand.u32 2147483648, %v3666_v43 }
 0x36d   :  { %v3669_v22 = vsub.f32 1.0, %v3668_v10  ;;  %vm3674_vm6 = vmor %vm3672_vm4, %vm3673_vm2 }
 0x36e   :  { %v3679_v2 = vor.u32 1.1754944e-38, %v3678_v44 }
 0x36f   :  { %v7361_v35 = vpop.eup %7360 }
 0x370   :  { %v7363_v13 = vpop.eup %7362  ;;  %v3629_v20 = vmul.f32 %v7361_v35, %v3627_v63  ;;  %vm3634_vm9 = vweird.f32 %v7361_v35 }
 0x371   :  { %v3648_v54 = vmul.f32 %v7363_v13, %v3646_v4  ;;  %vm3653_vm10 = vweird.f32 %v7363_v13  ;;  %vm3635_vm12 = vmor %vm3633_vm11, %vm3634_vm9  ;;  %v7365_v5 = vpop.eup %7364  ;;  %v3676_v4 = vand.u32 2147483647, %v3666_v43 }
 0x372   :  { %v3630_v57 = vsub.f32 1.0, %v3629_v20  ;;  %vm3654_vm15 = vmor %vm3652_vm13, %vm3653_vm10  ;;  %v3683_v20 = vrot.slane %v8936_v29, 7 }
 0x373   :  { %v3649_v18 = vsub.f32 1.0, %v3648_v54  ;;  %vm3677_vm7 = vcmp.eq.f32.partialorder %v3676_v4, 8.507059e+37 }
 0x374   :  { %v3631_v8 = vmul.f32 %v7361_v35, %v3630_v57 }
 0x375   :  { %v3650_v21 = vmul.f32 %v7363_v13, %v3649_v18  ;;  %v3670_v18 = vmul.f32 %v7359_v23, %v3669_v22 }
 0x376   :  { %v3632_v53 = vadd.f32 %v7361_v35, %v3631_v8 }
 0x377   :  { %v3651_v50 = vadd.f32 %v7363_v13, %v3650_v21  ;;  %v3671_v63 = vadd.f32 %v7359_v23, %v3670_v18 }
 0x378   :  { %v3636_v62 = vsel %vm3635_vm12, %v7361_v35, %v3632_v53 }
 0x379   :  { %v3641_v54 = vsel %vm3638_vm14, %v3640_v24, %v3636_v62  ;;  %v3655_v57 = vsel %vm3654_vm15, %v7363_v13, %v3651_v50  ;;  %v3675_v35 = vsel %vm3674_vm6, %v7359_v23, %v3671_v63 }
 0x37a   :  { %v3686_v9 = vmul.f32 %v7365_v5, %v3641_v54  ;;  %v3660_v48 = vsel %vm3657_vm0, %v3659_v45, %v3655_v57  ;;  %v3680_v13 = vsel %vm3677_vm7, %v3679_v2, %v3675_v35  ;;  %v10023_v45 = vld [vmem:[#allocation30_spill] sm:$0xff]  ;;  %vm5695_vm7 = vcmask 1040384  }
 0x37b   :  { %v3685_v10 = vmul.f32 %v3683_v20, %v3660_v48  ;;  %v10024_v20 = vld [vmem:[#allocation24_spill] sm:$0xff] }
 0x37d   :  { %v8980_v8 = vadd.f32 %v3686_v9, %v3685_v10 }
 0x37f   :  { %7366 = vtanh.f32 %v8980_v8 }
 0x385   :  { %v7367_v29 = vpop.eup %7366 }
 0x386   :  { %v8983_v37 = vmul.f32 %v7367_v29, %v3680_v13 }
 0x388   :  { %10022 = vst [vmem:[#allocation49_spill] sm:$0xff] %v8983_v37  ;;  %v3702_v48 = vpack.c.bf16 %v8983_v37, %v8983_v37 }
 0x38a   :  { %v3704_v9 = vshrl.u32 %v3702_v48, 16 }
 0x38c   :  { %3715 = vmatmul.bf16.vlgmr.msra.gmra.mxu2 %v3704_v9  ;;  %3728 = vmatmul.bf16.vlgmr.msra.gmra.mxu3 %v3704_v9 }
 0x38d   :  { %3741 = vmatmul.bf16.vlgmr.msrb.gmra.mxu0 %v3704_v9  ;;  %3754 = vmatmul.bf16.vlgmr.msrb.gmra.mxu1 %v3704_v9 }
 0x38e   :  { %3997 = vmatpush.bf16.msra.mxu2 %v8532_v49  ;;  %4010 = vmatpush.bf16.msra.mxu3 %v8630_v26 }
 0x38f   :  { %4023 = vmatpush.bf16.msrb.mxu0 %v8567_v33  ;;  %4036 = vmatpush.bf16.msrb.mxu1 %v8632_v25 }
 0x392   :  { %3998 = vmatpush.bf16.msra.mxu2 %v8537_v39  ;;  %4011 = vmatpush.bf16.msra.mxu3 %v8640_v31 }
 0x393   :  { %4024 = vmatpush.bf16.msrb.mxu0 %v8582_v56  ;;  %4037 = vmatpush.bf16.msrb.mxu1 %v8642_v40 }
 0x396   :  { %3999 = vmatpush.bf16.msra.mxu2 %v8546_v42  ;;  %4012 = vmatpush.bf16.msra.mxu3 %v8649_v60 }
 0x397   :  { %4025 = vmatpush.bf16.msrb.mxu0 %v8601_v11  ;;  %4038 = vmatpush.bf16.msrb.mxu1 %v8651_v7 }
 0x39a   :  { %4000 = vmatpush.bf16.msra.mxu2 %v8551_v16  ;;  %4013 = vmatpush.bf16.msra.mxu3 %v8658_v27 }
 0x39b   :  { %4026 = vmatpush.bf16.msrb.mxu0 %v8615_v12  ;;  %4039 = vmatpush.bf16.msrb.mxu1 %v8660_v52 }
 0x39e   :  { %4001 = vmatpush.bf16.msra.mxu2 %v8558_v47  ;;  %4014 = vmatpush.bf16.msra.mxu3 %v8667_v19 }
 0x39f   :  { %4027 = vmatpush.bf16.msrb.mxu0 %v8620_v34  ;;  %4040 = vmatpush.bf16.msrb.mxu1 %v8669_v1 }
 0x3a2   :  { %4002 = vmatpush.bf16.msra.mxu2 %v8565_v30  ;;  %4015 = vmatpush.bf16.msra.mxu3 %v8675_v59 }
 0x3a3   :  { %4028 = vmatpush.bf16.msrb.mxu0 %v8624_v41  ;;  %4041 = vmatpush.bf16.msrb.mxu1 %v8677_v55 }
 0x3a6   :  { %4003 = vmatpush.bf16.msra.mxu2 %v8575_v36  ;;  %4016 = vmatpush.bf16.msra.mxu3 %v8683_v3 }
 0x3a7   :  { %4029 = vmatpush.bf16.msrb.mxu0 %v8628_v51  ;;  %4042 = vmatpush.bf16.msrb.mxu1 %v8685_v28 }
 0x3aa   :  { %4004 = vmatpush.bf16.msra.mxu2 %v8592_v32  ;;  %4017 = vmatpush.bf16.msra.mxu3 %v8691_v38 }
 0x3ab   :  { %4030 = vmatpush.bf16.msrb.mxu0 %v8636_v6  ;;  %4043 = vmatpush.bf16.msrb.mxu1 %v8693_v0 }
 0x40a   :  { %v3742_v43 = vpop.f32.mrf.mxu0  ;;  %v3755_v23 = vpop.f32.mrf.mxu1 }
 0x40b   :  { %v3766_v21 = vrot.slane %v3755_v23, 6  ;;  %v3765_v23 = vrot.slane %v3742_v43, 6 }
 0x40d   :  { %v3774_v46 = vadd.f32 %v3766_v21, %v8880_v15 }
 0x40f   :  { %v7014_v22 = vmul.f32 -1.442695, %v3774_v46  ;;  %v3716_v53 = vpop.f32.mrf.mxu2  ;;  %v3729_v24 = vpop.f32.mrf.mxu3 }
 0x410   :  { %v3763_v50 = vrot.slane %v3716_v53, 6  ;;  %v3764_v62 = vrot.slane %v3729_v24, 6 }
 0x411   :  { %7368 = vpow2.f32 %v7014_v22  ;;  %v3773_v22 = vadd.f32 %v3765_v23, %v8906_v17  ;;  %v3834_v17 = vrot.slane %v8980_v8, 7 }
 0x412   :  { %v3771_v5 = vadd.f32 %v3763_v50, %v10023_v45  ;;  %v3772_v54 = vadd.f32 %v3764_v62, %v10024_v20  ;;  %v3744_v57 = vpop.f32.mrf.mxu0  ;;  %v3757_v18 = vpop.f32.mrf.mxu1 }
 0x414   :  { %v7012_v10 = vmul.f32 -1.442695, %v3771_v5  ;;  %v7013_v63 = vmul.f32 -1.442695, %v3772_v54 }
 0x416   :  { %7370 = vpow2.f32 %v7012_v10 }
 0x417   :  { %v7369_v44 = vpop.eup %7368  ;;  %7372 = vpow2.f32 %v7013_v63  ;;  %v3718_v4 = vpop.f32.mrf.mxu2 }
 0x418   :  { %v3731_v35 = vpop.f32.mrf.mxu3  ;;  %v3817_v2 = vadd.f32 1.0, %v7369_v44 }
 0x41a   :  { %7374 = vrcp.f32 %v3817_v2  ;;  %vm3823_vm2 = vweird.f32 %v3817_v2 }
 0x41c   :  { %v7371_v29 = vpop.eup %7370 }
 0x41d   :  { %v7373_v13 = vpop.eup %7372  ;;  %v3778_v48 = vadd.f32 1.0, %v7371_v29 }
 0x41e   :  { %v3797_v9 = vadd.f32 1.0, %v7373_v13 }
 0x41f   :  { %7376 = vrcp.f32 %v3778_v48  ;;  %v3790_v54 = vand.u32 2147483648, %v3778_v48  ;;  %v3788_v10 = vand.u32 2147483647, %v3778_v48  ;;  %vm3784_vm10 = vweird.f32 %v3778_v48 }
 0x420   :  { %7378 = vrcp.f32 %v3797_v9  ;;  %v7375_v21 = vpop.eup %7374  ;;  %v3809_v63 = vand.u32 2147483648, %v3797_v9  ;;  %v3807_v4 = vand.u32 2147483647, %v3797_v9  ;;  %vm3803_vm12 = vweird.f32 %v3797_v9 }
 0x421   :  { %v3819_v62 = vmul.f32 %v7375_v21, %v3817_v2  ;;  %7380 = vtanh.f32 %v3773_v22  ;;  %v3791_v29 = vor.u32 1.1754944e-38, %v3790_v54  ;;  %vm3789_vm13 = vcmp.eq.f32.partialorder %v3788_v10, 8.507059e+37 }
 0x422   :  { %v3810_v22 = vor.u32 1.1754944e-38, %v3809_v63  ;;  %vm3808_vm15 = vcmp.eq.f32.partialorder %v3807_v4, 8.507059e+37  ;;  %vm3824_vm0 = vweird.f32 %v7375_v21  ;;  %v3829_v54 = vand.u32 2147483648, %v3817_v2 }
 0x423   :  { %v3820_v43 = vsub.f32 1.0, %v3819_v62  ;;  %vm3825_vm4 = vmor %vm3823_vm2, %vm3824_vm0 }
 0x424   :  { %v3830_v10 = vor.u32 1.1754944e-38, %v3829_v54 }
 0x425   :  { %v7377_v46 = vpop.eup %7376 }
 0x426   :  { %v7379_v53 = vpop.eup %7378  ;;  %v3780_v24 = vmul.f32 %v7377_v46, %v3778_v48  ;;  %vm3785_vm8 = vweird.f32 %v7377_v46 }
 0x427   :  { %v3799_v50 = vmul.f32 %v7379_v53, %v3797_v9  ;;  %vm3804_vm9 = vweird.f32 %v7379_v53  ;;  %vm3786_vm11 = vmor %vm3784_vm10, %vm3785_vm8  ;;  %v3827_v9 = vand.u32 2147483647, %v3817_v2  ;;  %vm5697_vm8 = vcmask 1041408  }
 0x428   :  { %v3781_v5 = vsub.f32 1.0, %v3780_v24  ;;  %vm3805_vm14 = vmor %vm3803_vm12, %vm3804_vm9  ;;  %v7381_v24 = vpop.eup %7380 }
 0x429   :  { %v3800_v57 = vsub.f32 1.0, %v3799_v50  ;;  %vm3828_vm6 = vcmp.eq.f32.partialorder %v3827_v9, 8.507059e+37 }
 0x42a   :  { %v3782_v18 = vmul.f32 %v7377_v46, %v3781_v5 }
 0x42b   :  { %v3801_v44 = vmul.f32 %v7379_v53, %v3800_v57  ;;  %v3821_v57 = vmul.f32 %v7375_v21, %v3820_v43  ;;  %v10026_v43 = vld [vmem:[#allocation37_spill] sm:$0xff] }
 0x42c   :  { %v3783_v35 = vadd.f32 %v7377_v46, %v3782_v18 }
 0x42d   :  { %v3802_v13 = vadd.f32 %v7379_v53, %v3801_v44  ;;  %v3822_v48 = vadd.f32 %v7375_v21, %v3821_v57  ;;  %v10028_v57 = vld [vmem:[#allocation25_spill] sm:$0xff] }
 0x42e   :  { %v3787_v23 = vsel %vm3786_vm11, %v7377_v46, %v3783_v35 }
 0x42f   :  { %v3792_v50 = vsel %vm3789_vm13, %v3791_v29, %v3787_v23  ;;  %v3806_v5 = vsel %vm3805_vm14, %v7379_v53, %v3802_v13  ;;  %v3826_v46 = vsel %vm3825_vm4, %v7375_v21, %v3822_v48 }
 0x430   :  { %v3837_v20 = vmul.f32 %v7381_v24, %v3792_v50  ;;  %v3811_v45 = vsel %vm3808_vm15, %v3810_v22, %v3806_v5  ;;  %v3831_v8 = vsel %vm3828_vm6, %v3830_v10, %v3826_v46  ;;  %v10027_v50 = vld [vmem:[#allocation31_spill] sm:$0xff] }
 0x431   :  { %v3836_v62 = vmul.f32 %v3834_v17, %v3811_v45  ;;  %v5696_v17 = vsel %vm5695_vm7, %v8939_v58, %v8983_v37 }
 0x433   :  { %v9024_v18 = vadd.f32 %v3837_v20, %v3836_v62 }
 0x435   :  { %7382 = vtanh.f32 %v9024_v18 }
 0x43b   :  { %v7383_v53 = vpop.eup %7382 }
 0x43c   :  { %v9027_v63 = vmul.f32 %v7383_v53, %v3831_v8 }
 0x43e   :  { %10025 = vst [vmem:[#allocation51_spill] sm:$0xff] %v9027_v63  ;;  %v3853_v45 = vpack.c.bf16 %v9027_v63, %v9027_v63  ;;  %v9036_v20 = vsel %vm5697_vm8, %v5696_v17, %v9027_v63 }
 0x440   :  { %v3855_v2 = vrot.slane %v3853_v45, 1 }
 0x442   :  { %3865 = vmatmul.bf16.vlgmr.msrb.gmra.mxu2 %v3855_v2  ;;  %3878 = vmatmul.bf16.vlgmr.msrb.gmra.mxu3 %v3855_v2 }
 0x443   :  { %3891 = vmatmul.bf16.vlgmr.msra.gmra.mxu0 %v3855_v2  ;;  %3904 = vmatmul.bf16.vlgmr.msra.gmra.mxu1 %v3855_v2 }
 0x444   :  { %4135 = vmatpush.bf16.msrb.mxu2 %v8532_v49  ;;  %4148 = vmatpush.bf16.msrb.mxu3 %v8630_v26 }
 0x445   :  { %4161 = vmatpush.bf16.msra.mxu0 %v8567_v33  ;;  %4174 = vmatpush.bf16.msra.mxu1 %v8632_v25 }
 0x448   :  { %4136 = vmatpush.bf16.msrb.mxu2 %v8537_v39  ;;  %4149 = vmatpush.bf16.msrb.mxu3 %v8640_v31 }
 0x449   :  { %4162 = vmatpush.bf16.msra.mxu0 %v8582_v56  ;;  %4175 = vmatpush.bf16.msra.mxu1 %v8642_v40 }
 0x44c   :  { %4137 = vmatpush.bf16.msrb.mxu2 %v8546_v42  ;;  %4150 = vmatpush.bf16.msrb.mxu3 %v8649_v60 }
 0x44d   :  { %4163 = vmatpush.bf16.msra.mxu0 %v8601_v11  ;;  %4176 = vmatpush.bf16.msra.mxu1 %v8651_v7 }
 0x450   :  { %4138 = vmatpush.bf16.msrb.mxu2 %v8551_v16  ;;  %4151 = vmatpush.bf16.msrb.mxu3 %v8658_v27 }
 0x451   :  { %4164 = vmatpush.bf16.msra.mxu0 %v8615_v12  ;;  %4177 = vmatpush.bf16.msra.mxu1 %v8660_v52 }
 0x454   :  { %4139 = vmatpush.bf16.msrb.mxu2 %v8558_v47  ;;  %4152 = vmatpush.bf16.msrb.mxu3 %v8667_v19 }
 0x455   :  { %4165 = vmatpush.bf16.msra.mxu0 %v8620_v34  ;;  %4178 = vmatpush.bf16.msra.mxu1 %v8669_v1 }
 0x458   :  { %4140 = vmatpush.bf16.msrb.mxu2 %v8565_v30  ;;  %4153 = vmatpush.bf16.msrb.mxu3 %v8675_v59 }
 0x459   :  { %4166 = vmatpush.bf16.msra.mxu0 %v8624_v41  ;;  %4179 = vmatpush.bf16.msra.mxu1 %v8677_v55 }
 0x45c   :  { %4141 = vmatpush.bf16.msrb.mxu2 %v8575_v36  ;;  %4154 = vmatpush.bf16.msrb.mxu3 %v8683_v3 }
 0x45d   :  { %4167 = vmatpush.bf16.msra.mxu0 %v8628_v51  ;;  %4180 = vmatpush.bf16.msra.mxu1 %v8685_v28 }
 0x460   :  { %4142 = vmatpush.bf16.msrb.mxu2 %v8592_v32  ;;  %4155 = vmatpush.bf16.msrb.mxu3 %v8691_v38 }
 0x461   :  { %4168 = vmatpush.bf16.msra.mxu0 %v8636_v6  ;;  %4181 = vmatpush.bf16.msra.mxu1 %v8693_v0 }
 0x4c0   :  { %v3892_v21 = vpop.f32.mrf.mxu0  ;;  %v3905_v44 = vpop.f32.mrf.mxu1 }
 0x4c1   :  { %v3916_v4 = vrot.slane %v3905_v44, 5 }
 0x4c3   :  { %v3924_v35 = vadd.f32 %v3916_v4, %v10026_v43 }
 0x4c5   :  { %v7017_v29 = vmul.f32 -1.442695, %v3924_v35  ;;  %v3866_v13 = vpop.f32.mrf.mxu2  ;;  %v3879_v23 = vpop.f32.mrf.mxu3  ;;  %v3915_v35 = vrot.slane %v3892_v21, 5 }
 0x4c6   :  { %v3913_v22 = vrot.slane %v3866_v13, 5  ;;  %v3914_v24 = vrot.slane %v3879_v23, 5  ;;  %v10029_v23 = vld [vmem:[#allocation42_spill] sm:$0xff] }
 0x4c7   :  { %7384 = vpow2.f32 %v7017_v29 }
 0x4c8   :  { %v3921_v5 = vadd.f32 %v3913_v22, %v10027_v50  ;;  %v3922_v62 = vadd.f32 %v3914_v24, %v10028_v57  ;;  %v3894_v48 = vpop.f32.mrf.mxu0  ;;  %v3907_v54 = vpop.f32.mrf.mxu1  ;;  %v3923_v22 = vadd.f32 %v3915_v35, %v10029_v23  ;;  %v3984_v23 = vrot.slane %v9024_v18, 7 }
 0x4ca   :  { %v7015_v9 = vmul.f32 -1.442695, %v3921_v5  ;;  %v7016_v46 = vmul.f32 -1.442695, %v3922_v62 }
 0x4cc   :  { %7386 = vpow2.f32 %v7015_v9 }
 0x4cd   :  { %v7385_v10 = vpop.eup %7384  ;;  %7388 = vpow2.f32 %v7016_v46  ;;  %v3868_v53 = vpop.f32.mrf.mxu2 }
 0x4ce   :  { %v3881_v8 = vpop.f32.mrf.mxu3  ;;  %v3967_v17 = vadd.f32 1.0, %v7385_v10 }
 0x4d0   :  { %7390 = vrcp.f32 %v3967_v17  ;;  %vm3973_vm4 = vweird.f32 %v3967_v17 }
 0x4d2   :  { %v7387_v45 = vpop.eup %7386 }
 0x4d3   :  { %v7389_v2 = vpop.eup %7388  ;;  %v3928_v44 = vadd.f32 1.0, %v7387_v45 }
 0x4d4   :  { %v3947_v4 = vadd.f32 1.0, %v7389_v2 }
 0x4d5   :  { %7392 = vrcp.f32 %v3928_v44  ;;  %v3940_v9 = vand.u32 2147483648, %v3928_v44  ;;  %v3938_v53 = vand.u32 2147483647, %v3928_v44  ;;  %vm3934_vm11 = vweird.f32 %v3928_v44 }
 0x4d6   :  { %7394 = vrcp.f32 %v3947_v4  ;;  %v7391_v29 = vpop.eup %7390  ;;  %v3959_v8 = vand.u32 2147483648, %v3947_v4  ;;  %v3957_v2 = vand.u32 2147483647, %v3947_v4  ;;  %vm3953_vm13 = vweird.f32 %v3947_v4 }
 0x4d7   :  { %v3969_v48 = vmul.f32 %v7391_v29, %v3967_v17  ;;  %7396 = vtanh.f32 %v3923_v22  ;;  %v3941_v35 = vor.u32 1.1754944e-38, %v3940_v9  ;;  %vm3939_vm14 = vcmp.eq.f32.partialorder %v3938_v53, 8.507059e+37  ;;  %v10031_v53 = vld [vmem:[#allocation38_spill] sm:$0xff] }
 0x4d8   :  { %v3960_v22 = vor.u32 1.1754944e-38, %v3959_v8  ;;  %vm3958_vm0 = vcmp.eq.f32.partialorder %v3957_v2, 8.507059e+37  ;;  %vm3974_vm2 = vweird.f32 %v7391_v29  ;;  %v3979_v9 = vand.u32 2147483648, %v3967_v17 }
 0x4d9   :  { %v3970_v21 = vsub.f32 1.0, %v3969_v48  ;;  %vm3975_vm6 = vmor %vm3973_vm4, %vm3974_vm2 }
 0x4db   :  { %v7393_v13 = vpop.eup %7392 }
 0x4dc   :  { %v7395_v24 = vpop.eup %7394  ;;  %v3930_v5 = vmul.f32 %v7393_v13, %v3928_v44  ;;  %vm3935_vm9 = vweird.f32 %v7393_v13 }
 0x4dd   :  { %v3949_v62 = vmul.f32 %v7395_v24, %v3947_v4  ;;  %vm3954_vm10 = vweird.f32 %v7395_v24  ;;  %vm3936_vm12 = vmor %vm3934_vm11, %vm3935_vm9 }
 0x4de   :  { %v3931_v54 = vsub.f32 1.0, %v3930_v5  ;;  %vm3955_vm15 = vmor %vm3953_vm13, %vm3954_vm10  ;;  %v7397_v5 = vpop.eup %7396  ;;  %vm5699_vm10 = vcmask 1042432  }
 0x4df   :  { %v3950_v46 = vsub.f32 1.0, %v3949_v62 }
 0x4e0   :  { %v3932_v10 = vmul.f32 %v7393_v13, %v3931_v54 }
 0x4e1   :  { %v3951_v45 = vmul.f32 %v7395_v24, %v3950_v46  ;;  %v3971_v46 = vmul.f32 %v7391_v29, %v3970_v21 }
 0x4e2   :  { %v3933_v58 = vadd.f32 %v7393_v13, %v3932_v10 }
 0x4e3   :  { %v3952_v37 = vadd.f32 %v7395_v24, %v3951_v45  ;;  %v3972_v44 = vadd.f32 %v7391_v29, %v3971_v46 }
 0x4e4   :  { %v3937_v63 = vsel %vm3936_vm12, %v7393_v13, %v3933_v58  ;;  %v3977_v58 = vand.u32 2147483647, %v3967_v17 }
 0x4e5   :  { %v3942_v62 = vsel %vm3939_vm14, %v3941_v35, %v3937_v63  ;;  %v3956_v54 = vsel %vm3955_vm15, %v7395_v24, %v3952_v37  ;;  %v3976_v4 = vsel %vm3975_vm6, %v7391_v29, %v3972_v44  ;;  %v3980_v63 = vor.u32 1.1754944e-38, %v3979_v9 }
 0x4e6   :  { %v3987_v57 = vmul.f32 %v7397_v5, %v3942_v62  ;;  %v3961_v50 = vsel %vm3958_vm0, %v3960_v22, %v3956_v54  ;;  %vm3978_vm9 = vcmp.eq.f32.partialorder %v3977_v58, 8.507059e+37  ;;  %v10032_v5 = vld [vmem:[#allocation29_spill] sm:$0xff]  ;;  %v10033_v54 = vld [vmem:[#allocation44_spill] sm:$0xff] }
 0x4e7   :  { %v3986_v48 = vmul.f32 %v3984_v23, %v3961_v50  ;;  %v3981_v13 = vsel %vm3978_vm9, %v3980_v63, %v3976_v4 }
 0x4e9   :  { %v9075_v10 = vadd.f32 %v3987_v57, %v3986_v48 }
 0x4eb   :  { %7398 = vtanh.f32 %v9075_v10 }
 0x4f1   :  { %v7399_v37 = vpop.eup %7398 }
 0x4f2   :  { %v9078_v18 = vmul.f32 %v7399_v37, %v3981_v13 }
 0x4f4   :  { %10030 = vst [vmem:[#allocation50_spill] sm:$0xff] %v9078_v18  ;;  %v3991_v50 = vpack.c.bf16 %v9078_v18, %v9078_v18  ;;  %v9085_v57 = vsel %vm5699_vm10, %v9036_v20, %v9078_v18 }
 0x4f6   :  { %v3993_v23 = vshrl.u32 %v3991_v50, 16 }
 0x4f8   :  { %v3995_v24 = vrot.slane %v3993_v23, 1 }
 0x4fa   :  { %4005 = vmatmul.bf16.vlgmr.msra.gmra.mxu2 %v3995_v24  ;;  %4018 = vmatmul.bf16.vlgmr.msra.gmra.mxu3 %v3995_v24 }
 0x4fb   :  { %4031 = vmatmul.bf16.vlgmr.msrb.gmra.mxu0 %v3995_v24  ;;  %4044 = vmatmul.bf16.vlgmr.msrb.gmra.mxu1 %v3995_v24 }
 0x4fc   :  { %4275 = vmatpush.bf16.msra.mxu2 %v8532_v49  ;;  %4288 = vmatpush.bf16.msra.mxu3 %v8630_v26 }
 0x4fd   :  { %4301 = vmatpush.bf16.msrb.mxu0 %v8567_v33  ;;  %4314 = vmatpush.bf16.msrb.mxu1 %v8632_v25 }
 0x500   :  { %4276 = vmatpush.bf16.msra.mxu2 %v8537_v39  ;;  %4289 = vmatpush.bf16.msra.mxu3 %v8640_v31 }
 0x501   :  { %4302 = vmatpush.bf16.msrb.mxu0 %v8582_v56  ;;  %4315 = vmatpush.bf16.msrb.mxu1 %v8642_v40 }
 0x504   :  { %4277 = vmatpush.bf16.msra.mxu2 %v8546_v42  ;;  %4290 = vmatpush.bf16.msra.mxu3 %v8649_v60 }
 0x505   :  { %4303 = vmatpush.bf16.msrb.mxu0 %v8601_v11  ;;  %4316 = vmatpush.bf16.msrb.mxu1 %v8651_v7 }
 0x508   :  { %4278 = vmatpush.bf16.msra.mxu2 %v8551_v16  ;;  %4291 = vmatpush.bf16.msra.mxu3 %v8658_v27 }
 0x509   :  { %4304 = vmatpush.bf16.msrb.mxu0 %v8615_v12  ;;  %4317 = vmatpush.bf16.msrb.mxu1 %v8660_v52 }
 0x50c   :  { %4279 = vmatpush.bf16.msra.mxu2 %v8558_v47  ;;  %4292 = vmatpush.bf16.msra.mxu3 %v8667_v19 }
 0x50d   :  { %4305 = vmatpush.bf16.msrb.mxu0 %v8620_v34  ;;  %4318 = vmatpush.bf16.msrb.mxu1 %v8669_v1 }
 0x510   :  { %4280 = vmatpush.bf16.msra.mxu2 %v8565_v30  ;;  %4293 = vmatpush.bf16.msra.mxu3 %v8675_v59 }
 0x511   :  { %4306 = vmatpush.bf16.msrb.mxu0 %v8624_v41  ;;  %4319 = vmatpush.bf16.msrb.mxu1 %v8677_v55 }
 0x514   :  { %4281 = vmatpush.bf16.msra.mxu2 %v8575_v36  ;;  %4294 = vmatpush.bf16.msra.mxu3 %v8683_v3 }
 0x515   :  { %4307 = vmatpush.bf16.msrb.mxu0 %v8628_v51  ;;  %4320 = vmatpush.bf16.msrb.mxu1 %v8685_v28 }
 0x518   :  { %4282 = vmatpush.bf16.msra.mxu2 %v8592_v32  ;;  %4295 = vmatpush.bf16.msra.mxu3 %v8691_v38 }
 0x519   :  { %4308 = vmatpush.bf16.msrb.mxu0 %v8636_v6  ;;  %4321 = vmatpush.bf16.msrb.mxu1 %v8693_v0 }
 0x578   :  { %v4032_v20 = vpop.f32.mrf.mxu0  ;;  %v4045_v17 = vpop.f32.mrf.mxu1 }
 0x579   :  { %v4056_v29 = vrot.slane %v4045_v17, 4 }
 0x57b   :  { %v4064_v8 = vadd.f32 %v4056_v29, %v10031_v53  ;;  %v4055_v29 = vrot.slane %v4032_v20, 4 }
 0x57d   :  { %v7020_v45 = vmul.f32 -1.442695, %v4064_v8  ;;  %v4006_v2 = vpop.f32.mrf.mxu2  ;;  %v4019_v21 = vpop.f32.mrf.mxu3 }
 0x57e   :  { %v4053_v35 = vrot.slane %v4006_v2, 4  ;;  %v4054_v22 = vrot.slane %v4019_v21, 4 }
 0x57f   :  { %7400 = vpow2.f32 %v7020_v45  ;;  %v10034_v45 = vld [vmem:[#allocation47_spill] sm:$0xff] }
 0x580   :  { %v4061_v62 = vadd.f32 %v4053_v35, %v10032_v5  ;;  %v4062_v46 = vadd.f32 %v4054_v22, %v10033_v54  ;;  %v4034_v48 = vpop.f32.mrf.mxu0  ;;  %v4047_v44 = vpop.f32.mrf.mxu1  ;;  %v4063_v2 = vadd.f32 %v4055_v29, %v10034_v45 }
 0x582   :  { %v7018_v9 = vmul.f32 -1.442695, %v4061_v62  ;;  %v7019_v58 = vmul.f32 -1.442695, %v4062_v46 }
 0x584   :  { %7402 = vpow2.f32 %v7018_v9 }
 0x585   :  { %v7401_v4 = vpop.eup %7400  ;;  %7404 = vpow2.f32 %v7019_v58  ;;  %v4008_v63 = vpop.f32.mrf.mxu2 }
 0x586   :  { %v4021_v37 = vpop.f32.mrf.mxu3  ;;  %v4107_v13 = vadd.f32 1.0, %v7401_v4 }
 0x588   :  { %7406 = vrcp.f32 %v4107_v13  ;;  %vm4113_vm9 = vweird.f32 %v4107_v13 }
 0x58a   :  { %v7403_v50 = vpop.eup %7402 }
 0x58b   :  { %v7405_v23 = vpop.eup %7404  ;;  %v4068_v24 = vadd.f32 1.0, %v7403_v50 }
 0x58c   :  { %v4087_v17 = vadd.f32 1.0, %v7405_v23 }
 0x58d   :  { %7408 = vrcp.f32 %v4068_v24  ;;  %v4080_v54 = vand.u32 2147483648, %v4068_v24  ;;  %v4078_v44 = vand.u32 2147483647, %v4068_v24  ;;  %vm4074_vm13 = vweird.f32 %v4068_v24 }
 0x58e   :  { %7410 = vrcp.f32 %v4087_v17  ;;  %v7407_v53 = vpop.eup %7406  ;;  %v4099_v9 = vand.u32 2147483648, %v4087_v17  ;;  %v4097_v4 = vand.u32 2147483647, %v4087_v17  ;;  %vm4093_vm15 = vweird.f32 %v4087_v17 }
 0x58f   :  { %v4109_v5 = vmul.f32 %v7407_v53, %v4107_v13  ;;  %7412 = vtanh.f32 %v4063_v2  ;;  %v4081_v37 = vor.u32 1.1754944e-38, %v4080_v54  ;;  %vm4079_vm0 = vcmp.eq.f32.partialorder %v4078_v44, 8.507059e+37 }
 0x590   :  { %v4100_v29 = vor.u32 1.1754944e-38, %v4099_v9  ;;  %vm4098_vm4 = vcmp.eq.f32.partialorder %v4097_v4, 8.507059e+37  ;;  %vm4114_vm6 = vweird.f32 %v7407_v53  ;;  %v4119_v54 = vand.u32 2147483648, %v4107_v13 }
 0x591   :  { %v4110_v20 = vsub.f32 1.0, %v4109_v5 }
 0x592   :  { %v4120_v44 = vor.u32 1.1754944e-38, %v4119_v54 }
 0x593   :  { %v7409_v8 = vpop.eup %7408 }
 0x594   :  { %v7411_v21 = vpop.eup %7410  ;;  %v4070_v35 = vmul.f32 %v7409_v8, %v4068_v24  ;;  %vm4075_vm11 = vweird.f32 %v7409_v8 }
 0x595   :  { %v4089_v22 = vmul.f32 %v7411_v21, %v4087_v17  ;;  %vm4094_vm12 = vweird.f32 %v7411_v21  ;;  %vm4076_vm14 = vmor %vm4074_vm13, %vm4075_vm11  ;;  %v7413_v45 = vpop.eup %7412  ;;  %v4117_v17 = vand.u32 2147483647, %v4107_v13  ;;  %vm5701_vm13 = vcmask 1043456  }
 0x596   :  { %v4071_v62 = vsub.f32 1.0, %v4070_v35  ;;  %vm4095_vm2 = vmor %vm4093_vm15, %vm4094_vm12 }
 0x597   :  { %v4090_v46 = vsub.f32 1.0, %v4089_v22  ;;  %v4124_v22 = vrot.slane %v9075_v10, 7  ;;  %vm4115_vm11 = vmor %vm4113_vm9, %vm4114_vm6  ;;  %vm4118_vm12 = vcmp.eq.f32.partialorder %v4117_v17, 8.507059e+37 }
 0x598   :  { %v4072_v48 = vmul.f32 %v7409_v8, %v4071_v62  ;;  %v4111_v62 = vmul.f32 %v7407_v53, %v4110_v20 }
 0x599   :  { %v4091_v58 = vmul.f32 %v7411_v21, %v4090_v46 }
 0x59a   :  { %v4073_v63 = vadd.f32 %v7409_v8, %v4072_v48  ;;  %v4112_v24 = vadd.f32 %v7407_v53, %v4111_v62 }
 0x59b   :  { %v4092_v50 = vadd.f32 %v7411_v21, %v4091_v58 }
 0x59c   :  { %v4077_v23 = vsel %vm4076_vm14, %v7409_v8, %v4073_v63  ;;  %v4116_v8 = vsel %vm4115_vm11, %v7407_v53, %v4112_v24 }
 0x59d   :  { %v4082_v2 = vsel %vm4079_vm0, %v4081_v37, %v4077_v23  ;;  %v4096_v35 = vsel %vm4095_vm2, %v7411_v21, %v4092_v50  ;;  %v4121_v9 = vsel %vm4118_vm12, %v4120_v44, %v4116_v8 }
 0x59e   :  { %v4127_v46 = vmul.f32 %v7413_v45, %v4082_v2  ;;  %v4101_v18 = vsel %vm4098_vm4, %v4100_v29, %v4096_v35  ;;  %v10035_v2 = vld [vmem:[#allocation23_spill] sm:$0xff] }
 0x59f   :  { %v4126_v5 = vmul.f32 %v4124_v22, %v4101_v18 }
 0x5a1   :  { %v9124_v48 = vadd.f32 %v4127_v46, %v4126_v5 }
 0x5a3   :  { %7414 = vtanh.f32 %v9124_v48 }
 0x5a9   :  { %v7415_v21 = vpop.eup %7414 }
 0x5aa   :  { %v9127_v10 = vmul.f32 %v7415_v21, %v4121_v9 }
 0x5ac   :  { %v4131_v18 = vpack.c.bf16 %v9127_v10, %v9127_v10  ;;  %v9134_v58 = vsel %vm5701_vm13, %v9085_v57, %v9127_v10 }
 0x5ae   :  { %v4133_v4 = vrot.slane %v4131_v18, 2 }
 0x5b0   :  { %4143 = vmatmul.bf16.vlgmr.msrb.gmra.mxu2 %v4133_v4  ;;  %4156 = vmatmul.bf16.vlgmr.msrb.gmra.mxu3 %v4133_v4 }
 0x5b1   :  { %4169 = vmatmul.bf16.vlgmr.msra.gmra.mxu0 %v4133_v4  ;;  %4182 = vmatmul.bf16.vlgmr.msra.gmra.mxu1 %v4133_v4 }
 0x5b2   :  { %4413 = vmatpush.bf16.msrb.mxu2 %v8532_v49  ;;  %4426 = vmatpush.bf16.msrb.mxu3 %v8630_v26 }
 0x5b3   :  { %4439 = vmatpush.bf16.msra.mxu0 %v8567_v33  ;;  %4452 = vmatpush.bf16.msra.mxu1 %v8632_v25 }
 0x5b6   :  { %4414 = vmatpush.bf16.msrb.mxu2 %v8537_v39  ;;  %4427 = vmatpush.bf16.msrb.mxu3 %v8640_v31 }
 0x5b7   :  { %4440 = vmatpush.bf16.msra.mxu0 %v8582_v56  ;;  %4453 = vmatpush.bf16.msra.mxu1 %v8642_v40 }
 0x5ba   :  { %4415 = vmatpush.bf16.msrb.mxu2 %v8546_v42  ;;  %4428 = vmatpush.bf16.msrb.mxu3 %v8649_v60 }
 0x5bb   :  { %4441 = vmatpush.bf16.msra.mxu0 %v8601_v11  ;;  %4454 = vmatpush.bf16.msra.mxu1 %v8651_v7 }
 0x5be   :  { %4416 = vmatpush.bf16.msrb.mxu2 %v8551_v16  ;;  %4429 = vmatpush.bf16.msrb.mxu3 %v8658_v27 }
 0x5bf   :  { %4442 = vmatpush.bf16.msra.mxu0 %v8615_v12  ;;  %4455 = vmatpush.bf16.msra.mxu1 %v8660_v52 }
 0x5c2   :  { %4417 = vmatpush.bf16.msrb.mxu2 %v8558_v47  ;;  %4430 = vmatpush.bf16.msrb.mxu3 %v8667_v19 }
 0x5c3   :  { %4443 = vmatpush.bf16.msra.mxu0 %v8620_v34  ;;  %4456 = vmatpush.bf16.msra.mxu1 %v8669_v1 }
 0x5c6   :  { %4418 = vmatpush.bf16.msrb.mxu2 %v8565_v30  ;;  %4431 = vmatpush.bf16.msrb.mxu3 %v8675_v59 }
 0x5c7   :  { %4444 = vmatpush.bf16.msra.mxu0 %v8624_v41  ;;  %4457 = vmatpush.bf16.msra.mxu1 %v8677_v55 }
 0x5ca   :  { %4419 = vmatpush.bf16.msrb.mxu2 %v8575_v36  ;;  %4432 = vmatpush.bf16.msrb.mxu3 %v8683_v3 }
 0x5cb   :  { %4445 = vmatpush.bf16.msra.mxu0 %v8628_v51  ;;  %4458 = vmatpush.bf16.msra.mxu1 %v8685_v28 }
 0x5ce   :  { %4420 = vmatpush.bf16.msrb.mxu2 %v8592_v32  ;;  %4433 = vmatpush.bf16.msrb.mxu3 %v8691_v38 }
 0x5cf   :  { %4446 = vmatpush.bf16.msra.mxu0 %v8636_v6  ;;  %4459 = vmatpush.bf16.msra.mxu1 %v8693_v0 }
 0x62e   :  { %v4170_v57 = vpop.f32.mrf.mxu0  ;;  %v4183_v13 = vpop.f32.mrf.mxu1 }
 0x62f   :  { %v4194_v53 = vrot.slane %v4183_v13, 3  ;;  %v10036_v13 = vld [vmem:[#allocation40_spill] sm:$0xff] }
 0x631   :  { %v4202_v20 = vadd.f32 %v4194_v53, %v8876_v61 }
 0x633   :  { %v7023_v63 = vmul.f32 -1.442695, %v4202_v20  ;;  %v4144_v37 = vpop.f32.mrf.mxu2  ;;  %v4157_v50 = vpop.f32.mrf.mxu3 }
 0x634   :  { %v4191_v23 = vrot.slane %v4144_v37, 3  ;;  %v4192_v29 = vrot.slane %v4157_v50, 3 }
 0x635   :  { %7416 = vpow2.f32 %v7023_v63 }
 0x636   :  { %v4199_v45 = vadd.f32 %v4191_v23, %v8834_v14  ;;  %v4200_v35 = vadd.f32 %v4192_v29, %v10035_v2  ;;  %v4172_v22 = vpop.f32.mrf.mxu0  ;;  %v4185_v62 = vpop.f32.mrf.mxu1  ;;  %v4193_v14 = vrot.slane %v4170_v57, 3 }
 0x638   :  { %v7021_v46 = vmul.f32 -1.442695, %v4199_v45  ;;  %v7022_v5 = vmul.f32 -1.442695, %v4200_v35  ;;  %v4201_v53 = vadd.f32 %v4193_v14, %v10036_v13 }
 0x63a   :  { %7418 = vpow2.f32 %v7021_v46 }
 0x63b   :  { %v7417_v24 = vpop.eup %7416  ;;  %7420 = vpow2.f32 %v7022_v5  ;;  %v4146_v54 = vpop.f32.mrf.mxu2 }
 0x63c   :  { %v4159_v17 = vpop.f32.mrf.mxu3  ;;  %v4245_v61 = vadd.f32 1.0, %v7417_v24 }
 0x63e   :  { %7422 = vrcp.f32 %v4245_v61 }
 0x640   :  { %v7419_v8 = vpop.eup %7418 }
 0x641   :  { %v7421_v44 = vpop.eup %7420  ;;  %v4206_v21 = vadd.f32 1.0, %v7419_v8 }
 0x642   :  { %v4225_v9 = vadd.f32 1.0, %v7421_v44 }
 0x643   :  { %7424 = vrcp.f32 %v4206_v21  ;;  %v4218_v29 = vand.u32 2147483648, %v4206_v21  ;;  %v4216_v35 = vand.u32 2147483647, %v4206_v21  ;;  %vm4212_vm0 = vweird.f32 %v4206_v21 }
 0x644   :  { %7426 = vrcp.f32 %v4225_v9  ;;  %v7423_v18 = vpop.eup %7422  ;;  %v4237_v22 = vand.u32 2147483648, %v4225_v9  ;;  %v4235_v46 = vand.u32 2147483647, %v4225_v9  ;;  %vm4231_vm4 = vweird.f32 %v4225_v9 }
 0x645   :  { %v4247_v50 = vmul.f32 %v7423_v18, %v4245_v61  ;;  %7428 = vtanh.f32 %v4201_v53  ;;  %v4219_v24 = vor.u32 1.1754944e-38, %v4218_v29  ;;  %vm4217_vm6 = vcmp.eq.f32.partialorder %v4216_v35, 8.507059e+37 }
 0x646   :  { %v4238_v8 = vor.u32 1.1754944e-38, %v4237_v22  ;;  %vm4236_vm11 = vcmp.eq.f32.partialorder %v4235_v46, 8.507059e+37  ;;  %v4262_v53 = vrot.slane %v9124_v48, 7  ;;  %vm4252_vm12 = vweird.f32 %v7423_v18 }
 0x647   :  { %v4248_v57 = vsub.f32 1.0, %v4247_v50  ;;  %v4257_v29 = vand.u32 2147483648, %v4245_v61 }
 0x649   :  { %v7425_v4 = vpop.eup %7424 }
 0x64a   :  { %v7427_v20 = vpop.eup %7426  ;;  %v4208_v63 = vmul.f32 %v7425_v4, %v4206_v21  ;;  %vm4213_vm14 = vweird.f32 %v7425_v4 }
 0x64b   :  { %v4227_v37 = vmul.f32 %v7427_v20, %v4225_v9  ;;  %vm4232_vm15 = vweird.f32 %v7427_v20  ;;  %vm4214_vm2 = vmor %vm4212_vm0, %vm4213_vm14  ;;  %v7429_v44 = vpop.eup %7428  ;;  %vm4251_vm14 = vweird.f32 %v4245_v61  ;;  %v4255_v9 = vand.u32 2147483647, %v4245_v61 }
 0x64c   :  { %v4209_v23 = vsub.f32 1.0, %v4208_v63  ;;  %vm4233_vm9 = vmor %vm4231_vm4, %vm4232_vm15  ;;  %v4249_v63 = vmul.f32 %v7423_v18, %v4248_v57 }
 0x64d   :  { %v4228_v45 = vsub.f32 1.0, %v4227_v37  ;;  %vm4253_vm15 = vmor %vm4251_vm14, %vm4252_vm12  ;;  %vm4256_vm0 = vcmp.eq.f32.partialorder %v4255_v9, 8.507059e+37 }
 0x64e   :  { %v4210_v2 = vmul.f32 %v7425_v4, %v4209_v23  ;;  %v4250_v21 = vadd.f32 %v7423_v18, %v4249_v63 }
 0x64f   :  { %v4229_v62 = vmul.f32 %v7427_v20, %v4228_v45 }
 0x650   :  { %v4211_v5 = vadd.f32 %v7425_v4, %v4210_v2  ;;  %v4258_v2 = vor.u32 1.1754944e-38, %v4257_v29 }
 0x651   :  { %v4230_v54 = vadd.f32 %v7427_v20, %v4229_v62 }
 0x652   :  { %v4215_v17 = vsel %vm4214_vm2, %v7425_v4, %v4211_v5  ;;  %v4254_v4 = vsel %vm4253_vm15, %v7423_v18, %v4250_v21 }
 0x653   :  { %v4220_v14 = vsel %vm4217_vm6, %v4219_v24, %v4215_v17  ;;  %v4234_v13 = vsel %vm4233_vm9, %v7427_v20, %v4230_v54  ;;  %v4259_v35 = vsel %vm4256_vm0, %v4258_v2, %v4254_v4 }
 0x654   :  { %v4265_v37 = vmul.f32 %v7429_v44, %v4220_v14  ;;  %v4239_v23 = vsel %vm4236_vm11, %v4238_v8, %v4234_v13  ;;  %v10037_v14 = vld [vmem:[#allocation30_spill] sm:$0xff] }
 0x655   :  { %v4264_v50 = vmul.f32 %v4262_v53, %v4239_v23  ;;  %v10038_v53 = vld [vmem:[#allocation24_spill] sm:$0xff] }
 0x657   :  { %v9173_v45 = vadd.f32 %v4265_v37, %v4264_v50 }
 0x659   :  { %7430 = vtanh.f32 %v9173_v45 }
 0x65f   :  { %v7431_v20 = vpop.eup %7430 }
 0x660   :  { %v9176_v48 = vmul.f32 %v7431_v20, %v4259_v35 }
 0x662   :  { %v4269_v22 = vpack.c.bf16 %v9176_v48, %v9176_v48  ;;  %v9183_v62 = vsel %vm1852_vm5, %v9134_v58, %v9176_v48 }
 0x664   :  { %v4271_v46 = vshrl.u32 %v4269_v22, 16 }
 0x666   :  { %v4273_v57 = vrot.slane %v4271_v46, 2 }
 0x668   :  { %4283 = vmatmul.bf16.vlgmr.msra.gmra.mxu2 %v4273_v57  ;;  %4296 = vmatmul.bf16.vlgmr.msra.gmra.mxu3 %v4273_v57 }
 0x669   :  { %4309 = vmatmul.bf16.vlgmr.msrb.gmra.mxu0 %v4273_v57  ;;  %4322 = vmatmul.bf16.vlgmr.msrb.gmra.mxu1 %v4273_v57 }
 0x66a   :  { %4569 = vmatpush.bf16.msra.mxu2 %v8532_v49  ;;  %4582 = vmatpush.bf16.msra.mxu3 %v8630_v26 }
 0x66b   :  { %4595 = vmatpush.bf16.msrb.mxu0 %v8567_v33  ;;  %4608 = vmatpush.bf16.msrb.mxu1 %v8632_v25 }
 0x66e   :  { %4570 = vmatpush.bf16.msra.mxu2 %v8537_v39  ;;  %4583 = vmatpush.bf16.msra.mxu3 %v8640_v31 }
 0x66f   :  { %4596 = vmatpush.bf16.msrb.mxu0 %v8582_v56  ;;  %4609 = vmatpush.bf16.msrb.mxu1 %v8642_v40 }
 0x672   :  { %4571 = vmatpush.bf16.msra.mxu2 %v8546_v42  ;;  %4584 = vmatpush.bf16.msra.mxu3 %v8649_v60 }
 0x673   :  { %4597 = vmatpush.bf16.msrb.mxu0 %v8601_v11  ;;  %4610 = vmatpush.bf16.msrb.mxu1 %v8651_v7 }
 0x676   :  { %4572 = vmatpush.bf16.msra.mxu2 %v8551_v16  ;;  %4585 = vmatpush.bf16.msra.mxu3 %v8658_v27 }
 0x677   :  { %4598 = vmatpush.bf16.msrb.mxu0 %v8615_v12  ;;  %4611 = vmatpush.bf16.msrb.mxu1 %v8660_v52 }
 0x67a   :  { %4573 = vmatpush.bf16.msra.mxu2 %v8558_v47  ;;  %4586 = vmatpush.bf16.msra.mxu3 %v8667_v19 }
 0x67b   :  { %4599 = vmatpush.bf16.msrb.mxu0 %v8620_v34  ;;  %4612 = vmatpush.bf16.msrb.mxu1 %v8669_v1 }
 0x67e   :  { %4574 = vmatpush.bf16.msra.mxu2 %v8565_v30  ;;  %4587 = vmatpush.bf16.msra.mxu3 %v8675_v59 }
 0x67f   :  { %4600 = vmatpush.bf16.msrb.mxu0 %v8624_v41  ;;  %4613 = vmatpush.bf16.msrb.mxu1 %v8677_v55 }
 0x682   :  { %4575 = vmatpush.bf16.msra.mxu2 %v8575_v36  ;;  %4588 = vmatpush.bf16.msra.mxu3 %v8683_v3 }
 0x683   :  { %4601 = vmatpush.bf16.msrb.mxu0 %v8628_v51  ;;  %4614 = vmatpush.bf16.msrb.mxu1 %v8685_v28 }
 0x686   :  { %4576 = vmatpush.bf16.msra.mxu2 %v8592_v32  ;;  %4589 = vmatpush.bf16.msra.mxu3 %v8691_v38 }
 0x687   :  { %4602 = vmatpush.bf16.msrb.mxu0 %v8636_v6  ;;  %4615 = vmatpush.bf16.msrb.mxu1 %v8693_v0 }
 0x6e6   :  { %v4310_v58 = vpop.f32.mrf.mxu0  ;;  %v4323_v61 = vpop.f32.mrf.mxu1 }
 0x6e7   :  { %v4334_v18 = vrot.slane %v4323_v61, 2  ;;  %v4333_v46 = vrot.slane %v4310_v58, 2 }
 0x6e9   :  { %v4342_v5 = vadd.f32 %v4334_v18, %v8880_v15  ;;  %v10039_v18 = vld [vmem:[#allocation41_spill] sm:$0xff] }
 0x6eb   :  { %v7026_v24 = vmul.f32 -1.442695, %v4342_v5  ;;  %v4284_v54 = vpop.f32.mrf.mxu2  ;;  %v4297_v17 = vpop.f32.mrf.mxu3  ;;  %v4341_v5 = vadd.f32 %v4333_v46, %v10039_v18 }
 0x6ec   :  { %v4331_v8 = vrot.slane %v4284_v54, 2  ;;  %v4332_v44 = vrot.slane %v4297_v17, 2 }
 0x6ed   :  { %7432 = vpow2.f32 %v7026_v24 }
 0x6ee   :  { %v4339_v13 = vadd.f32 %v4331_v8, %v10037_v14  ;;  %v4340_v63 = vadd.f32 %v4332_v44, %v10038_v53  ;;  %v4312_v37 = vpop.f32.mrf.mxu0  ;;  %v4325_v23 = vpop.f32.mrf.mxu1 }
 0x6f0   :  { %v7024_v50 = vmul.f32 -1.442695, %v4339_v13  ;;  %v7025_v21 = vmul.f32 -1.442695, %v4340_v63 }
 0x6f2   :  { %7434 = vpow2.f32 %v7024_v50 }
 0x6f3   :  { %v7433_v29 = vpop.eup %7432  ;;  %7436 = vpow2.f32 %v7025_v21  ;;  %v4286_v9 = vpop.f32.mrf.mxu2 }
 0x6f4   :  { %v4299_v4 = vpop.f32.mrf.mxu3  ;;  %v4385_v15 = vadd.f32 1.0, %v7433_v29 }
 0x6f6   :  { %7438 = vrcp.f32 %v4385_v15 }
 0x6f8   :  { %v7435_v2 = vpop.eup %7434 }
 0x6f9   :  { %v7437_v20 = vpop.eup %7436  ;;  %v4346_v35 = vadd.f32 1.0, %v7435_v2 }
 0x6fa   :  { %v4365_v22 = vadd.f32 1.0, %v7437_v20 }
 0x6fb   :  { %7440 = vrcp.f32 %v4346_v35  ;;  %v4358_v14 = vand.u32 2147483648, %v4346_v35  ;;  %v4356_v63 = vand.u32 2147483647, %v4346_v35  ;;  %vm4352_vm6 = vweird.f32 %v4346_v35 }
 0x6fc   :  { %7442 = vrcp.f32 %v4365_v22  ;;  %v7439_v57 = vpop.eup %7438  ;;  %v4377_v37 = vand.u32 2147483648, %v4365_v22  ;;  %v4375_v50 = vand.u32 2147483647, %v4365_v22  ;;  %vm4371_vm11 = vweird.f32 %v4365_v22 }
 0x6fd   :  { %v4387_v8 = vmul.f32 %v7439_v57, %v4385_v15  ;;  %7444 = vtanh.f32 %v4341_v5  ;;  %v4359_v29 = vor.u32 1.1754944e-38, %v4358_v14  ;;  %vm4357_vm12 = vcmp.eq.f32.partialorder %v4356_v63, 8.507059e+37 }
 0x6fe   :  { %v4378_v2 = vor.u32 1.1754944e-38, %v4377_v37  ;;  %vm4376_vm15 = vcmp.eq.f32.partialorder %v4375_v50, 8.507059e+37  ;;  %v4402_v5 = vrot.slane %v9173_v45, 7  ;;  %vm4392_vm0 = vweird.f32 %v7439_v57 }
 0x6ff   :  { %v4388_v58 = vsub.f32 1.0, %v4387_v8  ;;  %v4397_v14 = vand.u32 2147483648, %v4385_v15 }
 0x701   :  { %v7441_v61 = vpop.eup %7440 }
 0x702   :  { %v7443_v24 = vpop.eup %7442  ;;  %v4348_v54 = vmul.f32 %v7441_v61, %v4346_v35  ;;  %vm4353_vm2 = vweird.f32 %v7441_v61 }
 0x703   :  { %v4367_v17 = vmul.f32 %v7443_v24, %v4365_v22  ;;  %vm4372_vm4 = vweird.f32 %v7443_v24  ;;  %vm4354_vm9 = vmor %vm4352_vm6, %vm4353_vm2  ;;  %v7445_v20 = vpop.eup %7444  ;;  %vm4391_vm2 = vweird.f32 %v4385_v15  ;;  %v4395_v22 = vand.u32 2147483647, %v4385_v15 }
 0x704   :  { %v4349_v44 = vsub.f32 1.0, %v4348_v54  ;;  %vm4373_vm14 = vmor %vm4371_vm11, %vm4372_vm4  ;;  %v4389_v54 = vmul.f32 %v7439_v57, %v4388_v58 }
 0x705   :  { %v4368_v13 = vsub.f32 1.0, %v4367_v17  ;;  %vm4393_vm4 = vmor %vm4391_vm2, %vm4392_vm0  ;;  %vm4396_vm6 = vcmp.eq.f32.partialorder %v4395_v22, 8.507059e+37 }
 0x706   :  { %v4350_v53 = vmul.f32 %v7441_v61, %v4349_v44  ;;  %v4390_v35 = vadd.f32 %v7439_v57, %v4389_v54 }
 0x707   :  { %v4369_v23 = vmul.f32 %v7443_v24, %v4368_v13 }
 0x708   :  { %v4351_v21 = vadd.f32 %v7441_v61, %v4350_v53  ;;  %v4398_v53 = vor.u32 1.1754944e-38, %v4397_v14 }
 0x709   :  { %v4370_v9 = vadd.f32 %v7443_v24, %v4369_v23 }
 0x70a   :  { %v4355_v4 = vsel %vm4354_vm9, %v7441_v61, %v4351_v21  ;;  %v4394_v61 = vsel %vm4393_vm4, %v7439_v57, %v4390_v35 }
 0x70b   :  { %v4360_v46 = vsel %vm4357_vm12, %v4359_v29, %v4355_v4  ;;  %v4374_v18 = vsel %vm4373_vm14, %v7443_v24, %v4370_v9  ;;  %v4399_v63 = vsel %vm4396_vm6, %v4398_v53, %v4394_v61 }
 0x70c   :  { %v4405_v17 = vmul.f32 %v7445_v20, %v4360_v46  ;;  %v4379_v44 = vsel %vm4376_vm15, %v4378_v2, %v4374_v18  ;;  %v10040_v20 = vld [vmem:[#allocation31_spill] sm:$0xff]  ;;  %v10041_v18 = vld [vmem:[#allocation25_spill] sm:$0xff] }
 0x70d   :  { %v4404_v8 = vmul.f32 %v4402_v5, %v4379_v44 }
 0x70f   :  { %v9222_v13 = vadd.f32 %v4405_v17, %v4404_v8 }
 0x711   :  { %7446 = vtanh.f32 %v9222_v13 }
 0x717   :  { %v7447_v24 = vpop.eup %7446 }
 0x718   :  { %v9225_v45 = vmul.f32 %v7447_v24, %v4399_v63 }
 0x71a   :  { %v4409_v37 = vpack.c.bf16 %v9225_v45, %v9225_v45  ;;  %v9232_v23 = vsel %vm1280_vm3, %v9183_v62, %v9225_v45 }
 0x71c   :  { %v4411_v50 = vrot.slane %v4409_v37, 3 }
 0x71e   :  { %4421 = vmatmul.bf16.vlgmr.msrb.gmra.mxu2 %v4411_v50  ;;  %4434 = vmatmul.bf16.vlgmr.msrb.gmra.mxu3 %v4411_v50 }
 0x71f   :  { %4447 = vmatmul.bf16.vlgmr.msra.gmra.mxu0 %v4411_v50  ;;  %4460 = vmatmul.bf16.vlgmr.msra.gmra.mxu1 %v4411_v50 }
 0x720   :  { %4704 = vmatpush.bf16.msrb.mxu2 %v8532_v49  ;;  %4717 = vmatpush.bf16.msrb.mxu3 %v8630_v26 }
 0x721   :  { %4730 = vmatpush.bf16.msra.mxu0 %v8567_v33  ;;  %4743 = vmatpush.bf16.msra.mxu1 %v8632_v25 }
 0x724   :  { %4705 = vmatpush.bf16.msrb.mxu2 %v8537_v39  ;;  %4718 = vmatpush.bf16.msrb.mxu3 %v8640_v31 }
 0x725   :  { %4731 = vmatpush.bf16.msra.mxu0 %v8582_v56  ;;  %4744 = vmatpush.bf16.msra.mxu1 %v8642_v40 }
 0x728   :  { %4706 = vmatpush.bf16.msrb.mxu2 %v8546_v42  ;;  %4719 = vmatpush.bf16.msrb.mxu3 %v8649_v60 }
 0x729   :  { %4732 = vmatpush.bf16.msra.mxu0 %v8601_v11  ;;  %4745 = vmatpush.bf16.msra.mxu1 %v8651_v7 }
 0x72c   :  { %4707 = vmatpush.bf16.msrb.mxu2 %v8551_v16  ;;  %4720 = vmatpush.bf16.msrb.mxu3 %v8658_v27 }
 0x72d   :  { %4733 = vmatpush.bf16.msra.mxu0 %v8615_v12  ;;  %4746 = vmatpush.bf16.msra.mxu1 %v8660_v52 }
 0x730   :  { %4708 = vmatpush.bf16.msrb.mxu2 %v8558_v47  ;;  %4721 = vmatpush.bf16.msrb.mxu3 %v8667_v19 }
 0x731   :  { %4734 = vmatpush.bf16.msra.mxu0 %v8620_v34  ;;  %4747 = vmatpush.bf16.msra.mxu1 %v8669_v1 }
 0x734   :  { %4709 = vmatpush.bf16.msrb.mxu2 %v8565_v30  ;;  %4722 = vmatpush.bf16.msrb.mxu3 %v8675_v59 }
 0x735   :  { %4735 = vmatpush.bf16.msra.mxu0 %v8624_v41  ;;  %4748 = vmatpush.bf16.msra.mxu1 %v8677_v55 }
 0x738   :  { %4710 = vmatpush.bf16.msrb.mxu2 %v8575_v36  ;;  %4723 = vmatpush.bf16.msrb.mxu3 %v8683_v3 }
 0x739   :  { %4736 = vmatpush.bf16.msra.mxu0 %v8628_v51  ;;  %4749 = vmatpush.bf16.msra.mxu1 %v8685_v28 }
 0x73c   :  { %4711 = vmatpush.bf16.msrb.mxu2 %v8592_v32  ;;  %4724 = vmatpush.bf16.msrb.mxu3 %v8691_v38 }
 0x73d   :  { %4737 = vmatpush.bf16.msra.mxu0 %v8636_v6  ;;  %4750 = vmatpush.bf16.msra.mxu1 %v8693_v0 }
 0x79c   :  { %v4448_v62 = vpop.f32.mrf.mxu0  ;;  %v4461_v15 = vpop.f32.mrf.mxu1 }
 0x79d   :  { %v4472_v57 = vrot.slane %v4461_v15, 1  ;;  %v4471_v37 = vrot.slane %v4448_v62, 1 }
 0x79f   :  { %v4480_v58 = vadd.f32 %v4472_v57, %v10026_v43  ;;  %v10042_v57 = vld [vmem:[#allocation42_spill] sm:$0xff] }
 0x7a1   :  { %v7029_v21 = vmul.f32 -1.442695, %v4480_v58  ;;  %v4422_v29 = vpop.f32.mrf.mxu2  ;;  %v4435_v9 = vpop.f32.mrf.mxu3  ;;  %v4479_v58 = vadd.f32 %v4471_v37, %v10042_v57 }
 0x7a2   :  { %v4469_v4 = vrot.slane %v4422_v29, 1  ;;  %v4470_v2 = vrot.slane %v4435_v9, 1 }
 0x7a3   :  { %7448 = vpow2.f32 %v7029_v21 }
 0x7a4   :  { %v4477_v46 = vadd.f32 %v4469_v4, %v10040_v20  ;;  %v4478_v5 = vadd.f32 %v4470_v2, %v10041_v18  ;;  %v4450_v54 = vpop.f32.mrf.mxu0  ;;  %v4463_v17 = vpop.f32.mrf.mxu1 }
 0x7a6   :  { %v7027_v44 = vmul.f32 -1.442695, %v4477_v46  ;;  %v7028_v8 = vmul.f32 -1.442695, %v4478_v5 }
 0x7a8   :  { %7450 = vpow2.f32 %v7027_v44 }
 0x7a9   :  { %v7449_v35 = vpop.eup %7448  ;;  %7452 = vpow2.f32 %v7028_v8  ;;  %v4424_v14 = vpop.f32.mrf.mxu2 }
 0x7aa   :  { %v4437_v22 = vpop.f32.mrf.mxu3  ;;  %v4523_v43 = vadd.f32 1.0, %v7449_v35 }
 0x7ac   :  { %7454 = vrcp.f32 %v4523_v43 }
 0x7ae   :  { %v7451_v61 = vpop.eup %7450 }
 0x7af   :  { %v7453_v53 = vpop.eup %7452  ;;  %v4484_v24 = vadd.f32 1.0, %v7451_v61 }
 0x7b0   :  { %v4503_v63 = vadd.f32 1.0, %v7453_v53 }
 0x7b1   :  { %7456 = vrcp.f32 %v4484_v24  ;;  %v4496_v20 = vand.u32 2147483648, %v4484_v24  ;;  %v4494_v5 = vand.u32 2147483647, %v4484_v24  ;;  %vm4490_vm12 = vweird.f32 %v4484_v24 }
 0x7b2   :  { %7458 = vrcp.f32 %v4503_v63  ;;  %v7455_v50 = vpop.eup %7454  ;;  %v4515_v54 = vand.u32 2147483648, %v4503_v63  ;;  %v4513_v44 = vand.u32 2147483647, %v4503_v63  ;;  %vm4509_vm15 = vweird.f32 %v4503_v63 }
 0x7b3   :  { %v4525_v4 = vmul.f32 %v7455_v50, %v4523_v43  ;;  %7460 = vtanh.f32 %v4479_v58  ;;  %v4497_v35 = vor.u32 1.1754944e-38, %v4496_v20  ;;  %vm4495_vm0 = vcmp.eq.f32.partialorder %v4494_v5, 8.507059e+37 }
 0x7b4   :  { %v4516_v61 = vor.u32 1.1754944e-38, %v4515_v54  ;;  %vm4514_vm4 = vcmp.eq.f32.partialorder %v4513_v44, 8.507059e+37  ;;  %v4540_v58 = vrot.slane %v9222_v13, 7  ;;  %vm4530_vm6 = vweird.f32 %v7455_v50 }
 0x7b5   :  { %v4526_v62 = vsub.f32 1.0, %v4525_v4  ;;  %v4535_v20 = vand.u32 2147483648, %v4523_v43 }
 0x7b7   :  { %v7457_v15 = vpop.eup %7456 }
 0x7b8   :  { %v7459_v21 = vpop.eup %7458  ;;  %v4486_v29 = vmul.f32 %v7457_v15, %v4484_v24  ;;  %vm4491_vm9 = vweird.f32 %v7457_v15 }
 0x7b9   :  { %v4505_v9 = vmul.f32 %v7459_v21, %v4503_v63  ;;  %vm4510_vm11 = vweird.f32 %v7459_v21  ;;  %vm4492_vm14 = vmor %vm4490_vm12, %vm4491_vm9  ;;  %v7461_v53 = vpop.eup %7460  ;;  %vm4529_vm9 = vweird.f32 %v4523_v43  ;;  %v4533_v63 = vand.u32 2147483647, %v4523_v43 }
 0x7ba   :  { %v4487_v2 = vsub.f32 1.0, %v4486_v29  ;;  %vm4511_vm2 = vmor %vm4509_vm15, %vm4510_vm11  ;;  %v4527_v29 = vmul.f32 %v7455_v50, %v4526_v62  ;;  %v5744_v62 = vrot.slane %v9225_v45, 5  ;;  %v5750_v43 = vrot.slane %v9127_v10, 1 }
 0x7bb   :  { %v4506_v46 = vsub.f32 1.0, %v4505_v9  ;;  %vm4531_vm11 = vmor %vm4529_vm9, %vm4530_vm6  ;;  %vm4534_vm12 = vcmp.eq.f32.partialorder %v4533_v63, 8.507059e+37 }
 0x7bc   :  { %v4488_v18 = vmul.f32 %v7457_v15, %v4487_v2  ;;  %v4528_v24 = vadd.f32 %v7455_v50, %v4527_v29 }
 0x7bd   :  { %v4507_v17 = vmul.f32 %v7459_v21, %v4506_v46 }
 0x7be   :  { %v4489_v8 = vadd.f32 %v7457_v15, %v4488_v18  ;;  %v4536_v18 = vor.u32 1.1754944e-38, %v4535_v20 }
 0x7bf   :  { %v4508_v14 = vadd.f32 %v7459_v21, %v4507_v17 }
 0x7c0   :  { %v4493_v22 = vsel %vm4492_vm14, %v7457_v15, %v4489_v8  ;;  %v4532_v15 = vsel %vm4531_vm11, %v7455_v50, %v4528_v24  ;;  %v5747_v8 = vrot.slane %v9176_v48, 3 }
 0x7c1   :  { %v4498_v37 = vsel %vm4495_vm0, %v4497_v35, %v4493_v22  ;;  %v4512_v57 = vsel %vm4511_vm2, %v7459_v21, %v4508_v14  ;;  %v4537_v5 = vsel %vm4534_vm12, %v4536_v18, %v4532_v15  ;;  %v10044_v14 = vld [vmem:[#allocation50_spill] sm:$0xff]  ;;  %v10049_v18 = vld [vmem:[#allocation27_spill] sm:$0xff] }
 0x7c2   :  { %v4543_v9 = vmul.f32 %v7461_v53, %v4498_v37  ;;  %v4517_v2 = vsel %vm4514_vm4, %v4516_v61, %v4512_v57  ;;  %v5753_v22 = vrot.slane %v10044_v14, 7  ;;  %v10045_v37 = vld [vmem:[#allocation51_spill] sm:$0xff] }
 0x7c3   :  { %v4542_v4 = vmul.f32 %v4540_v58, %v4517_v2  ;;  %v5756_v57 = vrot.slane %v10045_v37, 5  ;;  %v10046_v58 = vld [vmem:[#allocation49_spill] sm:$0xff] }
 0x7c4   :  { %v5759_v29 = vrot.slane %v10046_v58, 3  ;;  %v10051_v58 = vld [vmem:[#allocation39_spill] sm:$0xff] }
 0x7c5   :  { %v9271_v46 = vadd.f32 %v4543_v9, %v4542_v4  ;;  %v10048_v4 = vld [vmem:[#allocation33_spill] sm:$0xff] }
 0x7c7   :  { %7462 = vtanh.f32 %v9271_v46 }
 0x7cd   :  { %v7463_v21 = vpop.eup %7462 }
 0x7ce   :  { %v4546_v13 = vmul.f32 %v7463_v21, %v4537_v5  ;;  %v10050_v5 = vld [vmem:[#allocation19_spill] sm:$0xff] }
 0x7d0   :  { %v4563_v54 = vpack.c.bf16 %v4546_v13, %v4546_v13  ;;  %v9276_v17 = vsel %vm708_vm1, %v9232_v23, %v4546_v13  ;;  %v5741_v44 = vrot.slane %v4546_v13, 7 }
 0x7d1   :  { %10043 = vst [vmem:[#allocation53_spill] sm:$0xff] %v9276_v17 }
 0x7d2   :  { %v4565_v35 = vshrl.u32 %v4563_v54, 16  ;;  %v5771_v50 = vsel %vm5695_vm7, %v5741_v44, %v5744_v62 }
 0x7d3   :  { %v5772_v61 = vsel %vm5697_vm8, %v5771_v50, %v5747_v8 }
 0x7d4   :  { %v4567_v53 = vrot.slane %v4565_v35, 3  ;;  %v5773_v23 = vsel %vm5699_vm10, %v5772_v61, %v5750_v43 }
 0x7d5   :  { %v5774_v45 = vsel %vm5701_vm13, %v5773_v23, %v5753_v22 }
 0x7d6   :  { %4577 = vmatmul.bf16.vlgmr.msra.gmra.mxu2 %v4567_v53  ;;  %4590 = vmatmul.bf16.vlgmr.msra.gmra.mxu3 %v4567_v53  ;;  %v5775_v48 = vsel %vm1852_vm5, %v5774_v45, %v5756_v57 }
 0x7d7   :  { %4603 = vmatmul.bf16.vlgmr.msrb.gmra.mxu0 %v4567_v53  ;;  %4616 = vmatmul.bf16.vlgmr.msrb.gmra.mxu1 %v4567_v53  ;;  %v9290_v10 = vsel %vm1280_vm3, %v5775_v48, %v5759_v29 }
 0x7d8   :  { %10047 = vst [vmem:[#allocation54_spill] sm:$0xff] %v9290_v10  ;;  %4855 = vmatpush.bf16.msra.mxu2 %v8532_v49  ;;  %4868 = vmatpush.bf16.msra.mxu3 %v8630_v26 }
 0x7d9   :  { %4881 = vmatpush.bf16.msrb.mxu0 %v8567_v33  ;;  %4894 = vmatpush.bf16.msrb.mxu1 %v8632_v25 }
 0x7dc   :  { %4856 = vmatpush.bf16.msra.mxu2 %v8537_v39  ;;  %4869 = vmatpush.bf16.msra.mxu3 %v8640_v31 }
 0x7dd   :  { %4882 = vmatpush.bf16.msrb.mxu0 %v8582_v56  ;;  %4895 = vmatpush.bf16.msrb.mxu1 %v8642_v40 }
 0x7e0   :  { %4857 = vmatpush.bf16.msra.mxu2 %v8546_v42  ;;  %4870 = vmatpush.bf16.msra.mxu3 %v8649_v60 }
 0x7e1   :  { %4883 = vmatpush.bf16.msrb.mxu0 %v8601_v11  ;;  %4896 = vmatpush.bf16.msrb.mxu1 %v8651_v7 }
 0x7e4   :  { %4858 = vmatpush.bf16.msra.mxu2 %v8551_v16  ;;  %4871 = vmatpush.bf16.msra.mxu3 %v8658_v27 }
 0x7e5   :  { %4884 = vmatpush.bf16.msrb.mxu0 %v8615_v12  ;;  %4897 = vmatpush.bf16.msrb.mxu1 %v8660_v52 }
 0x7e8   :  { %4859 = vmatpush.bf16.msra.mxu2 %v8558_v47  ;;  %4872 = vmatpush.bf16.msra.mxu3 %v8667_v19 }
 0x7e9   :  { %4885 = vmatpush.bf16.msrb.mxu0 %v8620_v34  ;;  %4898 = vmatpush.bf16.msrb.mxu1 %v8669_v1 }
 0x7ec   :  { %4860 = vmatpush.bf16.msra.mxu2 %v8565_v30  ;;  %4873 = vmatpush.bf16.msra.mxu3 %v8675_v59 }
 0x7ed   :  { %4886 = vmatpush.bf16.msrb.mxu0 %v8624_v41  ;;  %4899 = vmatpush.bf16.msrb.mxu1 %v8677_v55 }
 0x7f0   :  { %4861 = vmatpush.bf16.msra.mxu2 %v8575_v36  ;;  %4874 = vmatpush.bf16.msra.mxu3 %v8683_v3 }
 0x7f1   :  { %4887 = vmatpush.bf16.msrb.mxu0 %v8628_v51  ;;  %4900 = vmatpush.bf16.msrb.mxu1 %v8685_v28 }
 0x7f4   :  { %4862 = vmatpush.bf16.msra.mxu2 %v8592_v32  ;;  %4875 = vmatpush.bf16.msra.mxu3 %v8691_v38 }
 0x7f5   :  { %4888 = vmatpush.bf16.msrb.mxu0 %v8636_v6  ;;  %4901 = vmatpush.bf16.msrb.mxu1 %v8693_v0 }
 0x854   :  { %v4604_v9 = vpop.f32.mrf.mxu0  ;;  %v4617_v2 = vpop.f32.mrf.mxu1 }
 0x855   :  { %v4624_v24 = vadd.f32 %v4617_v2, %v10048_v4  ;;  %v4623_v29 = vadd.f32 %v4604_v9, %v10051_v58 }
 0x857   :  { %v7032_v20 = vmul.f32 -1.442695, %v4624_v24 }
 0x859   :  { %7464 = vpow2.f32 %v7032_v20  ;;  %v4578_v63 = vpop.f32.mrf.mxu2  ;;  %v4591_v15 = vpop.f32.mrf.mxu3 }
 0x85a   :  { %v4621_v21 = vadd.f32 %v4578_v63, %v10049_v18  ;;  %v4622_v13 = vadd.f32 %v4591_v15, %v10050_v5 }
 0x85c   :  { %v7030_v54 = vmul.f32 -1.442695, %v4621_v21  ;;  %v7031_v44 = vmul.f32 -1.442695, %v4622_v13  ;;  %v4606_v62 = vpop.f32.mrf.mxu0  ;;  %v4619_v8 = vpop.f32.mrf.mxu1 }
 0x85e   :  { %7466 = vpow2.f32 %v7030_v54 }
 0x85f   :  { %v7465_v35 = vpop.eup %7464  ;;  %7468 = vpow2.f32 %v7031_v44 }
 0x860   :  { %v4667_v14 = vadd.f32 1.0, %v7465_v35 }
 0x861   :  { %v4580_v43 = vpop.f32.mrf.mxu2  ;;  %v4593_v50 = vpop.f32.mrf.mxu3 }
 0x862   :  { %7470 = vrcp.f32 %v4667_v14 }
 0x864   :  { %v7467_v22 = vpop.eup %7466 }
 0x865   :  { %v7469_v61 = vpop.eup %7468  ;;  %v4628_v53 = vadd.f32 1.0, %v7467_v22 }
 0x866   :  { %v4647_v37 = vadd.f32 1.0, %v7469_v61 }
 0x867   :  { %7472 = vrcp.f32 %v4628_v53  ;;  %v4640_v63 = vand.u32 2147483648, %v4628_v53  ;;  %v4638_v13 = vand.u32 2147483647, %v4628_v53  ;;  %vm4634_vm0 = vweird.f32 %v4628_v53 }
 0x868   :  { %7474 = vrcp.f32 %v4647_v37  ;;  %v7471_v57 = vpop.eup %7470  ;;  %v4659_v54 = vand.u32 2147483648, %v4647_v37  ;;  %v4657_v62 = vand.u32 2147483647, %v4647_v37  ;;  %vm4653_vm4 = vweird.f32 %v4647_v37 }
 0x869   :  { %v4669_v24 = vmul.f32 %v7471_v57, %v4667_v14  ;;  %7476 = vtanh.f32 %v4623_v29  ;;  %v4641_v9 = vor.u32 1.1754944e-38, %v4640_v63  ;;  %vm4639_vm6 = vcmp.eq.f32.partialorder %v4638_v13, 8.507059e+37 }
 0x86a   :  { %v4660_v22 = vor.u32 1.1754944e-38, %v4659_v54  ;;  %vm4658_vm11 = vcmp.eq.f32.partialorder %v4657_v62, 8.507059e+37  ;;  %vm4674_vm12 = vweird.f32 %v7471_v57  ;;  %v4679_v63 = vand.u32 2147483648, %v4667_v14  ;;  %v10053_v62 = vld [vmem:[#allocation34_spill] sm:$0xff] }
 0x86b   :  { %v4670_v8 = vsub.f32 1.0, %v4669_v24 }
 0x86c   :  { %v4680_v13 = vor.u32 1.1754944e-38, %v4679_v63 }
 0x86d   :  { %v7473_v23 = vpop.eup %7472 }
 0x86e   :  { %v7475_v45 = vpop.eup %7474  ;;  %v4630_v48 = vmul.f32 %v7473_v23, %v4628_v53  ;;  %vm4635_vm14 = vweird.f32 %v7473_v23 }
 0x86f   :  { %v4649_v2 = vmul.f32 %v7475_v45, %v4647_v37  ;;  %vm4654_vm15 = vweird.f32 %v7475_v45  ;;  %vm4636_vm2 = vmor %vm4634_vm0, %vm4635_vm14  ;;  %v7477_v61 = vpop.eup %7476  ;;  %vm4673_vm14 = vweird.f32 %v4667_v14  ;;  %v4677_v37 = vand.u32 2147483647, %v4667_v14 }
 0x870   :  { %v4631_v20 = vsub.f32 1.0, %v4630_v48  ;;  %vm4655_vm9 = vmor %vm4653_vm4, %vm4654_vm15 }
 0x871   :  { %v4650_v15 = vsub.f32 1.0, %v4649_v2  ;;  %v4684_v2 = vrot.slane %v9271_v46, 7  ;;  %vm4675_vm15 = vmor %vm4673_vm14, %vm4674_vm12  ;;  %vm4678_vm0 = vcmp.eq.f32.partialorder %v4677_v37, 8.507059e+37 }
 0x872   :  { %v4632_v21 = vmul.f32 %v7473_v23, %v4631_v20  ;;  %v4671_v20 = vmul.f32 %v7471_v57, %v4670_v8 }
 0x873   :  { %v4651_v44 = vmul.f32 %v7475_v45, %v4650_v15 }
 0x874   :  { %v4633_v35 = vadd.f32 %v7473_v23, %v4632_v21  ;;  %v4672_v53 = vadd.f32 %v7471_v57, %v4671_v20 }
 0x875   :  { %v4652_v43 = vadd.f32 %v7475_v45, %v4651_v44 }
 0x876   :  { %v4637_v50 = vsel %vm4636_vm2, %v7473_v23, %v4633_v35  ;;  %v4676_v23 = vsel %vm4675_vm15, %v7471_v57, %v4672_v53 }
 0x877   :  { %v4642_v29 = vsel %vm4639_vm6, %v4641_v9, %v4637_v50  ;;  %v4656_v48 = vsel %vm4655_vm9, %v7475_v45, %v4652_v43  ;;  %v4681_v54 = vsel %vm4678_vm0, %v4680_v13, %v4676_v23 }
 0x878   :  { %v4687_v15 = vmul.f32 %v7477_v61, %v4642_v29  ;;  %v4661_v10 = vsel %vm4658_vm11, %v4660_v22, %v4656_v48  ;;  %v10054_v61 = vld [vmem:[#allocation26_spill] sm:$0xff]  ;;  %v10055_v48 = vld [vmem:[#allocation20_spill] sm:$0xff] }
 0x879   :  { %v4686_v24 = vmul.f32 %v4684_v2, %v4661_v10 }
 0x87b   :  { %v9329_v21 = vadd.f32 %v4687_v15, %v4686_v24 }
 0x87d   :  { %7478 = vtanh.f32 %v9329_v21 }
 0x883   :  { %v7479_v45 = vpop.eup %7478 }
 0x884   :  { %v9332_v46 = vmul.f32 %v7479_v45, %v4681_v54 }
 0x886   :  { %10052 = vst [vmem:[#allocation52_spill] sm:$0xff] %v9332_v46  ;;  %v4703_v10 = vpack.c.bf16 %v9332_v46, %v9332_v46 }
 0x888   :  { %4712 = vmatmul.bf16.vlgmr.msrb.gmra.mxu2 %v4703_v10  ;;  %4725 = vmatmul.bf16.vlgmr.msrb.gmra.mxu3 %v4703_v10 }
 0x889   :  { %4738 = vmatmul.bf16.vlgmr.msra.gmra.mxu0 %v4703_v10  ;;  %4751 = vmatmul.bf16.vlgmr.msra.gmra.mxu1 %v4703_v10 }
 0x88a   :  { %5005 = vmatpush.bf16.msrb.mxu2 %v8532_v49  ;;  %5018 = vmatpush.bf16.msrb.mxu3 %v8630_v26 }
 0x88b   :  { %5031 = vmatpush.bf16.msra.mxu0 %v8567_v33  ;;  %5044 = vmatpush.bf16.msra.mxu1 %v8632_v25 }
 0x88e   :  { %5006 = vmatpush.bf16.msrb.mxu2 %v8537_v39  ;;  %5019 = vmatpush.bf16.msrb.mxu3 %v8640_v31 }
 0x88f   :  { %5032 = vmatpush.bf16.msra.mxu0 %v8582_v56  ;;  %5045 = vmatpush.bf16.msra.mxu1 %v8642_v40 }
 0x892   :  { %5007 = vmatpush.bf16.msrb.mxu2 %v8546_v42  ;;  %5020 = vmatpush.bf16.msrb.mxu3 %v8649_v60 }
 0x893   :  { %5033 = vmatpush.bf16.msra.mxu0 %v8601_v11  ;;  %5046 = vmatpush.bf16.msra.mxu1 %v8651_v7 }
 0x896   :  { %5008 = vmatpush.bf16.msrb.mxu2 %v8551_v16  ;;  %5021 = vmatpush.bf16.msrb.mxu3 %v8658_v27 }
 0x897   :  { %5034 = vmatpush.bf16.msra.mxu0 %v8615_v12  ;;  %5047 = vmatpush.bf16.msra.mxu1 %v8660_v52 }
 0x89a   :  { %5009 = vmatpush.bf16.msrb.mxu2 %v8558_v47  ;;  %5022 = vmatpush.bf16.msrb.mxu3 %v8667_v19 }
 0x89b   :  { %5035 = vmatpush.bf16.msra.mxu0 %v8620_v34  ;;  %5048 = vmatpush.bf16.msra.mxu1 %v8669_v1 }
 0x89e   :  { %5010 = vmatpush.bf16.msrb.mxu2 %v8565_v30  ;;  %5023 = vmatpush.bf16.msrb.mxu3 %v8675_v59 }
 0x89f   :  { %5036 = vmatpush.bf16.msra.mxu0 %v8624_v41  ;;  %5049 = vmatpush.bf16.msra.mxu1 %v8677_v55 }
 0x8a2   :  { %5011 = vmatpush.bf16.msrb.mxu2 %v8575_v36  ;;  %5024 = vmatpush.bf16.msrb.mxu3 %v8683_v3 }
 0x8a3   :  { %5037 = vmatpush.bf16.msra.mxu0 %v8628_v51  ;;  %5050 = vmatpush.bf16.msra.mxu1 %v8685_v28 }
 0x8a6   :  { %5012 = vmatpush.bf16.msrb.mxu2 %v8592_v32  ;;  %5025 = vmatpush.bf16.msrb.mxu3 %v8691_v38 }
 0x8a7   :  { %5038 = vmatpush.bf16.msra.mxu0 %v8636_v6  ;;  %5051 = vmatpush.bf16.msra.mxu1 %v8693_v0 }
 0x906   :  { %v4739_v14 = vpop.f32.mrf.mxu0  ;;  %v4752_v57 = vpop.f32.mrf.mxu1 }
 0x907   :  { %v4763_v44 = vrot.slane %v4752_v57, 7 }
 0x909   :  { %v4771_v8 = vadd.f32 %v4763_v44, %v10053_v62  ;;  %v4762_v44 = vrot.slane %v4739_v14, 7 }
 0x90b   :  { %v7035_v35 = vmul.f32 -1.442695, %v4771_v8  ;;  %v4713_v9 = vpop.f32.mrf.mxu2  ;;  %v4726_v43 = vpop.f32.mrf.mxu3 }
 0x90c   :  { %v4760_v50 = vrot.slane %v4713_v9, 7  ;;  %v4761_v22 = vrot.slane %v4726_v43, 7  ;;  %v10056_v9 = vld [vmem:[#allocation43_spill] sm:$0xff] }
 0x90d   :  { %7480 = vpow2.f32 %v7035_v35  ;;  %v4770_v43 = vadd.f32 %v4762_v44, %v10056_v9 }
 0x90e   :  { %v4768_v29 = vadd.f32 %v4760_v50, %v10054_v61  ;;  %v4769_v2 = vadd.f32 %v4761_v22, %v10055_v48  ;;  %v4741_v20 = vpop.f32.mrf.mxu0  ;;  %v4754_v15 = vpop.f32.mrf.mxu1  ;;  %v4831_v48 = vrot.slane %v9329_v21, 7 }
 0x910   :  { %v7033_v24 = vmul.f32 -1.442695, %v4768_v29  ;;  %v7034_v53 = vmul.f32 -1.442695, %v4769_v2 }
 0x912   :  { %7482 = vpow2.f32 %v7033_v24 }
 0x913   :  { %v7481_v63 = vpop.eup %7480  ;;  %7484 = vpow2.f32 %v7034_v53  ;;  %v4715_v37 = vpop.f32.mrf.mxu2 }
 0x914   :  { %v4728_v23 = vpop.f32.mrf.mxu3  ;;  %v4814_v13 = vadd.f32 1.0, %v7481_v63 }
 0x916   :  { %7486 = vrcp.f32 %v4814_v13 }
 0x918   :  { %v7483_v45 = vpop.eup %7482 }
 0x919   :  { %v7485_v54 = vpop.eup %7484  ;;  %v4775_v10 = vadd.f32 1.0, %v7483_v45 }
 0x91a   :  { %v4794_v57 = vadd.f32 1.0, %v7485_v54 }
 0x91b   :  { %7488 = vrcp.f32 %v4775_v10  ;;  %v4787_v15 = vand.u32 2147483648, %v4775_v10  ;;  %v4785_v63 = vand.u32 2147483647, %v4775_v10  ;;  %vm4781_vm6 = vweird.f32 %v4775_v10 }
 0x91c   :  { %7490 = vrcp.f32 %v4794_v57  ;;  %v7487_v8 = vpop.eup %7486  ;;  %v4806_v37 = vand.u32 2147483648, %v4794_v57  ;;  %v4804_v45 = vand.u32 2147483647, %v4794_v57  ;;  %vm4800_vm11 = vweird.f32 %v4794_v57 }
 0x91d   :  { %v4816_v2 = vmul.f32 %v7487_v8, %v4814_v13  ;;  %7492 = vtanh.f32 %v4770_v43  ;;  %v4788_v44 = vor.u32 1.1754944e-38, %v4787_v15  ;;  %vm4786_vm12 = vcmp.eq.f32.partialorder %v4785_v63, 8.507059e+37  ;;  %v10058_v63 = vld [vmem:[#allocation35_spill] sm:$0xff] }
 0x91e   :  { %v4807_v43 = vor.u32 1.1754944e-38, %v4806_v37  ;;  %vm4805_vm15 = vcmp.eq.f32.partialorder %v4804_v45, 8.507059e+37  ;;  %vm4821_vm0 = vweird.f32 %v7487_v8  ;;  %v4826_v15 = vand.u32 2147483648, %v4814_v13 }
 0x91f   :  { %v4817_v14 = vsub.f32 1.0, %v4816_v2 }
 0x921   :  { %v7489_v35 = vpop.eup %7488 }
 0x922   :  { %v7491_v50 = vpop.eup %7490  ;;  %v4777_v22 = vmul.f32 %v7489_v35, %v4775_v10  ;;  %vm4782_vm2 = vweird.f32 %v7489_v35 }
 0x923   :  { %v4796_v29 = vmul.f32 %v7491_v50, %v4794_v57  ;;  %vm4801_vm4 = vweird.f32 %v7491_v50  ;;  %vm4783_vm9 = vmor %vm4781_vm6, %vm4782_vm2  ;;  %vm4820_vm2 = vweird.f32 %v4814_v13  ;;  %v4824_v57 = vand.u32 2147483647, %v4814_v13 }
 0x924   :  { %v4778_v20 = vsub.f32 1.0, %v4777_v22  ;;  %vm4802_vm14 = vmor %vm4800_vm11, %vm4801_vm4  ;;  %v7493_v22 = vpop.eup %7492 }
 0x925   :  { %v4797_v24 = vsub.f32 1.0, %v4796_v29  ;;  %vm4822_vm4 = vmor %vm4820_vm2, %vm4821_vm0  ;;  %vm4825_vm6 = vcmp.eq.f32.partialorder %v4824_v57, 8.507059e+37 }
 0x926   :  { %v4779_v53 = vmul.f32 %v7489_v35, %v4778_v20 }
 0x927   :  { %v4798_v23 = vmul.f32 %v7491_v50, %v4797_v24  ;;  %v4818_v24 = vmul.f32 %v7487_v8, %v4817_v14 }
 0x928   :  { %v4780_v54 = vadd.f32 %v7489_v35, %v4779_v53 }
 0x929   :  { %v4799_v17 = vadd.f32 %v7491_v50, %v4798_v23  ;;  %v4819_v10 = vadd.f32 %v7487_v8, %v4818_v24 }
 0x92a   :  { %v4784_v9 = vsel %vm4783_vm9, %v7489_v35, %v4780_v54 }
 0x92b   :  { %v4789_v29 = vsel %vm4786_vm12, %v4788_v44, %v4784_v9  ;;  %v4803_v20 = vsel %vm4802_vm14, %v7491_v50, %v4799_v17  ;;  %v4823_v35 = vsel %vm4822_vm4, %v7487_v8, %v4819_v10  ;;  %v4827_v9 = vor.u32 1.1754944e-38, %v4826_v15 }
 0x92c   :  { %v4834_v61 = vmul.f32 %v7493_v22, %v4789_v29  ;;  %v4808_v62 = vsel %vm4805_vm15, %v4807_v43, %v4803_v20  ;;  %v10059_v43 = vld [vmem:[#allocation28_spill] sm:$0xff]  ;;  %v10060_v29 = vld [vmem:[#allocation21_spill] sm:$0xff] }
 0x92d   :  { %v4833_v2 = vmul.f32 %v4831_v48, %v4808_v62  ;;  %v4828_v50 = vsel %vm4825_vm6, %v4827_v9, %v4823_v35 }
 0x92f   :  { %v9373_v53 = vadd.f32 %v4834_v61, %v4833_v2 }
 0x931   :  { %7494 = vtanh.f32 %v9373_v53 }
 0x937   :  { %v7495_v17 = vpop.eup %7494 }
 0x938   :  { %v9376_v21 = vmul.f32 %v7495_v17, %v4828_v50 }
 0x93a   :  { %10057 = vst [vmem:[#allocation56_spill] sm:$0xff] %v9376_v21  ;;  %v4850_v62 = vpack.c.bf16 %v9376_v21, %v9376_v21 }
 0x93c   :  { %v4852_v61 = vshrl.u32 %v4850_v62, 16 }
 0x93e   :  { %4863 = vmatmul.bf16.vlgmr.msra.gmra.mxu2 %v4852_v61  ;;  %4876 = vmatmul.bf16.vlgmr.msra.gmra.mxu3 %v4852_v61 }
 0x93f   :  { %4889 = vmatmul.bf16.vlgmr.msrb.gmra.mxu0 %v4852_v61  ;;  %4902 = vmatmul.bf16.vlgmr.msrb.gmra.mxu1 %v4852_v61 }
 0x940   :  { %5145 = vmatpush.bf16.msra.mxu2 %v8532_v49  ;;  %5158 = vmatpush.bf16.msra.mxu3 %v8630_v26 }
 0x941   :  { %5171 = vmatpush.bf16.msrb.mxu0 %v8567_v33  ;;  %5184 = vmatpush.bf16.msrb.mxu1 %v8632_v25 }
 0x944   :  { %5146 = vmatpush.bf16.msra.mxu2 %v8537_v39  ;;  %5159 = vmatpush.bf16.msra.mxu3 %v8640_v31 }
 0x945   :  { %5172 = vmatpush.bf16.msrb.mxu0 %v8582_v56  ;;  %5185 = vmatpush.bf16.msrb.mxu1 %v8642_v40 }
 0x948   :  { %5147 = vmatpush.bf16.msra.mxu2 %v8546_v42  ;;  %5160 = vmatpush.bf16.msra.mxu3 %v8649_v60 }
 0x949   :  { %5173 = vmatpush.bf16.msrb.mxu0 %v8601_v11  ;;  %5186 = vmatpush.bf16.msrb.mxu1 %v8651_v7 }
 0x94c   :  { %5148 = vmatpush.bf16.msra.mxu2 %v8551_v16  ;;  %5161 = vmatpush.bf16.msra.mxu3 %v8658_v27 }
 0x94d   :  { %5174 = vmatpush.bf16.msrb.mxu0 %v8615_v12  ;;  %5187 = vmatpush.bf16.msrb.mxu1 %v8660_v52 }
 0x950   :  { %5149 = vmatpush.bf16.msra.mxu2 %v8558_v47  ;;  %5162 = vmatpush.bf16.msra.mxu3 %v8667_v19 }
 0x951   :  { %5175 = vmatpush.bf16.msrb.mxu0 %v8620_v34  ;;  %5188 = vmatpush.bf16.msrb.mxu1 %v8669_v1 }
 0x954   :  { %5150 = vmatpush.bf16.msra.mxu2 %v8565_v30  ;;  %5163 = vmatpush.bf16.msra.mxu3 %v8675_v59 }
 0x955   :  { %5176 = vmatpush.bf16.msrb.mxu0 %v8624_v41  ;;  %5189 = vmatpush.bf16.msrb.mxu1 %v8677_v55 }
 0x958   :  { %5151 = vmatpush.bf16.msra.mxu2 %v8575_v36  ;;  %5164 = vmatpush.bf16.msra.mxu3 %v8683_v3 }
 0x959   :  { %5177 = vmatpush.bf16.msrb.mxu0 %v8628_v51  ;;  %5190 = vmatpush.bf16.msrb.mxu1 %v8685_v28 }
 0x95c   :  { %5152 = vmatpush.bf16.msra.mxu2 %v8592_v32  ;;  %5165 = vmatpush.bf16.msra.mxu3 %v8691_v38 }
 0x95d   :  { %5178 = vmatpush.bf16.msrb.mxu0 %v8636_v6  ;;  %5191 = vmatpush.bf16.msrb.mxu1 %v8693_v0 }
 0x9bc   :  { %v4890_v48 = vpop.f32.mrf.mxu0  ;;  %v4903_v13 = vpop.f32.mrf.mxu1 }
 0x9bd   :  { %v4914_v8 = vrot.slane %v4903_v13, 6 }
 0x9bf   :  { %v4922_v37 = vadd.f32 %v4914_v8, %v10058_v63  ;;  %v4913_v8 = vrot.slane %v4890_v48, 6 }
 0x9c1   :  { %v7038_v23 = vmul.f32 -1.442695, %v4922_v37  ;;  %v4864_v45 = vpop.f32.mrf.mxu2  ;;  %v4877_v14 = vpop.f32.mrf.mxu3 }
 0x9c2   :  { %v4911_v54 = vrot.slane %v4864_v45, 6  ;;  %v4912_v44 = vrot.slane %v4877_v14, 6  ;;  %v10061_v45 = vld [vmem:[#allocation45_spill] sm:$0xff] }
 0x9c3   :  { %7496 = vpow2.f32 %v7038_v23  ;;  %v4921_v14 = vadd.f32 %v4913_v8, %v10061_v45 }
 0x9c4   :  { %v4919_v22 = vadd.f32 %v4911_v54, %v10059_v43  ;;  %v4920_v20 = vadd.f32 %v4912_v44, %v10060_v29  ;;  %v4892_v24 = vpop.f32.mrf.mxu0  ;;  %v4905_v2 = vpop.f32.mrf.mxu1  ;;  %v4982_v43 = vrot.slane %v9373_v53, 7 }
 0x9c6   :  { %v7036_v10 = vmul.f32 -1.442695, %v4919_v22  ;;  %v7037_v15 = vmul.f32 -1.442695, %v4920_v20 }
 0x9c8   :  { %7498 = vpow2.f32 %v7036_v10 }
 0x9c9   :  { %v7497_v57 = vpop.eup %7496  ;;  %7500 = vpow2.f32 %v7037_v15  ;;  %v4866_v35 = vpop.f32.mrf.mxu2 }
 0x9ca   :  { %v4879_v9 = vpop.f32.mrf.mxu3  ;;  %v4965_v17 = vadd.f32 1.0, %v7497_v57 }
 0x9cc   :  { %7502 = vrcp.f32 %v4965_v17 }
 0x9ce   :  { %v7499_v50 = vpop.eup %7498 }
 0x9cf   :  { %v7501_v62 = vpop.eup %7500  ;;  %v4926_v61 = vadd.f32 1.0, %v7499_v50 }
 0x9d0   :  { %v4945_v13 = vadd.f32 1.0, %v7501_v62 }
 0x9d1   :  { %7504 = vrcp.f32 %v4926_v61  ;;  %v4938_v2 = vand.u32 2147483648, %v4926_v61  ;;  %v4936_v57 = vand.u32 2147483647, %v4926_v61  ;;  %vm4932_vm12 = vweird.f32 %v4926_v61 }
 0x9d2   :  { %7506 = vrcp.f32 %v4945_v13  ;;  %v7503_v37 = vpop.eup %7502  ;;  %v4957_v35 = vand.u32 2147483648, %v4945_v13  ;;  %v4955_v50 = vand.u32 2147483647, %v4945_v13  ;;  %vm4951_vm15 = vweird.f32 %v4945_v13 }
 0x9d3   :  { %v4967_v20 = vmul.f32 %v7503_v37, %v4965_v17  ;;  %7508 = vtanh.f32 %v4921_v14  ;;  %v4939_v8 = vor.u32 1.1754944e-38, %v4938_v2  ;;  %vm4937_vm0 = vcmp.eq.f32.partialorder %v4936_v57, 8.507059e+37 }
 0x9d4   :  { %v4958_v14 = vor.u32 1.1754944e-38, %v4957_v35  ;;  %vm4956_vm4 = vcmp.eq.f32.partialorder %v4955_v50, 8.507059e+37  ;;  %vm4972_vm6 = vweird.f32 %v7503_v37  ;;  %v4977_v2 = vand.u32 2147483648, %v4965_v17 }
 0x9d5   :  { %v4968_v48 = vsub.f32 1.0, %v4967_v20 }
 0x9d7   :  { %v7505_v23 = vpop.eup %7504 }
 0x9d8   :  { %v7507_v54 = vpop.eup %7506  ;;  %v4928_v44 = vmul.f32 %v7505_v23, %v4926_v61  ;;  %vm4933_vm9 = vweird.f32 %v7505_v23 }
 0x9d9   :  { %v4947_v22 = vmul.f32 %v7507_v54, %v4945_v13  ;;  %vm4952_vm11 = vweird.f32 %v7507_v54  ;;  %vm4934_vm14 = vmor %vm4932_vm12, %vm4933_vm9  ;;  %vm4971_vm9 = vweird.f32 %v4965_v17  ;;  %v4975_v13 = vand.u32 2147483647, %v4965_v17 }
 0x9da   :  { %v4929_v24 = vsub.f32 1.0, %v4928_v44  ;;  %vm4953_vm2 = vmor %vm4951_vm15, %vm4952_vm11  ;;  %v7509_v44 = vpop.eup %7508 }
 0x9db   :  { %v4948_v10 = vsub.f32 1.0, %v4947_v22  ;;  %vm4973_vm11 = vmor %vm4971_vm9, %vm4972_vm6  ;;  %vm4976_vm12 = vcmp.eq.f32.partialorder %v4975_v13, 8.507059e+37 }
 0x9dc   :  { %v4930_v15 = vmul.f32 %v7505_v23, %v4929_v24 }
 0x9dd   :  { %v4949_v9 = vmul.f32 %v7507_v54, %v4948_v10  ;;  %v4969_v10 = vmul.f32 %v7503_v37, %v4968_v48 }
 0x9de   :  { %v4931_v62 = vadd.f32 %v7505_v23, %v4930_v15 }
 0x9df   :  { %v4950_v45 = vadd.f32 %v7507_v54, %v4949_v9  ;;  %v4970_v61 = vadd.f32 %v7503_v37, %v4969_v10  ;;  %v10063_v9 = vld [vmem:[#allocation36_spill] sm:$0xff]  ;;  %v10065_v10 = vld [vmem:[#allocation22_spill] sm:$0xff] }
 0x9e0   :  { %v4935_v29 = vsel %vm4934_vm14, %v7505_v23, %v4931_v62 }
 0x9e1   :  { %v4940_v22 = vsel %vm4937_vm0, %v4939_v8, %v4935_v29  ;;  %v4954_v24 = vsel %vm4953_vm2, %v7507_v54, %v4950_v45  ;;  %v4974_v23 = vsel %vm4973_vm11, %v7503_v37, %v4970_v61  ;;  %v4978_v29 = vor.u32 1.1754944e-38, %v4977_v2 }
 0x9e2   :  { %v4985_v63 = vmul.f32 %v7509_v44, %v4940_v22  ;;  %v4959_v58 = vsel %vm4956_vm4, %v4958_v14, %v4954_v24  ;;  %v10064_v22 = vld [vmem:[#allocation32_spill] sm:$0xff] }
 0x9e3   :  { %v4984_v20 = vmul.f32 %v4982_v43, %v4959_v58  ;;  %v4979_v54 = vsel %vm4976_vm12, %v4978_v29, %v4974_v23  ;;  %v5709_v58 = vsel %vm5695_vm7, %v9332_v46, %v9376_v21 }
 0x9e5   :  { %v9417_v15 = vadd.f32 %v4985_v63, %v4984_v20 }
 0x9e7   :  { %7510 = vtanh.f32 %v9417_v15 }
 0x9ed   :  { %v7511_v45 = vpop.eup %7510 }
 0x9ee   :  { %v9420_v53 = vmul.f32 %v7511_v45, %v4979_v54 }
 0x9f0   :  { %10062 = vst [vmem:[#allocation57_spill] sm:$0xff] %v9420_v53  ;;  %v5001_v63 = vpack.c.bf16 %v9420_v53, %v9420_v53  ;;  %v9429_v43 = vsel %vm5697_vm8, %v5709_v58, %v9420_v53 }
 0x9f2   :  { %v5003_v17 = vrot.slane %v5001_v63, 1 }
 0x9f4   :  { %5013 = vmatmul.bf16.vlgmr.msrb.gmra.mxu2 %v5003_v17  ;;  %5026 = vmatmul.bf16.vlgmr.msrb.gmra.mxu3 %v5003_v17 }
 0x9f5   :  { %5039 = vmatmul.bf16.vlgmr.msra.gmra.mxu0 %v5003_v17  ;;  %5052 = vmatmul.bf16.vlgmr.msra.gmra.mxu1 %v5003_v17 }
 0x9f6   :  { %5283 = vmatpush.bf16.msrb.mxu2 %v8532_v49  ;;  %5296 = vmatpush.bf16.msrb.mxu3 %v8630_v26 }
 0x9f7   :  { %5309 = vmatpush.bf16.msra.mxu0 %v8567_v33  ;;  %5322 = vmatpush.bf16.msra.mxu1 %v8632_v25 }
 0x9fa   :  { %5284 = vmatpush.bf16.msrb.mxu2 %v8537_v39  ;;  %5297 = vmatpush.bf16.msrb.mxu3 %v8640_v31 }
 0x9fb   :  { %5310 = vmatpush.bf16.msra.mxu0 %v8582_v56  ;;  %5323 = vmatpush.bf16.msra.mxu1 %v8642_v40 }
 0x9fe   :  { %5285 = vmatpush.bf16.msrb.mxu2 %v8546_v42  ;;  %5298 = vmatpush.bf16.msrb.mxu3 %v8649_v60 }
 0x9ff   :  { %5311 = vmatpush.bf16.msra.mxu0 %v8601_v11  ;;  %5324 = vmatpush.bf16.msra.mxu1 %v8651_v7 }
 0xa02   :  { %5286 = vmatpush.bf16.msrb.mxu2 %v8551_v16  ;;  %5299 = vmatpush.bf16.msrb.mxu3 %v8658_v27 }
 0xa03   :  { %5312 = vmatpush.bf16.msra.mxu0 %v8615_v12  ;;  %5325 = vmatpush.bf16.msra.mxu1 %v8660_v52 }
 0xa06   :  { %5287 = vmatpush.bf16.msrb.mxu2 %v8558_v47  ;;  %5300 = vmatpush.bf16.msrb.mxu3 %v8667_v19 }
 0xa07   :  { %5313 = vmatpush.bf16.msra.mxu0 %v8620_v34  ;;  %5326 = vmatpush.bf16.msra.mxu1 %v8669_v1 }
 0xa0a   :  { %5288 = vmatpush.bf16.msrb.mxu2 %v8565_v30  ;;  %5301 = vmatpush.bf16.msrb.mxu3 %v8675_v59 }
 0xa0b   :  { %5314 = vmatpush.bf16.msra.mxu0 %v8624_v41  ;;  %5327 = vmatpush.bf16.msra.mxu1 %v8677_v55 }
 0xa0e   :  { %5289 = vmatpush.bf16.msrb.mxu2 %v8575_v36  ;;  %5302 = vmatpush.bf16.msrb.mxu3 %v8683_v3 }
 0xa0f   :  { %5315 = vmatpush.bf16.msra.mxu0 %v8628_v51  ;;  %5328 = vmatpush.bf16.msra.mxu1 %v8685_v28 }
 0xa12   :  { %5290 = vmatpush.bf16.msrb.mxu2 %v8592_v32  ;;  %5303 = vmatpush.bf16.msrb.mxu3 %v8691_v38 }
 0xa13   :  { %5316 = vmatpush.bf16.msra.mxu0 %v8636_v6  ;;  %5329 = vmatpush.bf16.msra.mxu1 %v8693_v0 }
 0xa72   :  { %v5040_v37 = vpop.f32.mrf.mxu0  ;;  %v5053_v57 = vpop.f32.mrf.mxu1 }
 0xa73   :  { %v5064_v35 = vrot.slane %v5053_v57, 5 }
 0xa75   :  { %v5072_v50 = vadd.f32 %v5064_v35, %v10063_v9 }
 0xa77   :  { %v7041_v48 = vmul.f32 -1.442695, %v5072_v50  ;;  %v5014_v62 = vpop.f32.mrf.mxu2  ;;  %v5027_v8 = vpop.f32.mrf.mxu3  ;;  %v5063_v50 = vrot.slane %v5040_v37, 5 }
 0xa78   :  { %v5061_v14 = vrot.slane %v5014_v62, 5  ;;  %v5062_v44 = vrot.slane %v5027_v8, 5  ;;  %v10066_v8 = vld [vmem:[#allocation46_spill] sm:$0xff] }
 0xa79   :  { %7512 = vpow2.f32 %v7041_v48 }
 0xa7a   :  { %v5069_v24 = vadd.f32 %v5061_v14, %v10064_v22  ;;  %v5070_v20 = vadd.f32 %v5062_v44, %v10065_v10  ;;  %v5042_v61 = vpop.f32.mrf.mxu0  ;;  %v5055_v2 = vpop.f32.mrf.mxu1  ;;  %v5071_v14 = vadd.f32 %v5063_v50, %v10066_v8  ;;  %v5132_v8 = vrot.slane %v9417_v15, 7 }
 0xa7c   :  { %v7039_v13 = vmul.f32 -1.442695, %v5069_v24  ;;  %v7040_v23 = vmul.f32 -1.442695, %v5070_v20 }
 0xa7e   :  { %7514 = vpow2.f32 %v7039_v13 }
 0xa7f   :  { %v7513_v29 = vpop.eup %7512  ;;  %7516 = vpow2.f32 %v7040_v23  ;;  %v5016_v45 = vpop.f32.mrf.mxu2 }
 0xa80   :  { %v5029_v54 = vpop.f32.mrf.mxu3  ;;  %v5115_v58 = vadd.f32 1.0, %v7513_v29 }
 0xa82   :  { %7518 = vrcp.f32 %v5115_v58 }
 0xa84   :  { %v7515_v63 = vpop.eup %7514 }
 0xa85   :  { %v7517_v17 = vpop.eup %7516  ;;  %v5076_v57 = vadd.f32 1.0, %v7515_v63 }
 0xa86   :  { %v5095_v35 = vadd.f32 1.0, %v7517_v17 }
 0xa87   :  { %7520 = vrcp.f32 %v5076_v57  ;;  %v5088_v13 = vand.u32 2147483648, %v5076_v57  ;;  %v5086_v45 = vand.u32 2147483647, %v5076_v57  ;;  %vm5082_vm0 = vweird.f32 %v5076_v57 }
 0xa88   :  { %7522 = vrcp.f32 %v5095_v35  ;;  %v7519_v48 = vpop.eup %7518  ;;  %v5107_v54 = vand.u32 2147483648, %v5095_v35  ;;  %v5105_v17 = vand.u32 2147483647, %v5095_v35  ;;  %vm5101_vm4 = vweird.f32 %v5095_v35 }
 0xa89   :  { %v5117_v61 = vmul.f32 %v7519_v48, %v5115_v58  ;;  %7524 = vtanh.f32 %v5071_v14  ;;  %v5089_v50 = vor.u32 1.1754944e-38, %v5088_v13  ;;  %vm5087_vm6 = vcmp.eq.f32.partialorder %v5086_v45, 8.507059e+37 }
 0xa8a   :  { %v5108_v14 = vor.u32 1.1754944e-38, %v5107_v54  ;;  %vm5106_vm11 = vcmp.eq.f32.partialorder %v5105_v17, 8.507059e+37  ;;  %vm5122_vm12 = vweird.f32 %v7519_v48  ;;  %v5127_v13 = vand.u32 2147483648, %v5115_v58 }
 0xa8b   :  { %v5118_v37 = vsub.f32 1.0, %v5117_v61 }
 0xa8d   :  { %v7521_v62 = vpop.eup %7520 }
 0xa8e   :  { %v7523_v44 = vpop.eup %7522  ;;  %v5078_v24 = vmul.f32 %v7521_v62, %v5076_v57  ;;  %vm5083_vm14 = vweird.f32 %v7521_v62 }
 0xa8f   :  { %v5097_v20 = vmul.f32 %v7523_v44, %v5095_v35  ;;  %vm5102_vm15 = vweird.f32 %v7523_v44  ;;  %vm5084_vm2 = vmor %vm5082_vm0, %vm5083_vm14  ;;  %vm5121_vm14 = vweird.f32 %v5115_v58 }
 0xa90   :  { %v5079_v2 = vsub.f32 1.0, %v5078_v24  ;;  %vm5103_vm9 = vmor %vm5101_vm4, %vm5102_vm15  ;;  %v7525_v24 = vpop.eup %7524 }
 0xa91   :  { %v5098_v23 = vsub.f32 1.0, %v5097_v20  ;;  %vm5123_vm15 = vmor %vm5121_vm14, %vm5122_vm12 }
 0xa92   :  { %v5080_v29 = vmul.f32 %v7521_v62, %v5079_v2 }
 0xa93   :  { %v5099_v63 = vmul.f32 %v7523_v44, %v5098_v23  ;;  %v5119_v23 = vmul.f32 %v7519_v48, %v5118_v37 }
 0xa94   :  { %v5081_v46 = vadd.f32 %v7521_v62, %v5080_v29 }
 0xa95   :  { %v5100_v21 = vadd.f32 %v7523_v44, %v5099_v63  ;;  %v5120_v57 = vadd.f32 %v7519_v48, %v5119_v23 }
 0xa96   :  { %v5085_v53 = vsel %vm5084_vm2, %v7521_v62, %v5081_v46  ;;  %v5125_v46 = vand.u32 2147483647, %v5115_v58 }
 0xa97   :  { %v5090_v20 = vsel %vm5087_vm6, %v5089_v50, %v5085_v53  ;;  %v5104_v2 = vsel %vm5103_vm9, %v7523_v44, %v5100_v21  ;;  %v5124_v35 = vsel %vm5123_vm15, %v7519_v48, %v5120_v57  ;;  %v5128_v53 = vor.u32 1.1754944e-38, %v5127_v13 }
 0xa98   :  { %v5135_v10 = vmul.f32 %v7525_v24, %v5090_v20  ;;  %v5109_v22 = vsel %vm5106_vm11, %v5108_v14, %v5104_v2  ;;  %vm5126_vm0 = vcmp.eq.f32.partialorder %v5125_v46, 8.507059e+37 }
 0xa99   :  { %v5134_v61 = vmul.f32 %v5132_v8, %v5109_v22  ;;  %v5129_v62 = vsel %vm5126_vm0, %v5128_v53, %v5124_v35 }
 0xa9b   :  { %v9468_v29 = vadd.f32 %v5135_v10, %v5134_v61 }
 0xa9d   :  { %7526 = vtanh.f32 %v9468_v29 }
 0xaa3   :  { %v7527_v21 = vpop.eup %7526 }
 0xaa4   :  { %v9471_v15 = vmul.f32 %v7527_v21, %v5129_v62 }
 0xaa6   :  { %v5139_v22 = vpack.c.bf16 %v9471_v15, %v9471_v15  ;;  %v9478_v10 = vsel %vm5699_vm10, %v9429_v43, %v9471_v15 }
 0xaa8   :  { %v5141_v8 = vshrl.u32 %v5139_v22, 16 }
 0xaaa   :  { %v5143_v44 = vrot.slane %v5141_v8, 1  ;;  %v10067_v8 = vld [vmem:[#allocation39_spill] sm:$0xff] }
 0xaac   :  { %5153 = vmatmul.bf16.vlgmr.msra.gmra.mxu2 %v5143_v44  ;;  %5166 = vmatmul.bf16.vlgmr.msra.gmra.mxu3 %v5143_v44 }
 0xaad   :  { %5179 = vmatmul.bf16.vlgmr.msrb.gmra.mxu0 %v5143_v44  ;;  %5192 = vmatmul.bf16.vlgmr.msrb.gmra.mxu1 %v5143_v44 }
 0xaae   :  { %5423 = vmatpush.bf16.msra.mxu2 %v8532_v49  ;;  %5436 = vmatpush.bf16.msra.mxu3 %v8630_v26 }
 0xaaf   :  { %5449 = vmatpush.bf16.msrb.mxu0 %v8567_v33  ;;  %5462 = vmatpush.bf16.msrb.mxu1 %v8632_v25 }
 0xab2   :  { %5424 = vmatpush.bf16.msra.mxu2 %v8537_v39  ;;  %5437 = vmatpush.bf16.msra.mxu3 %v8640_v31 }
 0xab3   :  { %5450 = vmatpush.bf16.msrb.mxu0 %v8582_v56  ;;  %5463 = vmatpush.bf16.msrb.mxu1 %v8642_v40 }
 0xab6   :  { %5425 = vmatpush.bf16.msra.mxu2 %v8546_v42  ;;  %5438 = vmatpush.bf16.msra.mxu3 %v8649_v60 }
 0xab7   :  { %5451 = vmatpush.bf16.msrb.mxu0 %v8601_v11  ;;  %5464 = vmatpush.bf16.msrb.mxu1 %v8651_v7 }
 0xaba   :  { %5426 = vmatpush.bf16.msra.mxu2 %v8551_v16  ;;  %5439 = vmatpush.bf16.msra.mxu3 %v8658_v27 }
 0xabb   :  { %5452 = vmatpush.bf16.msrb.mxu0 %v8615_v12  ;;  %5465 = vmatpush.bf16.msrb.mxu1 %v8660_v52 }
 0xabe   :  { %5427 = vmatpush.bf16.msra.mxu2 %v8558_v47  ;;  %5440 = vmatpush.bf16.msra.mxu3 %v8667_v19 }
 0xabf   :  { %5453 = vmatpush.bf16.msrb.mxu0 %v8620_v34  ;;  %5466 = vmatpush.bf16.msrb.mxu1 %v8669_v1 }
 0xac2   :  { %5428 = vmatpush.bf16.msra.mxu2 %v8565_v30  ;;  %5441 = vmatpush.bf16.msra.mxu3 %v8675_v59 }
 0xac3   :  { %5454 = vmatpush.bf16.msrb.mxu0 %v8624_v41  ;;  %5467 = vmatpush.bf16.msrb.mxu1 %v8677_v55 }
 0xac6   :  { %5429 = vmatpush.bf16.msra.mxu2 %v8575_v36  ;;  %5442 = vmatpush.bf16.msra.mxu3 %v8683_v3 }
 0xac7   :  { %5455 = vmatpush.bf16.msrb.mxu0 %v8628_v51  ;;  %5468 = vmatpush.bf16.msrb.mxu1 %v8685_v28 }
 0xaca   :  { %5430 = vmatpush.bf16.msra.mxu2 %v8592_v32  ;;  %5443 = vmatpush.bf16.msra.mxu3 %v8691_v38 }
 0xacb   :  { %5456 = vmatpush.bf16.msrb.mxu0 %v8636_v6  ;;  %5469 = vmatpush.bf16.msrb.mxu1 %v8693_v0 }
 0xb2a   :  { %v5180_v43 = vpop.f32.mrf.mxu0  ;;  %v5193_v58 = vpop.f32.mrf.mxu1 }
 0xb2b   :  { %v5204_v48 = vrot.slane %v5193_v58, 4 }
 0xb2d   :  { %v5212_v45 = vadd.f32 %v5204_v48, %v10048_v4 }
 0xb2f   :  { %v7044_v54 = vmul.f32 -1.442695, %v5212_v45  ;;  %v5154_v63 = vpop.f32.mrf.mxu2  ;;  %v5167_v17 = vpop.f32.mrf.mxu3 }
 0xb30   :  { %v5201_v37 = vrot.slane %v5154_v63, 4  ;;  %v5202_v50 = vrot.slane %v5167_v17, 4 }
 0xb31   :  { %7528 = vpow2.f32 %v7044_v54 }
 0xb32   :  { %v5209_v14 = vadd.f32 %v5201_v37, %v10049_v18  ;;  %v5210_v24 = vadd.f32 %v5202_v50, %v10050_v5  ;;  %v5182_v20 = vpop.f32.mrf.mxu0  ;;  %v5195_v2 = vpop.f32.mrf.mxu1  ;;  %v5203_v18 = vrot.slane %v5180_v43, 4 }
 0xb34   :  { %v7042_v23 = vmul.f32 -1.442695, %v5209_v14  ;;  %v7043_v61 = vmul.f32 -1.442695, %v5210_v24  ;;  %v5211_v44 = vadd.f32 %v5203_v18, %v10067_v8  ;;  %v5272_v8 = vrot.slane %v9468_v29, 7 }
 0xb36   :  { %7530 = vpow2.f32 %v7042_v23 }
 0xb37   :  { %v7529_v57 = vpop.eup %7528  ;;  %7532 = vpow2.f32 %v7043_v61  ;;  %v5156_v13 = vpop.f32.mrf.mxu2 }
 0xb38   :  { %v5169_v46 = vpop.f32.mrf.mxu3  ;;  %v5255_v4 = vadd.f32 1.0, %v7529_v57 }
 0xb3a   :  { %7534 = vrcp.f32 %v5255_v4 }
 0xb3c   :  { %v7531_v35 = vpop.eup %7530 }
 0xb3d   :  { %v7533_v53 = vpop.eup %7532  ;;  %v5216_v21 = vadd.f32 1.0, %v7531_v35 }
 0xb3e   :  { %v5235_v62 = vadd.f32 1.0, %v7533_v53 }
 0xb3f   :  { %7536 = vrcp.f32 %v5216_v21  ;;  %v5228_v17 = vand.u32 2147483648, %v5216_v21  ;;  %v5226_v14 = vand.u32 2147483647, %v5216_v21  ;;  %vm5222_vm6 = vweird.f32 %v5216_v21 }
 0xb40   :  { %7538 = vrcp.f32 %v5235_v62  ;;  %v7535_v22 = vpop.eup %7534  ;;  %v5247_v24 = vand.u32 2147483648, %v5235_v62  ;;  %v5245_v2 = vand.u32 2147483647, %v5235_v62  ;;  %vm5241_vm11 = vweird.f32 %v5235_v62 }
 0xb41   :  { %v5257_v54 = vmul.f32 %v7535_v22, %v5255_v4  ;;  %7540 = vtanh.f32 %v5211_v44  ;;  %v5229_v61 = vor.u32 1.1754944e-38, %v5228_v17  ;;  %vm5227_vm12 = vcmp.eq.f32.partialorder %v5226_v14, 8.507059e+37 }
 0xb42   :  { %v5248_v46 = vor.u32 1.1754944e-38, %v5247_v24  ;;  %vm5246_vm15 = vcmp.eq.f32.partialorder %v5245_v2, 8.507059e+37  ;;  %vm5262_vm0 = vweird.f32 %v7535_v22  ;;  %v5267_v17 = vand.u32 2147483648, %v5255_v4 }
 0xb43   :  { %v5258_v43 = vsub.f32 1.0, %v5257_v54 }
 0xb45   :  { %v7537_v5 = vpop.eup %7536  ;;  %v5259_v44 = vmul.f32 %v7535_v22, %v5258_v43 }
 0xb46   :  { %v7539_v58 = vpop.eup %7538  ;;  %v5218_v48 = vmul.f32 %v7537_v5, %v5216_v21  ;;  %vm5223_vm2 = vweird.f32 %v7537_v5 }
 0xb47   :  { %v5237_v45 = vmul.f32 %v7539_v58, %v5235_v62  ;;  %vm5242_vm4 = vweird.f32 %v7539_v58  ;;  %vm5224_vm9 = vmor %vm5222_vm6, %vm5223_vm2  ;;  %v7541_v35 = vpop.eup %7540  ;;  %v5260_v21 = vadd.f32 %v7535_v22, %v5259_v44  ;;  %vm5261_vm2 = vweird.f32 %v5255_v4 }
 0xb48   :  { %v5219_v63 = vsub.f32 1.0, %v5218_v48  ;;  %vm5243_vm14 = vmor %vm5241_vm11, %vm5242_vm4  ;;  %v5265_v62 = vand.u32 2147483647, %v5255_v4 }
 0xb49   :  { %v5238_v37 = vsub.f32 1.0, %v5237_v45  ;;  %vm5263_vm4 = vmor %vm5261_vm2, %vm5262_vm0 }
 0xb4a   :  { %v5220_v50 = vmul.f32 %v7537_v5, %v5219_v63  ;;  %vm5266_vm6 = vcmp.eq.f32.partialorder %v5265_v62, 8.507059e+37 }
 0xb4b   :  { %v5239_v20 = vmul.f32 %v7539_v58, %v5238_v37  ;;  %v5268_v37 = vor.u32 1.1754944e-38, %v5267_v17 }
 0xb4c   :  { %v5221_v23 = vadd.f32 %v7537_v5, %v5220_v50 }
 0xb4d   :  { %v5240_v57 = vadd.f32 %v7539_v58, %v5239_v20 }
 0xb4e   :  { %v5225_v13 = vsel %vm5224_vm9, %v7537_v5, %v5221_v23  ;;  %v5264_v5 = vsel %vm5263_vm4, %v7535_v22, %v5260_v21 }
 0xb4f   :  { %v5230_v53 = vsel %vm5227_vm12, %v5229_v61, %v5225_v13  ;;  %v5244_v18 = vsel %vm5243_vm14, %v7539_v58, %v5240_v57  ;;  %v5269_v50 = vsel %vm5266_vm6, %v5268_v37, %v5264_v5 }
 0xb50   :  { %v5275_v48 = vmul.f32 %v7541_v35, %v5230_v53  ;;  %v5249_v45 = vsel %vm5246_vm15, %v5248_v46, %v5244_v18 }
 0xb51   :  { %v5274_v54 = vmul.f32 %v5272_v8, %v5249_v45 }
 0xb53   :  { %v9517_v63 = vadd.f32 %v5275_v48, %v5274_v54 }
 0xb55   :  { %7542 = vtanh.f32 %v9517_v63  ;;  %v5410_v62 = vrot.slane %v9517_v63, 7 }
 0xb5b   :  { %v7543_v58 = vpop.eup %7542 }
 0xb5c   :  { %v9520_v29 = vmul.f32 %v7543_v58, %v5269_v50 }
 0xb5e   :  { %v5279_v14 = vpack.c.bf16 %v9520_v29, %v9520_v29  ;;  %v9527_v24 = vsel %vm5701_vm13, %v9478_v10, %v9520_v29 }
 0xb60   :  { %v5281_v20 = vrot.slane %v5279_v14, 2 }
 0xb62   :  { %5291 = vmatmul.bf16.vlgmr.msrb.gmra.mxu2 %v5281_v20  ;;  %5304 = vmatmul.bf16.vlgmr.msrb.gmra.mxu3 %v5281_v20 }
 0xb63   :  { %5317 = vmatmul.bf16.vlgmr.msra.gmra.mxu0 %v5281_v20  ;;  %5330 = vmatmul.bf16.vlgmr.msra.gmra.mxu1 %v5281_v20 }
 0xb64   :  { %5561 = vmatpush.bf16.msrb.mxu2 %v8532_v49  ;;  %5574 = vmatpush.bf16.msrb.mxu3 %v8630_v26 }
 0xb65   :  { %5587 = vmatpush.bf16.msra.mxu0 %v8567_v33  ;;  %5600 = vmatpush.bf16.msra.mxu1 %v8632_v25 }
 0xb68   :  { %5562 = vmatpush.bf16.msrb.mxu2 %v8537_v39  ;;  %5575 = vmatpush.bf16.msrb.mxu3 %v8640_v31 }
 0xb69   :  { %5588 = vmatpush.bf16.msra.mxu0 %v8582_v56  ;;  %5601 = vmatpush.bf16.msra.mxu1 %v8642_v40 }
 0xb6c   :  { %5563 = vmatpush.bf16.msrb.mxu2 %v8546_v42  ;;  %5576 = vmatpush.bf16.msrb.mxu3 %v8649_v60 }
 0xb6d   :  { %5589 = vmatpush.bf16.msra.mxu0 %v8601_v11  ;;  %5602 = vmatpush.bf16.msra.mxu1 %v8651_v7 }
 0xb70   :  { %5564 = vmatpush.bf16.msrb.mxu2 %v8551_v16  ;;  %5577 = vmatpush.bf16.msrb.mxu3 %v8658_v27  ;;  %v10068_v16 = vld [vmem:[#allocation34_spill] sm:$0xff] }
 0xb71   :  { %5590 = vmatpush.bf16.msra.mxu0 %v8615_v12  ;;  %5603 = vmatpush.bf16.msra.mxu1 %v8660_v52  ;;  %v10069_v12 = vld [vmem:[#allocation26_spill] sm:$0xff] }
 0xb74   :  { %5565 = vmatpush.bf16.msrb.mxu2 %v8558_v47  ;;  %5578 = vmatpush.bf16.msrb.mxu3 %v8667_v19 }
 0xb75   :  { %5591 = vmatpush.bf16.msra.mxu0 %v8620_v34  ;;  %5604 = vmatpush.bf16.msra.mxu1 %v8669_v1 }
 0xb78   :  { %5566 = vmatpush.bf16.msrb.mxu2 %v8565_v30  ;;  %5579 = vmatpush.bf16.msrb.mxu3 %v8675_v59 }
 0xb79   :  { %5592 = vmatpush.bf16.msra.mxu0 %v8624_v41  ;;  %5605 = vmatpush.bf16.msra.mxu1 %v8677_v55 }
 0xb7c   :  { %5567 = vmatpush.bf16.msrb.mxu2 %v8575_v36  ;;  %5580 = vmatpush.bf16.msrb.mxu3 %v8683_v3 }
 0xb7d   :  { %5593 = vmatpush.bf16.msra.mxu0 %v8628_v51  ;;  %5606 = vmatpush.bf16.msra.mxu1 %v8685_v28  ;;  %v10071_v28 = vld [vmem:[#allocation43_spill] sm:$0xff] }
 0xb80   :  { %5568 = vmatpush.bf16.msrb.mxu2 %v8592_v32  ;;  %5581 = vmatpush.bf16.msrb.mxu3 %v8691_v38  ;;  %v10070_v32 = vld [vmem:[#allocation20_spill] sm:$0xff] }
 0xb81   :  { %5594 = vmatpush.bf16.msra.mxu0 %v8636_v6  ;;  %5607 = vmatpush.bf16.msra.mxu1 %v8693_v0 }
 0xbe0   :  { %v5318_v49 = vpop.f32.mrf.mxu0  ;;  %v5331_v39 = vpop.f32.mrf.mxu1 }
 0xbe1   :  { %v5342_v42 = vrot.slane %v5331_v39, 3  ;;  %v5341_v59 = vrot.slane %v5318_v49, 3 }
 0xbe3   :  { %v5350_v47 = vadd.f32 %v5342_v42, %v10068_v16  ;;  %v5349_v38 = vadd.f32 %v5341_v59, %v10071_v28  ;;  %v5792_v59 = vld [vmem:[%s9753_s6 + $0x70] sm:$0xff]  ;;  %v5791_v28 = vld [vmem:[%s9753_s6 + $0x68] sm:$0xff] }
 0xbe5   :  { %v7047_v30 = vmul.f32 -1.442695, %v5350_v47  ;;  %v5292_v33 = vpop.f32.mrf.mxu2  ;;  %v5305_v36 = vpop.f32.mrf.mxu3 }
 0xbe6   :  { %v5339_v56 = vrot.slane %v5292_v33, 3  ;;  %v5340_v11 = vrot.slane %v5305_v36, 3 }
 0xbe7   :  { %7544 = vpow2.f32 %v7047_v30 }
 0xbe8   :  { %v5347_v34 = vadd.f32 %v5339_v56, %v10069_v12  ;;  %v5348_v41 = vadd.f32 %v5340_v11, %v10070_v32  ;;  %v5320_v51 = vpop.f32.mrf.mxu0  ;;  %v5333_v26 = vpop.f32.mrf.mxu1 }
 0xbea   :  { %v7045_v25 = vmul.f32 -1.442695, %v5347_v34  ;;  %v7046_v6 = vmul.f32 -1.442695, %v5348_v41  ;;  %v10072_v41 = vld [vmem:[#allocation35_spill] sm:$0xff] }
 0xbec   :  { %7546 = vpow2.f32 %v7045_v25 }
 0xbed   :  { %v7545_v31 = vpop.eup %7544  ;;  %7548 = vpow2.f32 %v7046_v6  ;;  %v5294_v40 = vpop.f32.mrf.mxu2 }
 0xbee   :  { %v5307_v60 = vpop.f32.mrf.mxu3  ;;  %v5393_v7 = vadd.f32 1.0, %v7545_v31 }
 0xbef   :  { %v10073_v60 = vld [vmem:[#allocation28_spill] sm:$0xff] }
 0xbf0   :  { %7550 = vrcp.f32 %v5393_v7  ;;  %v5405_v49 = vand.u32 2147483648, %v5393_v7  ;;  %v5403_v39 = vand.u32 2147483647, %v5393_v7 }
 0xbf2   :  { %v7547_v27 = vpop.eup %7546  ;;  %v5406_v16 = vor.u32 1.1754944e-38, %v5405_v49 }
 0xbf3   :  { %v7549_v52 = vpop.eup %7548  ;;  %v5354_v19 = vadd.f32 1.0, %v7547_v27 }
 0xbf4   :  { %v5373_v1 = vadd.f32 1.0, %v7549_v52 }
 0xbf5   :  { %7552 = vrcp.f32 %v5354_v19  ;;  %v5366_v43 = vand.u32 2147483648, %v5354_v19  ;;  %v5364_v57 = vand.u32 2147483647, %v5354_v19  ;;  %vm5360_vm12 = vweird.f32 %v5354_v19 }
 0xbf6   :  { %7554 = vrcp.f32 %v5373_v1  ;;  %v7551_v55 = vpop.eup %7550  ;;  %v5385_v13 = vand.u32 2147483648, %v5373_v1  ;;  %v5383_v35 = vand.u32 2147483647, %v5373_v1  ;;  %vm5379_vm15 = vweird.f32 %v5373_v1 }
 0xbf7   :  { %v5395_v22 = vmul.f32 %v7551_v55, %v5393_v7  ;;  %7556 = vtanh.f32 %v5349_v38  ;;  %v5367_v8 = vor.u32 1.1754944e-38, %v5366_v43  ;;  %vm5365_vm0 = vcmp.eq.f32.partialorder %v5364_v57, 8.507059e+37  ;;  %v5790_v38 = vld [vmem:[%s9753_s6 + $0x60] sm:$0xff]  ;;  %v5788_v43 = vld [vmem:[%s9753_s6 + $0x50] sm:$0xff] }
 0xbf8   :  { %v5386_v45 = vor.u32 1.1754944e-38, %v5385_v13  ;;  %vm5384_vm4 = vcmp.eq.f32.partialorder %v5383_v35, 8.507059e+37  ;;  %vm5400_vm6 = vweird.f32 %v7551_v55  ;;  %v5786_v35 = vld [vmem:[%s9753_s6 + $0x40] sm:$0xff] }
 0xbf9   :  { %v5396_v53 = vsub.f32 1.0, %v5395_v22  ;;  %v5789_v22 = vld [vmem:[%s9753_s6 + $0x58] sm:$0xff] }
 0xbfb   :  { %v7553_v3 = vpop.eup %7552  ;;  %v5397_v5 = vmul.f32 %v7551_v55, %v5396_v53 }
 0xbfc   :  { %v7555_v0 = vpop.eup %7554  ;;  %v5356_v10 = vmul.f32 %v7553_v3, %v5354_v19  ;;  %vm5361_vm9 = vweird.f32 %v7553_v3 }
 0xbfd   :  { %v5375_v4 = vmul.f32 %v7555_v0, %v5373_v1  ;;  %vm5380_vm11 = vweird.f32 %v7555_v0  ;;  %vm5362_vm14 = vmor %vm5360_vm12, %vm5361_vm9  ;;  %v7557_v54 = vpop.eup %7556  ;;  %v5398_v20 = vadd.f32 %v7551_v55, %v5397_v5  ;;  %vm5399_vm9 = vweird.f32 %v5393_v7  ;;  %v10074_v7 = vld [vmem:[#allocation21_spill] sm:$0xff]  ;;  %v5793_v1 = vld [vmem:[%s9753_s6 + $0x78] sm:$0xff] }
 0xbfe   :  { %v5357_v2 = vsub.f32 1.0, %v5356_v10  ;;  %vm5381_vm2 = vmor %vm5379_vm15, %vm5380_vm11  ;;  %vm5404_vm12 = vcmp.eq.f32.partialorder %v5403_v39, 8.507059e+37  ;;  %v5781_v39 = vld [vmem:[%s9753_s6 + $0x18] sm:$0xff] }
 0xbff   :  { %v5376_v23 = vsub.f32 1.0, %v5375_v4  ;;  %vm5401_vm11 = vmor %vm5399_vm9, %vm5400_vm6 }
 0xc00   :  { %v5358_v61 = vmul.f32 %v7553_v3, %v5357_v2  ;;  %v5402_v42 = vsel %vm5401_vm11, %v7551_v55, %v5398_v20 }
 0xc01   :  { %v5377_v46 = vmul.f32 %v7555_v0, %v5376_v23  ;;  %v5407_v30 = vsel %vm5404_vm12, %v5406_v16, %v5402_v42 }
 0xc02   :  { %v5359_v18 = vadd.f32 %v7553_v3, %v5358_v61  ;;  %v5787_v61 = vld [vmem:[%s9753_s6 + $0x48] sm:$0xff] }
 0xc03   :  { %v5378_v44 = vadd.f32 %v7555_v0, %v5377_v46 }
 0xc04   :  { %v5363_v48 = vsel %vm5362_vm14, %v7553_v3, %v5359_v18  ;;  %v5785_v18 = vld [vmem:[%s9753_s6 + $0x38] sm:$0xff] }
 0xc05   :  { %v5368_v21 = vsel %vm5365_vm0, %v5367_v8, %v5363_v48  ;;  %v5382_v17 = vsel %vm5381_vm2, %v7555_v0, %v5378_v44  ;;  %v5784_v8 = vld [vmem:[%s9753_s6 + $0x30] sm:$0xff] }
 0xc06   :  { %v5413_v37 = vmul.f32 %v7557_v54, %v5368_v21  ;;  %v5387_v58 = vsel %vm5384_vm4, %v5386_v45, %v5382_v17  ;;  %v10075_v45 = vld [vmem:[#allocation45_spill] sm:$0xff] }
 0xc07   :  { %v5412_v50 = vmul.f32 %v5410_v62, %v5387_v58  ;;  %v5783_v21 = vld [vmem:[%s9753_s6 + $0x28] sm:$0xff] }
 0xc09   :  { %v9566_v14 = vadd.f32 %v5413_v37, %v5412_v50  ;;  %v5782_v37 = vld [vmem:[%s9753_s6 + $0x20] sm:$0xff] }
 0xc0b   :  { %7558 = vtanh.f32 %v9566_v14 }
 0xc11   :  { %v7559_v47 = vpop.eup %7558 }
 0xc12   :  { %v9569_v63 = vmul.f32 %v7559_v47, %v5407_v30 }
 0xc14   :  { %v5417_v33 = vpack.c.bf16 %v9569_v63, %v9569_v63  ;;  %v9576_v36 = vsel %vm1852_vm5, %v9527_v24, %v9569_v63 }
 0xc16   :  { %v5419_v56 = vshrl.u32 %v5417_v33, 16 }
 0xc18   :  { %v5421_v11 = vrot.slane %v5419_v56, 2  ;;  %v5780_v56 = vld [vmem:[%s9753_s6 + $0x10] sm:$0xff] }
 0xc1a   :  { %5431 = vmatmul.bf16.vlgmr.msra.gmra.mxu2 %v5421_v11  ;;  %5444 = vmatmul.bf16.vlgmr.msra.gmra.mxu3 %v5421_v11 }
 0xc1b   :  { %5457 = vmatmul.bf16.vlgmr.msrb.gmra.mxu0 %v5421_v11  ;;  %5470 = vmatmul.bf16.vlgmr.msrb.gmra.mxu1 %v5421_v11 }
 0xc1c   :  { %5794 = vmatpush.msra.mxu2 %v5793_v1 }
 0xc1e   :  { %5795 = vmatpush.msra.mxu2 %v5792_v59 }
 0xc20   :  { %5796 = vmatpush.msra.mxu2 %v5791_v28 }
 0xc22   :  { %5797 = vmatpush.msra.mxu2 %v5790_v38 }
 0xc24   :  { %5798 = vmatpush.msra.mxu2 %v5789_v22 }
 0xc26   :  { %5799 = vmatpush.msra.mxu2 %v5788_v43 }
 0xc28   :  { %5800 = vmatpush.msra.mxu2 %v5787_v61 }
 0xc2a   :  { %5801 = vmatpush.msra.mxu2 %v5786_v35 }
 0xc2c   :  { %5802 = vmatpush.msra.mxu2 %v5785_v18 }
 0xc2e   :  { %5803 = vmatpush.msra.mxu2 %v5784_v8 }
 0xc30   :  { %5804 = vmatpush.msra.mxu2 %v5783_v21 }
 0xc32   :  { %5805 = vmatpush.msra.mxu2 %v5782_v37 }
 0xc34   :  { %5806 = vmatpush.msra.mxu2 %v5781_v39 }
 0xc36   :  { %5807 = vmatpush.msra.mxu2 %v5780_v56 }
 0xc98   :  { %v5458_v12 = vpop.f32.mrf.mxu0  ;;  %v5471_v34 = vpop.f32.mrf.mxu1 }
 0xc99   :  { %v5482_v32 = vrot.slane %v5471_v34, 2  ;;  %v5481_v53 = vrot.slane %v5458_v12, 2 }
 0xc9b   :  { %v5490_v51 = vadd.f32 %v5482_v32, %v10072_v41  ;;  %v5489_v54 = vadd.f32 %v5481_v53, %v10075_v45  ;;  %v5779_v41 = vld [vmem:[%s9753_s6 + $0x8] sm:$0xff] }
 0xc9c   :  { %5808 = vmatpush.msra.mxu2 %v5779_v41 }
 0xc9d   :  { %v7050_v26 = vmul.f32 -1.442695, %v5490_v51  ;;  %v5432_v25 = vpop.f32.mrf.mxu2  ;;  %v5445_v6 = vpop.f32.mrf.mxu3 }
 0xc9e   :  { %v5479_v31 = vrot.slane %v5432_v25, 2  ;;  %v5480_v40 = vrot.slane %v5445_v6, 2 }
 0xc9f   :  { %7560 = vpow2.f32 %v7050_v26 }
 0xca0   :  { %v5487_v24 = vadd.f32 %v5479_v31, %v10073_v60  ;;  %v5488_v27 = vadd.f32 %v5480_v40, %v10074_v7  ;;  %v5460_v52 = vpop.f32.mrf.mxu0  ;;  %v5473_v19 = vpop.f32.mrf.mxu1  ;;  %v5550_v40 = vrot.slane %v9566_v14, 7  ;;  %v5778_v60 = vld [vmem:[%s9753_s6] sm:$0xff] }
 0xca1   :  { %5809 = vmatpush.msra.mxu2 %v5778_v60 }
 0xca2   :  { %v7048_v55 = vmul.f32 -1.442695, %v5487_v24  ;;  %v7049_v3 = vmul.f32 -1.442695, %v5488_v27 }
 0xca4   :  { %7562 = vpow2.f32 %v7048_v55 }
 0xca5   :  { %v7561_v0 = vpop.eup %7560  ;;  %7564 = vpow2.f32 %v7049_v3  ;;  %v5434_v10 = vpop.f32.mrf.mxu2 }
 0xca6   :  { %v5447_v4 = vpop.f32.mrf.mxu3  ;;  %v9596_v2 = vadd.f32 1.0, %v7561_v0 }
 0xca8   :  { %7566 = vrcp.f32 %v9596_v2  ;;  %v5545_v59 = vand.u32 2147483648, %v9596_v2  ;;  %v5543_v14 = vand.u32 2147483647, %v9596_v2 }
 0xcaa   :  { %v7563_v23 = vpop.eup %7562  ;;  %v5546_v3 = vor.u32 1.1754944e-38, %v5545_v59 }
 0xcab   :  { %v7565_v57 = vpop.eup %7564  ;;  %v5494_v13 = vadd.f32 1.0, %v7563_v23 }
 0xcac   :  { %v5513_v46 = vadd.f32 1.0, %v7565_v57 }
 0xcad   :  { %7568 = vrcp.f32 %v5494_v13  ;;  %v5506_v20 = vand.u32 2147483648, %v5494_v13  ;;  %v5504_v16 = vand.u32 2147483647, %v5494_v13  ;;  %vm5500_vm0 = vweird.f32 %v5494_v13 }
 0xcae   :  { %7570 = vrcp.f32 %v5513_v46  ;;  %v9614_v44 = vpop.eup %7566  ;;  %v5525_v47 = vand.u32 2147483648, %v5513_v46  ;;  %v5523_v33 = vand.u32 2147483647, %v5513_v46  ;;  %vm5519_vm4 = vweird.f32 %v5513_v46 }
 0xcaf   :  { %v5535_v58 = vmul.f32 %v9614_v44, %v9596_v2  ;;  %7572 = vtanh.f32 %v5489_v54  ;;  %v5507_v34 = vor.u32 1.1754944e-38, %v5506_v20  ;;  %vm5505_vm6 = vcmp.eq.f32.partialorder %v5504_v16, 8.507059e+37 }
 0xcb0   :  { %v5526_v26 = vor.u32 1.1754944e-38, %v5525_v47  ;;  %vm5524_vm11 = vcmp.eq.f32.partialorder %v5523_v33, 8.507059e+37  ;;  %vm5540_vm12 = vweird.f32 %v9614_v44  ;;  %v10079_v47 = vld [vmem:[#allocation46_spill] sm:$0xff] }
 0xcb1   :  { %v5536_v11 = vsub.f32 1.0, %v5535_v58 }
 0xcb3   :  { %v7569_v48 = vpop.eup %7568  ;;  %v5537_v24 = vmul.f32 %v9614_v44, %v5536_v11 }
 0xcb4   :  { %v7571_v17 = vpop.eup %7570  ;;  %v5496_v62 = vmul.f32 %v7569_v48, %v5494_v13  ;;  %vm5501_vm14 = vweird.f32 %v7569_v48 }
 0xcb5   :  { %v5515_v5 = vmul.f32 %v7571_v17, %v5513_v46  ;;  %vm5520_vm15 = vweird.f32 %v7571_v17  ;;  %vm5502_vm2 = vmor %vm5500_vm0, %vm5501_vm14  ;;  %v7573_v25 = vpop.eup %7572  ;;  %v5538_v1 = vadd.f32 %v9614_v44, %v5537_v24  ;;  %vm5539_vm14 = vweird.f32 %v9596_v2  ;;  %v10076_v2 = vld [vmem:[#allocation53_spill] sm:$0xff] }
 0xcb6   :  { %v5497_v50 = vsub.f32 1.0, %v5496_v62  ;;  %vm5521_vm9 = vmor %vm5519_vm4, %vm5520_vm15  ;;  %vm5544_vm0 = vcmp.eq.f32.partialorder %v5543_v14, 8.507059e+37 }
 0xcb7   :  { %v5516_v49 = vsub.f32 1.0, %v5515_v5  ;;  %vm5541_vm15 = vmor %vm5539_vm14, %vm5540_vm12 }
 0xcb8   :  { %v5498_v42 = vmul.f32 %v7569_v48, %v5497_v50  ;;  %v5542_v55 = vsel %vm5541_vm15, %v9614_v44, %v5538_v1  ;;  %v10078_v44 = vld [vmem:[#allocation22_spill] sm:$0xff] }
 0xcb9   :  { %v5517_v30 = vmul.f32 %v7571_v17, %v5516_v49  ;;  %v5547_v38 = vsel %vm5544_vm0, %v5546_v3, %v5542_v55 }
 0xcba   :  { %v5499_v12 = vadd.f32 %v7569_v48, %v5498_v42 }
 0xcbb   :  { %v5518_v32 = vadd.f32 %v7571_v17, %v5517_v30 }
 0xcbc   :  { %v5503_v51 = vsel %vm5502_vm2, %v7569_v48, %v5499_v12 }
 0xcbd   :  { %v5508_v6 = vsel %vm5505_vm6, %v5507_v34, %v5503_v51  ;;  %v5522_v31 = vsel %vm5521_vm9, %v7571_v17, %v5518_v32 }
 0xcbe   :  { %v5553_v7 = vmul.f32 %v7573_v25, %v5508_v6  ;;  %v5527_v27 = vsel %vm5524_vm11, %v5526_v26, %v5522_v31 }
 0xcbf   :  { %v5552_v52 = vmul.f32 %v5550_v40, %v5527_v27 }
 0xcc1   :  { %v9639_v19 = vadd.f32 %v5553_v7, %v5552_v52 }
 0xcc3   :  { %7574 = vtanh.f32 %v9639_v19  ;;  %v5688_v55 = vrot.slane %v9639_v19, 7 }
 0xcc9   :  { %v7575_v28 = vpop.eup %7574 }
 0xcca   :  { %v9648_v0 = vmul.f32 %v7575_v28, %v5547_v38 }
 0xccc   :  { %v5557_v10 = vpack.c.bf16 %v9648_v0, %v9648_v0  ;;  %v9655_v4 = vsel %vm1280_vm3, %v9576_v36, %v9648_v0  ;;  %v10077_v36 = vld [vmem:[#allocation32_spill] sm:$0xff] }
 0xcce   :  { %v5559_v22 = vrot.slane %v5557_v10, 3 }
 0xcd0   :  { %5569 = vmatmul.bf16.vlgmr.msrb.gmra.mxu2 %v5559_v22  ;;  %5582 = vmatmul.bf16.vlgmr.msrb.gmra.mxu3 %v5559_v22 }
 0xcd1   :  { %5595 = vmatmul.bf16.vlgmr.msra.gmra.mxu0 %v5559_v22  ;;  %5608 = vmatmul.bf16.vlgmr.msra.gmra.mxu1 %v5559_v22 }
 0xce0   :  { %5810 = vmatmul.f32.vlgmr.msra.gmra.mxu2 %v10076_v2 }
 0xd4e   :  { %v5596_v43 = vpop.f32.mrf.mxu0  ;;  %v5609_v23 = vpop.f32.mrf.mxu1 }
 0xd4f   :  { %v5620_v61 = vrot.slane %v5609_v23, 1  ;;  %v5619_v39 = vrot.slane %v5596_v43, 1 }
 0xd51   :  { %v5628_v57 = vadd.f32 %v5620_v61, %v10063_v9  ;;  %v5627_v30 = vadd.f32 %v5619_v39, %v10079_v47 }
 0xd53   :  { %v7053_v13 = vmul.f32 -1.442695, %v5628_v57  ;;  %v5570_v46 = vpop.f32.mrf.mxu2  ;;  %v5583_v35 = vpop.f32.mrf.mxu3 }
 0xd54   :  { %v5617_v53 = vrot.slane %v5570_v46, 1  ;;  %v5618_v18 = vrot.slane %v5583_v35, 1 }
 0xd55   :  { %7576 = vpow2.f32 %v7053_v13 }
 0xd56   :  { %v5625_v8 = vadd.f32 %v5617_v53, %v10077_v36  ;;  %v5626_v48 = vadd.f32 %v5618_v18, %v10078_v44  ;;  %v5598_v45 = vpop.f32.mrf.mxu0  ;;  %v5611_v54 = vpop.f32.mrf.mxu1  ;;  %v5720_v36 = vrot.slane %v9648_v0, 5 }
 0xd57   :  { %v5729_v45 = vrot.slane %v9471_v15, 7  ;;  %v10083_v15 = vld [vmem:[#allocation48_spill] sm:$0xff] }
 0xd58   :  { %v7051_v21 = vmul.f32 -1.442695, %v5625_v8  ;;  %v7052_v17 = vmul.f32 -1.442695, %v5626_v48  ;;  %v5723_v8 = vrot.slane %v9569_v63, 3  ;;  %v5726_v48 = vrot.slane %v9520_v29, 1 }
 0xd5a   :  { %7578 = vpow2.f32 %v7051_v21  ;;  %v10080_v21 = vld [vmem:[#allocation57_spill] sm:$0xff] }
 0xd5b   :  { %v7577_v62 = vpop.eup %7576  ;;  %7580 = vpow2.f32 %v7052_v17  ;;  %v5572_v5 = vpop.f32.mrf.mxu2  ;;  %v5732_v17 = vrot.slane %v10080_v21, 5 }
 0xd5c   :  { %v5585_v37 = vpop.f32.mrf.mxu3  ;;  %v5671_v9 = vadd.f32 1.0, %v7577_v62  ;;  %v10081_v62 = vld [vmem:[#allocation56_spill] sm:$0xff] }
 0xd5d   :  { %v5735_v5 = vrot.slane %v10081_v62, 3  ;;  %v10082_v37 = vld [vmem:[#allocation52_spill] sm:$0xff] }
 0xd5e   :  { %7582 = vrcp.f32 %v5671_v9  ;;  %v5683_v23 = vand.u32 2147483648, %v5671_v9  ;;  %v5681_v61 = vand.u32 2147483647, %v5671_v9 }
 0xd60   :  { %v7579_v58 = vpop.eup %7578  ;;  %v5684_v13 = vor.u32 1.1754944e-38, %v5683_v23 }
 0xd61   :  { %v7581_v50 = vpop.eup %7580  ;;  %v5632_v20 = vadd.f32 1.0, %v7579_v58 }
 0xd62   :  { %v5651_v49 = vadd.f32 1.0, %v7581_v50  ;;  %v5762_v50 = vrot.slane %v10083_v15, 1 }
 0xd63   :  { %7584 = vrcp.f32 %v5632_v20  ;;  %v5644_v32 = vand.u32 2147483648, %v5632_v20  ;;  %v5642_v26 = vand.u32 2147483647, %v5632_v20  ;;  %vm5638_vm6 = vweird.f32 %v5632_v20  ;;  %v5811_v39 = vpop.f32.mrf.mxu2 }
 0xd64   :  { %7586 = vrcp.f32 %v5651_v49  ;;  %v7583_v42 = vpop.eup %7582  ;;  %v5663_v25 = vand.u32 2147483648, %v5651_v49  ;;  %v5661_v31 = vand.u32 2147483647, %v5651_v49  ;;  %vm5657_vm11 = vweird.f32 %v5651_v49 }
 0xd65   :  { %v5673_v12 = vmul.f32 %v7583_v42, %v5671_v9  ;;  %7588 = vtanh.f32 %v5627_v30  ;;  %v5645_v24 = vor.u32 1.1754944e-38, %v5644_v32  ;;  %vm5643_vm12 = vcmp.eq.f32.partialorder %v5642_v26, 8.507059e+37  ;;  %v5897_v30 = vld [vmem:[%s9755_s8 + $0x78] sm:$0xff]  ;;  %v5892_v26 = vld [vmem:[%s9755_s8 + $0x50] sm:$0xff] }
 0xd66   :  { %v5664_v27 = vor.u32 1.1754944e-38, %v5663_v25  ;;  %vm5662_vm15 = vcmp.eq.f32.partialorder %v5661_v31, 8.507059e+37  ;;  %vm5678_vm0 = vweird.f32 %v7583_v42  ;;  %5898 = vmatpush.msra.mxu3 %v5897_v30  ;;  %v5890_v31 = vld [vmem:[%s9755_s8 + $0x40] sm:$0xff] }
 0xd67   :  { %v5674_v60 = vsub.f32 1.0, %v5673_v12  ;;  %v5894_v12 = vld [vmem:[%s9755_s8 + $0x60] sm:$0xff] }
 0xd69   :  { %v7585_v16 = vpop.eup %7584  ;;  %v5675_v28 = vmul.f32 %v7583_v42, %v5674_v60  ;;  %v5889_v60 = vld [vmem:[%s9755_s8 + $0x38] sm:$0xff] }
 0xd6a   :  { %v7587_v33 = vpop.eup %7586  ;;  %v5634_v56 = vmul.f32 %v7585_v16, %v5632_v20  ;;  %vm5639_vm2 = vweird.f32 %v7585_v16  ;;  %v10084_v20 = vld [vmem:[#allocation54_spill] sm:$0xff] }
 0xd6b   :  { %v5653_v11 = vmul.f32 %v7587_v33, %v5651_v49  ;;  %vm5658_vm4 = vweird.f32 %v7587_v33  ;;  %vm5640_vm9 = vmor %vm5638_vm6, %vm5639_vm2  ;;  %v7589_v1 = vpop.eup %7588  ;;  %v5676_v43 = vadd.f32 %v7583_v42, %v5675_v28  ;;  %vm5677_vm2 = vweird.f32 %v5671_v9  ;;  %v5884_v28 = vld [vmem:[%s9755_s8 + $0x10] sm:$0xff] }
 0xd6c   :  { %v5635_v34 = vsub.f32 1.0, %v5634_v56  ;;  %vm5659_vm14 = vmor %vm5657_vm11, %vm5658_vm4  ;;  %vm5682_vm6 = vcmp.eq.f32.partialorder %v5681_v61, 8.507059e+37  ;;  %v5738_v9 = vrot.slane %v10082_v37, 1  ;;  %v5777_v49 = vsel %vm708_vm1, %v10084_v20, %v5762_v50  ;;  %v5895_v56 = vld [vmem:[%s9755_s8 + $0x68] sm:$0xff] }
 0xd6d   :  { %v5654_v41 = vsub.f32 1.0, %v5653_v11  ;;  %vm5679_vm4 = vmor %vm5677_vm2, %vm5678_vm0  ;;  %v7334_v11 = vld [vmem:[%s9754_s7] ss:$0 sm:$0xff] }
 0xd6e   :  { %v5636_v51 = vmul.f32 %v7585_v16, %v5635_v34  ;;  %v5680_v57 = vsel %vm5679_vm4, %v7583_v42, %v5676_v43 }
 0xd6f   :  { %v5655_v6 = vmul.f32 %v7587_v33, %v5654_v41  ;;  %v5685_v35 = vsel %vm5682_vm6, %v5684_v13, %v5680_v57  ;;  %v5893_v41 = vld [vmem:[%s9755_s8 + $0x58] sm:$0xff] }
 0xd70   :  { %v5637_v40 = vadd.f32 %v7585_v16, %v5636_v51 }
 0xd71   :  { %v5656_v7 = vadd.f32 %v7587_v33, %v5655_v6  ;;  %v5891_v6 = vld [vmem:[%s9755_s8 + $0x48] sm:$0xff] }
 0xd72   :  { %v5641_v52 = vsel %vm5640_vm9, %v7585_v16, %v5637_v40 }
 0xd73   :  { %v5646_v59 = vsel %vm5643_vm12, %v5645_v24, %v5641_v52  ;;  %v5660_v14 = vsel %vm5659_vm14, %v7587_v33, %v5656_v7  ;;  %v5896_v33 = vld [vmem:[%s9755_s8 + $0x70] sm:$0xff]  ;;  %v5887_v52 = vld [vmem:[%s9755_s8 + $0x28] sm:$0xff]  ;;  %vm5929_vm12 = vcmask 9216  }
 0xd74   :  { %v5665_v3 = vsel %vm5662_vm15, %v5664_v27, %v5660_v14  ;;  %v5691_v38 = vmul.f32 %v7589_v1, %v5646_v59  ;;  %5899 = vmatpush.msra.mxu3 %v5896_v33  ;;  %v5888_v7 = vld [vmem:[%s9755_s8 + $0x30] sm:$0xff]  ;;  %v5886_v14 = vld [vmem:[%s9755_s8 + $0x20] sm:$0xff] }
 0xd75   :  { %v5690_v10 = vmul.f32 %v5688_v55, %v5665_v3  ;;  %v5885_v3 = vld [vmem:[%s9755_s8 + $0x18] sm:$0xff] }
 0xd76   :  { %5900 = vmatpush.msra.mxu3 %v5895_v56 }
 0xd77   :  { %v5692_v22 = vadd.f32 %v5691_v38, %v5690_v10  ;;  %v5883_v38 = vld [vmem:[%s9755_s8 + $0x8] sm:$0xff] }
 0xd78   :  { %5901 = vmatpush.msra.mxu3 %v5894_v12 }
 0xd79   :  { %7590 = vtanh.f32 %v5692_v22  ;;  %v5882_v22 = vld [vmem:[%s9755_s8] sm:$0xff]  ;;  %s7806_s8 = smov 126  }
 0xd7a   :  { %5902 = vmatpush.msra.mxu3 %v5893_v41 }
 0xd7c   :  { %5903 = vmatpush.msra.mxu3 %v5892_v26 }
 0xd7e   :  { %5904 = vmatpush.msra.mxu3 %v5891_v6 }
 0xd7f   :  { %v7591_v46 = vpop.eup %7590 }
 0xd80   :  { %v5694_v53 = vmul.f32 %v7591_v46, %v5685_v35  ;;  %5905 = vmatpush.msra.mxu3 %v5890_v31 }
 0xd82   :  { %v9665_v19 = vsel %vm708_vm1, %v9655_v4, %v5694_v53  ;;  %v5717_v18 = vrot.slane %v5694_v53, 7  ;;  %5906 = vmatpush.msra.mxu3 %v5889_v60 }
 0xd83   :  { %5813 = vmatmul.f32.gmra.mxu2 %v9665_v19 }
 0xd84   :  { %v5764_v44 = vsel %vm5695_vm7, %v5717_v18, %v5720_v36  ;;  %5907 = vmatpush.msra.mxu3 %v5888_v7 }
 0xd85   :  { %v5765_v54 = vsel %vm5697_vm8, %v5764_v44, %v5723_v8 }
 0xd86   :  { %v5766_v4 = vsel %vm5699_vm10, %v5765_v54, %v5726_v48  ;;  %5908 = vmatpush.msra.mxu3 %v5887_v52 }
 0xd87   :  { %v5767_v0 = vsel %vm5701_vm13, %v5766_v4, %v5729_v45 }
 0xd88   :  { %v5768_v63 = vsel %vm1852_vm5, %v5767_v0, %v5732_v17  ;;  %5909 = vmatpush.msra.mxu3 %v5886_v14 }
 0xd89   :  { %v5769_v58 = vsel %vm1280_vm3, %v5768_v63, %v5735_v5 }
 0xd8a   :  { %v5770_v29 = vsel %vm708_vm1, %v5769_v58, %v5738_v9  ;;  %5910 = vmatpush.msra.mxu3 %v5885_v3 }
 0xd8b   :  { %5816 = vmatmul.f32.gmra.mxu2 %v5770_v29 }
 0xd8c   :  { %5911 = vmatpush.msra.mxu3 %v5884_v28 }
 0xd8e   :  { %5912 = vmatpush.msra.mxu3 %v5883_v38 }
 0xd90   :  { %5913 = vmatpush.msra.mxu3 %v5882_v22 }
 0xd93   :  { %5819 = vmatmul.f32.gmra.mxu2 %v5777_v49 }
 0xe06   :  { %v5814_v42 = vpop.f32.mrf.mxu2 }
 0xe0e   :  { %v5817_v16 = vpop.f32.mrf.mxu2 }
 0xe0f   :  { %5823 = vrot.lane.b32.xlu0 %v5817_v16, %s7796_s21  ;;  %v7335_v16 = vld [vmem:[%s9756_s9] ss:$0 sm:$0xff] }
 0xe16   :  { %v5820_v47 = vpop.f32.mrf.mxu2 }
 0xe17   :  { %5825 = vrot.lane.b32.xlu0 %v5820_v47, %s7796_s21  ;;  %s7807_s21 = smov [#allocation10]  }
 0xe18   :  { %s5936_s0 = sshll.u32 %s7807_s21, 4  ;;  %s5937_s0 = int_to_ptr.vmem [resolvable:$true] %s5936_s0 }
 0xe81   :  { %v5824_v34 = vpop.permute.xlu0 %5823 }
 0xe82   :  { %v5827_v32 = vadd.f32 %v5824_v34, %v5811_v39 }
 0xe84   :  { %v5833_v51 = vadd.f32 %v7334_v11, %v5827_v32 }
 0xe86   :  { %v7054_v25 = vmul.f32 -1.442695, %v5833_v51 }
 0xe88   :  { %7592 = vpow2.f32 %v7054_v25 }
 0xe89   :  { %v5826_v40 = vpop.permute.xlu0 %5825 }
 0xe8a   :  { %v5828_v24 = vadd.f32 %v5826_v40, %v5814_v42 }
 0xe8c   :  { %v5834_v27 = vadd.f32 %v7334_v11, %v5828_v24 }
 0xe8e   :  { %v7593_v1 = vpop.eup %7592  ;;  %v7055_v59 = vmul.f32 -1.442695, %v5834_v27 }
 0xe8f   :  { %v5841_v55 = vadd.f32 1.0, %v7593_v1 }
 0xe90   :  { %7594 = vpow2.f32 %v7055_v59 }
 0xe91   :  { %7596 = vrcp.f32 %v5841_v55  ;;  %v5854_v18 = vand.u32 2147483648, %v5841_v55  ;;  %vm5848_vm3 = vweird.f32 %v5841_v55  ;;  %v5852_v36 = vand.u32 2147483647, %v5841_v55 }
 0xe93   :  { %v5855_v21 = vor.u32 1.1754944e-38, %v5854_v18  ;;  %vm5853_vm10 = vcmp.eq.f32.partialorder %v5852_v36, 8.507059e+37 }
 0xe96   :  { %v7595_v10 = vpop.eup %7594 }
 0xe97   :  { %v7597_v43 = vpop.eup %7596  ;;  %v5842_v23 = vadd.f32 1.0, %v7595_v10 }
 0xe98   :  { %v5844_v61 = vmul.f32 %v7597_v43, %v5841_v55  ;;  %vm5849_vm1 = vweird.f32 %v7597_v43 }
 0xe99   :  { %7598 = vrcp.f32 %v5842_v23  ;;  %vm5850_vm5 = vmor %vm5848_vm3, %vm5849_vm1  ;;  %v5869_v44 = vand.u32 2147483648, %v5842_v23  ;;  %v5867_v54 = vand.u32 2147483647, %v5842_v23  ;;  %vm5863_vm13 = vweird.f32 %v5842_v23 }
 0xe9a   :  { %v5845_v57 = vsub.f32 1.0, %v5844_v61 }
 0xe9b   :  { %v5870_v62 = vor.u32 1.1754944e-38, %v5869_v44  ;;  %vm5868_vm11 = vcmp.eq.f32.partialorder %v5867_v54, 8.507059e+37 }
 0xe9c   :  { %v5846_v13 = vmul.f32 %v7597_v43, %v5845_v57 }
 0xe9e   :  { %v5847_v35 = vadd.f32 %v7597_v43, %v5846_v13 }
 0xe9f   :  { %v7599_v46 = vpop.eup %7598 }
 0xea0   :  { %v5859_v53 = vmul.f32 %v7599_v46, %v5842_v23  ;;  %v5851_v48 = vsel %vm5850_vm5, %v7597_v43, %v5847_v35  ;;  %vm5864_vm8 = vweird.f32 %v7599_v46 }
 0xea1   :  { %v5856_v4 = vsel %vm5853_vm10, %v5855_v21, %v5851_v48  ;;  %vm5865_vm9 = vmor %vm5863_vm13, %vm5864_vm8 }
 0xea2   :  { %v5860_v8 = vsub.f32 1.0, %v5859_v53  ;;  %v5873_v37 = vmul.f32 %v5856_v4, %v10076_v2 }
 0xea4   :  { %v5861_v45 = vmul.f32 %v7599_v46, %v5860_v8 }
 0xea6   :  { %v5862_v17 = vadd.f32 %v7599_v46, %v5861_v45 }
 0xea8   :  { %v5866_v5 = vsel %vm5865_vm9, %v7599_v46, %v5862_v17 }
 0xea9   :  { %v5871_v0 = vsel %vm5868_vm11, %v5870_v62, %v5866_v5 }
 0xeaa   :  { %v5874_v9 = vmul.f32 %v5871_v0, %v9665_v19 }
 0xeac   :  { %v5875_v63 = vadd.f32 %v5874_v9, %v5873_v37 }
 0xeae   :  { %v5876_v58 = vrot.slane %v5875_v63, 4 }
 0xeb0   :  { %v5877_v29 = vadd.f32 %v5876_v58, %v5875_v63 }
 0xeb2   :  { %v5878_v15 = vrot.slane %v5877_v29, 2 }
 0xeb4   :  { %v5879_v50 = vadd.f32 %v5878_v15, %v5877_v29 }
 0xeb6   :  { %v5880_v20 = vrot.slane %v5879_v50, 1 }
 0xeb8   :  { %v5881_v49 = vadd.f32 %v5880_v20, %v5879_v50 }
 0xeba   :  { %5914 = vmatmul.f32.vlgmr.msra.gmra.mxu3 %v5881_v49 }
 0xf3d   :  { %v5915_v39 = vpop.f32.mrf.mxu3 }
 0xf3e   :  { %v5919_v42 = vrot.slane %v5915_v39, 7 }
 0xf40   :  { %5920 = vrot.lane.b32.xlu1 %v5919_v42, %s7806_s8 }
 0xfb2   :  { %v5921_v2 = vpop.permute.xlu1 %5920 }
 0xfb3   :  { %v5923_v19 = vsel %vm5695_vm7, %v5915_v39, %v5921_v2 }
 0xfb4   :  { %v5928_v47 = vadd.f32 %v7335_v16, %v5923_v19 }
 0xfb6   :  { %5930 = vst.msk [vmem:[#allocation10] sm:$0x3] %vm5929_vm12, %v5928_v47 }
 0xfb7   :  { %5941 = dma.vmem_to_hbm [thread:$0]  %s5937_s0, 32, %s5939_s13, [#allocation4]  }
 0xfb8   :  { %7793 = dma.done.wait [#allocation4], 32  }
 0xfb9   :  { %7794 = vsyncadd [#allocation4], 4294967264 }
 0xfba   :  { %5946 = vsyncpa [#allocation3], 1 }
 0xfbb   :  { %5947 = vsyncpa [#allocation6], 1 }
 0xfbc   :  { %5948 = vsyncpa [#allocation9], 1 }
 0xfbd   :  { %5949 = vsyncpa [#allocation4], 1 }

</bundles_post_ra>
